<compile_context>
chip_gen: v5e
topology: v5e:2x2
jax: 0.10.0
libtpu: 0.0.40
codegen_flags: <defaults>
</compile_context>

<pallas_src>
import functools
import math

import jax
import jax.numpy as jnp
from jax.experimental import pallas as pl
from jax.experimental.pallas import tpu as pltpu


def _round_up(x, m):
    return (x + m - 1) // m * m


def _choose_tm(mp, cap=512):
    """Largest M-tile <= cap that divides mp and is a multiple of 16 (bf16
    sublane tile); falls back to the always-legal full-M block."""
    if mp <= cap:
        return mp
    tm = None
    for t in range(16, cap + 1, 16):
        if mp % t == 0:
            tm = t
    return tm if tm is not None else mp


# ----------------------------------------------------------------------------
# Pallas kernel: matmul + bias + optional ReLU (single K step, M-tiled grid)
# ----------------------------------------------------------------------------
def _matmul_bias_act_kernel(a_ref, b_ref, bias_ref, o_ref, *, relu):
    acc = jnp.dot(a_ref[...], b_ref[...], preferred_element_type=jnp.float32)
    acc = acc + bias_ref[...]                      # bias (1, N) broadcasts
    if relu:
        acc = jnp.maximum(acc, 0.0)
    o_ref[...] = acc.astype(o_ref.dtype)


def matmul_bias_act(a, b_packed, bias_packed, *, relu, out_dtype=jnp.bfloat16):
    """a: (M, K) bf16, b_packed: (K, N) bf16, bias: (1, N) f32 -> (M, N)."""
    M, K = a.shape
    K2, N = b_packed.shape
    assert K == K2
    Mp = _round_up(M, 8)
    tm = _choose_tm(Mp)
    if Mp > M:
        a = jnp.pad(a, ((0, Mp - M), (0, 0)))

    out = pl.pallas_call(
        functools.partial(_matmul_bias_act_kernel, relu=relu),
        out_shape=jax.ShapeDtypeStruct((Mp, N), out_dtype),
        grid=(Mp // tm,),
        in_specs=[
            pl.BlockSpec((tm, K), lambda i: (i, 0)),   # A tile
            pl.BlockSpec((K, N), lambda i: (0, 0)),    # full weight, stays resident
            pl.BlockSpec((1, N), lambda i: (0, 0)),    # bias
        ],
        out_specs=pl.BlockSpec((tm, N), lambda i: (i, 0)),
        compiler_params=pltpu.CompilerParams(
            dimension_semantics=("parallel",)),
    )(a, b_packed, bias_packed)
    return out[:M]


# ----------------------------------------------------------------------------
# Pallas kernel: fused 2x2 max-pool (no HBM tap materialization, lane-dense in)
# ----------------------------------------------------------------------------
def _maxpool_kernel(x_ref, o_ref):
    x = x_ref[...]                               # (H2, 2, W2, 2*C)
    v = jnp.maximum(x[:, 0], x[:, 1])            # vertical pool -> (H2, W2, 2*C)
    c = o_ref.shape[-1]
    o_ref[...] = jnp.maximum(v[..., :c], v[..., c:])   # horizontal pool -> (H2, W2, C)


def maxpool2x2(x):
    """x: (B, H, W, C) NHWC with even H, W -> (B, H//2, W//2, C)."""
    B, H, W, C = x.shape
    H2, W2 = H // 2, W // 2
    xr = x.reshape(B * H2, 2, W2, 2 * C)         # free, contiguous reshape
    out = pl.pallas_call(
        _maxpool_kernel,
        out_shape=jax.ShapeDtypeStruct((B * H2, W2, C), x.dtype),
        grid=(B,),
        in_specs=[pl.BlockSpec((H2, 2, W2, 2 * C), lambda b: (b, 0, 0, 0))],
        out_specs=pl.BlockSpec((H2, W2, C), lambda b: (b, 0, 0)),
        compiler_params=pltpu.CompilerParams(
            dimension_semantics=("parallel",)),
    )(xr)
    return out.reshape(B, H2, W2, C)


# ----------------------------------------------------------------------------
# Pallas kernel: fused FC1 -> ReLU -> FC2 -> ReLU -> FC3 (intermediates in VMEM)
# ----------------------------------------------------------------------------
def _fc_chain_kernel(x_ref, w1_ref, b1_ref, w2_ref, b2_ref, w3_ref, b3_ref, o_ref):
    h = jnp.dot(x_ref[...], w1_ref[...], preferred_element_type=jnp.float32)
    h = jnp.maximum(h + b1_ref[...], 0.0)
    h = jnp.dot(h.astype(w2_ref.dtype), w2_ref[...],
                preferred_element_type=jnp.float32)
    h = jnp.maximum(h + b2_ref[...], 0.0)
    h = jnp.dot(h.astype(w3_ref.dtype), w3_ref[...],
                preferred_element_type=jnp.float32)
    o_ref[...] = (h + b3_ref[...]).astype(o_ref.dtype)


def _full_vmem_spec(arr):
    nd = arr.ndim
    return pl.BlockSpec(arr.shape, lambda i, _nd=nd: (0,) * _nd)


def fc_chain(x, w1, b1, w2, b2, w3, b3):
    """x: (B, 1600) bf16 -> logits (B, Np) f32 (Np = padded output width)."""
    args = (x, w1, b1, w2, b2, w3, b3)
    B = x.shape[0]
    Np = w3.shape[1]
    return pl.pallas_call(
        _fc_chain_kernel,
        out_shape=jax.ShapeDtypeStruct((B, Np), jnp.float32),
        grid=(1,),
        in_specs=[_full_vmem_spec(a) for a in args],
        out_specs=pl.BlockSpec((B, Np), lambda i: (0, 0)),
    )(*args)


# ----------------------------------------------------------------------------
# Glue: im2col patch extraction (plain JAX; matmul stays in Pallas)
# ----------------------------------------------------------------------------
def im2col(x, kh, kw):
    """x: (B, H, W, C) -> (B*OH*OW, kh*kw*C), patch order (kh, kw, C)."""
    B, H, W, C = x.shape
    oh, ow = H - kh + 1, W - kw + 1
    patches = [x[:, i:i + oh, j:j + ow, :] for i in range(kh) for j in range(kw)]
    p = jnp.stack(patches, axis=3)               # (B, oh, ow, kh*kw, C)
    return p.reshape(B * oh * ow, kh * kw * C), (B, oh, ow)


# ----------------------------------------------------------------------------
# Parameter init (PyTorch-default-style uniform) and one-time packing
# ----------------------------------------------------------------------------
def init_params(key):
    def uniform(key, shape, bound):
        return jax.random.uniform(key, shape, jnp.float32, -bound, bound)

    ks = jax.random.split(key, 10)
    p = {}
    b = 1.0 / math.sqrt(3 * 5 * 5)
    p["conv1_w"] = uniform(ks[0], (64, 3, 5, 5), b)
    p["conv1_b"] = uniform(ks[1], (64,), b)
    b = 1.0 / math.sqrt(64 * 5 * 5)
    p["conv2_w"] = uniform(ks[2], (64, 64, 5, 5), b)
    p["conv2_b"] = uniform(ks[3], (64,), b)
    b = 1.0 / math.sqrt(1600)
    p["fc1_w"] = uniform(ks[4], (384, 1600), b)
    p["fc1_b"] = uniform(ks[5], (384,), b)
    b = 1.0 / math.sqrt(384)
    p["fc2_w"] = uniform(ks[6], (192, 384), b)
    p["fc2_b"] = uniform(ks[7], (192,), b)
    b = 1.0 / math.sqrt(192)
    p["fc3_w"] = uniform(ks[8], (10, 192), b)
    p["fc3_b"] = uniform(ks[9], (10,), b)
    return p


def conv_weight_to_mat(w):
    """(OC, IC, KH, KW) -> (KH*KW*IC, OC) matching im2col's (kh, kw, C) order."""
    return jnp.transpose(w, (2, 3, 1, 0)).reshape(-1, w.shape[0])


def pack_params(p):
    """One-time layout/padding/bf16 work, hoisted out of the forward pass."""
    f = {}
    f["conv1_w"] = conv_weight_to_mat(p["conv1_w"]).astype(jnp.bfloat16)   # (75, 64)
    f["conv1_b"] = p["conv1_b"].reshape(1, -1).astype(jnp.float32)         # (1, 64)
    f["conv2_w"] = conv_weight_to_mat(p["conv2_w"]).astype(jnp.bfloat16)   # (1600, 64)
    f["conv2_b"] = p["conv2_b"].reshape(1, -1).astype(jnp.float32)
    f["fc1_w"] = p["fc1_w"].T.astype(jnp.bfloat16)                         # (1600, 384)
    f["fc1_b"] = p["fc1_b"].reshape(1, -1).astype(jnp.float32)
    f["fc2_w"] = p["fc2_w"].T.astype(jnp.bfloat16)                         # (384, 192)
    f["fc2_b"] = p["fc2_b"].reshape(1, -1).astype(jnp.float32)
    # fc3: pad the 10-wide output to 128 lanes (lane-dense final store).
    w3 = jnp.zeros((192, 128), jnp.float32).at[:, :10].set(p["fc3_w"].T)
    f["fc3_w"] = w3.astype(jnp.bfloat16)                                   # (192, 128)
    f["fc3_b"] = jnp.zeros((1, 128), jnp.float32).at[0, :10].set(p["fc3_b"])
    return f


# ----------------------------------------------------------------------------
# Forward pass
# ----------------------------------------------------------------------------
@jax.jit
def forward(x_nchw, packed):
    x = jnp.transpose(x_nchw, (0, 2, 3, 1)).astype(jnp.bfloat16)  # NCHW -> NHWC bf16
    B = x.shape[0]

    # Conv1 (3->64, 5x5) + ReLU + MaxPool
    patches, (_, oh, ow) = im2col(x, 5, 5)                        # (B*28*28, 75)
    y = matmul_bias_act(patches, packed["conv1_w"], packed["conv1_b"], relu=True)
    y = y.reshape(B, oh, ow, 64)                                  # (B, 28, 28, 64)
    y = maxpool2x2(y)                                             # (B, 14, 14, 64)

    # Conv2 (64->64, 5x5) + ReLU + MaxPool
    patches, (_, oh, ow) = im2col(y, 5, 5)                        # (B*10*10, 1600)
    y = matmul_bias_act(patches, packed["conv2_w"], packed["conv2_b"], relu=True)
    y = y.reshape(B, oh, ow, 64)                                  # (B, 10, 10, 64)
    y = maxpool2x2(y)                                             # (B, 5, 5, 64)

    # Flatten exactly like PyTorch nn.Flatten(1) on NCHW (C, H, W order)
    flat = jnp.transpose(y, (0, 3, 1, 2)).reshape(B, 64 * 5 * 5)  # (B, 1600) bf16

    # Fused FC1 -> ReLU -> FC2 -> ReLU -> FC3
    logits = fc_chain(flat, packed["fc1_w"], packed["fc1_b"],
                      packed["fc2_w"], packed["fc2_b"],
                      packed["fc3_w"], packed["fc3_b"])           # (B, 128) f32
    return logits[:, :10]                                         # (B, 10)


if __name__ == "__main__":
    key = jax.random.PRNGKey(0)
    k_x, k_p = jax.random.split(key)
    # CIFAR-10 shaped input (batch=2, 3x32x32) — required for the 1600-dim flatten.
    x = jax.random.normal(k_x, (2, 3, 32, 32), dtype=jnp.float32)
    params = init_params(k_p)
    packed = pack_params(params)        # one-time weight layout / bf16 packing

    logits = forward(x, packed)
    jax.block_until_ready(logits)
    assert logits.shape == (2, 10), logits.shape
    assert jnp.all(jnp.isfinite(logits))
    print("KERNEL_OK")
</pallas_src>

<mosaic_0001>
module attributes {stable_mosaic.version = 11 : i64} {
  func.func @_matmul_bias_act_kernel(%arg0: i32, %arg1: memref<224x75xbf16, #tpu.memory_space<vmem>>, %arg2: memref<75x64xbf16, #tpu.memory_space<vmem>>, %arg3: memref<1x64xf32, #tpu.memory_space<vmem>>, %arg4: memref<224x64xbf16, #tpu.memory_space<vmem>>) attributes {dimension_semantics = [#tpu.dimension_semantics<parallel>], iteration_bounds = array<i64: 7>, scalar_prefetch = 0 : i64, scratch_operands = 0 : i64, tpu.core_type = #tpu.core_type<tc>, window_params = [{transform_indices = @transform_0, window_bounds = array<i64: 224, 75>}, {pipeline_mode = #tpu.pipeline_mode<synchronous>, transform_indices = @transform_1, window_bounds = array<i64: 75, 64>}, {pipeline_mode = #tpu.pipeline_mode<synchronous>, transform_indices = @transform_2, window_bounds = array<i64: 1, 64>}, {transform_indices = @transform_3, window_bounds = array<i64: 224, 64>}]} {
    %c0 = arith.constant 0 : index
    %c0_0 = arith.constant 0 : index
    %0 = vector.load %arg1[%c0, %c0_0] : memref<224x75xbf16, #tpu.memory_space<vmem>>, vector<224x75xbf16>
    %c0_1 = arith.constant 0 : index
    %c0_2 = arith.constant 0 : index
    %1 = vector.load %arg2[%c0_1, %c0_2] : memref<75x64xbf16, #tpu.memory_space<vmem>>, vector<75x64xbf16>
    %cst = arith.constant dense<0.000000e+00> : vector<224x64xf32>
    %2 = tpu.matmul %0, %1, %cst {dimension_numbers = #tpu.dot_dimension_numbers<[1], [0], [0], [1], [0, 0, 1, 1], [], []>} : vector<224x75xbf16>, vector<75x64xbf16>, vector<224x64xf32> -> vector<224x64xf32>
    %c0_3 = arith.constant 0 : index
    %c0_4 = arith.constant 0 : index
    %3 = vector.load %arg3[%c0_3, %c0_4] : memref<1x64xf32, #tpu.memory_space<vmem>>, vector<1x64xf32>
    %4 = vector.broadcast %3 : vector<1x64xf32> to vector<224x64xf32>
    %5 = arith.addf %2, %4 : vector<224x64xf32>
    %cst_5 = arith.constant 0.000000e+00 : f32
    %6 = vector.broadcast %cst_5 : f32 to vector<224x64xf32>
    %7 = arith.maximumf %5, %6 : vector<224x64xf32>
    %8 = arith.truncf %7 : vector<224x64xf32> to vector<224x64xbf16>
    %c0_6 = arith.constant 0 : index
    %c0_7 = arith.constant 0 : index
    %9 = vector.load %arg4[%c0_6, %c0_7] : memref<224x64xbf16, #tpu.memory_space<vmem>>, vector<224x64xbf16>
    tpu.vector_store %arg4[%c0_6, %c0_7], %8 {strides = array<i32>} : memref<224x64xbf16, #tpu.memory_space<vmem>>, vector<224x64xbf16>,
    return
  }
  func.func @transform_0(%arg0: i32) -> (i32, i32) {
    %c0_i32 = arith.constant 0 : i32
    %c0_i32_0 = arith.constant 0 : i32
    return %arg0, %c0_i32 : i32, i32
  }
  func.func @transform_1(%arg0: i32) -> (i32, i32) {
    %c0_i32 = arith.constant 0 : i32
    %c0_i32_0 = arith.constant 0 : i32
    %c0_i32_1 = arith.constant 0 : i32
    return %c0_i32, %c0_i32_0 : i32, i32
  }
  func.func @transform_2(%arg0: i32) -> (i32, i32) {
    %c0_i32 = arith.constant 0 : i32
    %c0_i32_0 = arith.constant 0 : i32
    %c0_i32_1 = arith.constant 0 : i32
    return %c0_i32, %c0_i32_0 : i32, i32
  }
  func.func @transform_3(%arg0: i32) -> (i32, i32) {
    %c0_i32 = arith.constant 0 : i32
    %c0_i32_0 = arith.constant 0 : i32
    return %arg0, %c0_i32 : i32, i32
  }
}

module attributes {stable_mosaic.version = 11 : i64} {
  func.func @_maxpool_kernel(%arg0: i32, %arg1: memref<14x2x14x128xbf16, #tpu.memory_space<vmem>>, %arg2: memref<14x14x64xbf16, #tpu.memory_space<vmem>>) attributes {dimension_semantics = [#tpu.dimension_semantics<parallel>], iteration_bounds = array<i64: 2>, scalar_prefetch = 0 : i64, scratch_operands = 0 : i64, tpu.core_type = #tpu.core_type<tc>, window_params = [{transform_indices = @transform_0, window_bounds = array<i64: 14, 2, 14, 128>}, {transform_indices = @transform_1, window_bounds = array<i64: 14, 14, 64>}]} {
    %c0 = arith.constant 0 : index
    %c0_0 = arith.constant 0 : index
    %c0_1 = arith.constant 0 : index
    %c0_2 = arith.constant 0 : index
    %0 = vector.load %arg1[%c0, %c0_0, %c0_1, %c0_2] : memref<14x2x14x128xbf16, #tpu.memory_space<vmem>>, vector<14x2x14x128xbf16>
    %1 = vector.extract_strided_slice %0 {offsets = [0, 0, 0, 0], sizes = [14, 1, 14, 128], strides = [1, 1, 1, 1]} : vector<14x2x14x128xbf16> to vector<14x1x14x128xbf16>
    %2 = vector.shape_cast %1 : vector<14x1x14x128xbf16> to vector<14x14x128xbf16>
    %3 = vector.extract_strided_slice %0 {offsets = [0, 1, 0, 0], sizes = [14, 1, 14, 128], strides = [1, 1, 1, 1]} : vector<14x2x14x128xbf16> to vector<14x1x14x128xbf16>
    %4 = vector.shape_cast %3 : vector<14x1x14x128xbf16> to vector<14x14x128xbf16>
    %5 = arith.maximumf %2, %4 : vector<14x14x128xbf16>
    %6 = vector.extract_strided_slice %5 {offsets = [0, 0, 0], sizes = [14, 14, 64], strides = [1, 1, 1]} : vector<14x14x128xbf16> to vector<14x14x64xbf16>
    %7 = vector.extract_strided_slice %5 {offsets = [0, 0, 64], sizes = [14, 14, 64], strides = [1, 1, 1]} : vector<14x14x128xbf16> to vector<14x14x64xbf16>
    %8 = arith.maximumf %6, %7 : vector<14x14x64xbf16>
    %c0_3 = arith.constant 0 : index
    %c0_4 = arith.constant 0 : index
    %c0_5 = arith.constant 0 : index
    %9 = vector.load %arg2[%c0_3, %c0_4, %c0_5] : memref<14x14x64xbf16, #tpu.memory_space<vmem>>, vector<14x14x64xbf16>
    tpu.vector_store %arg2[%c0_3, %c0_4, %c0_5], %8 {strides = array<i32>} : memref<14x14x64xbf16, #tpu.memory_space<vmem>>, vector<14x14x64xbf16>,
    return
  }
  func.func @transform_0(%arg0: i32) -> (i32, i32, i32, i32) {
    %c0_i32 = arith.constant 0 : i32
    %c0_i32_0 = arith.constant 0 : i32
    %c0_i32_1 = arith.constant 0 : i32
    %c0_i32_2 = arith.constant 0 : i32
    return %arg0, %c0_i32, %c0_i32_0, %c0_i32_1 : i32, i32, i32, i32
  }
  func.func @transform_1(%arg0: i32) -> (i32, i32, i32) {
    %c0_i32 = arith.constant 0 : i32
    %c0_i32_0 = arith.constant 0 : i32
    %c0_i32_1 = arith.constant 0 : i32
    return %arg0, %c0_i32, %c0_i32_0 : i32, i32, i32
  }
}

module attributes {stable_mosaic.version = 11 : i64} {
  func.func @_matmul_bias_act_kernel(%arg0: i32, %arg1: memref<200x1600xbf16, #tpu.memory_space<vmem>>, %arg2: memref<1600x64xbf16, #tpu.memory_space<vmem>>, %arg3: memref<1x64xf32, #tpu.memory_space<vmem>>, %arg4: memref<200x64xbf16, #tpu.memory_space<vmem>>) attributes {dimension_semantics = [#tpu.dimension_semantics<parallel>], iteration_bounds = array<i64: 1>, scalar_prefetch = 0 : i64, scratch_operands = 0 : i64, tpu.core_type = #tpu.core_type<tc>, window_params = [{transform_indices = @transform_0, window_bounds = array<i64: 200, 1600>}, {pipeline_mode = #tpu.pipeline_mode<synchronous>, transform_indices = @transform_1, window_bounds = array<i64: 1600, 64>}, {pipeline_mode = #tpu.pipeline_mode<synchronous>, transform_indices = @transform_2, window_bounds = array<i64: 1, 64>}, {transform_indices = @transform_3, window_bounds = array<i64: 200, 64>}]} {
    %c0 = arith.constant 0 : index
    %c0_0 = arith.constant 0 : index
    %0 = vector.load %arg1[%c0, %c0_0] : memref<200x1600xbf16, #tpu.memory_space<vmem>>, vector<200x1600xbf16>
    %c0_1 = arith.constant 0 : index
    %c0_2 = arith.constant 0 : index
    %1 = vector.load %arg2[%c0_1, %c0_2] : memref<1600x64xbf16, #tpu.memory_space<vmem>>, vector<1600x64xbf16>
    %cst = arith.constant dense<0.000000e+00> : vector<200x64xf32>
    %2 = tpu.matmul %0, %1, %cst {dimension_numbers = #tpu.dot_dimension_numbers<[1], [0], [0], [1], [0, 0, 1, 1], [], []>} : vector<200x1600xbf16>, vector<1600x64xbf16>, vector<200x64xf32> -> vector<200x64xf32>
    %c0_3 = arith.constant 0 : index
    %c0_4 = arith.constant 0 : index
    %3 = vector.load %arg3[%c0_3, %c0_4] : memref<1x64xf32, #tpu.memory_space<vmem>>, vector<1x64xf32>
    %4 = vector.broadcast %3 : vector<1x64xf32> to vector<200x64xf32>
    %5 = arith.addf %2, %4 : vector<200x64xf32>
    %cst_5 = arith.constant 0.000000e+00 : f32
    %6 = vector.broadcast %cst_5 : f32 to vector<200x64xf32>
    %7 = arith.maximumf %5, %6 : vector<200x64xf32>
    %8 = arith.truncf %7 : vector<200x64xf32> to vector<200x64xbf16>
    %c0_6 = arith.constant 0 : index
    %c0_7 = arith.constant 0 : index
    %9 = vector.load %arg4[%c0_6, %c0_7] : memref<200x64xbf16, #tpu.memory_space<vmem>>, vector<200x64xbf16>
    tpu.vector_store %arg4[%c0_6, %c0_7], %8 {strides = array<i32>} : memref<200x64xbf16, #tpu.memory_space<vmem>>, vector<200x64xbf16>,
    return
  }
  func.func @transform_0(%arg0: i32) -> (i32, i32) {
    %c0_i32 = arith.constant 0 : i32
    %c0_i32_0 = arith.constant 0 : i32
    return %arg0, %c0_i32 : i32, i32
  }
  func.func @transform_1(%arg0: i32) -> (i32, i32) {
    %c0_i32 = arith.constant 0 : i32
    %c0_i32_0 = arith.constant 0 : i32
    %c0_i32_1 = arith.constant 0 : i32
    return %c0_i32, %c0_i32_0 : i32, i32
  }
  func.func @transform_2(%arg0: i32) -> (i32, i32) {
    %c0_i32 = arith.constant 0 : i32
    %c0_i32_0 = arith.constant 0 : i32
    %c0_i32_1 = arith.constant 0 : i32
    return %c0_i32, %c0_i32_0 : i32, i32
  }
  func.func @transform_3(%arg0: i32) -> (i32, i32) {
    %c0_i32 = arith.constant 0 : i32
    %c0_i32_0 = arith.constant 0 : i32
    return %arg0, %c0_i32 : i32, i32
  }
}

module attributes {stable_mosaic.version = 11 : i64} {
  func.func @_maxpool_kernel(%arg0: i32, %arg1: memref<5x2x5x128xbf16, #tpu.memory_space<vmem>>, %arg2: memref<5x5x64xbf16, #tpu.memory_space<vmem>>) attributes {dimension_semantics = [#tpu.dimension_semantics<parallel>], iteration_bounds = array<i64: 2>, scalar_prefetch = 0 : i64, scratch_operands = 0 : i64, tpu.core_type = #tpu.core_type<tc>, window_params = [{transform_indices = @transform_0, window_bounds = array<i64: 5, 2, 5, 128>}, {transform_indices = @transform_1, window_bounds = array<i64: 5, 5, 64>}]} {
    %c0 = arith.constant 0 : index
    %c0_0 = arith.constant 0 : index
    %c0_1 = arith.constant 0 : index
    %c0_2 = arith.constant 0 : index
    %0 = vector.load %arg1[%c0, %c0_0, %c0_1, %c0_2] : memref<5x2x5x128xbf16, #tpu.memory_space<vmem>>, vector<5x2x5x128xbf16>
    %1 = vector.extract_strided_slice %0 {offsets = [0, 0, 0, 0], sizes = [5, 1, 5, 128], strides = [1, 1, 1, 1]} : vector<5x2x5x128xbf16> to vector<5x1x5x128xbf16>
    %2 = vector.shape_cast %1 : vector<5x1x5x128xbf16> to vector<5x5x128xbf16>
    %3 = vector.extract_strided_slice %0 {offsets = [0, 1, 0, 0], sizes = [5, 1, 5, 128], strides = [1, 1, 1, 1]} : vector<5x2x5x128xbf16> to vector<5x1x5x128xbf16>
    %4 = vector.shape_cast %3 : vector<5x1x5x128xbf16> to vector<5x5x128xbf16>
    %5 = arith.maximumf %2, %4 : vector<5x5x128xbf16>
    %6 = vector.extract_strided_slice %5 {offsets = [0, 0, 0], sizes = [5, 5, 64], strides = [1, 1, 1]} : vector<5x5x128xbf16> to vector<5x5x64xbf16>
    %7 = vector.extract_strided_slice %5 {offsets = [0, 0, 64], sizes = [5, 5, 64], strides = [1, 1, 1]} : vector<5x5x128xbf16> to vector<5x5x64xbf16>
    %8 = arith.maximumf %6, %7 : vector<5x5x64xbf16>
    %c0_3 = arith.constant 0 : index
    %c0_4 = arith.constant 0 : index
    %c0_5 = arith.constant 0 : index
    %9 = vector.load %arg2[%c0_3, %c0_4, %c0_5] : memref<5x5x64xbf16, #tpu.memory_space<vmem>>, vector<5x5x64xbf16>
    tpu.vector_store %arg2[%c0_3, %c0_4, %c0_5], %8 {strides = array<i32>} : memref<5x5x64xbf16, #tpu.memory_space<vmem>>, vector<5x5x64xbf16>,
    return
  }
  func.func @transform_0(%arg0: i32) -> (i32, i32, i32, i32) {
    %c0_i32 = arith.constant 0 : i32
    %c0_i32_0 = arith.constant 0 : i32
    %c0_i32_1 = arith.constant 0 : i32
    %c0_i32_2 = arith.constant 0 : i32
    return %arg0, %c0_i32, %c0_i32_0, %c0_i32_1 : i32, i32, i32, i32
  }
  func.func @transform_1(%arg0: i32) -> (i32, i32, i32) {
    %c0_i32 = arith.constant 0 : i32
    %c0_i32_0 = arith.constant 0 : i32
    %c0_i32_1 = arith.constant 0 : i32
    return %arg0, %c0_i32, %c0_i32_0 : i32, i32, i32
  }
}

module attributes {stable_mosaic.version = 11 : i64} {
  func.func @_fc_chain_kernel(%arg0: i32, %arg1: memref<2x1600xbf16, #tpu.memory_space<vmem>>, %arg2: memref<1600x384xbf16, #tpu.memory_space<vmem>>, %arg3: memref<1x384xf32, #tpu.memory_space<vmem>>, %arg4: memref<384x192xbf16, #tpu.memory_space<vmem>>, %arg5: memref<1x192xf32, #tpu.memory_space<vmem>>, %arg6: memref<192x128xbf16, #tpu.memory_space<vmem>>, %arg7: memref<1x128xf32, #tpu.memory_space<vmem>>, %arg8: memref<2x128xf32, #tpu.memory_space<vmem>>) attributes {dimension_semantics = [#tpu.dimension_semantics<arbitrary>], iteration_bounds = array<i64: 1>, scalar_prefetch = 0 : i64, scratch_operands = 0 : i64, tpu.core_type = #tpu.core_type<tc>, window_params = [{pipeline_mode = #tpu.pipeline_mode<synchronous>, transform_indices = @transform_0, window_bounds = array<i64: 2, 1600>}, {pipeline_mode = #tpu.pipeline_mode<synchronous>, transform_indices = @transform_1, window_bounds = array<i64: 1600, 384>}, {pipeline_mode = #tpu.pipeline_mode<synchronous>, transform_indices = @transform_2, window_bounds = array<i64: 1, 384>}, {pipeline_mode = #tpu.pipeline_mode<synchronous>, transform_indices = @transform_3, window_bounds = array<i64: 384, 192>}, {pipeline_mode = #tpu.pipeline_mode<synchronous>, transform_indices = @transform_4, window_bounds = array<i64: 1, 192>}, {pipeline_mode = #tpu.pipeline_mode<synchronous>, transform_indices = @transform_5, window_bounds = array<i64: 192, 128>}, {pipeline_mode = #tpu.pipeline_mode<synchronous>, transform_indices = @transform_6, window_bounds = array<i64: 1, 128>}, {pipeline_mode = #tpu.pipeline_mode<synchronous>, transform_indices = @transform_7, window_bounds = array<i64: 2, 128>}]} {
    %c0 = arith.constant 0 : index
    %c0_0 = arith.constant 0 : index
    %0 = vector.load %arg1[%c0, %c0_0] : memref<2x1600xbf16, #tpu.memory_space<vmem>>, vector<2x1600xbf16>
    %c0_1 = arith.constant 0 : index
    %c0_2 = arith.constant 0 : index
    %1 = vector.load %arg2[%c0_1, %c0_2] : memref<1600x384xbf16, #tpu.memory_space<vmem>>, vector<1600x384xbf16>
    %cst = arith.constant dense<0.000000e+00> : vector<2x384xf32>
    %2 = tpu.matmul %0, %1, %cst {dimension_numbers = #tpu.dot_dimension_numbers<[1], [0], [0], [1], [0, 0, 1, 1], [], []>} : vector<2x1600xbf16>, vector<1600x384xbf16>, vector<2x384xf32> -> vector<2x384xf32>
    %c0_3 = arith.constant 0 : index
    %c0_4 = arith.constant 0 : index
    %3 = vector.load %arg3[%c0_3, %c0_4] : memref<1x384xf32, #tpu.memory_space<vmem>>, vector<1x384xf32>
    %4 = vector.broadcast %3 : vector<1x384xf32> to vector<2x384xf32>
    %5 = arith.addf %2, %4 : vector<2x384xf32>
    %cst_5 = arith.constant 0.000000e+00 : f32
    %6 = vector.broadcast %cst_5 : f32 to vector<2x384xf32>
    %7 = arith.maximumf %5, %6 : vector<2x384xf32>
    %8 = arith.truncf %7 : vector<2x384xf32> to vector<2x384xbf16>
    %c0_6 = arith.constant 0 : index
    %c0_7 = arith.constant 0 : index
    %9 = vector.load %arg4[%c0_6, %c0_7] : memref<384x192xbf16, #tpu.memory_space<vmem>>, vector<384x192xbf16>
    %cst_8 = arith.constant dense<0.000000e+00> : vector<2x192xf32>
    %10 = tpu.matmul %8, %9, %cst_8 {dimension_numbers = #tpu.dot_dimension_numbers<[1], [0], [0], [1], [0, 0, 1, 1], [], []>} : vector<2x384xbf16>, vector<384x192xbf16>, vector<2x192xf32> -> vector<2x192xf32>
    %c0_9 = arith.constant 0 : index
    %c0_10 = arith.constant 0 : index
    %11 = vector.load %arg5[%c0_9, %c0_10] : memref<1x192xf32, #tpu.memory_space<vmem>>, vector<1x192xf32>
    %12 = vector.broadcast %11 : vector<1x192xf32> to vector<2x192xf32>
    %13 = arith.addf %10, %12 : vector<2x192xf32>
    %cst_11 = arith.constant 0.000000e+00 : f32
    %14 = vector.broadcast %cst_11 : f32 to vector<2x192xf32>
    %15 = arith.maximumf %13, %14 : vector<2x192xf32>
    %16 = arith.truncf %15 : vector<2x192xf32> to vector<2x192xbf16>
    %c0_12 = arith.constant 0 : index
    %c0_13 = arith.constant 0 : index
    %17 = vector.load %arg6[%c0_12, %c0_13] : memref<192x128xbf16, #tpu.memory_space<vmem>>, vector<192x128xbf16>
    %cst_14 = arith.constant dense<0.000000e+00> : vector<2x128xf32>
    %18 = tpu.matmul %16, %17, %cst_14 {dimension_numbers = #tpu.dot_dimension_numbers<[1], [0], [0], [1], [0, 0, 1, 1], [], []>} : vector<2x192xbf16>, vector<192x128xbf16>, vector<2x128xf32> -> vector<2x128xf32>
    %c0_15 = arith.constant 0 : index
    %c0_16 = arith.constant 0 : index
    %19 = vector.load %arg7[%c0_15, %c0_16] : memref<1x128xf32, #tpu.memory_space<vmem>>, vector<1x128xf32>
    %20 = vector.broadcast %19 : vector<1x128xf32> to vector<2x128xf32>
    %21 = arith.addf %18, %20 : vector<2x128xf32>
    %c0_17 = arith.constant 0 : index
    %c0_18 = arith.constant 0 : index
    %22 = vector.load %arg8[%c0_17, %c0_18] : memref<2x128xf32, #tpu.memory_space<vmem>>, vector<2x128xf32>
    tpu.vector_store %arg8[%c0_17, %c0_18], %21 {strides = array<i32>} : memref<2x128xf32, #tpu.memory_space<vmem>>, vector<2x128xf32>,
    return
  }
  func.func @transform_0(%arg0: i32) -> (i32, i32) {
    %c0_i32 = arith.constant 0 : i32
    %c0_i32_0 = arith.constant 0 : i32
    %c0_i32_1 = arith.constant 0 : i32
    return %c0_i32, %c0_i32_0 : i32, i32
  }
  func.func @transform_1(%arg0: i32) -> (i32, i32) {
    %c0_i32 = arith.constant 0 : i32
    %c0_i32_0 = arith.constant 0 : i32
    %c0_i32_1 = arith.constant 0 : i32
    return %c0_i32, %c0_i32_0 : i32, i32
  }
  func.func @transform_2(%arg0: i32) -> (i32, i32) {
    %c0_i32 = arith.constant 0 : i32
    %c0_i32_0 = arith.constant 0 : i32
    %c0_i32_1 = arith.constant 0 : i32
    return %c0_i32, %c0_i32_0 : i32, i32
  }
  func.func @transform_3(%arg0: i32) -> (i32, i32) {
    %c0_i32 = arith.constant 0 : i32
    %c0_i32_0 = arith.constant 0 : i32
    %c0_i32_1 = arith.constant 0 : i32
    return %c0_i32, %c0_i32_0 : i32, i32
  }
  func.func @transform_4(%arg0: i32) -> (i32, i32) {
    %c0_i32 = arith.constant 0 : i32
    %c0_i32_0 = arith.constant 0 : i32
    %c0_i32_1 = arith.constant 0 : i32
    return %c0_i32, %c0_i32_0 : i32, i32
  }
  func.func @transform_5(%arg0: i32) -> (i32, i32) {
    %c0_i32 = arith.constant 0 : i32
    %c0_i32_0 = arith.constant 0 : i32
    %c0_i32_1 = arith.constant 0 : i32
    return %c0_i32, %c0_i32_0 : i32, i32
  }
  func.func @transform_6(%arg0: i32) -> (i32, i32) {
    %c0_i32 = arith.constant 0 : i32
    %c0_i32_0 = arith.constant 0 : i32
    %c0_i32_1 = arith.constant 0 : i32
    return %c0_i32, %c0_i32_0 : i32, i32
  }
  func.func @transform_7(%arg0: i32) -> (i32, i32) {
    %c0_i32 = arith.constant 0 : i32
    %c0_i32_0 = arith.constant 0 : i32
    %c0_i32_1 = arith.constant 0 : i32
    return %c0_i32, %c0_i32_0 : i32, i32
  }
}

</mosaic_0001>

<bundles_post_ra>
// kernel: forward.5
= control target key start
LH: loop header
LB: loop body
LE: loop exit
PB: predicated region body
PF: predicated region fallthrough
CT: control target
= control target key end

     0   :  { %s758_s12 = smov 0   ;;  %s921_s0 = inlined_call_operand.vmem [shape: bf16[1568,75], index: 0, kind: input, shape index: {}]   ;;  %s922_s1 = inlined_call_operand.vmem [shape: bf16[75,64], index: 1, kind: input, shape index: {}]   ;;  %s923_s2 = inlined_call_operand.vmem [shape: f32[1,64], index: 2, kind: input, shape index: {}]   ;;  %s924_s3 = inlined_call_operand.vmem [shape: bf16[1568,64], index: 3, kind: output, shape index: {}]  }
   0x1 LB: > { %s586_s13 = sadd.s32 4294967295, %s735_s12   ;;  %p590_p0 = scmp.ge.s32.totalorder %s735_s12, 1  ;;  %s735_s12 = sphi %s758_s12, %s13_s12  }
   0x2   : > { %p138_p1 = scmp.lt.s32.totalorder %s735_s12, 8 }
   0x4   : > { %p139_p2 = pnand %p590_p0, %p138_p1 }
   0x5   : > { %s162_s18 = smul.u32 (!%p139_p2), 28, %s586_s13 }
   0x6   : > { %142 = sbr.rel (%p139_p2) target bundleno = 231 (0xe7), region = 32 }
   0x7   : > { %p163_p3 = scmp.lt.s32.totalorder (!%p139_p2), %s162_s18, 195 }
   0xb   : > { %v667_v0 = vld [vmem:[%s922_s1 + $0x20] sm:$0xf]  ;;  %v703_v1 = vld [vmem:[%s922_s1 + $0x20] sm:$0x30]  ;;  %vm359_vm0 = vcmask 1044480   ;;  %vm360_vm1 = vcmask 1045504  }
   0xc   : > { %v668_v2 = vor.u32 %v703_v1, %v667_v0  ;;  %v737_v3 = vmov 65535   ;;  %v702_v7 = vld [vmem:[%s922_s1 + $0x18] sm:$0xff]  ;;  %v701_v8 = vld [vmem:[%s922_s1 + $0x10] sm:$0xff]  ;;  %s926_s18 = smov (!%p163_p3, %s162_s18), 195  ;;  %v700_v9 = vld [vmem:[%s922_s1 + $0x8] sm:$0xff]  ;;  %vm316_vm2 = vcmask 613376  }
   0xd   : > { %v361_v4 = vsel %vm359_vm0, 4294967295, %v737_v3  ;;  %s591_s25 = sshll.u32 %s926_s18, 2  ;;  %v699_v10 = vld [vmem:[%s922_s1] sm:$0xff]  ;;  %vm501_vm3 = vcmask 519168  }
   0xe   : > { %v362_v5 = vsel %vm360_vm1, %v361_v4, 0  ;;  %s792_s30 = scalar_lea.vmem %s921_s0, %s591_s25  ;;  %v825_v25 = vld [vmem:[%s923_s2] ss:$0 sm:$0xff]  ;;  %s834_s8 = scalar_lea.vmem %s924_s3, %s591_s25 }
   0xf   : > { %v364_v6 = vand.u32 %v668_v2, %v362_v5  ;;  %v688_v11 = vld [vmem:[%s792_s30 + $0x18] sm:$0xff]  ;;  %v685_v14 = vld [vmem:[%s792_s30] sm:$0xff]  ;;  %v686_v18 = vld [vmem:[%s792_s30 + $0x8] sm:$0xff] }
  0x10   : > { %v692_v12 = vld [vmem:[%s792_s30 + $0x38] sm:$0xff]  ;;  %v689_v15 = vld [vmem:[%s792_s30 + $0x20] sm:$0xff]  ;;  %v690_v19 = vld [vmem:[%s792_s30 + $0x28] sm:$0xff] }
  0x11   : > { %704 = vmatpush.bf16.msra.mxu1 %v364_v6  ;;  %705 = vmatpush.bf16.msra.mxu2 %v364_v6  ;;  %v696_v13 = vld [vmem:[%s792_s30 + $0x58] sm:$0xff]  ;;  %v693_v16 = vld [vmem:[%s792_s30 + $0x40] sm:$0xff]  ;;  %v694_v20 = vld [vmem:[%s792_s30 + $0x48] sm:$0xff] }
  0x12   : > { %706 = vmatpush.bf16.msra.mxu3 %v364_v6  ;;  %369 = vmatpush.bf16.msra.mxu0 %v364_v6  ;;  %v697_v17 = vld [vmem:[%s792_s30 + $0x60] sm:$0xff]  ;;  %v698_v21 = vld [vmem:[%s792_s30 + $0x68] sm:$0xff]  ;;  %v687_v22 = vld [vmem:[%s792_s30 + $0x10] sm:$0xff] }
  0x13   : > { %v691_v23 = vld [vmem:[%s792_s30 + $0x30] sm:$0xff] }
  0x14   : > { %v695_v24 = vld [vmem:[%s792_s30 + $0x50] sm:$0xff] }
  0x15   : > { %707 = vmatpush.bf16.msra.mxu1 %v702_v7  ;;  %708 = vmatpush.bf16.msra.mxu2 %v702_v7 }
  0x16   : > { %709 = vmatpush.bf16.msra.mxu3 %v702_v7  ;;  %370 = vmatpush.bf16.msra.mxu0 %v702_v7 }
  0x19   : > { %710 = vmatpush.bf16.msra.mxu1 %v701_v8  ;;  %711 = vmatpush.bf16.msra.mxu2 %v701_v8 }
  0x1a   : > { %712 = vmatpush.bf16.msra.mxu3 %v701_v8  ;;  %371 = vmatpush.bf16.msra.mxu0 %v701_v8 }
  0x1d   : > { %713 = vmatpush.bf16.msra.mxu1 %v700_v9  ;;  %714 = vmatpush.bf16.msra.mxu2 %v700_v9 }
  0x1e   : > { %715 = vmatpush.bf16.msra.mxu3 %v700_v9  ;;  %372 = vmatpush.bf16.msra.mxu0 %v700_v9 }
  0x21   : > { %716 = vmatpush.bf16.msra.mxu1 %v699_v10  ;;  %717 = vmatpush.bf16.msra.mxu2 %v699_v10 }
  0x22   : > { %718 = vmatpush.bf16.msra.mxu3 %v699_v10  ;;  %373 = vmatpush.bf16.msra.mxu0 %v699_v10 }
  0x24   : > { %672 = vmatmul.msk.bf16.vlgmr.msra.gmra.mxu1 %vm316_vm2, %v688_v11  ;;  %676 = vmatmul.msk.bf16.vlgmr.msra.gmra.mxu2 %vm316_vm2, %v692_v12 }
  0x25   : > { %680 = vmatmul.msk.bf16.vlgmr.msra.gmra.mxu3 %vm316_vm2, %v696_v13  ;;  %669 = vmatmul.msk.bf16.vlgmr.msra.gmra.mxu0 %vm316_vm2, %v685_v14 }
  0x34   : > { %673 = vmatmul.msk.bf16.gmra.mxu1 %vm316_vm2, %v689_v15  ;;  %677 = vmatmul.msk.bf16.gmra.mxu2 %vm316_vm2, %v693_v16 }
  0x35   : > { %681 = vmatmul.msk.bf16.gmra.mxu3 %vm316_vm2, %v697_v17  ;;  %670 = vmatmul.msk.bf16.gmra.mxu0 %vm316_vm2, %v686_v18 }
  0x44   : > { %674 = vmatmul.msk.bf16.gmra.mxu1 %vm316_vm2, %v690_v19  ;;  %678 = vmatmul.msk.bf16.gmra.mxu2 %vm316_vm2, %v694_v20 }
  0x45   : > { %682 = vmatmul.msk.bf16.gmra.mxu3 %vm316_vm2, %v698_v21  ;;  %671 = vmatmul.msk.bf16.gmra.mxu0 %vm316_vm2, %v687_v22 }
  0x54   : > { %675 = vmatmul.msk.bf16.gmra.mxu1 %vm316_vm2, %v691_v23  ;;  %679 = vmatmul.msk.bf16.gmra.mxu2 %vm316_vm2, %v695_v24 }
  0xa1   : > { %v390_v26 = vpop.f32.mrf.mxu1 }
  0xa2   : > { %v391_v27 = vadd.f32 %v825_v25, %v390_v26  ;;  %v375_v28 = vpop.f32.mrf.mxu0 }
  0xa3   : > { %v376_v29 = vadd.f32 %v825_v25, %v375_v28 }
  0xa4   : > { %v451_v30 = vmax.f32 %v391_v27, 0.0 }
  0xa5   : > { %v445_v31 = vmax.f32 %v376_v29, 0.0 }
  0xa6   : > { %v479_v32 = vpack.c.bf16 %v451_v30, %v451_v30 }
  0xa7   : > { %v410_v33 = vpop.f32.mrf.mxu2  ;;  %v473_v34 = vpack.c.bf16 %v445_v31, %v445_v31 }
  0xa8   : > { %508 = vst.msk [vmem:[%s834_s8 + $0x18] sm:$0xf] %vm501_vm3, %v479_v32  ;;  %v411_v35 = vadd.f32 %v825_v25, %v410_v33  ;;  %v430_v36 = vpop.f32.mrf.mxu3 }
  0xa9   : > { %v392_v37 = vpop.f32.mrf.mxu1  ;;  %502 = vst.msk [vmem:[%s834_s8] sm:$0xf] %vm501_vm3, %v473_v34  ;;  %v431_v38 = vadd.f32 %v825_v25, %v430_v36 }
  0xaa   : > { %v459_v39 = vmax.f32 %v411_v35, 0.0  ;;  %v393_v40 = vadd.f32 %v825_v25, %v392_v37  ;;  %v377_v41 = vpop.f32.mrf.mxu0 }
  0xab   : > { %v467_v42 = vmax.f32 %v431_v38, 0.0  ;;  %v378_v43 = vadd.f32 %v825_v25, %v377_v41 }
  0xac   : > { %v487_v44 = vpack.c.bf16 %v459_v39, %v459_v39  ;;  %v452_v45 = vmax.f32 %v393_v40, 0.0 }
  0xad   : > { %v495_v46 = vpack.c.bf16 %v467_v42, %v467_v42  ;;  %v446_v47 = vmax.f32 %v378_v43, 0.0 }
  0xae   : > { %516 = vst.msk [vmem:[%s834_s8 + $0x38] sm:$0xf] %vm501_vm3, %v487_v44  ;;  %v480_v48 = vpack.c.bf16 %v452_v45, %v452_v45 }
  0xaf   : > { %v412_v49 = vpop.f32.mrf.mxu2  ;;  %524 = vst.msk [vmem:[%s834_s8 + $0x58] sm:$0xf] %vm501_vm3, %v495_v46  ;;  %v474_v50 = vpack.c.bf16 %v446_v47, %v446_v47 }
  0xb0   : > { %509 = vst.msk [vmem:[%s834_s8 + $0x1c] sm:$0xf] %vm501_vm3, %v480_v48  ;;  %v413_v51 = vadd.f32 %v825_v25, %v412_v49  ;;  %v432_v52 = vpop.f32.mrf.mxu3 }
  0xb1   : > { %v395_v53 = vpop.f32.mrf.mxu1  ;;  %503 = vst.msk [vmem:[%s834_s8 + $0x4] sm:$0xf] %vm501_vm3, %v474_v50  ;;  %v433_v54 = vadd.f32 %v825_v25, %v432_v52 }
  0xb2   : > { %v460_v55 = vmax.f32 %v413_v51, 0.0  ;;  %v396_v56 = vadd.f32 %v825_v25, %v395_v53  ;;  %v380_v57 = vpop.f32.mrf.mxu0 }
  0xb3   : > { %v468_v58 = vmax.f32 %v433_v54, 0.0  ;;  %v381_v59 = vadd.f32 %v825_v25, %v380_v57 }
  0xb4   : > { %v488_v60 = vpack.c.bf16 %v460_v55, %v460_v55  ;;  %v453_v61 = vmax.f32 %v396_v56, 0.0 }
  0xb5   : > { %v496_v62 = vpack.c.bf16 %v468_v58, %v468_v58  ;;  %v447_v63 = vmax.f32 %v381_v59, 0.0 }
  0xb6   : > { %517 = vst.msk [vmem:[%s834_s8 + $0x3c] sm:$0xf] %vm501_vm3, %v488_v60  ;;  %v481_v0 = vpack.c.bf16 %v453_v61, %v453_v61 }
  0xb7   : > { %v415_v1 = vpop.f32.mrf.mxu2  ;;  %525 = vst.msk [vmem:[%s834_s8 + $0x5c] sm:$0xf] %vm501_vm3, %v496_v62  ;;  %v475_v2 = vpack.c.bf16 %v447_v63, %v447_v63 }
  0xb8   : > { %510 = vst.msk [vmem:[%s834_s8 + $0x20] sm:$0xf] %vm501_vm3, %v481_v0  ;;  %v416_v3 = vadd.f32 %v825_v25, %v415_v1  ;;  %v435_v4 = vpop.f32.mrf.mxu3 }
  0xb9   : > { %v397_v5 = vpop.f32.mrf.mxu1  ;;  %504 = vst.msk [vmem:[%s834_s8 + $0x8] sm:$0xf] %vm501_vm3, %v475_v2  ;;  %v436_v6 = vadd.f32 %v825_v25, %v435_v4 }
  0xba   : > { %v461_v7 = vmax.f32 %v416_v3, 0.0  ;;  %v398_v8 = vadd.f32 %v825_v25, %v397_v5  ;;  %v382_v9 = vpop.f32.mrf.mxu0 }
  0xbb   : > { %v469_v10 = vmax.f32 %v436_v6, 0.0  ;;  %v383_v11 = vadd.f32 %v825_v25, %v382_v9 }
  0xbc   : > { %v489_v12 = vpack.c.bf16 %v461_v7, %v461_v7  ;;  %v454_v13 = vmax.f32 %v398_v8, 0.0 }
  0xbd   : > { %v497_v14 = vpack.c.bf16 %v469_v10, %v469_v10  ;;  %v448_v15 = vmax.f32 %v383_v11, 0.0 }
  0xbe   : > { %518 = vst.msk [vmem:[%s834_s8 + $0x40] sm:$0xf] %vm501_vm3, %v489_v12  ;;  %v482_v16 = vpack.c.bf16 %v454_v13, %v454_v13 }
  0xbf   : > { %v417_v17 = vpop.f32.mrf.mxu2  ;;  %526 = vst.msk [vmem:[%s834_s8 + $0x60] sm:$0xf] %vm501_vm3, %v497_v14  ;;  %v476_v18 = vpack.c.bf16 %v448_v15, %v448_v15 }
  0xc0   : > { %511 = vst.msk [vmem:[%s834_s8 + $0x24] sm:$0xf] %vm501_vm3, %v482_v16  ;;  %v418_v19 = vadd.f32 %v825_v25, %v417_v17  ;;  %v437_v20 = vpop.f32.mrf.mxu3 }
  0xc1   : > { %v400_v21 = vpop.f32.mrf.mxu1  ;;  %505 = vst.msk [vmem:[%s834_s8 + $0xc] sm:$0xf] %vm501_vm3, %v476_v18  ;;  %v438_v22 = vadd.f32 %v825_v25, %v437_v20 }
  0xc2   : > { %v462_v23 = vmax.f32 %v418_v19, 0.0  ;;  %v401_v24 = vadd.f32 %v825_v25, %v400_v21  ;;  %v385_v26 = vpop.f32.mrf.mxu0 }
  0xc3   : > { %v470_v27 = vmax.f32 %v438_v22, 0.0  ;;  %v386_v28 = vadd.f32 %v825_v25, %v385_v26 }
  0xc4   : > { %v490_v29 = vpack.c.bf16 %v462_v23, %v462_v23  ;;  %v455_v30 = vmax.f32 %v401_v24, 0.0 }
  0xc5   : > { %v498_v31 = vpack.c.bf16 %v470_v27, %v470_v27  ;;  %v449_v32 = vmax.f32 %v386_v28, 0.0 }
  0xc6   : > { %519 = vst.msk [vmem:[%s834_s8 + $0x44] sm:$0xf] %vm501_vm3, %v490_v29  ;;  %v483_v33 = vpack.c.bf16 %v455_v30, %v455_v30 }
  0xc7   : > { %v420_v34 = vpop.f32.mrf.mxu2  ;;  %527 = vst.msk [vmem:[%s834_s8 + $0x64] sm:$0xf] %vm501_vm3, %v498_v31  ;;  %v477_v35 = vpack.c.bf16 %v449_v32, %v449_v32 }
  0xc8   : > { %512 = vst.msk [vmem:[%s834_s8 + $0x28] sm:$0xf] %vm501_vm3, %v483_v33  ;;  %v421_v36 = vadd.f32 %v825_v25, %v420_v34  ;;  %v440_v37 = vpop.f32.mrf.mxu3 }
  0xc9   : > { %v402_v38 = vpop.f32.mrf.mxu1  ;;  %506 = vst.msk [vmem:[%s834_s8 + $0x10] sm:$0xf] %vm501_vm3, %v477_v35  ;;  %v441_v39 = vadd.f32 %v825_v25, %v440_v37 }
  0xca   : > { %v463_v40 = vmax.f32 %v421_v36, 0.0  ;;  %v403_v41 = vadd.f32 %v825_v25, %v402_v38  ;;  %v387_v42 = vpop.f32.mrf.mxu0 }
  0xcb   : > { %v471_v43 = vmax.f32 %v441_v39, 0.0  ;;  %v388_v44 = vadd.f32 %v825_v25, %v387_v42 }
  0xcc   : > { %v491_v45 = vpack.c.bf16 %v463_v40, %v463_v40  ;;  %v456_v46 = vmax.f32 %v403_v41, 0.0 }
  0xcd   : > { %v499_v47 = vpack.c.bf16 %v471_v43, %v471_v43  ;;  %v450_v48 = vmax.f32 %v388_v44, 0.0 }
  0xce   : > { %520 = vst.msk [vmem:[%s834_s8 + $0x48] sm:$0xf] %vm501_vm3, %v491_v45  ;;  %v484_v49 = vpack.c.bf16 %v456_v46, %v456_v46 }
  0xcf   : > { %v422_v50 = vpop.f32.mrf.mxu2  ;;  %528 = vst.msk [vmem:[%s834_s8 + $0x68] sm:$0xf] %vm501_vm3, %v499_v47  ;;  %v478_v51 = vpack.c.bf16 %v450_v48, %v450_v48 }
  0xd0   : > { %513 = vst.msk [vmem:[%s834_s8 + $0x2c] sm:$0xf] %vm501_vm3, %v484_v49  ;;  %v423_v52 = vadd.f32 %v825_v25, %v422_v50  ;;  %v442_v53 = vpop.f32.mrf.mxu3 }
  0xd1   : > { %v405_v54 = vpop.f32.mrf.mxu1  ;;  %507 = vst.msk [vmem:[%s834_s8 + $0x14] sm:$0xf] %vm501_vm3, %v478_v51  ;;  %v443_v55 = vadd.f32 %v825_v25, %v442_v53 }
  0xd2   : > { %v464_v56 = vmax.f32 %v423_v52, 0.0  ;;  %v406_v57 = vadd.f32 %v825_v25, %v405_v54 }
  0xd3   : > { %v472_v58 = vmax.f32 %v443_v55, 0.0 }
  0xd4   : > { %v492_v59 = vpack.c.bf16 %v464_v56, %v464_v56  ;;  %v457_v60 = vmax.f32 %v406_v57, 0.0 }
  0xd5   : > { %v500_v61 = vpack.c.bf16 %v472_v58, %v472_v58 }
  0xd6   : > { %521 = vst.msk [vmem:[%s834_s8 + $0x4c] sm:$0xf] %vm501_vm3, %v492_v59  ;;  %v485_v62 = vpack.c.bf16 %v457_v60, %v457_v60 }
  0xd7   : > { %v425_v63 = vpop.f32.mrf.mxu2  ;;  %529 = vst.msk [vmem:[%s834_s8 + $0x6c] sm:$0xf] %vm501_vm3, %v500_v61 }
  0xd8   : > { %514 = vst.msk [vmem:[%s834_s8 + $0x30] sm:$0xf] %vm501_vm3, %v485_v62  ;;  %v426_v0 = vadd.f32 %v825_v25, %v425_v63 }
  0xd9   : > { %v407_v1 = vpop.f32.mrf.mxu1 }
  0xda   : > { %v465_v2 = vmax.f32 %v426_v0, 0.0  ;;  %v408_v3 = vadd.f32 %v825_v25, %v407_v1 }
  0xdc   : > { %v493_v4 = vpack.c.bf16 %v465_v2, %v465_v2  ;;  %v458_v5 = vmax.f32 %v408_v3, 0.0 }
  0xde   : > { %522 = vst.msk [vmem:[%s834_s8 + $0x50] sm:$0xf] %vm501_vm3, %v493_v4  ;;  %v486_v6 = vpack.c.bf16 %v458_v5, %v458_v5 }
  0xdf   : > { %v427_v7 = vpop.f32.mrf.mxu2 }
  0xe0   : > { %515 = vst.msk [vmem:[%s834_s8 + $0x34] sm:$0xf] %vm501_vm3, %v486_v6  ;;  %v428_v8 = vadd.f32 %v825_v25, %v427_v7 }
  0xe2   : > { %v466_v9 = vmax.f32 %v428_v8, 0.0 }
  0xe4   : > { %v494_v10 = vpack.c.bf16 %v466_v9, %v466_v9 }
  0xe6   : > { %523 = vst.msk [vmem:[%s834_s8 + $0x54] sm:$0xf] %vm501_vm3, %v494_v10 }
  0xe7 PF: > { %s13_s12 = sadd.s32 1, %s735_s12  }
  0xe8   : > { %p10_p4 = scmp.ge.s32.totalorder %s13_s12, 9  }
  0xea   :  { %12 = sbr.rel (!%p10_p4) target bundleno = 1 (0x1), region = 62 }

// kernel: forward.6
= control target key start
LH: loop header
LB: loop body
LE: loop exit
PB: predicated region body
PF: predicated region fallthrough
CT: control target
= control target key end

     0   :  { %s688_s6 = smov 0   ;;  %s943_s0 = inlined_call_operand.vmem [shape: bf16[28,2,14,128], index: 0, kind: input, shape index: {}]   ;;  %s944_s1 = inlined_call_operand.vmem [shape: bf16[28,14,64], index: 1, kind: output, shape index: {}]  }
   0x1 LB: > { %s577_s7 = sadd.s32 4294967295, %s675_s6   ;;  %p581_p0 = scmp.ge.s32.totalorder %s675_s6, 1  ;;  %s675_s6 = sphi %s688_s6, %s11_s6  }
   0x2   : > { %p89_p1 = scmp.lt.s32.totalorder %s675_s6, 3 }
   0x4   : > { %p90_p2 = pnand %p581_p0, %p89_p1 }
   0x5   : > { %s111_s8 = smul.u32 (!%p90_p2), 14, %s577_s7  ;;  %s677_s13 = smov (!%p90_p2), 64  }
   0x6   : > { %93 = sbr.rel (%p90_p2) target bundleno = 180 (0xb4), region = 24 }
   0x7   : > { %p112_p3 = scmp.lt.s32.totalorder (!%p90_p2), %s111_s8, 27 }
   0xb   : > { %s946_s8 = smov (!%p112_p3, %s111_s8), 27  ;;  %vm491_vm0 = vcmask 518144   ;;  %vm489_vm1 = vcmask 519168  }
   0xc   : > { %s588_s9 = sshll.u32 %s946_s8, 4  ;;  %s589_s14 = sshll.u32 %s946_s8, 3 }
   0xd   : > { %s702_s12 = scalar_lea.vmem %s943_s0, %s588_s9  ;;  %s858_s17 = scalar_lea.vmem %s944_s1, %s589_s14 }
   0xe   : > { %v133_v0 = vld [vmem:[%s702_s12 + $0x20] sm:$0xf]  ;;  %v134_v1 = vld [vmem:[%s702_s12 + $0x24] sm:$0x7]  ;;  %v135_v2 = vld [vmem:[%s702_s12 + $0x28] sm:$0xf] }
   0xf   : > { %v136_v3 = vld [vmem:[%s702_s12 + $0x2c] sm:$0x7]  ;;  %v185_v4 = vunpack.c.l.bf16 %v133_v0  ;;  %v186_v5 = vunpack.c.l.bf16 %v134_v1  ;;  %v213_v6 = vunpack.c.l.bf16 %v135_v2  ;;  %v125_v7 = vld [vmem:[%s702_s12] sm:$0xf]  ;;  %v126_v8 = vld [vmem:[%s702_s12 + $0x4] sm:$0x7] }
  0x10   : > { %v214_v9 = vunpack.c.l.bf16 %v136_v3  ;;  %v127_v10 = vld [vmem:[%s702_s12 + $0x8] sm:$0xf]  ;;  %v128_v11 = vld [vmem:[%s702_s12 + $0xc] sm:$0x7]  ;;  %v181_v12 = vunpack.c.l.bf16 %v125_v7  ;;  %v182_v13 = vunpack.c.l.bf16 %v126_v8  ;;  %v137_v14 = vld [vmem:[%s702_s12 + $0x30] sm:$0xf] }
  0x11   : > { %v713_v15 = vmax.f32 %v185_v4, %v213_v6  ;;  %v209_v16 = vunpack.c.l.bf16 %v127_v10  ;;  %v210_v17 = vunpack.c.l.bf16 %v128_v11  ;;  %v138_v18 = vld [vmem:[%s702_s12 + $0x34] sm:$0x7]  ;;  %v139_v19 = vld [vmem:[%s702_s12 + $0x38] sm:$0xf]  ;;  %v140_v20 = vld [vmem:[%s702_s12 + $0x3c] sm:$0x7]  ;;  %v187_v21 = vunpack.c.l.bf16 %v137_v14 }
  0x12   : > { %v718_v22 = vmax.f32 %v186_v5, %v214_v9  ;;  %v188_v23 = vunpack.c.l.bf16 %v138_v18  ;;  %v215_v24 = vunpack.c.l.bf16 %v139_v19  ;;  %v216_v25 = vunpack.c.l.bf16 %v140_v20  ;;  %v129_v26 = vld [vmem:[%s702_s12 + $0x10] sm:$0xf]  ;;  %v130_v27 = vld [vmem:[%s702_s12 + $0x14] sm:$0x7]  ;;  %v131_v28 = vld [vmem:[%s702_s12 + $0x18] sm:$0xf] }
  0x13   : > { %v723_v29 = vmax.f32 %v181_v12, %v209_v16  ;;  %v725_v30 = vmax.f32 %v182_v13, %v210_v17  ;;  %v132_v31 = vld [vmem:[%s702_s12 + $0x1c] sm:$0x7]  ;;  %v183_v32 = vunpack.c.l.bf16 %v129_v26  ;;  %v184_v35 = vunpack.c.l.bf16 %v130_v27  ;;  %v153_v36 = vld [vmem:[%s702_s12 + $0x70] sm:$0xf]  ;;  %v154_v39 = vld [vmem:[%s702_s12 + $0x74] sm:$0x7] }
  0x14   : > { %v728_v33 = vmax.f32 %v187_v21, %v215_v24  ;;  %v730_v34 = vmax.f32 %v188_v23, %v216_v25  ;;  %v211_v37 = vunpack.c.l.bf16 %v131_v28  ;;  %v212_v38 = vunpack.c.l.bf16 %v132_v31  ;;  %v155_v40 = vld [vmem:[%s702_s12 + $0x78] sm:$0xf]  ;;  %v156_v42 = vld [vmem:[%s702_s12 + $0x7c] sm:$0x7]  ;;  %v149_v44 = vld [vmem:[%s702_s12 + $0x60] sm:$0xf] }
  0x15   : > { %v195_v43 = vunpack.c.l.bf16 %v153_v36  ;;  %v609_v45 = vpack.i.bf16 %v718_v22, %v713_v15  ;;  %v150_v47 = vld [vmem:[%s702_s12 + $0x64] sm:$0x7]  ;;  %v151_v48 = vld [vmem:[%s702_s12 + $0x68] sm:$0xf]  ;;  %v599_v49 = vpack.i.bf16 %v725_v30, %v723_v29  ;;  %v196_v50 = vunpack.c.l.bf16 %v154_v39  ;;  %v152_v52 = vld [vmem:[%s702_s12 + $0x6c] sm:$0x7] }
  0x16   : > { %v735_v41 = vmax.f32 %v183_v32, %v211_v37  ;;  %v741_v46 = vmax.f32 %v184_v35, %v212_v38  ;;  %v223_v51 = vunpack.c.l.bf16 %v155_v40  ;;  %v165_v53 = vld [vmem:[%s702_s12 + $0xa0] sm:$0xf]  ;;  %v614_v54 = vpack.i.bf16 %v730_v34, %v728_v33  ;;  %v166_v57 = vld [vmem:[%s702_s12 + $0xa4] sm:$0x7]  ;;  %v167_v58 = vld [vmem:[%s702_s12 + $0xa8] sm:$0xf] }
  0x17   : > { %610 = vrot.lane.b32.xlu1 %v609_v45, %s677_s13  ;;  %v224_v55 = vunpack.c.l.bf16 %v156_v42  ;;  %v193_v56 = vunpack.c.l.bf16 %v149_v44  ;;  %600 = vrot.lane.b32.xlu0 %v599_v49, %s677_s13  ;;  %v194_v60 = vunpack.c.l.bf16 %v150_v47  ;;  %v221_v61 = vunpack.c.l.bf16 %v151_v48  ;;  %v168_v62 = vld [vmem:[%s702_s12 + $0xac] sm:$0x7]  ;;  %v161_v2 = vld [vmem:[%s702_s12 + $0x90] sm:$0xf] }
  0x18   : > { %v755_v59 = vmax.f32 %v195_v43, %v223_v51  ;;  %v222_v0 = vunpack.c.l.bf16 %v152_v52  ;;  %v201_v1 = vunpack.c.l.bf16 %v165_v53  ;;  %v202_v4 = vunpack.c.l.bf16 %v166_v57  ;;  %v162_v6 = vld [vmem:[%s702_s12 + $0x94] sm:$0x7]  ;;  %v163_v10 = vld [vmem:[%s702_s12 + $0x98] sm:$0xf]  ;;  %v164_v11 = vld [vmem:[%s702_s12 + $0x9c] sm:$0x7] }
  0x19   : > { %v758_v63 = vmax.f32 %v196_v50, %v224_v55  ;;  %v761_v3 = vmax.f32 %v193_v56, %v221_v61  ;;  %v229_v5 = vunpack.c.l.bf16 %v167_v58  ;;  %v604_v7 = vpack.i.bf16 %v741_v46, %v735_v41  ;;  %v141_v14 = vld [vmem:[%s702_s12 + $0x40] sm:$0xf]  ;;  %v142_v18 = vld [vmem:[%s702_s12 + $0x44] sm:$0x7]  ;;  %v143_v21 = vld [vmem:[%s702_s12 + $0x48] sm:$0xf] }
  0x1a   : > { %v766_v8 = vmax.f32 %v194_v60, %v222_v0  ;;  %v230_v9 = vunpack.c.l.bf16 %v168_v62  ;;  %v199_v13 = vunpack.c.l.bf16 %v161_v2  ;;  %v200_v17 = vunpack.c.l.bf16 %v162_v6  ;;  %v144_v23 = vld [vmem:[%s702_s12 + $0x4c] sm:$0x7]  ;;  %v177_v25 = vld [vmem:[%s702_s12 + $0xd0] sm:$0xf]  ;;  %v178_v26 = vld [vmem:[%s702_s12 + $0xd4] sm:$0x7] }
  0x1b   : > { %v770_v12 = vmax.f32 %v201_v1, %v229_v5  ;;  %v227_v19 = vunpack.c.l.bf16 %v163_v10  ;;  %v228_v20 = vunpack.c.l.bf16 %v164_v11  ;;  %v189_v24 = vunpack.c.l.bf16 %v141_v14  ;;  %v179_v32 = vld [vmem:[%s702_s12 + $0xd8] sm:$0xf]  ;;  %v180_v38 = vld [vmem:[%s702_s12 + $0xdc] sm:$0x7]  ;;  %v173_v39 = vld [vmem:[%s702_s12 + $0xc0] sm:$0xf] }
  0x1c   : > { %v773_v16 = vmax.f32 %v202_v4, %v230_v9  ;;  %v190_v31 = vunpack.c.l.bf16 %v142_v18  ;;  %v634_v35 = vpack.i.bf16 %v758_v63, %v755_v59  ;;  %v217_v36 = vunpack.c.l.bf16 %v143_v21  ;;  %v174_v43 = vld [vmem:[%s702_s12 + $0xc4] sm:$0x7]  ;;  %v175_v49 = vld [vmem:[%s702_s12 + $0xc8] sm:$0xf]  ;;  %v176_v50 = vld [vmem:[%s702_s12 + $0xcc] sm:$0x7] }
  0x1d   : > { %v782_v27 = vmax.f32 %v199_v13, %v227_v19  ;;  %v784_v28 = vmax.f32 %v200_v17, %v228_v20  ;;  %v218_v37 = vunpack.c.l.bf16 %v144_v23  ;;  %v207_v40 = vunpack.c.l.bf16 %v177_v25  ;;  %v145_v53 = vld [vmem:[%s702_s12 + $0x50] sm:$0xf]  ;;  %v146_v56 = vld [vmem:[%s702_s12 + $0x54] sm:$0x7]  ;;  %v147_v61 = vld [vmem:[%s702_s12 + $0x58] sm:$0xf] }
  0x1e   : > { %v208_v42 = vunpack.c.l.bf16 %v178_v26  ;;  %v629_v44 = vpack.i.bf16 %v766_v8, %v761_v3  ;;  %v794_v45 = vmax.f32 %v189_v24, %v217_v36  ;;  %v235_v48 = vunpack.c.l.bf16 %v179_v32  ;;  %v148_v62 = vld [vmem:[%s702_s12 + $0x5c] sm:$0x7]  ;;  %v157_v1 = vld [vmem:[%s702_s12 + $0x80] sm:$0xf]  ;;  %v158_v6 = vld [vmem:[%s702_s12 + $0x84] sm:$0x7] }
  0x1f   : > { %615 = vrot.lane.b32.xlu1 %v614_v54, %s677_s13  ;;  %605 = vrot.lane.b32.xlu0 %v604_v7, %s677_s13  ;;  %v796_v47 = vmax.f32 %v190_v31, %v218_v37  ;;  %v236_v51 = vunpack.c.l.bf16 %v180_v38  ;;  %v205_v52 = vunpack.c.l.bf16 %v173_v39  ;;  %v206_v55 = vunpack.c.l.bf16 %v174_v43  ;;  %v159_v7 = vld [vmem:[%s702_s12 + $0x88] sm:$0xf]  ;;  %v160_v13 = vld [vmem:[%s702_s12 + $0x8c] sm:$0x7] }
  0x20   : > { %v801_v54 = vmax.f32 %v207_v40, %v235_v48  ;;  %v233_v58 = vunpack.c.l.bf16 %v175_v49  ;;  %v234_v60 = vunpack.c.l.bf16 %v176_v50  ;;  %v191_v0 = vunpack.c.l.bf16 %v145_v53  ;;  %v169_v24 = vld [vmem:[%s702_s12 + $0xb0] sm:$0xf]  ;;  %v170_v25 = vld [vmem:[%s702_s12 + $0xb4] sm:$0x7]  ;;  %v171_v26 = vld [vmem:[%s702_s12 + $0xb8] sm:$0xf] }
  0x21   : > { %v804_v57 = vmax.f32 %v208_v42, %v236_v51  ;;  %v192_v5 = vunpack.c.l.bf16 %v146_v56  ;;  %v619_v9 = vpack.i.bf16 %v796_v47, %v794_v45  ;;  %v219_v10 = vunpack.c.l.bf16 %v147_v61  ;;  %v172_v32 = vld [vmem:[%s702_s12 + $0xbc] sm:$0x7] }
  0x22   : > { %v811_v2 = vmax.f32 %v205_v52, %v233_v58  ;;  %v813_v4 = vmax.f32 %v206_v55, %v234_v60  ;;  %v220_v11 = vunpack.c.l.bf16 %v148_v62  ;;  %v649_v14 = vpack.i.bf16 %v773_v16, %v770_v12 }
  0x23   : > { %v644_v17 = vpack.i.bf16 %v784_v28, %v782_v27  ;;  %v197_v18 = vunpack.c.l.bf16 %v157_v1  ;;  %620 = vrot.lane.b32.xlu2 %v619_v9, %s677_s13  ;;  %v247_v19 = vmax.f32 %v191_v0, %v219_v10  ;;  %v198_v21 = vunpack.c.l.bf16 %v158_v6 }
  0x24   : > { %v248_v20 = vmax.f32 %v192_v5, %v220_v11  ;;  %v225_v23 = vunpack.c.l.bf16 %v159_v7  ;;  %v226_v31 = vunpack.c.l.bf16 %v160_v13  ;;  %v203_v37 = vunpack.c.l.bf16 %v169_v24 }
  0x25   : > { %v204_v38 = vunpack.c.l.bf16 %v170_v25  ;;  %v231_v39 = vunpack.c.l.bf16 %v171_v26  ;;  %v232_v40 = vunpack.c.l.bf16 %v172_v32  ;;  %v664_v43 = vpack.i.bf16 %v804_v57, %v801_v54 }
  0x26   : > { %v831_v36 = vmax.f32 %v198_v21, %v226_v31  ;;  %v624_v42 = vpack.i.bf16 %v248_v20, %v247_v19  ;;  %v659_v49 = vpack.i.bf16 %v813_v4, %v811_v2 }
  0x27   : > { %635 = vrot.lane.b32.xlu1 %v634_v35, %s677_s13  ;;  %630 = vrot.lane.b32.xlu0 %v629_v44, %s677_s13  ;;  %v829_v35 = vmax.f32 %v197_v18, %v225_v23  ;;  %v838_v44 = vmax.f32 %v203_v37, %v231_v39  ;;  %v840_v48 = vmax.f32 %v204_v38, %v232_v40 }
  0x29   : > { %v639_v50 = vpack.i.bf16 %v831_v36, %v829_v35  ;;  %v654_v51 = vpack.i.bf16 %v840_v48, %v838_v44 }
  0x2b   : > { %625 = vrot.lane.b32.xlu2 %v624_v42, %s677_s13 }
  0x2f   : > { %650 = vrot.lane.b32.xlu1 %v649_v14, %s677_s13  ;;  %645 = vrot.lane.b32.xlu0 %v644_v17, %s677_s13 }
  0x33   : > { %640 = vrot.lane.b32.xlu2 %v639_v50, %s677_s13 }
  0x37   : > { %665 = vrot.lane.b32.xlu1 %v664_v43, %s677_s13  ;;  %660 = vrot.lane.b32.xlu0 %v659_v49, %s677_s13 }
  0x3b   : > { %655 = vrot.lane.b32.xlu2 %v654_v51, %s677_s13 }
  0x7d   : > { %v621_v52 = vpop.permute.xlu2 %620 }
  0x7e   : > { %v623_v53 = vunpack.i.h.bf16 %v621_v52  ;;  %v622_v55 = vunpack.i.l.bf16 %v621_v52 }
  0x80   : > { %v442_v56 = vmax.f32 %v796_v47, %v623_v53  ;;  %v441_v58 = vmax.f32 %v794_v45, %v622_v55 }
  0x82   : > { %v470_v1 = vpack.c.bf16 %v442_v56, %v442_v56  ;;  %v469_v5 = vpack.c.bf16 %v441_v58, %v441_v58 }
  0x84   : > { %500 = vst.msk [vmem:[%s858_s17 + $0x24] sm:$0x7] %vm491_vm0, %v470_v1 }
  0x85   : > { %499 = vst.msk [vmem:[%s858_s17 + $0x20] sm:$0xf] %vm489_vm1, %v469_v5  ;;  %v626_v11 = vpop.permute.xlu2 %625 }
  0x86   : > { %v628_v17 = vunpack.i.h.bf16 %v626_v11  ;;  %v627_v18 = vunpack.i.l.bf16 %v626_v11 }
  0x88   : > { %v443_v23 = vmax.f32 %v247_v19, %v627_v18 }
  0x89   : > { %v611_v60 = vpop.permute.xlu1 %610  ;;  %v601_v0 = vpop.permute.xlu0 %600 }
  0x8a   : > { %v613_v61 = vunpack.i.h.bf16 %v611_v60  ;;  %v612_v62 = vunpack.i.l.bf16 %v611_v60  ;;  %v603_v6 = vunpack.i.h.bf16 %v601_v0  ;;  %v602_v7 = vunpack.i.l.bf16 %v601_v0 }
  0x8b   : > { %v471_v31 = vpack.c.bf16 %v443_v23, %v443_v23 }
  0x8c   : > { %v438_v45 = vmax.f32 %v718_v22, %v613_v61  ;;  %v437_v47 = vmax.f32 %v713_v15, %v612_v62  ;;  %v434_v9 = vmax.f32 %v725_v30, %v603_v6  ;;  %v433_v10 = vmax.f32 %v723_v29, %v602_v7 }
  0x8d   : > { %v444_v15 = vmax.f32 %v248_v20, %v628_v17  ;;  %501 = vst.msk [vmem:[%s858_s17 + $0x28] sm:$0xf] %vm489_vm1, %v471_v31  ;;  %v641_v40 = vpop.permute.xlu2 %640 }
  0x8e   : > { %v466_v13 = vpack.c.bf16 %v438_v45, %v438_v45  ;;  %v465_v14 = vpack.c.bf16 %v437_v47, %v437_v47  ;;  %v462_v21 = vpack.c.bf16 %v434_v9, %v434_v9  ;;  %v461_v22 = vpack.c.bf16 %v433_v10, %v433_v10 }
  0x8f   : > { %v472_v26 = vpack.c.bf16 %v444_v15, %v444_v15  ;;  %v643_v49 = vunpack.i.h.bf16 %v641_v40  ;;  %v642_v50 = vunpack.i.l.bf16 %v641_v40 }
  0x90   : > { %496 = vst.msk [vmem:[%s858_s17 + $0x14] sm:$0x7] %vm491_vm0, %v466_v13 }
  0x91   : > { %495 = vst.msk [vmem:[%s858_s17 + $0x10] sm:$0xf] %vm489_vm1, %v465_v14  ;;  %v616_v30 = vpop.permute.xlu1 %615  ;;  %v606_v25 = vpop.permute.xlu0 %605  ;;  %v449_v52 = vmax.f32 %v829_v35, %v642_v50 }
  0x92   : > { %492 = vst.msk [vmem:[%s858_s17 + $0x4] sm:$0x7] %vm491_vm0, %v462_v21  ;;  %v618_v29 = vunpack.i.h.bf16 %v616_v30  ;;  %v617_v24 = vunpack.i.l.bf16 %v616_v30  ;;  %v608_v32 = vunpack.i.h.bf16 %v606_v25  ;;  %v607_v37 = vunpack.i.l.bf16 %v606_v25 }
  0x93   : > { %490 = vst.msk [vmem:[%s858_s17] sm:$0xf] %vm489_vm1, %v461_v22  ;;  %v477_v58 = vpack.c.bf16 %v449_v52, %v449_v52 }
  0x94   : > { %v440_v38 = vmax.f32 %v730_v34, %v618_v29  ;;  %v439_v19 = vmax.f32 %v728_v33, %v617_v24  ;;  %502 = vst.msk [vmem:[%s858_s17 + $0x2c] sm:$0x7] %vm491_vm0, %v472_v26  ;;  %v436_v20 = vmax.f32 %v741_v46, %v608_v32  ;;  %v435_v39 = vmax.f32 %v735_v41, %v607_v37 }
  0x95   : > { %v450_v33 = vmax.f32 %v831_v36, %v643_v49  ;;  %507 = vst.msk [vmem:[%s858_s17 + $0x40] sm:$0xf] %vm489_vm1, %v477_v58  ;;  %v656_v1 = vpop.permute.xlu2 %655 }
  0x96   : > { %v468_v42 = vpack.c.bf16 %v440_v38, %v440_v38  ;;  %v467_v43 = vpack.c.bf16 %v439_v19, %v439_v19  ;;  %v464_v51 = vpack.c.bf16 %v436_v20, %v436_v20  ;;  %v463_v34 = vpack.c.bf16 %v435_v39, %v435_v39 }
  0x97   : > { %v478_v56 = vpack.c.bf16 %v450_v33, %v450_v33  ;;  %v658_v7 = vunpack.i.h.bf16 %v656_v1  ;;  %v657_v45 = vunpack.i.l.bf16 %v656_v1 }
  0x98   : > { %498 = vst.msk [vmem:[%s858_s17 + $0x1c] sm:$0x7] %vm491_vm0, %v468_v42 }
  0x99   : > { %497 = vst.msk [vmem:[%s858_s17 + $0x18] sm:$0xf] %vm489_vm1, %v467_v43  ;;  %v636_v41 = vpop.permute.xlu1 %635  ;;  %v631_v55 = vpop.permute.xlu0 %630  ;;  %v455_v9 = vmax.f32 %v838_v44, %v657_v45 }
  0x9a   : > { %494 = vst.msk [vmem:[%s858_s17 + $0xc] sm:$0x7] %vm491_vm0, %v464_v51  ;;  %v638_v46 = vunpack.i.h.bf16 %v636_v41  ;;  %v637_v53 = vunpack.i.l.bf16 %v636_v41  ;;  %v633_v60 = vunpack.i.h.bf16 %v631_v55  ;;  %v632_v61 = vunpack.i.l.bf16 %v631_v55 }
  0x9b   : > { %493 = vst.msk [vmem:[%s858_s17 + $0x8] sm:$0xf] %vm489_vm1, %v463_v34  ;;  %v483_v14 = vpack.c.bf16 %v455_v9, %v455_v9 }
  0x9c   : > { %v448_v36 = vmax.f32 %v758_v63, %v638_v46  ;;  %v447_v35 = vmax.f32 %v755_v59, %v637_v53  ;;  %508 = vst.msk [vmem:[%s858_s17 + $0x44] sm:$0x7] %vm491_vm0, %v478_v56  ;;  %v446_v62 = vmax.f32 %v766_v8, %v633_v60  ;;  %v445_v0 = vmax.f32 %v761_v3, %v632_v61 }
  0x9d   : > { %v456_v59 = vmax.f32 %v840_v48, %v658_v7  ;;  %513 = vst.msk [vmem:[%s858_s17 + $0x58] sm:$0xf] %vm489_vm1, %v483_v14 }
  0x9e   : > { %v476_v5 = vpack.c.bf16 %v448_v36, %v448_v36  ;;  %v475_v6 = vpack.c.bf16 %v447_v35, %v447_v35  ;;  %v474_v47 = vpack.c.bf16 %v446_v62, %v446_v62  ;;  %v473_v63 = vpack.c.bf16 %v445_v0, %v445_v0 }
  0x9f   : > { %v484_v13 = vpack.c.bf16 %v456_v59, %v456_v59 }
  0xa0   : > { %506 = vst.msk [vmem:[%s858_s17 + $0x3c] sm:$0x7] %vm491_vm0, %v476_v5 }
  0xa1   : > { %505 = vst.msk [vmem:[%s858_s17 + $0x38] sm:$0xf] %vm489_vm1, %v475_v6  ;;  %v651_v3 = vpop.permute.xlu1 %650  ;;  %v646_v11 = vpop.permute.xlu0 %645 }
  0xa2   : > { %504 = vst.msk [vmem:[%s858_s17 + $0x34] sm:$0x7] %vm491_vm0, %v474_v47  ;;  %v653_v8 = vunpack.i.h.bf16 %v651_v3  ;;  %v652_v10 = vunpack.i.l.bf16 %v651_v3  ;;  %v648_v17 = vunpack.i.h.bf16 %v646_v11  ;;  %v647_v48 = vunpack.i.l.bf16 %v646_v11 }
  0xa3   : > { %503 = vst.msk [vmem:[%s858_s17 + $0x30] sm:$0xf] %vm489_vm1, %v473_v63 }
  0xa4   : > { %v454_v44 = vmax.f32 %v773_v16, %v653_v8  ;;  %v453_v18 = vmax.f32 %v770_v12, %v652_v10  ;;  %514 = vst.msk [vmem:[%s858_s17 + $0x5c] sm:$0x7] %vm491_vm0, %v484_v13  ;;  %v452_v21 = vmax.f32 %v784_v28, %v648_v17  ;;  %v451_v22 = vmax.f32 %v782_v27, %v647_v48 }
  0xa6   : > { %v482_v15 = vpack.c.bf16 %v454_v44, %v454_v44  ;;  %v481_v23 = vpack.c.bf16 %v453_v18, %v453_v18  ;;  %v480_v30 = vpack.c.bf16 %v452_v21, %v452_v21  ;;  %v479_v29 = vpack.c.bf16 %v451_v22, %v451_v22 }
  0xa8   : > { %512 = vst.msk [vmem:[%s858_s17 + $0x54] sm:$0x7] %vm491_vm0, %v482_v15 }
  0xa9   : > { %511 = vst.msk [vmem:[%s858_s17 + $0x50] sm:$0xf] %vm489_vm1, %v481_v23  ;;  %v666_v16 = vpop.permute.xlu1 %665  ;;  %v661_v27 = vpop.permute.xlu0 %660 }
  0xaa   : > { %510 = vst.msk [vmem:[%s858_s17 + $0x4c] sm:$0x7] %vm491_vm0, %v480_v30  ;;  %v668_v12 = vunpack.i.h.bf16 %v666_v16  ;;  %v667_v28 = vunpack.i.l.bf16 %v666_v16  ;;  %v663_v24 = vunpack.i.h.bf16 %v661_v27  ;;  %v662_v25 = vunpack.i.l.bf16 %v661_v27 }
  0xab   : > { %509 = vst.msk [vmem:[%s858_s17 + $0x48] sm:$0xf] %vm489_vm1, %v479_v29 }
  0xac   : > { %v460_v26 = vmax.f32 %v804_v57, %v668_v12  ;;  %v459_v31 = vmax.f32 %v801_v54, %v667_v28  ;;  %v458_v32 = vmax.f32 %v813_v4, %v663_v24  ;;  %v457_v37 = vmax.f32 %v811_v2, %v662_v25 }
  0xae   : > { %v488_v38 = vpack.c.bf16 %v460_v26, %v460_v26  ;;  %v487_v19 = vpack.c.bf16 %v459_v31, %v459_v31  ;;  %v486_v20 = vpack.c.bf16 %v458_v32, %v458_v32  ;;  %v485_v39 = vpack.c.bf16 %v457_v37, %v457_v37 }
  0xb0   : > { %518 = vst.msk [vmem:[%s858_s17 + $0x6c] sm:$0x7] %vm491_vm0, %v488_v38 }
  0xb1   : > { %517 = vst.msk [vmem:[%s858_s17 + $0x68] sm:$0xf] %vm489_vm1, %v487_v19 }
  0xb2   : > { %516 = vst.msk [vmem:[%s858_s17 + $0x64] sm:$0x7] %vm491_vm0, %v486_v20 }
  0xb3   : > { %515 = vst.msk [vmem:[%s858_s17 + $0x60] sm:$0xf] %vm489_vm1, %v485_v39 }
  0xb4 PF: > { %s11_s6 = sadd.s32 1, %s675_s6  }
  0xb5   : > { %p8_p4 = scmp.ge.s32.totalorder %s11_s6, 4  }
  0xb7   :  { %10 = sbr.rel (!%p8_p4) target bundleno = 1 (0x1), region = 54 }

// kernel: forward.8
= control target key start
LH: loop header
LB: loop body
LE: loop exit
PB: predicated region body
PF: predicated region fallthrough
CT: control target
= control target key end

     0   :  { %s311_s6 = smov 0   ;;  %s358_s0 = inlined_call_operand.vmem [shape: bf16[10,2,5,128], index: 0, kind: input, shape index: {}]   ;;  %s359_s1 = inlined_call_operand.vmem [shape: bf16[10,5,64], index: 1, kind: output, shape index: {}]  }
   0x1 LB: > { %s262_s7 = sadd.s32 4294967295, %s298_s6   ;;  %p266_p0 = scmp.ge.s32.totalorder %s298_s6, 1  ;;  %s298_s6 = sphi %s311_s6, %s11_s6  }
   0x2   : > { %p89_p1 = scmp.lt.s32.totalorder %s298_s6, 3 }
   0x4   : > { %p90_p2 = pnand %p266_p0, %p89_p1 }
   0x5   : > { %s110_s8 = smul.u32 (!%p90_p2), 5, %s262_s7  ;;  %s300_s13 = smov (!%p90_p2), 64  }
   0x6   : > { %93 = sbr.rel (%p90_p2) target bundleno = 154 (0x9a), region = 24 }
   0x7   : > { %p111_p3 = scmp.lt.s32.totalorder (!%p90_p2), %s110_s8, 9 }
   0xb   : > { %s363_s8 = smov (!%p111_p3, %s110_s8), 9  ;;  %vm188_vm0 = vcmask 518144   ;;  %vm189_vm1 = vsmask.f32 2304 }
   0xc   : > { %s272_s9 = sshll.u32 %s363_s8, 3  ;;  %s269_s14 = sshll.u32 %s363_s8, 2  ;;  %vm332_vm2 = vmand %vm188_vm0, %vm189_vm1 }
   0xd   : > { %s115_s12 = scalar_lea.vmem %s358_s0, %s272_s9  ;;  %s329_s17 = scalar_lea.vmem %s359_s1, %s269_s14 }
   0xe   : > { %v123_v0 = vld [vmem:[%s115_s12] sm:$0x7]  ;;  %v124_v1 = vld [vmem:[%s115_s12 + $0x4] sm:$0x7]  ;;  %v125_v2 = vld [vmem:[%s115_s12 + $0x8] sm:$0x7] }
   0xf   : > { %v126_v3 = vld [vmem:[%s115_s12 + $0xc] sm:$0x7]  ;;  %v133_v4 = vunpack.c.l.bf16 %v123_v0  ;;  %v134_v5 = vunpack.c.l.bf16 %v125_v2  ;;  %v138_v6 = vunpack.c.l.bf16 %v124_v1  ;;  %v127_v7 = vld [vmem:[%s115_s12 + $0x10] sm:$0x7]  ;;  %v128_v8 = vld [vmem:[%s115_s12 + $0x14] sm:$0x7] }
  0x10   : > { %v139_v9 = vunpack.c.l.bf16 %v126_v3  ;;  %v129_v10 = vld [vmem:[%s115_s12 + $0x18] sm:$0x7]  ;;  %v130_v11 = vld [vmem:[%s115_s12 + $0x1c] sm:$0x7]  ;;  %v135_v12 = vunpack.c.l.bf16 %v127_v7  ;;  %v140_v13 = vunpack.c.l.bf16 %v128_v8  ;;  %v131_v14 = vld [vmem:[%s115_s12 + $0x20] sm:$0x7] }
  0x11   : > { %v143_v15 = vmax.f32 %v133_v4, %v138_v6  ;;  %v136_v16 = vunpack.c.l.bf16 %v129_v10  ;;  %v141_v17 = vunpack.c.l.bf16 %v130_v11  ;;  %v132_v18 = vld [vmem:[%s115_s12 + $0x24] sm:$0x7]  ;;  %v137_v19 = vunpack.c.l.bf16 %v131_v14  ;;  %v203_v34 = vld [vmem:[%s329_s17 + $0x10] sm:$0x7]  ;;  %v191_v39 = vld [vmem:[%s329_s17] sm:$0x7] }
  0x12   : > { %v144_v20 = vmax.f32 %v134_v5, %v139_v9  ;;  %v145_v21 = vmax.f32 %v135_v12, %v140_v13  ;;  %v142_v22 = vunpack.c.l.bf16 %v132_v18  ;;  %v194_v40 = vld [vmem:[%s329_s17 + $0x4] sm:$0x7]  ;;  %v197_v51 = vld [vmem:[%s329_s17 + $0x8] sm:$0x7]  ;;  %v200_v52 = vld [vmem:[%s329_s17 + $0xc] sm:$0x7] }
  0x13   : > { %v146_v23 = vmax.f32 %v136_v16, %v141_v17 }
  0x14   : > { %v147_v24 = vmax.f32 %v137_v19, %v142_v22  ;;  %v282_v26 = vpack.i.bf16 %v144_v20, %v143_v15 }
  0x15   : > { %v287_v28 = vpack.i.bf16 %v146_v23, %v145_v21 }
  0x16   : > { %v152_v25 = vpack.c.bf16 %v147_v24, %v147_v24  ;;  %283 = vrot.lane.b32.xlu0 %v282_v26, %s300_s13 }
  0x18   : > { %v157_v27 = vunpack.c.l.bf16 %v152_v25 }
  0x1a   : > { %171 = vrot.lane.b32.xlu1 %v157_v27, %s300_s13 }
  0x1e   : > { %288 = vrot.lane.b32.xlu0 %v287_v28, %s300_s13 }
  0x88   : > { %v284_v29 = vpop.permute.xlu0 %283 }
  0x89   : > { %v286_v31 = vunpack.i.h.bf16 %v284_v29  ;;  %v285_v32 = vunpack.i.l.bf16 %v284_v29 }
  0x8b   : > { %v179_v35 = vmax.f32 %v144_v20, %v286_v31  ;;  %v178_v36 = vmax.f32 %v143_v15, %v285_v32 }
  0x8c   : > { %v172_v30 = vpop.permute.xlu1 %171 }
  0x8d   : > { %v182_v33 = vmax.f32 %v157_v27, %v172_v30  ;;  %v184_v41 = vpack.c.bf16 %v179_v35, %v179_v35  ;;  %v183_v42 = vpack.c.bf16 %v178_v36, %v178_v36 }
  0x8f   : > { %v187_v37 = vpack.c.bf16 %v182_v33, %v182_v33  ;;  %v195_v44 = vsel %vm332_vm2, %v184_v41, %v194_v40  ;;  %v192_v45 = vsel %vm332_vm2, %v183_v42, %v191_v39 }
  0x90   : > { %196 = vst [vmem:[%s329_s17 + $0x4] sm:$0x7] %v195_v44  ;;  %v289_v46 = vpop.permute.xlu0 %288 }
  0x91   : > { %v204_v43 = vsel %vm332_vm2, %v187_v37, %v203_v34  ;;  %193 = vst [vmem:[%s329_s17] sm:$0x7] %v192_v45  ;;  %v291_v47 = vunpack.i.h.bf16 %v289_v46  ;;  %v290_v48 = vunpack.i.l.bf16 %v289_v46 }
  0x92   : > { %205 = vst [vmem:[%s329_s17 + $0x10] sm:$0x7] %v204_v43 }
  0x93   : > { %v181_v49 = vmax.f32 %v146_v23, %v291_v47  ;;  %v180_v50 = vmax.f32 %v145_v21, %v290_v48 }
  0x95   : > { %v186_v53 = vpack.c.bf16 %v181_v49, %v181_v49  ;;  %v185_v54 = vpack.c.bf16 %v180_v50, %v180_v50 }
  0x97   : > { %v201_v55 = vsel %vm332_vm2, %v186_v53, %v200_v52  ;;  %v198_v56 = vsel %vm332_vm2, %v185_v54, %v197_v51 }
  0x98   : > { %202 = vst [vmem:[%s329_s17 + $0xc] sm:$0x7] %v201_v55 }
  0x99   : > { %199 = vst [vmem:[%s329_s17 + $0x8] sm:$0x7] %v198_v56 }
  0x9a PF: > { %s11_s6 = sadd.s32 1, %s298_s6  }
  0x9b   : > { %p8_p4 = scmp.ge.s32.totalorder %s11_s6, 4  }
  0x9d   :  { %10 = sbr.rel (!%p8_p4) target bundleno = 1 (0x1), region = 54 }

// kernel: forward.7
= control target key start
LH: loop header
LB: loop body
LE: loop exit
PB: predicated region body
PF: predicated region fallthrough
CT: control target
= control target key end

     0   :  { %vm1819_vm0 = vcmask 523264   ;;  %vm2858_vm1 = vcmask 519168   ;;  %s5866_s1 = inlined_call_operand.vmem [shape: bf16[1600,64], index: 1, kind: input, shape index: {}]   ;;  %s5867_s2 = inlined_call_operand.vmem [shape: f32[1,64], index: 2, kind: input, shape index: {}]   ;;  %s5868_s0 = inlined_call_operand.vmem [shape: bf16[200,1600], index: 0, kind: input, shape index: {}]   ;;  %s5869_s3 = inlined_call_operand.vmem [shape: bf16[200,64], index: 3, kind: output, shape index: {}]  }
   0x1   :  { %v4088_v0 = vld [vmem:[%s5866_s1 + $0x38] sm:$0xff]  ;;  %v4087_v1 = vld [vmem:[%s5866_s1 + $0x30] sm:$0xff]  ;;  %v4086_v2 = vld [vmem:[%s5866_s1 + $0x28] sm:$0xff] }
   0x2   :  { %1859 = vmatpush.bf16.msra.mxu0 %v4088_v0  ;;  %4181 = vmatpush.bf16.msra.mxu1 %v4088_v0  ;;  %v4085_v3 = vld [vmem:[%s5866_s1 + $0x20] sm:$0xff]  ;;  %v4084_v4 = vld [vmem:[%s5866_s1 + $0x18] sm:$0xff]  ;;  %v4083_v5 = vld [vmem:[%s5866_s1 + $0x10] sm:$0xff] }
   0x3   :  { %4183 = vmatpush.bf16.msra.mxu3 %v4088_v0  ;;  %4182 = vmatpush.bf16.msra.mxu2 %v4088_v0  ;;  %v4082_v6 = vld [vmem:[%s5866_s1 + $0x8] sm:$0xff]  ;;  %v4081_v7 = vld [vmem:[%s5866_s1] sm:$0xff]  ;;  %v3931_v9 = vld [vmem:[%s5868_s0 + $0x30] sm:$0xf0] }
   0x4   :  { %v2890_v8 = vld [vmem:[%s5868_s0] sm:$0xf]  ;;  %v3983_v11 = vld [vmem:[%s5868_s0 + $0x1d0] sm:$0xf0]  ;;  %v4096_v12 = vld [vmem:[%s5866_s1 + $0x78] sm:$0xff] }
   0x5   :  { %v3098_v10 = vld [vmem:[%s5868_s0 + $0x1a0] sm:$0xf]  ;;  %v3410_v13 = vld [vmem:[%s5868_s0 + $0x410] sm:$0xf]  ;;  %v4061_v14 = vld [vmem:[%s5868_s0 + $0x440] sm:$0xf0]  ;;  %v2891_v17 = vor.u32 %v3931_v9, %v2890_v8 }
   0x6   :  { %1860 = vmatpush.bf16.msra.mxu0 %v4087_v1  ;;  %4184 = vmatpush.bf16.msra.mxu1 %v4087_v1  ;;  %v4120_v15 = vld [vmem:[%s5866_s1 + $0x138] sm:$0xff]  ;;  %v3099_v18 = vor.u32 %v3983_v11, %v3098_v10  ;;  %v3411_v19 = vor.u32 %v4061_v14, %v3410_v13  ;;  %v3306_v20 = vld [vmem:[%s5868_s0 + $0x340] sm:$0xf]  ;;  %v4035_v21 = vld [vmem:[%s5868_s0 + $0x370] sm:$0xf0] }
   0x7   :  { %4186 = vmatpush.bf16.msra.mxu3 %v4087_v1  ;;  %4185 = vmatpush.bf16.msra.mxu2 %v4087_v1  ;;  %v4112_v16 = vld [vmem:[%s5866_s1 + $0xf8] sm:$0xff]  ;;  %v4095_v22 = vld [vmem:[%s5866_s1 + $0x70] sm:$0xff]  ;;  %v3307_v26 = vor.u32 %v4035_v21, %v3306_v20  ;;  %v4094_v27 = vld [vmem:[%s5866_s1 + $0x68] sm:$0xff] }
   0x8   :  { %v4104_v23 = vld [vmem:[%s5866_s1 + $0xb8] sm:$0xff]  ;;  %v4119_v24 = vld [vmem:[%s5866_s1 + $0x130] sm:$0xff]  ;;  %v4118_v29 = vld [vmem:[%s5866_s1 + $0x128] sm:$0xff] }
   0x9   :  { %v4111_v25 = vld [vmem:[%s5866_s1 + $0xf0] sm:$0xff]  ;;  %v4110_v30 = vld [vmem:[%s5866_s1 + $0xe8] sm:$0xff]  ;;  %v4093_v31 = vld [vmem:[%s5866_s1 + $0x60] sm:$0xff] }
   0xa   :  { %1861 = vmatpush.bf16.msra.mxu0 %v4086_v2  ;;  %4187 = vmatpush.bf16.msra.mxu1 %v4086_v2  ;;  %v4103_v28 = vld [vmem:[%s5866_s1 + $0xb0] sm:$0xff]  ;;  %v4102_v32 = vld [vmem:[%s5866_s1 + $0xa8] sm:$0xff]  ;;  %v4117_v33 = vld [vmem:[%s5866_s1 + $0x120] sm:$0xff] }
   0xb   :  { %4189 = vmatpush.bf16.msra.mxu3 %v4086_v2  ;;  %4188 = vmatpush.bf16.msra.mxu2 %v4086_v2  ;;  %v4109_v34 = vld [vmem:[%s5866_s1 + $0xe0] sm:$0xff]  ;;  %v2942_v35 = vld [vmem:[%s5868_s0 + $0x68] sm:$0xf]  ;;  %v3944_v36 = vld [vmem:[%s5868_s0 + $0x98] sm:$0xf0] }
   0xc   :  { %v3150_v37 = vld [vmem:[%s5868_s0 + $0x208] sm:$0xf]  ;;  %v3996_v38 = vld [vmem:[%s5868_s0 + $0x238] sm:$0xf0]  ;;  %v3462_v39 = vld [vmem:[%s5868_s0 + $0x478] sm:$0xf]  ;;  %v2943_v45 = vor.u32 %v3944_v36, %v2942_v35 }
   0xd   :  { %v4074_v40 = vld [vmem:[%s5868_s0 + $0x4a8] sm:$0xf0]  ;;  %v4092_v41 = vld [vmem:[%s5866_s1 + $0x58] sm:$0xff]  ;;  %v4101_v42 = vld [vmem:[%s5866_s1 + $0xa0] sm:$0xff]  ;;  %v3151_v46 = vor.u32 %v3996_v38, %v3150_v37 }
   0xe   :  { %1862 = vmatpush.bf16.msra.mxu0 %v4085_v3  ;;  %4190 = vmatpush.bf16.msra.mxu1 %v4085_v3  ;;  %v4116_v43 = vld [vmem:[%s5866_s1 + $0x118] sm:$0xff]  ;;  %v3463_v47 = vor.u32 %v4074_v40, %v3462_v39  ;;  %v3358_v48 = vld [vmem:[%s5868_s0 + $0x3a8] sm:$0xf]  ;;  %v4091_v51 = vld [vmem:[%s5866_s1 + $0x50] sm:$0xff] }
   0xf   :  { %4192 = vmatpush.bf16.msra.mxu3 %v4085_v3  ;;  %4191 = vmatpush.bf16.msra.mxu2 %v4085_v3  ;;  %v4108_v44 = vld [vmem:[%s5866_s1 + $0xd8] sm:$0xff]  ;;  %v4107_v52 = vld [vmem:[%s5866_s1 + $0xd0] sm:$0xff]  ;;  %v4090_v56 = vld [vmem:[%s5866_s1 + $0x48] sm:$0xff] }
  0x10   :  { %v4048_v49 = vld [vmem:[%s5868_s0 + $0x3d8] sm:$0xf0]  ;;  %v4115_v53 = vld [vmem:[%s5866_s1 + $0x110] sm:$0xff]  ;;  %v4106_v57 = vld [vmem:[%s5866_s1 + $0xc8] sm:$0xff] }
  0x11   :  { %v4100_v50 = vld [vmem:[%s5866_s1 + $0x98] sm:$0xff]  ;;  %v3359_v54 = vor.u32 %v4048_v49, %v3358_v48  ;;  %v4099_v55 = vld [vmem:[%s5866_s1 + $0x90] sm:$0xff]  ;;  %v4114_v58 = vld [vmem:[%s5866_s1 + $0x108] sm:$0xff] }
  0x12   :  { %1863 = vmatpush.bf16.msra.mxu0 %v4084_v4  ;;  %4193 = vmatpush.bf16.msra.mxu1 %v4084_v4  ;;  %v4382_v59 = vld [vmem:[%s5868_s0 + $0x4e0] sm:$0xff]  ;;  %v4098_v60 = vld [vmem:[%s5866_s1 + $0x88] sm:$0xff]  ;;  %v2994_v0 = vld [vmem:[%s5868_s0 + $0xd0] sm:$0xf] }
  0x13   :  { %4195 = vmatpush.bf16.msra.mxu3 %v4084_v4  ;;  %4194 = vmatpush.bf16.msra.mxu2 %v4084_v4  ;;  %v4089_v61 = vld [vmem:[%s5866_s1 + $0x40] sm:$0xff]  ;;  %v4144_v1 = vld [vmem:[%s5866_s1 + $0x1f8] sm:$0xff]  ;;  %v3202_v3 = vld [vmem:[%s5868_s0 + $0x270] sm:$0xf] }
  0x14   :  { %v4105_v62 = vld [vmem:[%s5866_s1 + $0xc0] sm:$0xff]  ;;  %v2898_v11 = vld [vmem:[%s5868_s0 + $0x8] sm:$0xf]  ;;  %v4128_v14 = vld [vmem:[%s5866_s1 + $0x178] sm:$0xff] }
  0x15   :  { %v4113_v63 = vld [vmem:[%s5866_s1 + $0x100] sm:$0xff]  ;;  %v3926_v20 = vld [vmem:[%s5868_s0 + $0xc] sm:$0xf]  ;;  %v3939_v36 = vld [vmem:[%s5868_s0 + $0x74] sm:$0xf] }
  0x16   :  { %1864 = vmatpush.bf16.msra.mxu0 %v4083_v5  ;;  %4196 = vmatpush.bf16.msra.mxu1 %v4083_v5  ;;  %v3957_v2 = vld [vmem:[%s5868_s0 + $0x100] sm:$0xf0]  ;;  %v2900_v21 = vld [vmem:[%s5868_s0 + $0x3c] sm:$0xf0]  ;;  %v2952_v37 = vld [vmem:[%s5868_s0 + $0xa4] sm:$0xf0] }
  0x17   :  { %4198 = vmatpush.bf16.msra.mxu3 %v4083_v5  ;;  %4197 = vmatpush.bf16.msra.mxu2 %v4083_v5  ;;  %v4009_v4 = vld [vmem:[%s5868_s0 + $0x2a0] sm:$0xf0]  ;;  %v881_v5 = vunpack.c.l.b16 %v4382_v59  ;;  %v2995_v8 = vor.u32 %v3957_v2, %v2994_v0  ;;  %v2955_v40 = vor.u32 %v3939_v36, %v2952_v37  ;;  %v3952_v48 = vld [vmem:[%s5868_s0 + $0xdc] sm:$0xf]  ;;  %v3004_v49 = vld [vmem:[%s5868_s0 + $0x10c] sm:$0xf0] }
  0x18   :  { %v3203_v9 = vor.u32 %v4009_v4, %v3202_v3  ;;  %v3933_v35 = vld [vmem:[%s5868_s0 + $0x40] sm:$0xf0]  ;;  %v3959_v0 = vld [vmem:[%s5868_s0 + $0x110] sm:$0xf0]  ;;  %v3056_v2 = vld [vmem:[%s5868_s0 + $0x174] sm:$0xf0] }
  0x19   :  { %v1050_v10 = vpack.c.b16 %v881_v5, %v881_v5  ;;  %v3210_v37 = vld [vmem:[%s5868_s0 + $0x278] sm:$0xf] }
  0x1a   :  { %1865 = vmatpush.bf16.msra.mxu0 %v4082_v6  ;;  %4199 = vmatpush.bf16.msra.mxu1 %v4082_v6 }
  0x1b   :  { %4201 = vmatpush.bf16.msra.mxu3 %v4082_v6  ;;  %4200 = vmatpush.bf16.msra.mxu2 %v4082_v6  ;;  %v4097_v6 = vld [vmem:[%s5866_s1 + $0x80] sm:$0xff] }
  0x1e   :  { %1866 = vmatpush.bf16.msra.mxu0 %v4081_v7  ;;  %4202 = vmatpush.bf16.msra.mxu1 %v4081_v7 }
  0x1f   :  { %4204 = vmatpush.bf16.msra.mxu3 %v4081_v7  ;;  %4203 = vmatpush.bf16.msra.mxu2 %v4081_v7  ;;  %v4136_v7 = vld [vmem:[%s5866_s1 + $0x1b8] sm:$0xff] }
  0x21   :  { %1867 = vmatmul.bf16.vlgmr.msra.gmra.mxu0 %v2891_v17  ;;  %1887 = vmatmul.bf16.vlgmr.msra.gmra.mxu1 %v3099_v18  ;;  %v3970_v17 = vld [vmem:[%s5868_s0 + $0x168] sm:$0xf0]  ;;  %v3254_v18 = vld [vmem:[%s5868_s0 + $0x2d8] sm:$0xf] }
  0x22   :  { %1932 = vmatpush.bf16.msrb.mxu1 %v4096_v12  ;;  %2151 = vmatpush.bf16.msrb.mxu0 %v4120_v15  ;;  %v3932_v12 = vld [vmem:[%s5868_s0 + $0x38] sm:$0xf0] }
  0x23   :  { %2078 = vmatpush.bf16.msrb.mxu3 %v4112_v16  ;;  %2005 = vmatpush.bf16.msrb.mxu2 %v4104_v23  ;;  %v2899_v13 = vor.u32 %v3932_v12, %v2898_v11  ;;  %v4152_v15 = vld [vmem:[%s5866_s1 + $0x238] sm:$0xff]  ;;  %v3048_v12 = vld [vmem:[%s5868_s0 + $0x16c] sm:$0xf0] }
  0x24   :  { %1917 = vmatmul.bf16.vlgmr.msra.gmra.mxu3 %v3411_v19  ;;  %1907 = vmatmul.bf16.vlgmr.msra.gmra.mxu2 %v3307_v26  ;;  %v3046_v16 = vld [vmem:[%s5868_s0 + $0x138] sm:$0xf]  ;;  %v4022_v19 = vld [vmem:[%s5868_s0 + $0x308] sm:$0xf0]  ;;  %v3945_v26 = vld [vmem:[%s5868_s0 + $0xa0] sm:$0xf0] }
  0x25   :  { %v3255_v23 = vor.u32 %v4022_v19, %v3254_v18  ;;  %v3964_v11 = vld [vmem:[%s5868_s0 + $0x13c] sm:$0xf] }
  0x26   :  { %1933 = vmatpush.bf16.msrb.mxu1 %v4095_v22  ;;  %2152 = vmatpush.bf16.msrb.mxu0 %v4119_v24  ;;  %v3047_v22 = vor.u32 %v3970_v17, %v3046_v16  ;;  %v2903_v24 = vor.u32 %v3926_v20, %v2900_v21  ;;  %v3108_v16 = vld [vmem:[%s5868_s0 + $0x1dc] sm:$0xf0]  ;;  %v3051_v17 = vor.u32 %v3964_v11, %v3048_v12  ;;  %v3158_v20 = vld [vmem:[%s5868_s0 + $0x210] sm:$0xf]  ;;  %v3997_v21 = vld [vmem:[%s5868_s0 + $0x240] sm:$0xf0] }
  0x27   :  { %2079 = vmatpush.bf16.msrb.mxu3 %v4111_v25  ;;  %2006 = vmatpush.bf16.msrb.mxu2 %v4103_v28  ;;  %v2950_v25 = vld [vmem:[%s5868_s0 + $0x70] sm:$0xf] }
  0x28   :  { %v4135_v28 = vld [vmem:[%s5866_s1 + $0x1b0] sm:$0xff] }
  0x2a   :  { %1934 = vmatpush.bf16.msrb.mxu1 %v4094_v27  ;;  %2153 = vmatpush.bf16.msrb.mxu0 %v4118_v29  ;;  %v2951_v27 = vor.u32 %v3945_v26, %v2950_v25  ;;  %v4143_v29 = vld [vmem:[%s5866_s1 + $0x1f0] sm:$0xff]  ;;  %v3977_v25 = vld [vmem:[%s5868_s0 + $0x1a4] sm:$0xf]  ;;  %v3100_v26 = vld [vmem:[%s5868_s0 + $0x1d4] sm:$0xf0] }
  0x2b   :  { %2080 = vmatpush.bf16.msrb.mxu3 %v4110_v30  ;;  %2007 = vmatpush.bf16.msrb.mxu2 %v4102_v32  ;;  %v4127_v30 = vld [vmem:[%s5866_s1 + $0x170] sm:$0xff]  ;;  %v3925_v32 = vld [vmem:[%s5868_s0 + $0x4] sm:$0xf] }
  0x2e   :  { %1935 = vmatpush.bf16.msrb.mxu1 %v4093_v31  ;;  %2154 = vmatpush.bf16.msrb.mxu0 %v4117_v33  ;;  %v4151_v31 = vld [vmem:[%s5866_s1 + $0x230] sm:$0xff]  ;;  %v2892_v33 = vld [vmem:[%s5868_s0 + $0x34] sm:$0xf0] }
  0x2f   :  { %2081 = vmatpush.bf16.msrb.mxu3 %v4109_v34  ;;  %2008 = vmatpush.bf16.msrb.mxu2 %v4101_v42  ;;  %v2906_v34 = vld [vmem:[%s5868_s0 + $0x10] sm:$0xf]  ;;  %v2895_v38 = vor.u32 %v3925_v32, %v2892_v33  ;;  %v3958_v42 = vld [vmem:[%s5868_s0 + $0x108] sm:$0xf0]  ;;  %v3103_v32 = vor.u32 %v3977_v25, %v3100_v26 }
  0x30   :  { %v2907_v39 = vor.u32 %v3933_v35, %v2906_v34 }
  0x31   :  { %1872 = vmatmul.bf16.gmra.mxu0 %v2943_v45  ;;  %1892 = vmatmul.bf16.gmra.mxu1 %v3151_v46  ;;  %v2944_v45 = vld [vmem:[%s5868_s0 + $0x9c] sm:$0xf0]  ;;  %v2958_v46 = vld [vmem:[%s5868_s0 + $0x78] sm:$0xf] }
  0x32   :  { %1936 = vmatpush.bf16.msrb.mxu1 %v4092_v41  ;;  %2155 = vmatpush.bf16.msrb.mxu0 %v4116_v43  ;;  %v3002_v41 = vld [vmem:[%s5868_s0 + $0xd8] sm:$0xf] }
  0x33   :  { %2082 = vmatpush.bf16.msrb.mxu3 %v4108_v44  ;;  %2009 = vmatpush.bf16.msrb.mxu2 %v4100_v50  ;;  %v3003_v43 = vor.u32 %v3958_v42, %v3002_v41  ;;  %v3938_v44 = vld [vmem:[%s5868_s0 + $0x6c] sm:$0xf]  ;;  %v4132_v41 = vld [vmem:[%s5866_s1 + $0x198] sm:$0xff] }
  0x34   :  { %1922 = vmatmul.bf16.gmra.mxu3 %v3463_v47  ;;  %1912 = vmatmul.bf16.gmra.mxu2 %v3359_v54  ;;  %v3946_v47 = vld [vmem:[%s5868_s0 + $0xa8] sm:$0xf0]  ;;  %v2947_v50 = vor.u32 %v3938_v44, %v2944_v45  ;;  %v3971_v54 = vld [vmem:[%s5868_s0 + $0x170] sm:$0xf0] }
  0x36   :  { %1937 = vmatpush.bf16.msrb.mxu1 %v4091_v51  ;;  %2156 = vmatpush.bf16.msrb.mxu0 %v4115_v53  ;;  %v2959_v51 = vor.u32 %v3946_v47, %v2958_v46  ;;  %v3054_v53 = vld [vmem:[%s5868_s0 + $0x140] sm:$0xf]  ;;  %v4140_v47 = vld [vmem:[%s5866_s1 + $0x1d8] sm:$0xff] }
  0x37   :  { %2083 = vmatpush.bf16.msrb.mxu3 %v4107_v52  ;;  %2010 = vmatpush.bf16.msrb.mxu2 %v4099_v55  ;;  %v3007_v52 = vor.u32 %v3952_v48, %v3004_v49  ;;  %v3055_v55 = vor.u32 %v3971_v54, %v3054_v53  ;;  %v4124_v48 = vld [vmem:[%s5866_s1 + $0x158] sm:$0xff]  ;;  %v3998_v54 = vld [vmem:[%s5868_s0 + $0x248] sm:$0xf0] }
  0x38   :  { %v3166_v53 = vld [vmem:[%s5868_s0 + $0x218] sm:$0xf] }
  0x3a   :  { %1938 = vmatpush.bf16.msrb.mxu1 %v4090_v56  ;;  %2157 = vmatpush.bf16.msrb.mxu0 %v4114_v58  ;;  %v4134_v56 = vld [vmem:[%s5866_s1 + $0x1a8] sm:$0xff] }
  0x3b   :  { %2084 = vmatpush.bf16.msrb.mxu3 %v4106_v57  ;;  %2011 = vmatpush.bf16.msrb.mxu2 %v4098_v60  ;;  %v4142_v57 = vld [vmem:[%s5866_s1 + $0x1e8] sm:$0xff] }
  0x3c   :  { %v4126_v58 = vld [vmem:[%s5866_s1 + $0x168] sm:$0xff] }
  0x3d   :  { %v4150_v60 = vld [vmem:[%s5866_s1 + $0x228] sm:$0xff] }
  0x3e   :  { %1939 = vmatpush.bf16.msrb.mxu1 %v4089_v61  ;;  %2158 = vmatpush.bf16.msrb.mxu0 %v4113_v63  ;;  %v3951_v61 = vld [vmem:[%s5868_s0 + $0xd4] sm:$0xf]  ;;  %v3010_v63 = vld [vmem:[%s5868_s0 + $0xe0] sm:$0xf] }
  0x3f   :  { %2085 = vmatpush.bf16.msrb.mxu3 %v4105_v62  ;;  %2012 = vmatpush.bf16.msrb.mxu2 %v4097_v6  ;;  %v2996_v62 = vld [vmem:[%s5868_s0 + $0x104] sm:$0xf0]  ;;  %v3011_v4 = vor.u32 %v3959_v0, %v3010_v63 }
  0x40   :  { %v2999_v3 = vor.u32 %v3951_v61, %v2996_v62  ;;  %v3106_v6 = vld [vmem:[%s5868_s0 + $0x1a8] sm:$0xf] }
  0x41   :  { %1877 = vmatmul.bf16.gmra.mxu0 %v2995_v8  ;;  %1897 = vmatmul.bf16.gmra.mxu1 %v3203_v9  ;;  %v4133_v9 = vld [vmem:[%s5866_s1 + $0x1a0] sm:$0xff] }
  0x42   :  { %2224 = vmatpush.bf16.msra.mxu1 %v4128_v14  ;;  %2443 = vmatpush.bf16.msra.mxu0 %v4152_v15  ;;  %v3972_v14 = vld [vmem:[%s5868_s0 + $0x178] sm:$0xf0]  ;;  %v3978_v15 = vld [vmem:[%s5868_s0 + $0x1ac] sm:$0xf] }
  0x43   :  { %2370 = vmatpush.bf16.msra.mxu3 %v4144_v1  ;;  %2297 = vmatpush.bf16.msra.mxu2 %v4136_v7  ;;  %v3965_v1 = vld [vmem:[%s5868_s0 + $0x144] sm:$0xf]  ;;  %v3984_v7 = vld [vmem:[%s5868_s0 + $0x1d8] sm:$0xf0]  ;;  %v3111_v19 = vor.u32 %v3978_v15, %v3108_v16  ;;  %v3204_v16 = vld [vmem:[%s5868_s0 + $0x2a4] sm:$0xf0] }
  0x44   :  { %1927 = vmatmul.bf16.gmra.mxu3 %v1050_v10  ;;  %2013 = vmatmul.bf16.vlgmr.msrb.gmra.mxu2 %v2899_v13  ;;  %v3059_v5 = vor.u32 %v3965_v1, %v3056_v2  ;;  %v3107_v8 = vor.u32 %v3984_v7, %v3106_v6  ;;  %v4141_v10 = vld [vmem:[%s5866_s1 + $0x1e0] sm:$0xff]  ;;  %v3062_v13 = vld [vmem:[%s5868_s0 + $0x148] sm:$0xf]  ;;  %v4023_v2 = vld [vmem:[%s5868_s0 + $0x310] sm:$0xf0] }
  0x45   :  { %v3063_v18 = vor.u32 %v3972_v14, %v3062_v13  ;;  %v3262_v1 = vld [vmem:[%s5868_s0 + $0x2e0] sm:$0xf]  ;;  %v4003_v14 = vld [vmem:[%s5868_s0 + $0x274] sm:$0xf] }
  0x46   :  { %2225 = vmatpush.bf16.msra.mxu1 %v4127_v30  ;;  %2444 = vmatpush.bf16.msra.mxu0 %v4151_v31  ;;  %v3991_v30 = vld [vmem:[%s5868_s0 + $0x214] sm:$0xf]  ;;  %v3160_v31 = vld [vmem:[%s5868_s0 + $0x244] sm:$0xf0]  ;;  %v3263_v7 = vor.u32 %v4023_v2, %v3262_v1  ;;  %v3366_v2 = vld [vmem:[%s5868_s0 + $0x3b0] sm:$0xf] }
  0x47   :  { %2298 = vmatpush.bf16.msra.mxu2 %v4135_v28  ;;  %2371 = vmatpush.bf16.msra.mxu3 %v4143_v29  ;;  %v3985_v28 = vld [vmem:[%s5868_s0 + $0x1e0] sm:$0xf0]  ;;  %v4601_v29 = vld [vmem:[%s5867_s2] ss:$0 sm:$0xff]  ;;  %v3163_v36 = vor.u32 %v3991_v30, %v3160_v31  ;;  %v4036_v30 = vld [vmem:[%s5868_s0 + $0x378] sm:$0xf0] }
  0x4a   :  { %2226 = vmatpush.bf16.msra.mxu1 %v4126_v58  ;;  %2445 = vmatpush.bf16.msra.mxu0 %v4150_v60  ;;  %v3167_v58 = vor.u32 %v3998_v54, %v3166_v53  ;;  %v4024_v53 = vld [vmem:[%s5868_s0 + $0x318] sm:$0xf0]  ;;  %v4030_v54 = vld [vmem:[%s5868_s0 + $0x34c] sm:$0xf] }
  0x4b   :  { %2299 = vmatpush.bf16.msra.mxu2 %v4134_v56  ;;  %2372 = vmatpush.bf16.msra.mxu3 %v4142_v57  ;;  %v3212_v56 = vld [vmem:[%s5868_s0 + $0x2ac] sm:$0xf0] }
  0x4f   :  { %2300 = vmatpush.bf16.msra.mxu2 %v4133_v9  ;;  %2373 = vmatpush.bf16.msra.mxu3 %v4141_v10 }
  0x51   :  { %1882 = vmatmul.bf16.gmra.mxu0 %v3047_v22  ;;  %1902 = vmatmul.bf16.gmra.mxu1 %v3255_v23  ;;  %v4125_v22 = vld [vmem:[%s5866_s1 + $0x160] sm:$0xff]  ;;  %v3159_v23 = vor.u32 %v3997_v21, %v3158_v20  ;;  %v3264_v20 = vld [vmem:[%s5868_s0 + $0x314] sm:$0xf0]  ;;  %v3207_v21 = vor.u32 %v4003_v14, %v3204_v16 }
  0x52   :  { %2227 = vmatpush.bf16.msra.mxu1 %v4125_v22 }
  0x53   :  { %2301 = vmatpush.bf16.msra.mxu2 %v4132_v41  ;;  %2374 = vmatpush.bf16.msra.mxu3 %v4140_v47 }
  0x54   :  { %2086 = vmatmul.bf16.vlgmr.msrb.gmra.mxu3 %v2903_v24  ;;  %2018 = vmatmul.bf16.gmra.mxu2 %v2951_v27  ;;  %v4149_v24 = vld [vmem:[%s5866_s1 + $0x220] sm:$0xff]  ;;  %v3114_v27 = vld [vmem:[%s5868_s0 + $0x1b0] sm:$0xf] }
  0x55   :  { %2446 = vmatpush.bf16.msra.mxu0 %v4149_v24  ;;  %v3115_v33 = vor.u32 %v3985_v28, %v3114_v27  ;;  %v3314_v28 = vld [vmem:[%s5868_s0 + $0x348] sm:$0xf] }
  0x56   :  { %2228 = vmatpush.bf16.msra.mxu1 %v4124_v48 }
  0x61   :  { %1940 = vmatmul.bf16.vlgmr.msrb.gmra.mxu1 %v2895_v38  ;;  %2159 = vmatmul.bf16.vlgmr.msrb.gmra.mxu0 %v2907_v39  ;;  %v4010_v38 = vld [vmem:[%s5868_s0 + $0x2a8] sm:$0xf0] }
  0x64   :  { %2091 = vmatmul.bf16.gmra.mxu3 %v2955_v40  ;;  %2023 = vmatmul.bf16.gmra.mxu2 %v3003_v43  ;;  %v3211_v40 = vor.u32 %v4010_v38, %v3210_v37  ;;  %v4131_v37 = vld [vmem:[%s5866_s1 + $0x190] sm:$0xff] }
  0x65   :  { %v4139_v38 = vld [vmem:[%s5866_s1 + $0x1d0] sm:$0xff]  ;;  %2302 = vmatpush.bf16.msra.mxu2 %v4131_v37 }
  0x66   :  { %2375 = vmatpush.bf16.msra.mxu3 %v4139_v38 }
  0x71   :  { %1945 = vmatmul.bf16.gmra.mxu1 %v2947_v50  ;;  %2164 = vmatmul.bf16.gmra.mxu0 %v2959_v51  ;;  %v3990_v50 = vld [vmem:[%s5868_s0 + $0x20c] sm:$0xf] }
  0x74   :  { %2096 = vmatmul.bf16.gmra.mxu3 %v3007_v52  ;;  %2028 = vmatmul.bf16.gmra.mxu2 %v3055_v55  ;;  %v3152_v52 = vld [vmem:[%s5868_s0 + $0x23c] sm:$0xf0]  ;;  %v4004_v55 = vld [vmem:[%s5868_s0 + $0x27c] sm:$0xf] }
  0x75   :  { %v3155_v57 = vor.u32 %v3990_v50, %v3152_v52  ;;  %v3215_v0 = vor.u32 %v4004_v55, %v3212_v56  ;;  %v3256_v50 = vld [vmem:[%s5868_s0 + $0x30c] sm:$0xf0]  ;;  %v3270_v52 = vld [vmem:[%s5868_s0 + $0x2e8] sm:$0xf]  ;;  %v3316_v55 = vld [vmem:[%s5868_s0 + $0x37c] sm:$0xf0] }
  0x76   :  { %v3319_v1 = vor.u32 %v4030_v54, %v3316_v55 }
  0x81   :  { %1950 = vmatmul.bf16.gmra.mxu1 %v2999_v3  ;;  %2169 = vmatmul.bf16.gmra.mxu0 %v3011_v4  ;;  %v4148_v4 = vld [vmem:[%s5866_s1 + $0x218] sm:$0xff] }
  0x82   :  { %2447 = vmatpush.bf16.msra.mxu0 %v4148_v4  ;;  %v4049_v4 = vld [vmem:[%s5868_s0 + $0x3e0] sm:$0xf0] }
  0x84   :  { %2101 = vmatmul.bf16.gmra.mxu3 %v3059_v5  ;;  %2033 = vmatmul.bf16.gmra.mxu2 %v3107_v8 }
  0x91   :  { %1955 = vmatmul.bf16.gmra.mxu1 %v3051_v17  ;;  %2174 = vmatmul.bf16.gmra.mxu0 %v3063_v18  ;;  %v3218_v17 = vld [vmem:[%s5868_s0 + $0x280] sm:$0xf]  ;;  %v4011_v18 = vld [vmem:[%s5868_s0 + $0x2b0] sm:$0xf0] }
  0x92   :  { %v3219_v22 = vor.u32 %v4011_v18, %v3218_v17  ;;  %v4029_v18 = vld [vmem:[%s5868_s0 + $0x344] sm:$0xf] }
  0x94   :  { %2106 = vmatmul.bf16.gmra.mxu3 %v3111_v19  ;;  %2038 = vmatmul.bf16.gmra.mxu2 %v3159_v23  ;;  %v4017_v19 = vld [vmem:[%s5868_s0 + $0x2e4] sm:$0xf] }
  0x95   :  { %v3267_v27 = vor.u32 %v4017_v19, %v3264_v20  ;;  %v3308_v19 = vld [vmem:[%s5868_s0 + $0x374] sm:$0xf0]  ;;  %v3322_v20 = vld [vmem:[%s5868_s0 + $0x350] sm:$0xf] }
  0x9e   :  { %v4609_v34 = vpop.f32.mrf.mxu0  ;;  %v1888_v35 = vpop.f32.mrf.mxu1 }
  0x9f   :  { %v4618_v39 = vadd.f32 %v4601_v29, %v1888_v35  ;;  %v3315_v35 = vor.u32 %v4036_v30, %v3314_v28 }
  0xa1   :  { %1960 = vmatmul.bf16.gmra.mxu1 %v3103_v32  ;;  %2179 = vmatmul.bf16.gmra.mxu0 %v3115_v33 }
  0xa4   :  { %2111 = vmatmul.bf16.gmra.mxu3 %v3163_v36  ;;  %2043 = vmatmul.bf16.gmra.mxu2 %v3211_v40  ;;  %v4123_v40 = vld [vmem:[%s5866_s1 + $0x150] sm:$0xff] }
  0xa5   :  { %2229 = vmatpush.bf16.msra.mxu1 %v4123_v40 }
  0xa6   :  { %v4623_v43 = vpop.f32.mrf.mxu0  ;;  %v1890_v44 = vpop.f32.mrf.mxu1 }
  0xa7   :  { %v1918_v42 = vpop.f32.mrf.mxu3  ;;  %v4629_v46 = vadd.f32 %v4601_v29, %v1890_v44  ;;  %v1908_v49 = vpop.f32.mrf.mxu2  ;;  %v1871_v55 = vadd.f32 %v4601_v29, %v4623_v43  ;;  %v3360_v43 = vld [vmem:[%s5868_s0 + $0x3dc] sm:$0xf0] }
  0xa8   :  { %v4626_v45 = vadd.f32 %v4601_v29, %v1918_v42  ;;  %v4641_v51 = vadd.f32 %v4601_v29, %v1908_v49  ;;  %v4016_v49 = vld [vmem:[%s5868_s0 + $0x2dc] sm:$0xf] }
  0xa9   :  { %v3259_v56 = vor.u32 %v4016_v49, %v3256_v50 }
  0xae   :  { %v4658_v61 = vpop.f32.mrf.mxu0  ;;  %v1893_v62 = vpop.f32.mrf.mxu1 }
  0xaf   :  { %v1920_v60 = vpop.f32.mrf.mxu3  ;;  %v4670_v3 = vadd.f32 %v4601_v29, %v1893_v62  ;;  %v1910_v5 = vpop.f32.mrf.mxu2 }
  0xb0   :  { %v4661_v63 = vadd.f32 %v4601_v29, %v1920_v60  ;;  %v4676_v6 = vadd.f32 %v4601_v29, %v1910_v5  ;;  %v4147_v60 = vld [vmem:[%s5866_s1 + $0x210] sm:$0xff] }
  0xb1   :  { %1965 = vmatmul.bf16.gmra.mxu1 %v3155_v57  ;;  %2184 = vmatmul.bf16.gmra.mxu0 %v3167_v58  ;;  %v3271_v57 = vor.u32 %v4024_v53, %v3270_v52 }
  0xb2   :  { %2448 = vmatpush.bf16.msra.mxu0 %v4147_v60 }
  0xb4   :  { %2116 = vmatmul.bf16.gmra.mxu3 %v3215_v0  ;;  %2048 = vmatmul.bf16.gmra.mxu2 %v3263_v7 }
  0xb6   :  { %v4678_v9 = vpop.f32.mrf.mxu0  ;;  %v1895_v10 = vpop.f32.mrf.mxu1 }
  0xb7   :  { %v1923_v8 = vpop.f32.mrf.mxu3  ;;  %v4684_v12 = vadd.f32 %v4601_v29, %v1895_v10  ;;  %v1913_v13 = vpop.f32.mrf.mxu2 }
  0xb8   :  { %v4681_v11 = vadd.f32 %v4601_v29, %v1923_v8  ;;  %v4690_v15 = vadd.f32 %v4601_v29, %v1913_v13  ;;  %v3367_v8 = vor.u32 %v4049_v4, %v3366_v2  ;;  %v4042_v4 = vld [vmem:[%s5868_s0 + $0x3ac] sm:$0xf] }
  0xbe   :  { %v4707_v24 = vpop.f32.mrf.mxu0  ;;  %v1898_v25 = vpop.f32.mrf.mxu1 }
  0xbf   :  { %v1925_v23 = vpop.f32.mrf.mxu3  ;;  %v4719_v31 = vadd.f32 %v4601_v29, %v1898_v25  ;;  %v1915_v32 = vpop.f32.mrf.mxu2  ;;  %v1869_v25 = vadd.f32 %v4601_v29, %v4609_v34  ;;  %v3418_v34 = vld [vmem:[%s5868_s0 + $0x418] sm:$0xf] }
  0xc0   :  { %v4710_v26 = vadd.f32 %v4601_v29, %v1925_v23  ;;  %v4722_v33 = vadd.f32 %v4601_v29, %v1915_v32  ;;  %v3368_v23 = vld [vmem:[%s5868_s0 + $0x3e4] sm:$0xf0] }
  0xc1   :  { %1970 = vmatmul.bf16.gmra.mxu1 %v3207_v21  ;;  %2189 = vmatmul.bf16.gmra.mxu0 %v3219_v22  ;;  %v4037_v21 = vld [vmem:[%s5868_s0 + $0x380] sm:$0xf0]  ;;  %v4043_v22 = vld [vmem:[%s5868_s0 + $0x3b4] sm:$0xf]  ;;  %v4130_v32 = vld [vmem:[%s5866_s1 + $0x188] sm:$0xff] }
  0xc2   :  { %v3323_v28 = vor.u32 %v4037_v21, %v3322_v20  ;;  %v3371_v40 = vor.u32 %v4043_v22, %v3368_v23  ;;  %2303 = vmatpush.bf16.msra.mxu2 %v4130_v32  ;;  %v3363_v21 = vor.u32 %v4042_v4, %v3360_v43  ;;  %v4075_v32 = vld [vmem:[%s5868_s0 + $0x4b0] sm:$0xf0]  ;;  %v3472_v4 = vld [vmem:[%s5868_s0 + $0x4b4] sm:$0xf0]  ;;  %v1879_v43 = vadd.f32 %v4601_v29, %v4707_v24 }
  0xc4   :  { %2121 = vmatmul.bf16.gmra.mxu3 %v3267_v27  ;;  %2053 = vmatmul.bf16.gmra.mxu2 %v3315_v35  ;;  %v3311_v27 = vor.u32 %v4029_v18, %v3308_v19  ;;  %v4138_v35 = vld [vmem:[%s5866_s1 + $0x1c8] sm:$0xff]  ;;  %v3420_v18 = vld [vmem:[%s5868_s0 + $0x44c] sm:$0xf0]  ;;  %v1874_v19 = vadd.f32 %v4601_v29, %v4658_v61 }
  0xc5   :  { %2376 = vmatpush.bf16.msra.mxu3 %v4138_v35 }
  0xc6   :  { %v4733_v41 = vpop.f32.mrf.mxu0  ;;  %v1900_v42 = vpop.f32.mrf.mxu1 }
  0xc7   :  { %v1928_v36 = vpop.f32.mrf.mxu3  ;;  %v4739_v47 = vadd.f32 %v4601_v29, %v1900_v42  ;;  %v2014_v48 = vpop.f32.mrf.mxu2  ;;  %v4062_v42 = vld [vmem:[%s5868_s0 + $0x448] sm:$0xf0] }
  0xc8   :  { %v4736_v44 = vadd.f32 %v4601_v29, %v1928_v36  ;;  %v4122_v36 = vld [vmem:[%s5866_s1 + $0x148] sm:$0xff]  ;;  %v3419_v53 = vor.u32 %v4062_v42, %v3418_v34 }
  0xc9   :  { %2230 = vmatpush.bf16.msra.mxu1 %v4122_v36 }
  0xce   :  { %v4762_v62 = vpop.f32.mrf.mxu0  ;;  %v1903_v0 = vpop.f32.mrf.mxu1 }
  0xcf   :  { %v1930_v58 = vpop.f32.mrf.mxu3  ;;  %v4771_v5 = vadd.f32 %v4601_v29, %v1903_v0  ;;  %v2016_v7 = vpop.f32.mrf.mxu2 }
  0xd0   :  { %v4146_v58 = vld [vmem:[%s5866_s1 + $0x208] sm:$0xff] }
  0xd1   :  { %1975 = vmatmul.bf16.gmra.mxu1 %v3259_v56  ;;  %2194 = vmatmul.bf16.gmra.mxu0 %v3271_v57 }
  0xd2   :  { %2449 = vmatpush.bf16.msra.mxu0 %v4146_v58  ;;  %v3412_v58 = vld [vmem:[%s5868_s0 + $0x444] sm:$0xf0] }
  0xd4   :  { %2126 = vmatmul.bf16.gmra.mxu3 %v3319_v1  ;;  %2058 = vmatmul.bf16.gmra.mxu2 %v3367_v8  ;;  %v3374_v8 = vld [vmem:[%s5868_s0 + $0x3b8] sm:$0xf] }
  0xd6   :  { %v4773_v13 = vpop.f32.mrf.mxu0  ;;  %v1905_v14 = vpop.f32.mrf.mxu1 }
  0xd7   :  { %v2087_v10 = vpop.f32.mrf.mxu3  ;;  %v4776_v16 = vadd.f32 %v4601_v29, %v1905_v14  ;;  %v2019_v17 = vpop.f32.mrf.mxu2 }
  0xde   :  { %v1941_v37 = vpop.f32.mrf.mxu1  ;;  %v2160_v38 = vpop.f32.mrf.mxu0 }
  0xdf   :  { %v2089_v30 = vpop.f32.mrf.mxu3  ;;  %v1942_v49 = vadd.f32 %v1941_v37, %v1869_v25  ;;  %v2021_v50 = vpop.f32.mrf.mxu2 }
  0xe1   :  { %v2015_v52 = vadd.f32 %v2014_v48, %v1942_v49  ;;  %1980 = vmatmul.bf16.gmra.mxu1 %v3311_v27  ;;  %2199 = vmatmul.bf16.gmra.mxu0 %v3323_v28  ;;  %v4129_v49 = vld [vmem:[%s5866_s1 + $0x180] sm:$0xff] }
  0xe2   :  { %2304 = vmatpush.bf16.msra.mxu2 %v4129_v49 }
  0xe3   :  { %v2088_v54 = vadd.f32 %v2087_v10, %v2015_v52  ;;  %v4050_v10 = vld [vmem:[%s5868_s0 + $0x3e8] sm:$0xf0] }
  0xe4   :  { %2131 = vmatmul.bf16.gmra.mxu3 %v3371_v40  ;;  %2063 = vmatmul.bf16.gmra.mxu2 %v3419_v53  ;;  %v3375_v22 = vor.u32 %v4050_v10, %v3374_v8  ;;  %v1876_v40 = vadd.f32 %v4601_v29, %v4678_v9  ;;  %v4055_v9 = vld [vmem:[%s5868_s0 + $0x414] sm:$0xf] }
  0xe5   :  { %v4815_v56 = vadd.f32 %v2160_v38, %v2088_v54  ;;  %v3415_v10 = vor.u32 %v4055_v9, %v3412_v58 }
  0xe6   :  { %v1943_v60 = vpop.f32.mrf.mxu1  ;;  %v2162_v0 = vpop.f32.mrf.mxu0 }
  0xe7   :  { %v2092_v57 = vpop.f32.mrf.mxu3  ;;  %v1944_v1 = vadd.f32 %v1943_v60, %v1871_v55  ;;  %v4820_v48 = vpop.f32.mrf.mxu2  ;;  %v3426_v60 = vld [vmem:[%s5868_s0 + $0x420] sm:$0xf] }
  0xe9   :  { %v2017_v2 = vadd.f32 %v2016_v7, %v1944_v1  ;;  %v4056_v7 = vld [vmem:[%s5868_s0 + $0x41c] sm:$0xf] }
  0xea   :  { %v3423_v28 = vor.u32 %v4056_v7, %v3420_v18 }
  0xeb   :  { %v2090_v14 = vadd.f32 %v2089_v30, %v2017_v2  ;;  %v3470_v30 = vld [vmem:[%s5868_s0 + $0x480] sm:$0xf]  ;;  %v4069_v2 = vld [vmem:[%s5868_s0 + $0x484] sm:$0xf] }
  0xec   :  { %v3471_v61 = vor.u32 %v4075_v32, %v3470_v30 }
  0xed   :  { %v4842_v20 = vadd.f32 %v2162_v0, %v2090_v14  ;;  %v4063_v0 = vld [vmem:[%s5868_s0 + $0x450] sm:$0xf0] }
  0xee   :  { %v1946_v25 = vpop.f32.mrf.mxu1  ;;  %v2165_v27 = vpop.f32.mrf.mxu0  ;;  %v3427_v14 = vor.u32 %v4063_v0, %v3426_v60 }
  0xef   :  { %v2094_v23 = vpop.f32.mrf.mxu3  ;;  %v1947_v35 = vadd.f32 %v1946_v25, %v1874_v19  ;;  %v2026_v36 = vpop.f32.mrf.mxu2  ;;  %v4121_v19 = vld [vmem:[%s5866_s1 + $0x140] sm:$0xff]  ;;  %v3475_v25 = vor.u32 %v4069_v2, %v3472_v4 }
  0xf0   :  { %2231 = vmatpush.bf16.msra.mxu1 %v4121_v19 }
  0xf1   :  { %v2020_v37 = vadd.f32 %v2019_v17, %v1947_v35  ;;  %1985 = vmatmul.bf16.gmra.mxu1 %v3363_v21  ;;  %2204 = vmatmul.bf16.gmra.mxu0 %v3375_v22  ;;  %v4137_v17 = vld [vmem:[%s5866_s1 + $0x1c0] sm:$0xff]  ;;  %v1881_v35 = vadd.f32 %v4601_v29, %v4733_v41  ;;  %v3478_v41 = vld [vmem:[%s5868_s0 + $0x488] sm:$0xf] }
  0xf2   :  { %2377 = vmatpush.bf16.msra.mxu3 %v4137_v17  ;;  %v4145_v21 = vld [vmem:[%s5866_s1 + $0x200] sm:$0xff] }
  0xf3   :  { %v2093_v38 = vadd.f32 %v2092_v57, %v2020_v37  ;;  %2450 = vmatpush.bf16.msra.mxu0 %v4145_v21  ;;  %v1886_v21 = vadd.f32 %v4601_v29, %v4773_v13 }
  0xf4   :  { %2136 = vmatmul.bf16.gmra.mxu3 %v3423_v28  ;;  %2068 = vmatmul.bf16.gmra.mxu2 %v3471_v61 }
  0xf5   :  { %v4852_v34 = vadd.f32 %v2165_v27, %v2093_v38 }
  0xf6   :  { %v1948_v52 = vpop.f32.mrf.mxu1  ;;  %v2167_v53 = vpop.f32.mrf.mxu0 }
  0xf7   :  { %v2097_v42 = vpop.f32.mrf.mxu3  ;;  %v1949_v54 = vadd.f32 %v1948_v52, %v1876_v40  ;;  %v2029_v55 = vpop.f32.mrf.mxu2 }
  0xf9   :  { %v2022_v57 = vadd.f32 %v2021_v50, %v1949_v54  ;;  %v184_v50 = vld [vmem:[%s5868_s0 + $0x4e8] sm:$0xff] }
  0xfa   :  { %v883_v18 = vunpack.c.l.b16 %v184_v50  ;;  %v884_v54 = vunpack.c.h.b16 %v184_v50  ;;  %v2914_v50 = vld [vmem:[%s5868_s0 + $0x18] sm:$0xf] }
  0xfb   :  { %v2095_v1 = vadd.f32 %v2094_v23, %v2022_v57 }
  0xfc   :  { %v1052_v30 = vpack.c.b16 %v883_v18, %v883_v18 }
  0xfd   :  { %v4883_v8 = vadd.f32 %v2167_v53, %v2095_v1  ;;  %v4076_v53 = vld [vmem:[%s5868_s0 + $0x4b8] sm:$0xf0] }
  0xfe   :  { %v1951_v22 = vpop.f32.mrf.mxu1  ;;  %v2170_v23 = vpop.f32.mrf.mxu0  ;;  %v3479_v60 = vor.u32 %v4076_v53, %v3478_v41  ;;  %v4168_v1 = vld [vmem:[%s5866_s1 + $0x2b8] sm:$0xff] }
  0xff   :  { %v2099_v7 = vpop.f32.mrf.mxu3  ;;  %v1952_v27 = vadd.f32 %v1951_v22, %v1879_v43  ;;  %v2031_v24 = vpop.f32.mrf.mxu2  ;;  %v1053_v43 = vpack.c.b16 %v884_v54, %v884_v54  ;;  %2589 = vmatpush.bf16.msrb.mxu2 %v4168_v1 }
 0x101   :  { %v2025_v28 = vadd.f32 %v4820_v48, %v1952_v27  ;;  %1990 = vmatmul.bf16.gmra.mxu1 %v3415_v10  ;;  %2209 = vmatmul.bf16.gmra.mxu0 %v3427_v14  ;;  %v4068_v48 = vld [vmem:[%s5868_s0 + $0x47c] sm:$0xf] }
 0x103   :  { %v2098_v32 = vadd.f32 %v2097_v42, %v2025_v28  ;;  %v3464_v42 = vld [vmem:[%s5868_s0 + $0x4ac] sm:$0xf0] }
 0x104   :  { %2141 = vmatmul.bf16.gmra.mxu3 %v3475_v25  ;;  %2073 = vmatmul.bf16.gmra.mxu2 %v1052_v30  ;;  %v3467_v58 = vor.u32 %v4068_v48, %v3464_v42  ;;  %v4176_v25 = vld [vmem:[%s5866_s1 + $0x2f8] sm:$0xff]  ;;  %v4934_v30 = vld [vmem:[%s5868_s0 + $0x4f0] sm:$0xff] }
 0x105   :  { %v4894_v37 = vadd.f32 %v2170_v23, %v2098_v32  ;;  %2662 = vmatpush.bf16.msrb.mxu3 %v4176_v25  ;;  %v882_v32 = vunpack.c.h.b16 %v4382_v59  ;;  %v4180_v59 = vld [vmem:[%s5866_s1 + $0x318] sm:$0xff] }
 0x106   :  { %v1953_v38 = vpop.f32.mrf.mxu1  ;;  %v2172_v40 = vpop.f32.mrf.mxu0  ;;  %2739 = vmatpush.bf16.msrb.mxu0 %v4180_v59 }
 0x107   :  { %v2102_v61 = vpop.f32.mrf.mxu3  ;;  %v1954_v49 = vadd.f32 %v1953_v38, %v1881_v35  ;;  %v2034_v17 = vpop.f32.mrf.mxu2  ;;  %v1051_v48 = vpack.c.b16 %v882_v32, %v882_v32  ;;  %v4175_v32 = vld [vmem:[%s5866_s1 + $0x2f0] sm:$0xff] }
 0x109   :  { %v2027_v52 = vadd.f32 %v2026_v36, %v1954_v49  ;;  %v1884_v36 = vadd.f32 %v4601_v29, %v4762_v62  ;;  %v3934_v62 = vld [vmem:[%s5868_s0 + $0x48] sm:$0xf0]  ;;  %v2916_v49 = vld [vmem:[%s5868_s0 + $0x4c] sm:$0xf0]  ;;  %2663 = vmatpush.bf16.msrb.mxu3 %v4175_v32 }
 0x10a   :  { %v2915_v18 = vor.u32 %v3934_v62, %v2914_v50 }
 0x10b   :  { %v2100_v57 = vadd.f32 %v2099_v7, %v2027_v52 }
 0x10d   :  { %v4910_v9 = vadd.f32 %v2172_v40, %v2100_v57  ;;  %v3928_v40 = vld [vmem:[%s5868_s0 + $0x1c] sm:$0xf]  ;;  %v2966_v57 = vld [vmem:[%s5868_s0 + $0x80] sm:$0xf] }
 0x10e   :  { %v1956_v2 = vpop.f32.mrf.mxu1  ;;  %v2175_v4 = vpop.f32.mrf.mxu0  ;;  %v2919_v54 = vor.u32 %v3928_v40, %v2916_v49  ;;  %v3018_v49 = vld [vmem:[%s5868_s0 + $0xe8] sm:$0xf] }
 0x10f   :  { %v2104_v0 = vpop.f32.mrf.mxu3  ;;  %v1957_v10 = vadd.f32 %v1956_v2, %v1884_v36  ;;  %v2036_v14 = vpop.f32.mrf.mxu2  ;;  %v3947_v36 = vld [vmem:[%s5868_s0 + $0xb0] sm:$0xf0] }
 0x110   :  { %v2967_v1 = vor.u32 %v3947_v36, %v2966_v57 }
 0x111   :  { %v2030_v7 = vadd.f32 %v2029_v55, %v1957_v10  ;;  %1995 = vmatmul.bf16.gmra.mxu1 %v3467_v58  ;;  %2214 = vmatmul.bf16.gmra.mxu0 %v3479_v60  ;;  %v4160_v55 = vld [vmem:[%s5866_s1 + $0x278] sm:$0xff] }
 0x112   :  { %2516 = vmatpush.bf16.msrb.mxu1 %v4160_v55 }
 0x113   :  { %v2103_v19 = vadd.f32 %v2102_v61, %v2030_v7  ;;  %v885_v61 = vunpack.c.l.b16 %v4934_v30 }
 0x114   :  { %2146 = vmatmul.bf16.gmra.mxu3 %v1053_v43  ;;  %2305 = vmatmul.bf16.vlgmr.msra.gmra.mxu2 %v2915_v18 }
 0x115   :  { %v4923_v22 = vadd.f32 %v2175_v4, %v2103_v19  ;;  %v1054_v42 = vpack.c.b16 %v885_v61, %v885_v61  ;;  %v2922_v19 = vld [vmem:[%s5868_s0 + $0x20] sm:$0xf] }
 0x116   :  { %v1958_v27 = vpop.f32.mrf.mxu1  ;;  %v2177_v28 = vpop.f32.mrf.mxu0 }
 0x117   :  { %v2107_v23 = vpop.f32.mrf.mxu3  ;;  %v1959_v29 = vadd.f32 %v1958_v27, %v1886_v21  ;;  %v2039_v13 = vpop.f32.mrf.mxu2  ;;  %v3935_v21 = vld [vmem:[%s5868_s0 + $0x50] sm:$0xf0] }
 0x118   :  { %v2923_v27 = vor.u32 %v3935_v21, %v2922_v19 }
 0x119   :  { %v2032_v35 = vadd.f32 %v2031_v24, %v1959_v29  ;;  %v4167_v29 = vld [vmem:[%s5866_s1 + $0x2b0] sm:$0xff] }
 0x11a   :  { %2590 = vmatpush.bf16.msrb.mxu2 %v4167_v29 }
 0x11b   :  { %v2105_v38 = vadd.f32 %v2104_v0, %v2032_v35  ;;  %v4159_v35 = vld [vmem:[%s5866_s1 + $0x270] sm:$0xff] }
 0x11c   :  { %2517 = vmatpush.bf16.msrb.mxu1 %v4159_v35 }
 0x11d   :  { %v4944_v52 = vadd.f32 %v2177_v28, %v2105_v38 }
 0x11e   :  { %v1961_v24 = vpop.f32.mrf.mxu1  ;;  %v2180_v53 = vpop.f32.mrf.mxu0 }
 0x11f   :  { %v2109_v41 = vpop.f32.mrf.mxu3  ;;  %v1962_v58 = vadd.f32 %v1961_v24, %v4618_v39  ;;  %v2041_v60 = vpop.f32.mrf.mxu2  ;;  %v3927_v39 = vld [vmem:[%s5868_s0 + $0x14] sm:$0xf] }
 0x121   :  { %v2035_v0 = vadd.f32 %v2034_v17, %v1962_v58  ;;  %2000 = vmatmul.bf16.gmra.mxu1 %v1051_v48  ;;  %2219 = vmatmul.bf16.gmra.mxu0 %v1054_v42  ;;  %v2908_v17 = vld [vmem:[%s5868_s0 + $0x44] sm:$0xf0]  ;;  %v3960_v48 = vld [vmem:[%s5868_s0 + $0x118] sm:$0xf0] }
 0x122   :  { %v2911_v55 = vor.u32 %v3927_v39, %v2908_v17  ;;  %v3019_v24 = vor.u32 %v3960_v48, %v3018_v49 }
 0x123   :  { %v2108_v2 = vadd.f32 %v2107_v23, %v2035_v0 }
 0x124   :  { %2378 = vmatmul.bf16.vlgmr.msra.gmra.mxu3 %v2919_v54  ;;  %2310 = vmatmul.bf16.gmra.mxu2 %v2967_v1 }
 0x125   :  { %v4956_v4 = vadd.f32 %v2180_v53, %v2108_v2  ;;  %v3940_v2 = vld [vmem:[%s5868_s0 + $0x7c] sm:$0xf] }
 0x126   :  { %v1963_v50 = vpop.f32.mrf.mxu1  ;;  %v2182_v62 = vpop.f32.mrf.mxu0 }
 0x127   :  { %v2112_v43 = vpop.f32.mrf.mxu3  ;;  %v1964_v10 = vadd.f32 %v1963_v50, %v4629_v46  ;;  %v2044_v7 = vpop.f32.mrf.mxu2  ;;  %v3941_v46 = vld [vmem:[%s5868_s0 + $0x84] sm:$0xf]  ;;  %v3948_v50 = vld [vmem:[%s5868_s0 + $0xb8] sm:$0xf0] }
 0x129   :  { %v2037_v18 = vadd.f32 %v2036_v14, %v1964_v10  ;;  %v2968_v14 = vld [vmem:[%s5868_s0 + $0xb4] sm:$0xf0] }
 0x12a   :  { %v2971_v40 = vor.u32 %v3941_v46, %v2968_v14  ;;  %v3070_v46 = vld [vmem:[%s5868_s0 + $0x150] sm:$0xf]  ;;  %v3973_v14 = vld [vmem:[%s5868_s0 + $0x180] sm:$0xf0] }
 0x12b   :  { %v2110_v23 = vadd.f32 %v2109_v41, %v2037_v18  ;;  %v3071_v29 = vor.u32 %v3973_v14, %v3070_v46 }
 0x12d   :  { %v4977_v25 = vadd.f32 %v2182_v62, %v2110_v23 }
 0x12e   :  { %v1966_v61 = vpop.f32.mrf.mxu1  ;;  %v2185_v38 = vpop.f32.mrf.mxu0 }
 0x12f   :  { %v2114_v28 = vpop.f32.mrf.mxu3  ;;  %v1967_v42 = vadd.f32 %v1966_v61, %v4670_v3  ;;  %v2046_v41 = vpop.f32.mrf.mxu2 }
 0x131   :  { %v2040_v59 = vadd.f32 %v2039_v13, %v1967_v42  ;;  %2232 = vmatmul.bf16.vlgmr.msra.gmra.mxu1 %v2911_v55  ;;  %2451 = vmatmul.bf16.vlgmr.msra.gmra.mxu0 %v2923_v27  ;;  %v2960_v13 = vld [vmem:[%s5868_s0 + $0xac] sm:$0xf0] }
 0x132   :  { %v2963_v18 = vor.u32 %v3940_v2, %v2960_v13 }
 0x133   :  { %v2113_v53 = vadd.f32 %v2112_v43, %v2040_v59  ;;  %v2974_v43 = vld [vmem:[%s5868_s0 + $0x88] sm:$0xf] }
 0x134   :  { %2383 = vmatmul.bf16.gmra.mxu3 %v2971_v40  ;;  %2315 = vmatmul.bf16.gmra.mxu2 %v3019_v24  ;;  %v2975_v39 = vor.u32 %v3948_v50, %v2974_v43  ;;  %v4174_v40 = vld [vmem:[%s5866_s1 + $0x2e8] sm:$0xff]  ;;  %v3953_v24 = vld [vmem:[%s5868_s0 + $0xe4] sm:$0xf]  ;;  %v4179_v43 = vld [vmem:[%s5866_s1 + $0x310] sm:$0xff] }
 0x135   :  { %v4995_v54 = vadd.f32 %v2185_v38, %v2113_v53  ;;  %v4166_v38 = vld [vmem:[%s5866_s1 + $0x2a8] sm:$0xff]  ;;  %2664 = vmatpush.bf16.msrb.mxu3 %v4174_v40  ;;  %v3012_v53 = vld [vmem:[%s5868_s0 + $0x114] sm:$0xf0]  ;;  %2740 = vmatpush.bf16.msrb.mxu0 %v4179_v43 }
 0x136   :  { %v1968_v36 = vpop.f32.mrf.mxu1  ;;  %v2187_v58 = vpop.f32.mrf.mxu0  ;;  %2591 = vmatpush.bf16.msrb.mxu2 %v4166_v38  ;;  %v3974_v40 = vld [vmem:[%s5868_s0 + $0x188] sm:$0xf0] }
 0x137   :  { %v2117_v57 = vpop.f32.mrf.mxu3  ;;  %v1969_v0 = vadd.f32 %v1968_v36, %v4684_v12  ;;  %v2049_v1 = vpop.f32.mrf.mxu2  ;;  %v3954_v12 = vld [vmem:[%s5868_s0 + $0xec] sm:$0xf] }
 0x139   :  { %v2042_v3 = vadd.f32 %v2041_v60, %v1969_v0  ;;  %v3020_v60 = vld [vmem:[%s5868_s0 + $0x11c] sm:$0xf0] }
 0x13a   :  { %v3023_v23 = vor.u32 %v3954_v12, %v3020_v60  ;;  %v3122_v60 = vld [vmem:[%s5868_s0 + $0x1b8] sm:$0xf] }
 0x13b   :  { %v2115_v62 = vadd.f32 %v2114_v28, %v2042_v3  ;;  %v3015_v3 = vor.u32 %v3953_v24, %v3012_v53  ;;  %v4165_v24 = vld [vmem:[%s5866_s1 + $0x2a0] sm:$0xff] }
 0x13c   :  { %v4173_v53 = vld [vmem:[%s5866_s1 + $0x2e0] sm:$0xff]  ;;  %2592 = vmatpush.bf16.msrb.mxu2 %v4165_v24 }
 0x13d   :  { %v5016_v10 = vadd.f32 %v2187_v58, %v2115_v62  ;;  %v3072_v58 = vld [vmem:[%s5868_s0 + $0x184] sm:$0xf0]  ;;  %2665 = vmatpush.bf16.msrb.mxu3 %v4173_v53 }
 0x13e   :  { %v1971_v19 = vpop.f32.mrf.mxu1  ;;  %v2190_v21 = vpop.f32.mrf.mxu0 }
 0x13f   :  { %v2119_v17 = vpop.f32.mrf.mxu3  ;;  %v1972_v55 = vadd.f32 %v1971_v19, %v4719_v31  ;;  %v2051_v27 = vpop.f32.mrf.mxu2  ;;  %v4158_v31 = vld [vmem:[%s5866_s1 + $0x268] sm:$0xff] }
 0x140   :  { %2518 = vmatpush.bf16.msrb.mxu1 %v4158_v31 }
 0x141   :  { %v2045_v28 = vadd.f32 %v2044_v7, %v1972_v55  ;;  %2237 = vmatmul.bf16.gmra.mxu1 %v2963_v18  ;;  %2456 = vmatmul.bf16.gmra.mxu0 %v2975_v39  ;;  %v3986_v18 = vld [vmem:[%s5868_s0 + $0x1e8] sm:$0xf0] }
 0x143   :  { %v2118_v32 = vadd.f32 %v2117_v57, %v2045_v28  ;;  %v3026_v57 = vld [vmem:[%s5868_s0 + $0xf0] sm:$0xf] }
 0x144   :  { %2388 = vmatmul.bf16.gmra.mxu3 %v3023_v23  ;;  %2320 = vmatmul.bf16.gmra.mxu2 %v3071_v29 }
 0x145   :  { %v5025_v35 = vadd.f32 %v2190_v21, %v2118_v32  ;;  %v3123_v21 = vor.u32 %v3986_v18, %v3122_v60  ;;  %v4157_v60 = vld [vmem:[%s5866_s1 + $0x260] sm:$0xff] }
 0x146   :  { %v1973_v7 = vpop.f32.mrf.mxu1  ;;  %v2192_v49 = vpop.f32.mrf.mxu0  ;;  %2519 = vmatpush.bf16.msrb.mxu1 %v4157_v60  ;;  %v3228_v60 = vld [vmem:[%s5868_s0 + $0x2bc] sm:$0xf0] }
 0x147   :  { %v2122_v61 = vpop.f32.mrf.mxu3  ;;  %v1974_v48 = vadd.f32 %v1973_v7, %v4739_v47  ;;  %v2054_v42 = vpop.f32.mrf.mxu2  ;;  %v3961_v47 = vld [vmem:[%s5868_s0 + $0x120] sm:$0xf0] }
 0x148   :  { %v3027_v2 = vor.u32 %v3961_v47, %v3026_v57 }
 0x149   :  { %v2047_v59 = vadd.f32 %v2046_v41, %v1974_v48  ;;  %v3967_v41 = vld [vmem:[%s5868_s0 + $0x154] sm:$0xf] }
 0x14a   :  { %v3075_v12 = vor.u32 %v3967_v41, %v3072_v58  ;;  %v3174_v41 = vld [vmem:[%s5868_s0 + $0x220] sm:$0xf]  ;;  %v3999_v58 = vld [vmem:[%s5868_s0 + $0x250] sm:$0xf0] }
 0x14b   :  { %v2120_v36 = vadd.f32 %v2119_v17, %v2047_v59  ;;  %v3175_v43 = vor.u32 %v3999_v58, %v3174_v41 }
 0x14d   :  { %v5055_v0 = vadd.f32 %v2192_v49, %v2120_v36 }
 0x14e   :  { %v1976_v50 = vpop.f32.mrf.mxu1  ;;  %v2195_v62 = vpop.f32.mrf.mxu0 }
 0x14f   :  { %v2124_v13 = vpop.f32.mrf.mxu3  ;;  %v1977_v39 = vadd.f32 %v1976_v50, %v4771_v5  ;;  %v2056_v17 = vpop.f32.mrf.mxu2  ;;  %v3966_v5 = vld [vmem:[%s5868_s0 + $0x14c] sm:$0xf] }
 0x151   :  { %v2050_v19 = vadd.f32 %v2049_v1, %v1977_v39  ;;  %2242 = vmatmul.bf16.gmra.mxu1 %v3015_v3  ;;  %2461 = vmatmul.bf16.gmra.mxu0 %v3027_v2  ;;  %v3064_v1 = vld [vmem:[%s5868_s0 + $0x17c] sm:$0xf0] }
 0x152   :  { %v3067_v49 = vor.u32 %v3966_v5, %v3064_v1 }
 0x153   :  { %v2123_v23 = vadd.f32 %v2122_v61, %v2050_v19  ;;  %v3078_v61 = vld [vmem:[%s5868_s0 + $0x158] sm:$0xf] }
 0x154   :  { %2393 = vmatmul.bf16.gmra.mxu3 %v3075_v12  ;;  %2325 = vmatmul.bf16.gmra.mxu2 %v3123_v21  ;;  %v3079_v48 = vor.u32 %v3974_v40, %v3078_v61  ;;  %v3979_v21 = vld [vmem:[%s5868_s0 + $0x1b4] sm:$0xf] }
 0x155   :  { %v5067_v46 = vadd.f32 %v2195_v62, %v2123_v23  ;;  %v3116_v23 = vld [vmem:[%s5868_s0 + $0x1e4] sm:$0xf0] }
 0x156   :  { %v1978_v55 = vpop.f32.mrf.mxu1  ;;  %v2197_v28 = vpop.f32.mrf.mxu0 }
 0x157   :  { %v2127_v14 = vpop.f32.mrf.mxu3  ;;  %v1979_v29 = vadd.f32 %v1978_v55, %v4776_v16  ;;  %v2059_v32 = vpop.f32.mrf.mxu2  ;;  %v3980_v16 = vld [vmem:[%s5868_s0 + $0x1bc] sm:$0xf]  ;;  %v3987_v55 = vld [vmem:[%s5868_s0 + $0x1f0] sm:$0xf0] }
 0x159   :  { %v2052_v38 = vadd.f32 %v2051_v27, %v1979_v29  ;;  %v3124_v27 = vld [vmem:[%s5868_s0 + $0x1ec] sm:$0xf0] }
 0x15a   :  { %v3127_v36 = vor.u32 %v3980_v16, %v3124_v27  ;;  %v3226_v16 = vld [vmem:[%s5868_s0 + $0x288] sm:$0xf]  ;;  %v4012_v27 = vld [vmem:[%s5868_s0 + $0x2b8] sm:$0xf0] }
 0x15b   :  { %v2125_v31 = vadd.f32 %v2124_v13, %v2052_v38  ;;  %v3119_v38 = vor.u32 %v3979_v21, %v3116_v23  ;;  %v3227_v24 = vor.u32 %v4012_v27, %v3226_v16  ;;  %v4172_v21 = vld [vmem:[%s5866_s1 + $0x2d8] sm:$0xff]  ;;  %v4178_v27 = vld [vmem:[%s5866_s1 + $0x308] sm:$0xff] }
 0x15c   :  { %v4156_v23 = vld [vmem:[%s5866_s1 + $0x258] sm:$0xff]  ;;  %2666 = vmatpush.bf16.msrb.mxu3 %v4172_v21  ;;  %2741 = vmatpush.bf16.msrb.mxu0 %v4178_v27 }
 0x15d   :  { %v5088_v7 = vadd.f32 %v2197_v28, %v2125_v31  ;;  %v3176_v28 = vld [vmem:[%s5868_s0 + $0x254] sm:$0xf0]  ;;  %2520 = vmatpush.bf16.msrb.mxu1 %v4156_v23 }
 0x15e   :  { %v1981_v57 = vpop.f32.mrf.mxu1  ;;  %v2200_v47 = vpop.f32.mrf.mxu0  ;;  %v3286_v27 = vld [vmem:[%s5868_s0 + $0x2f8] sm:$0xf] }
 0x15f   :  { %v2129_v59 = vpop.f32.mrf.mxu3  ;;  %v1982_v3 = vadd.f32 %v1981_v57, %v4641_v51  ;;  %v2061_v2 = vpop.f32.mrf.mxu2 }
 0x161   :  { %v2055_v13 = vadd.f32 %v2054_v42, %v1982_v3  ;;  %2247 = vmatmul.bf16.gmra.mxu1 %v3067_v49  ;;  %2466 = vmatmul.bf16.gmra.mxu0 %v3079_v48 }
 0x163   :  { %v2128_v50 = vadd.f32 %v2127_v14, %v2055_v13  ;;  %v3130_v14 = vld [vmem:[%s5868_s0 + $0x1c0] sm:$0xf]  ;;  %v3992_v13 = vld [vmem:[%s5868_s0 + $0x21c] sm:$0xf] }
 0x164   :  { %2398 = vmatmul.bf16.gmra.mxu3 %v3127_v36  ;;  %2330 = vmatmul.bf16.gmra.mxu2 %v3175_v43  ;;  %v3131_v5 = vor.u32 %v3987_v55, %v3130_v14  ;;  %v4164_v36 = vld [vmem:[%s5866_s1 + $0x298] sm:$0xff]  ;;  %v3168_v43 = vld [vmem:[%s5868_s0 + $0x24c] sm:$0xf0] }
 0x165   :  { %v5103_v62 = vadd.f32 %v2200_v47, %v2128_v50  ;;  %2593 = vmatpush.bf16.msrb.mxu2 %v4164_v36  ;;  %v3182_v50 = vld [vmem:[%s5868_s0 + $0x228] sm:$0xf]  ;;  %v3234_v36 = vld [vmem:[%s5868_s0 + $0x290] sm:$0xf] }
 0x166   :  { %v1983_v18 = vpop.f32.mrf.mxu1  ;;  %v2202_v39 = vpop.f32.mrf.mxu0 }
 0x167   :  { %v2132_v12 = vpop.f32.mrf.mxu3  ;;  %v1984_v51 = vadd.f32 %v1983_v18, %v4676_v6  ;;  %v2064_v19 = vpop.f32.mrf.mxu2 }
 0x169   :  { %v2057_v42 = vadd.f32 %v2056_v17, %v1984_v51  ;;  %v3993_v17 = vld [vmem:[%s5868_s0 + $0x224] sm:$0xf] }
 0x16a   :  { %v3179_v31 = vor.u32 %v3993_v17, %v3176_v28  ;;  %v3278_v17 = vld [vmem:[%s5868_s0 + $0x2f0] sm:$0xf]  ;;  %v4025_v28 = vld [vmem:[%s5868_s0 + $0x320] sm:$0xf0] }
 0x16b   :  { %v2130_v6 = vadd.f32 %v2129_v59, %v2057_v42 }
 0x16d   :  { %v5127_v29 = vadd.f32 %v2202_v39, %v2130_v6  ;;  %v3171_v39 = vor.u32 %v3992_v13, %v3168_v43 }
 0x16e   :  { %v1986_v61 = vpop.f32.mrf.mxu1  ;;  %v2205_v40 = vpop.f32.mrf.mxu0 }
 0x16f   :  { %v2134_v1 = vpop.f32.mrf.mxu3  ;;  %v1987_v49 = vadd.f32 %v1986_v61, %v4690_v15  ;;  %v2066_v48 = vpop.f32.mrf.mxu2  ;;  %v3279_v61 = vor.u32 %v4025_v28, %v3278_v17  ;;  %v4171_v17 = vld [vmem:[%s5866_s1 + $0x2d0] sm:$0xff] }
 0x170   :  { %2667 = vmatpush.bf16.msrb.mxu3 %v4171_v17 }
 0x171   :  { %v2060_v59 = vadd.f32 %v2059_v32, %v1987_v49  ;;  %2252 = vmatmul.bf16.gmra.mxu1 %v3119_v38  ;;  %2471 = vmatmul.bf16.gmra.mxu0 %v3131_v5 }
 0x173   :  { %v2133_v53 = vadd.f32 %v2132_v12, %v2060_v59  ;;  %v4000_v12 = vld [vmem:[%s5868_s0 + $0x258] sm:$0xf0] }
 0x174   :  { %2403 = vmatmul.bf16.gmra.mxu3 %v3179_v31  ;;  %2335 = vmatmul.bf16.gmra.mxu2 %v3227_v24  ;;  %v3183_v51 = vor.u32 %v4000_v12, %v3182_v50 }
 0x175   :  { %v5136_v57 = vadd.f32 %v2205_v40, %v2133_v53  ;;  %v4005_v53 = vld [vmem:[%s5868_s0 + $0x284] sm:$0xf] }
 0x176   :  { %v1988_v41 = vpop.f32.mrf.mxu1  ;;  %v2207_v58 = vpop.f32.mrf.mxu0 }
 0x177   :  { %v2137_v47 = vpop.f32.mrf.mxu3  ;;  %v1989_v3 = vadd.f32 %v1988_v41, %v4722_v33  ;;  %v2069_v15 = vpop.f32.mrf.mxu2  ;;  %v4013_v41 = vld [vmem:[%s5868_s0 + $0x2c0] sm:$0xf0] }
 0x178   :  { %v3235_v13 = vor.u32 %v4013_v41, %v3234_v36 }
 0x179   :  { %v2062_v32 = vadd.f32 %v2061_v2, %v1989_v3  ;;  %v4006_v2 = vld [vmem:[%s5868_s0 + $0x28c] sm:$0xf] }
 0x17a   :  { %v3231_v6 = vor.u32 %v4006_v2, %v3228_v60  ;;  %v3330_v2 = vld [vmem:[%s5868_s0 + $0x358] sm:$0xf]  ;;  %v4038_v60 = vld [vmem:[%s5868_s0 + $0x388] sm:$0xf0] }
 0x17b   :  { %v2135_v33 = vadd.f32 %v2134_v1, %v2062_v32  ;;  %v3331_v21 = vor.u32 %v4038_v60, %v3330_v2 }
 0x17d   :  { %v5160_v18 = vadd.f32 %v2207_v58, %v2135_v33  ;;  %v3280_v58 = vld [vmem:[%s5868_s0 + $0x324] sm:$0xf0] }
 0x17e   :  { %v1991_v14 = vpop.f32.mrf.mxu1  ;;  %v2210_v55 = vpop.f32.mrf.mxu0 }
 0x17f   :  { %v2139_v42 = vpop.f32.mrf.mxu3  ;;  %v1992_v38 = vadd.f32 %v1991_v14, %v4626_v45  ;;  %v2071_v5 = vpop.f32.mrf.mxu2 }
 0x181   :  { %v2065_v1 = vadd.f32 %v2064_v19, %v1992_v38  ;;  %2257 = vmatmul.bf16.gmra.mxu1 %v3171_v39  ;;  %2476 = vmatmul.bf16.gmra.mxu0 %v3183_v51 }
 0x183   :  { %v2138_v40 = vadd.f32 %v2137_v47, %v2065_v1  ;;  %v3220_v47 = vld [vmem:[%s5868_s0 + $0x2b4] sm:$0xf0] }
 0x184   :  { %2408 = vmatmul.bf16.gmra.mxu3 %v3231_v6  ;;  %2340 = vmatmul.bf16.gmra.mxu2 %v3279_v61  ;;  %v3223_v32 = vor.u32 %v4005_v53, %v3220_v47  ;;  %v4163_v6 = vld [vmem:[%s5866_s1 + $0x290] sm:$0xff] }
 0x185   :  { %v5175_v31 = vadd.f32 %v2210_v55, %v2138_v40  ;;  %2594 = vmatpush.bf16.msrb.mxu2 %v4163_v6  ;;  %v4018_v40 = vld [vmem:[%s5868_s0 + $0x2ec] sm:$0xf] }
 0x186   :  { %v1993_v49 = vpop.f32.mrf.mxu1  ;;  %v2212_v59 = vpop.f32.mrf.mxu0 }
 0x187   :  { %v2142_v16 = vpop.f32.mrf.mxu3  ;;  %v1994_v45 = vadd.f32 %v1993_v49, %v4661_v63  ;;  %v2074_v24 = vpop.f32.mrf.mxu2 }
 0x189   :  { %v2067_v19 = vadd.f32 %v2066_v48, %v1994_v45  ;;  %v4019_v48 = vld [vmem:[%s5868_s0 + $0x2f4] sm:$0xf] }
 0x18a   :  { %v3283_v33 = vor.u32 %v4019_v48, %v3280_v58  ;;  %v3382_v48 = vld [vmem:[%s5868_s0 + $0x3c0] sm:$0xf]  ;;  %v4051_v58 = vld [vmem:[%s5868_s0 + $0x3f0] sm:$0xf0] }
 0x18b   :  { %v2140_v63 = vadd.f32 %v2139_v42, %v2067_v19 }
 0x18d   :  { %v5199_v3 = vadd.f32 %v2212_v59, %v2140_v63  ;;  %v3332_v59 = vld [vmem:[%s5868_s0 + $0x38c] sm:$0xf0] }
 0x18e   :  { %v1996_v50 = vpop.f32.mrf.mxu1  ;;  %v2215_v12 = vpop.f32.mrf.mxu0 }
 0x18f   :  { %v2144_v43 = vpop.f32.mrf.mxu3  ;;  %v1997_v39 = vadd.f32 %v1996_v50, %v4681_v11  ;;  %v2076_v51 = vpop.f32.mrf.mxu2  ;;  %v4155_v11 = vld [vmem:[%s5866_s1 + $0x250] sm:$0xff]  ;;  %v3383_v50 = vor.u32 %v4051_v58, %v3382_v48 }
 0x190   :  { %2521 = vmatpush.bf16.msrb.mxu1 %v4155_v11 }
 0x191   :  { %v2070_v42 = vadd.f32 %v2069_v15, %v1997_v39  ;;  %2262 = vmatmul.bf16.gmra.mxu1 %v3223_v32  ;;  %2481 = vmatmul.bf16.gmra.mxu0 %v3235_v13 }
 0x193   :  { %v2143_v23 = vadd.f32 %v2142_v16, %v2070_v42  ;;  %v3272_v16 = vld [vmem:[%s5868_s0 + $0x31c] sm:$0xf0]  ;;  %v4031_v42 = vld [vmem:[%s5868_s0 + $0x354] sm:$0xf] }
 0x194   :  { %2413 = vmatmul.bf16.gmra.mxu3 %v3283_v33  ;;  %2345 = vmatmul.bf16.gmra.mxu2 %v3331_v21  ;;  %v3275_v19 = vor.u32 %v4018_v40, %v3272_v16  ;;  %v4039_v21 = vld [vmem:[%s5868_s0 + $0x390] sm:$0xf0] }
 0x195   :  { %v5208_v14 = vadd.f32 %v2215_v12, %v2143_v23  ;;  %v4045_v23 = vld [vmem:[%s5868_s0 + $0x3c4] sm:$0xf] }
 0x196   :  { %v1998_v15 = vpop.f32.mrf.mxu1  ;;  %v2217_v28 = vpop.f32.mrf.mxu0 }
 0x197   :  { %v2147_v55 = vpop.f32.mrf.mxu3  ;;  %v1999_v38 = vadd.f32 %v1998_v15, %v4710_v26  ;;  %v2306_v1 = vpop.f32.mrf.mxu2  ;;  %v4026_v26 = vld [vmem:[%s5868_s0 + $0x328] sm:$0xf0] }
 0x198   :  { %v3287_v53 = vor.u32 %v4026_v26, %v3286_v27  ;;  %v4162_v15 = vld [vmem:[%s5866_s1 + $0x288] sm:$0xff]  ;;  %v4064_v26 = vld [vmem:[%s5868_s0 + $0x458] sm:$0xf0] }
 0x199   :  { %v2072_v61 = vadd.f32 %v2071_v5, %v1999_v38  ;;  %v4032_v5 = vld [vmem:[%s5868_s0 + $0x35c] sm:$0xf]  ;;  %v4154_v38 = vld [vmem:[%s5866_s1 + $0x248] sm:$0xff]  ;;  %2595 = vmatpush.bf16.msrb.mxu2 %v4162_v15 }
 0x19a   :  { %v3335_v63 = vor.u32 %v4032_v5, %v3332_v59  ;;  %v3434_v27 = vld [vmem:[%s5868_s0 + $0x428] sm:$0xf]  ;;  %2522 = vmatpush.bf16.msrb.mxu1 %v4154_v38 }
 0x19b   :  { %v2145_v49 = vadd.f32 %v2144_v43, %v2072_v61 }
 0x19d   :  { %v5238_v45 = vadd.f32 %v2217_v28, %v2145_v49  ;;  %v4170_v28 = vld [vmem:[%s5866_s1 + $0x2c8] sm:$0xff] }
 0x19e   :  { %v2001_v36 = vpop.f32.mrf.mxu1  ;;  %v2220_v41 = vpop.f32.mrf.mxu0  ;;  %2668 = vmatpush.bf16.msrb.mxu3 %v4170_v28 }
 0x19f   :  { %v2149_v47 = vpop.f32.mrf.mxu3  ;;  %v2002_v32 = vadd.f32 %v2001_v36, %v4736_v44  ;;  %v2308_v13 = vpop.f32.mrf.mxu2  ;;  %v3324_v44 = vld [vmem:[%s5868_s0 + $0x384] sm:$0xf0] }
 0x1a0   :  { %v3327_v6 = vor.u32 %v4031_v42, %v3324_v44 }
 0x1a1   :  { %v2075_v43 = vadd.f32 %v2074_v24, %v2002_v32  ;;  %2267 = vmatmul.bf16.gmra.mxu1 %v3275_v19  ;;  %2486 = vmatmul.bf16.gmra.mxu0 %v3287_v53  ;;  %v3338_v24 = vld [vmem:[%s5868_s0 + $0x360] sm:$0xf]  ;;  %v3435_v19 = vor.u32 %v4064_v26, %v3434_v27  ;;  %v4044_v32 = vld [vmem:[%s5868_s0 + $0x3bc] sm:$0xf] }
 0x1a2   :  { %v3339_v17 = vor.u32 %v4039_v21, %v3338_v24  ;;  %v4169_v27 = vld [vmem:[%s5866_s1 + $0x2c0] sm:$0xff] }
 0x1a3   :  { %v2148_v12 = vadd.f32 %v2147_v55, %v2075_v43  ;;  %v3384_v55 = vld [vmem:[%s5868_s0 + $0x3f4] sm:$0xf0]  ;;  %v3376_v43 = vld [vmem:[%s5868_s0 + $0x3ec] sm:$0xf0]  ;;  %2669 = vmatpush.bf16.msrb.mxu3 %v4169_v27 }
 0x1a4   :  { %2418 = vmatmul.bf16.gmra.mxu3 %v3335_v63  ;;  %2350 = vmatmul.bf16.gmra.mxu2 %v3383_v50  ;;  %v3387_v16 = vor.u32 %v4045_v23, %v3384_v55  ;;  %v3390_v50 = vld [vmem:[%s5868_s0 + $0x3c8] sm:$0xf]  ;;  %v3486_v55 = vld [vmem:[%s5868_s0 + $0x490] sm:$0xf] }
 0x1a5   :  { %v5247_v33 = vadd.f32 %v2220_v41, %v2148_v12  ;;  %v4177_v41 = vld [vmem:[%s5866_s1 + $0x300] sm:$0xff]  ;;  %v4052_v12 = vld [vmem:[%s5868_s0 + $0x3f8] sm:$0xf0] }
 0x1a6   :  { %v2003_v60 = vpop.f32.mrf.mxu1  ;;  %v2222_v39 = vpop.f32.mrf.mxu0  ;;  %2742 = vmatpush.bf16.msrb.mxu0 %v4177_v41  ;;  %v3391_v42 = vor.u32 %v4052_v12, %v3390_v50  ;;  %v4153_v12 = vld [vmem:[%s5866_s1 + $0x240] sm:$0xff] }
 0x1a7   :  { %v2379_v2 = vpop.f32.mrf.mxu3  ;;  %v2311_v51 = vpop.f32.mrf.mxu2  ;;  %v3379_v39 = vor.u32 %v4044_v32, %v3376_v43  ;;  %2523 = vmatpush.bf16.msrb.mxu1 %v4153_v12 }
 0x1ae   :  { %v2233_v61 = vpop.f32.mrf.mxu1  ;;  %v2452_v40 = vpop.f32.mrf.mxu0 }
 0x1af   :  { %v2381_v11 = vpop.f32.mrf.mxu3  ;;  %v2234_v49 = vadd.f32 %v2233_v61, %v4815_v56  ;;  %v2313_v5 = vpop.f32.mrf.mxu2 }
 0x1b1   :  { %v2307_v59 = vadd.f32 %v2306_v1, %v2234_v49  ;;  %2272 = vmatmul.bf16.gmra.mxu1 %v3327_v6  ;;  %2491 = vmatmul.bf16.gmra.mxu0 %v3339_v17  ;;  %v4077_v6 = vld [vmem:[%s5868_s0 + $0x4c0] sm:$0xf0] }
 0x1b2   :  { %v3487_v28 = vor.u32 %v4077_v6, %v3486_v55 }
 0x1b3   :  { %v2380_v53 = vadd.f32 %v2379_v2, %v2307_v59  ;;  %v3436_v2 = vld [vmem:[%s5868_s0 + $0x45c] sm:$0xf0] }
 0x1b4   :  { %2423 = vmatmul.bf16.gmra.mxu3 %v3387_v16  ;;  %2355 = vmatmul.bf16.gmra.mxu2 %v3435_v19  ;;  %v4161_v16 = vld [vmem:[%s5866_s1 + $0x280] sm:$0xff] }
 0x1b5   :  { %v5283_v47 = vadd.f32 %v2452_v40, %v2380_v53  ;;  %2596 = vmatpush.bf16.msrb.mxu2 %v4161_v16  ;;  %v4057_v19 = vld [vmem:[%s5868_s0 + $0x424] sm:$0xf]  ;;  %v3428_v53 = vld [vmem:[%s5868_s0 + $0x454] sm:$0xf0]  ;;  %v4078_v16 = vld [vmem:[%s5868_s0 + $0x4c8] sm:$0xf0] }
 0x1b6   :  { %v2235_v63 = vpop.f32.mrf.mxu1  ;;  %v2454_v56 = vpop.f32.mrf.mxu0 }
 0x1b7   :  { %v2384_v36 = vpop.f32.mrf.mxu3  ;;  %v2236_v48 = vadd.f32 %v2235_v63, %v4842_v20  ;;  %v2316_v58 = vpop.f32.mrf.mxu2  ;;  %v4071_v63 = vld [vmem:[%s5868_s0 + $0x494] sm:$0xf] }
 0x1b9   :  { %v2309_v1 = vadd.f32 %v2308_v13, %v2236_v48  ;;  %v4058_v13 = vld [vmem:[%s5868_s0 + $0x42c] sm:$0xf] }
 0x1ba   :  { %v3439_v23 = vor.u32 %v4058_v13, %v3436_v2 }
 0x1bb   :  { %v2382_v20 = vadd.f32 %v2381_v11, %v2309_v1  ;;  %v3431_v1 = vor.u32 %v4057_v19, %v3428_v53 }
 0x1bd   :  { %v5307_v60 = vadd.f32 %v2454_v56, %v2382_v20  ;;  %v3488_v56 = vld [vmem:[%s5868_s0 + $0x4c4] sm:$0xf0] }
 0x1be   :  { %v2238_v24 = vpop.f32.mrf.mxu1  ;;  %v2457_v21 = vpop.f32.mrf.mxu0  ;;  %v3491_v2 = vor.u32 %v4071_v63, %v3488_v56 }
 0x1bf   :  { %v2386_v44 = vpop.f32.mrf.mxu3  ;;  %v2239_v17 = vadd.f32 %v2238_v24, %v4852_v34  ;;  %v2318_v11 = vpop.f32.mrf.mxu2 }
 0x1c1   :  { %v2312_v15 = vadd.f32 %v2311_v51, %v2239_v17  ;;  %2277 = vmatmul.bf16.gmra.mxu1 %v3379_v39  ;;  %2496 = vmatmul.bf16.gmra.mxu0 %v3391_v42 }
 0x1c3   :  { %v2385_v38 = vadd.f32 %v2384_v36, %v2312_v15  ;;  %v3442_v36 = vld [vmem:[%s5868_s0 + $0x430] sm:$0xf] }
 0x1c4   :  { %2428 = vmatmul.bf16.gmra.mxu3 %v3439_v23  ;;  %2360 = vmatmul.bf16.gmra.mxu2 %v3487_v28 }
 0x1c5   :  { %v5316_v61 = vadd.f32 %v2457_v21, %v2385_v38 }
 0x1c6   :  { %v2240_v34 = vpop.f32.mrf.mxu1  ;;  %v2459_v26 = vpop.f32.mrf.mxu0 }
 0x1c7   :  { %v2389_v40 = vpop.f32.mrf.mxu3  ;;  %v2241_v51 = vadd.f32 %v2240_v34, %v4883_v8  ;;  %v2321_v49 = vpop.f32.mrf.mxu2  ;;  %v4065_v8 = vld [vmem:[%s5868_s0 + $0x460] sm:$0xf0] }
 0x1c8   :  { %v3443_v32 = vor.u32 %v4065_v8, %v3442_v36  ;;  %v2930_v36 = vld [vmem:[%s5868_s0 + $0x28] sm:$0xf]  ;;  %v3936_v8 = vld [vmem:[%s5868_s0 + $0x58] sm:$0xf0] }
 0x1c9   :  { %v2314_v59 = vadd.f32 %v2313_v5, %v2241_v51  ;;  %v186_v5 = vld [vmem:[%s5868_s0 + $0x4f8] sm:$0xff]  ;;  %v2931_v56 = vor.u32 %v3936_v8, %v2930_v36  ;;  %v2938_v8 = vld [vmem:[%s5868_s0 + $0x30] sm:$0xf] }
 0x1ca   :  { %v887_v50 = vunpack.c.l.b16 %v186_v5  ;;  %v888_v27 = vunpack.c.h.b16 %v186_v5 }
 0x1cb   :  { %v2387_v41 = vadd.f32 %v2386_v44, %v2314_v59 }
 0x1cc   :  { %v1056_v24 = vpack.c.b16 %v887_v50, %v887_v50  ;;  %v1057_v53 = vpack.c.b16 %v888_v27, %v888_v27 }
 0x1cd   :  { %v5346_v48 = vadd.f32 %v2459_v26, %v2387_v41 }
 0x1ce   :  { %v2243_v20 = vpop.f32.mrf.mxu1  ;;  %v2462_v13 = vpop.f32.mrf.mxu0 }
 0x1cf   :  { %v2391_v43 = vpop.f32.mrf.mxu3  ;;  %v2244_v39 = vadd.f32 %v2243_v20, %v4894_v37  ;;  %v2323_v42 = vpop.f32.mrf.mxu2  ;;  %v4070_v37 = vld [vmem:[%s5868_s0 + $0x48c] sm:$0xf]  ;;  %v5381_v20 = vld [vmem:[%s5868_s0 + $0x500] sm:$0xff] }
 0x1d1   :  { %v2317_v44 = vadd.f32 %v2316_v58, %v2244_v39  ;;  %2282 = vmatmul.bf16.gmra.mxu1 %v3431_v1  ;;  %2501 = vmatmul.bf16.gmra.mxu0 %v3443_v32  ;;  %v3480_v58 = vld [vmem:[%s5868_s0 + $0x4bc] sm:$0xf0]  ;;  %v889_v39 = vunpack.c.l.b16 %v5381_v20 }
 0x1d3   :  { %v2390_v21 = vadd.f32 %v2389_v40, %v2317_v44  ;;  %v3494_v40 = vld [vmem:[%s5868_s0 + $0x498] sm:$0xf] }
 0x1d4   :  { %2433 = vmatmul.bf16.gmra.mxu3 %v3491_v2  ;;  %2365 = vmatmul.bf16.gmra.mxu2 %v1056_v24  ;;  %v3495_v26 = vor.u32 %v4078_v16, %v3494_v40  ;;  %v886_v2 = vunpack.c.h.b16 %v4934_v30  ;;  %v3930_v24 = vld [vmem:[%s5868_s0 + $0x2c] sm:$0xf]  ;;  %v2982_v30 = vld [vmem:[%s5868_s0 + $0x90] sm:$0xf] }
 0x1d5   :  { %v5352_v23 = vadd.f32 %v2462_v13, %v2390_v21  ;;  %v2932_v21 = vld [vmem:[%s5868_s0 + $0x5c] sm:$0xf0] }
 0x1d6   :  { %v2245_v6 = vpop.f32.mrf.mxu1  ;;  %v2464_v17 = vpop.f32.mrf.mxu0 }
 0x1d7   :  { %v2394_v55 = vpop.f32.mrf.mxu3  ;;  %v2246_v15 = vadd.f32 %v2245_v6, %v4910_v9  ;;  %v2326_v28 = vpop.f32.mrf.mxu2  ;;  %v1055_v6 = vpack.c.b16 %v886_v2, %v886_v2  ;;  %v3034_v2 = vld [vmem:[%s5868_s0 + $0xf8] sm:$0xf] }
 0x1d9   :  { %v2319_v38 = vadd.f32 %v2318_v11, %v2246_v15  ;;  %v3483_v11 = vor.u32 %v4070_v37, %v3480_v58  ;;  %v3949_v37 = vld [vmem:[%s5868_s0 + $0xc0] sm:$0xf0] }
 0x1da   :  { %v2983_v27 = vor.u32 %v3949_v37, %v2982_v30 }
 0x1db   :  { %v2392_v9 = vadd.f32 %v2391_v43, %v2319_v38  ;;  %v2935_v38 = vor.u32 %v3930_v24, %v2932_v21 }
 0x1dd   :  { %v5367_v34 = vadd.f32 %v2464_v17, %v2392_v9  ;;  %v1058_v17 = vpack.c.b16 %v889_v39, %v889_v39  ;;  %v3962_v39 = vld [vmem:[%s5868_s0 + $0x128] sm:$0xf0] }
 0x1de   :  { %v2248_v59 = vpop.f32.mrf.mxu1  ;;  %v2467_v19 = vpop.f32.mrf.mxu0 }
 0x1df   :  { %v2396_v51 = vpop.f32.mrf.mxu3  ;;  %v2249_v41 = vadd.f32 %v2248_v59, %v4923_v22  ;;  %v2328_v5 = vpop.f32.mrf.mxu2 }
 0x1e1   :  { %v2322_v63 = vadd.f32 %v2321_v49, %v2249_v41  ;;  %2287 = vmatmul.bf16.gmra.mxu1 %v3483_v11  ;;  %2506 = vmatmul.bf16.gmra.mxu0 %v3495_v26  ;;  %v3937_v41 = vld [vmem:[%s5868_s0 + $0x60] sm:$0xf0] }
 0x1e3   :  { %v2395_v1 = vadd.f32 %v2394_v55, %v2322_v63 }
 0x1e4   :  { %2438 = vmatmul.bf16.gmra.mxu3 %v1057_v53  ;;  %2597 = vmatmul.bf16.vlgmr.msrb.gmra.mxu2 %v2931_v56 }
 0x1e5   :  { %v5376_v32 = vadd.f32 %v2467_v19, %v2395_v1 }
 0x1e6   :  { %v2250_v50 = vpop.f32.mrf.mxu1  ;;  %v2469_v12 = vpop.f32.mrf.mxu0 }
 0x1e7   :  { %v2399_v43 = vpop.f32.mrf.mxu3  ;;  %v2251_v22 = vadd.f32 %v2250_v50, %v4944_v52  ;;  %v2331_v13 = vpop.f32.mrf.mxu2 }
 0x1e9   :  { %v2324_v49 = vadd.f32 %v2323_v42, %v2251_v22 }
 0x1eb   :  { %v2397_v44 = vadd.f32 %v2396_v51, %v2324_v49 }
 0x1ed   :  { %v5392_v55 = vadd.f32 %v2469_v12, %v2397_v44 }
 0x1ee   :  { %v2253_v15 = vpop.f32.mrf.mxu1  ;;  %v2472_v42 = vpop.f32.mrf.mxu0 }
 0x1ef   :  { %v2401_v52 = vpop.f32.mrf.mxu3  ;;  %v2254_v58 = vadd.f32 %v2253_v15, %v4956_v4  ;;  %v2333_v40 = vpop.f32.mrf.mxu2  ;;  %v3929_v4 = vld [vmem:[%s5868_s0 + $0x24] sm:$0xf] }
 0x1f1   :  { %v2327_v16 = vadd.f32 %v2326_v28, %v2254_v58  ;;  %2292 = vmatmul.bf16.gmra.mxu1 %v1055_v6  ;;  %2511 = vmatmul.bf16.gmra.mxu0 %v1058_v17  ;;  %v2924_v28 = vld [vmem:[%s5868_s0 + $0x54] sm:$0xf0]  ;;  %v3035_v6 = vor.u32 %v3962_v39, %v3034_v2 }
 0x1f2   :  { %v2927_v1 = vor.u32 %v3929_v4, %v2924_v28 }
 0x1f3   :  { %v2400_v9 = vadd.f32 %v2399_v43, %v2327_v16  ;;  %v2939_v43 = vor.u32 %v3937_v41, %v2938_v8  ;;  %v2990_v16 = vld [vmem:[%s5868_s0 + $0x98] sm:$0xf]  ;;  %v3086_v8 = vld [vmem:[%s5868_s0 + $0x160] sm:$0xf]  ;;  %v3975_v41 = vld [vmem:[%s5868_s0 + $0x190] sm:$0xf0] }
 0x1f4   :  { %2670 = vmatmul.bf16.vlgmr.msrb.gmra.mxu3 %v2935_v38  ;;  %2602 = vmatmul.bf16.gmra.mxu2 %v2983_v27  ;;  %v3950_v27 = vld [vmem:[%s5868_s0 + $0xc8] sm:$0xf0] }
 0x1f5   :  { %v5401_v11 = vadd.f32 %v2472_v42, %v2400_v9 }
 0x1f6   :  { %v2255_v51 = vpop.f32.mrf.mxu1  ;;  %v2474_v59 = vpop.f32.mrf.mxu0 }
 0x1f7   :  { %v2404_v26 = vpop.f32.mrf.mxu3  ;;  %v2256_v19 = vadd.f32 %v2255_v51, %v4977_v25  ;;  %v2336_v53 = vpop.f32.mrf.mxu2  ;;  %v3943_v25 = vld [vmem:[%s5868_s0 + $0x94] sm:$0xf] }
 0x1f9   :  { %v2329_v36 = vadd.f32 %v2328_v5, %v2256_v19  ;;  %v2984_v5 = vld [vmem:[%s5868_s0 + $0xc4] sm:$0xf0] }
 0x1fa   :  { %v2987_v49 = vor.u32 %v3943_v25, %v2984_v5 }
 0x1fb   :  { %v2402_v63 = vadd.f32 %v2401_v52, %v2329_v36 }
 0x1fd   :  { %v5422_v56 = vadd.f32 %v2474_v59, %v2402_v63  ;;  %v2991_v59 = vor.u32 %v3950_v27, %v2990_v16  ;;  %v3138_v16 = vld [vmem:[%s5868_s0 + $0x1c8] sm:$0xf]  ;;  %v3988_v27 = vld [vmem:[%s5868_s0 + $0x1f8] sm:$0xf0] }
 0x1fe   :  { %v2258_v12 = vpop.f32.mrf.mxu1  ;;  %v2477_v22 = vpop.f32.mrf.mxu0 }
 0x1ff   :  { %v2406_v50 = vpop.f32.mrf.mxu3  ;;  %v2259_v44 = vadd.f32 %v2258_v12, %v4995_v54  ;;  %v2338_v24 = vpop.f32.mrf.mxu2  ;;  %v3942_v54 = vld [vmem:[%s5868_s0 + $0x8c] sm:$0xf] }
 0x201   :  { %v2332_v21 = vadd.f32 %v2331_v13, %v2259_v44  ;;  %2524 = vmatmul.bf16.vlgmr.msrb.gmra.mxu1 %v2927_v1  ;;  %3912 = vmatmul.msk.bf16.vlgmr.msrb.gmra.mxu0 %vm1819_vm0, %v2939_v43  ;;  %v2976_v13 = vld [vmem:[%s5868_s0 + $0xbc] sm:$0xf0]  ;;  %v3087_v1 = vor.u32 %v3975_v41, %v3086_v8 }
 0x202   :  { %v2979_v51 = vor.u32 %v3942_v54, %v2976_v13 }
 0x203   :  { %v2405_v17 = vadd.f32 %v2404_v26, %v2332_v21  ;;  %v3042_v21 = vld [vmem:[%s5868_s0 + $0x100] sm:$0xf] }
 0x204   :  { %2675 = vmatmul.bf16.gmra.mxu3 %v2987_v49  ;;  %2607 = vmatmul.bf16.gmra.mxu2 %v3035_v6  ;;  %v3963_v6 = vld [vmem:[%s5868_s0 + $0x130] sm:$0xf0] }
 0x205   :  { %v5432_v52 = vadd.f32 %v2477_v22, %v2405_v17 }
 0x206   :  { %v2260_v42 = vpop.f32.mrf.mxu1  ;;  %v2479_v38 = vpop.f32.mrf.mxu0 }
 0x207   :  { %v2409_v15 = vpop.f32.mrf.mxu3  ;;  %v2261_v30 = vadd.f32 %v2260_v42, %v5016_v10  ;;  %v2341_v37 = vpop.f32.mrf.mxu2  ;;  %v3956_v10 = vld [vmem:[%s5868_s0 + $0xfc] sm:$0xf] }
 0x209   :  { %v2334_v58 = vadd.f32 %v2333_v40, %v2261_v30  ;;  %v3036_v40 = vld [vmem:[%s5868_s0 + $0x12c] sm:$0xf0] }
 0x20a   :  { %v3039_v28 = vor.u32 %v3956_v10, %v3036_v40 }
 0x20b   :  { %v2407_v9 = vadd.f32 %v2406_v50, %v2334_v58 }
 0x20d   :  { %v5453_v26 = vadd.f32 %v2479_v38, %v2407_v9  ;;  %v3043_v38 = vor.u32 %v3963_v6, %v3042_v21  ;;  %v3190_v21 = vld [vmem:[%s5868_s0 + $0x230] sm:$0xf]  ;;  %v4001_v6 = vld [vmem:[%s5868_s0 + $0x260] sm:$0xf0] }
 0x20e   :  { %v2263_v36 = vpop.f32.mrf.mxu1  ;;  %v2482_v4 = vpop.f32.mrf.mxu0 }
 0x20f   :  { %v2411_v19 = vpop.f32.mrf.mxu3  ;;  %v2264_v63 = vadd.f32 %v2263_v36, %v5025_v35  ;;  %v2343_v25 = vpop.f32.mrf.mxu2  ;;  %v3955_v35 = vld [vmem:[%s5868_s0 + $0xf4] sm:$0xf] }
 0x211   :  { %v2337_v5 = vadd.f32 %v2336_v53, %v2264_v63  ;;  %2529 = vmatmul.bf16.gmra.mxu1 %v2979_v51  ;;  %3913 = vmatmul.msk.bf16.gmra.mxu0 %vm1819_vm0, %v2991_v59  ;;  %v3028_v53 = vld [vmem:[%s5868_s0 + $0x124] sm:$0xf0]  ;;  %v3139_v51 = vor.u32 %v3988_v27, %v3138_v16 }
 0x212   :  { %v3031_v42 = vor.u32 %v3955_v35, %v3028_v53 }
 0x213   :  { %v2410_v43 = vadd.f32 %v2409_v15, %v2337_v5  ;;  %v3094_v5 = vld [vmem:[%s5868_s0 + $0x168] sm:$0xf] }
 0x214   :  { %2680 = vmatmul.bf16.gmra.mxu3 %v3039_v28  ;;  %2612 = vmatmul.bf16.gmra.mxu2 %v3087_v1  ;;  %v3976_v1 = vld [vmem:[%s5868_s0 + $0x198] sm:$0xf0] }
 0x215   :  { %v5463_v50 = vadd.f32 %v2482_v4, %v2410_v43 }
 0x216   :  { %v2265_v22 = vpop.f32.mrf.mxu1  ;;  %v2484_v49 = vpop.f32.mrf.mxu0 }
 0x217   :  { %v2414_v12 = vpop.f32.mrf.mxu3  ;;  %v2266_v2 = vadd.f32 %v2265_v22, %v5055_v0  ;;  %v2346_v39 = vpop.f32.mrf.mxu2  ;;  %v3969_v0 = vld [vmem:[%s5868_s0 + $0x164] sm:$0xf] }
 0x219   :  { %v2339_v44 = vadd.f32 %v2338_v24, %v2266_v2  ;;  %v3088_v24 = vld [vmem:[%s5868_s0 + $0x194] sm:$0xf0] }
 0x21a   :  { %v3091_v13 = vor.u32 %v3969_v0, %v3088_v24 }
 0x21b   :  { %v2412_v17 = vadd.f32 %v2411_v19, %v2339_v44 }
 0x21d   :  { %v5484_v15 = vadd.f32 %v2484_v49, %v2412_v17  ;;  %v3095_v49 = vor.u32 %v3976_v1, %v3094_v5  ;;  %v3242_v5 = vld [vmem:[%s5868_s0 + $0x298] sm:$0xf]  ;;  %v4014_v1 = vld [vmem:[%s5868_s0 + $0x2c8] sm:$0xf0] }
 0x21e   :  { %v2268_v58 = vpop.f32.mrf.mxu1  ;;  %v2487_v54 = vpop.f32.mrf.mxu0 }
 0x21f   :  { %v2416_v30 = vpop.f32.mrf.mxu3  ;;  %v2269_v9 = vadd.f32 %v2268_v58, %v5067_v46  ;;  %v2348_v10 = vpop.f32.mrf.mxu2  ;;  %v3968_v46 = vld [vmem:[%s5868_s0 + $0x15c] sm:$0xf] }
 0x221   :  { %v2342_v40 = vadd.f32 %v2341_v37, %v2269_v9  ;;  %2534 = vmatmul.bf16.gmra.mxu1 %v3031_v42  ;;  %3914 = vmatmul.msk.bf16.gmra.mxu0 %vm1819_vm0, %v3043_v38  ;;  %v3080_v37 = vld [vmem:[%s5868_s0 + $0x18c] sm:$0xf0]  ;;  %v3191_v42 = vor.u32 %v4001_v6, %v3190_v21 }
 0x222   :  { %v3083_v22 = vor.u32 %v3968_v46, %v3080_v37 }
 0x223   :  { %v2415_v59 = vadd.f32 %v2414_v12, %v2342_v40  ;;  %v3146_v40 = vld [vmem:[%s5868_s0 + $0x1d0] sm:$0xf] }
 0x224   :  { %2685 = vmatmul.bf16.gmra.mxu3 %v3091_v13  ;;  %2617 = vmatmul.bf16.gmra.mxu2 %v3139_v51  ;;  %v3989_v51 = vld [vmem:[%s5868_s0 + $0x200] sm:$0xf0] }
 0x225   :  { %v5494_v19 = vadd.f32 %v2487_v54, %v2415_v59 }
 0x226   :  { %v2270_v4 = vpop.f32.mrf.mxu1  ;;  %v2489_v28 = vpop.f32.mrf.mxu0 }
 0x227   :  { %v2419_v36 = vpop.f32.mrf.mxu3  ;;  %v2271_v8 = vadd.f32 %v2270_v4, %v5088_v7  ;;  %v2351_v41 = vpop.f32.mrf.mxu2  ;;  %v3982_v7 = vld [vmem:[%s5868_s0 + $0x1cc] sm:$0xf] }
 0x229   :  { %v2344_v63 = vadd.f32 %v2343_v25, %v2271_v8  ;;  %v3140_v25 = vld [vmem:[%s5868_s0 + $0x1fc] sm:$0xf0] }
 0x22a   :  { %v3143_v53 = vor.u32 %v3982_v7, %v3140_v25 }
 0x22b   :  { %v2417_v43 = vadd.f32 %v2416_v30, %v2344_v63 }
 0x22d   :  { %v5515_v12 = vadd.f32 %v2489_v28, %v2417_v43  ;;  %v3147_v28 = vor.u32 %v3989_v51, %v3146_v40  ;;  %v3294_v40 = vld [vmem:[%s5868_s0 + $0x300] sm:$0xf]  ;;  %v4027_v51 = vld [vmem:[%s5868_s0 + $0x330] sm:$0xf0] }
 0x22e   :  { %v2273_v44 = vpop.f32.mrf.mxu1  ;;  %v2492_v35 = vpop.f32.mrf.mxu0 }
 0x22f   :  { %v2421_v2 = vpop.f32.mrf.mxu3  ;;  %v2274_v17 = vadd.f32 %v2273_v44, %v5103_v62  ;;  %v2353_v0 = vpop.f32.mrf.mxu2  ;;  %v3981_v62 = vld [vmem:[%s5868_s0 + $0x1c4] sm:$0xf] }
 0x231   :  { %v2347_v24 = vadd.f32 %v2346_v39, %v2274_v17  ;;  %2539 = vmatmul.bf16.gmra.mxu1 %v3083_v22  ;;  %3915 = vmatmul.msk.bf16.gmra.mxu0 %vm1819_vm0, %v3095_v49  ;;  %v3132_v39 = vld [vmem:[%s5868_s0 + $0x1f4] sm:$0xf0]  ;;  %v3243_v22 = vor.u32 %v4014_v1, %v3242_v5 }
 0x232   :  { %v3135_v4 = vor.u32 %v3981_v62, %v3132_v39 }
 0x233   :  { %v2420_v38 = vadd.f32 %v2419_v36, %v2347_v24  ;;  %v3198_v24 = vld [vmem:[%s5868_s0 + $0x238] sm:$0xf] }
 0x234   :  { %2690 = vmatmul.bf16.gmra.mxu3 %v3143_v53  ;;  %2622 = vmatmul.bf16.gmra.mxu2 %v3191_v42  ;;  %v4002_v42 = vld [vmem:[%s5868_s0 + $0x268] sm:$0xf0] }
 0x235   :  { %v5525_v30 = vadd.f32 %v2492_v35, %v2420_v38 }
 0x236   :  { %v2275_v54 = vpop.f32.mrf.mxu1  ;;  %v2494_v13 = vpop.f32.mrf.mxu0 }
 0x237   :  { %v2424_v58 = vpop.f32.mrf.mxu3  ;;  %v2276_v16 = vadd.f32 %v2275_v54, %v5127_v29  ;;  %v2356_v27 = vpop.f32.mrf.mxu2  ;;  %v3995_v29 = vld [vmem:[%s5868_s0 + $0x234] sm:$0xf] }
 0x239   :  { %v2349_v9 = vadd.f32 %v2348_v10, %v2276_v16  ;;  %v3192_v10 = vld [vmem:[%s5868_s0 + $0x264] sm:$0xf0] }
 0x23a   :  { %v3195_v37 = vor.u32 %v3995_v29, %v3192_v10 }
 0x23b   :  { %v2422_v59 = vadd.f32 %v2421_v2, %v2349_v9 }
 0x23d   :  { %v5546_v36 = vadd.f32 %v2494_v13, %v2422_v59  ;;  %v3199_v13 = vor.u32 %v4002_v42, %v3198_v24  ;;  %v3346_v24 = vld [vmem:[%s5868_s0 + $0x368] sm:$0xf]  ;;  %v4040_v42 = vld [vmem:[%s5868_s0 + $0x398] sm:$0xf0] }
 0x23e   :  { %v2278_v63 = vpop.f32.mrf.mxu1  ;;  %v2497_v46 = vpop.f32.mrf.mxu0 }
 0x23f   :  { %v2426_v8 = vpop.f32.mrf.mxu3  ;;  %v2279_v43 = vadd.f32 %v2278_v63, %v5136_v57  ;;  %v2358_v7 = vpop.f32.mrf.mxu2  ;;  %v3994_v57 = vld [vmem:[%s5868_s0 + $0x22c] sm:$0xf] }
 0x241   :  { %v2352_v25 = vadd.f32 %v2351_v41, %v2279_v43  ;;  %2544 = vmatmul.bf16.gmra.mxu1 %v3135_v4  ;;  %3916 = vmatmul.msk.bf16.gmra.mxu0 %vm1819_vm0, %v3147_v28  ;;  %v3184_v41 = vld [vmem:[%s5868_s0 + $0x25c] sm:$0xf0]  ;;  %v3295_v4 = vor.u32 %v4027_v51, %v3294_v40 }
 0x242   :  { %v3187_v54 = vor.u32 %v3994_v57, %v3184_v41 }
 0x243   :  { %v2425_v49 = vadd.f32 %v2424_v58, %v2352_v25  ;;  %v3250_v25 = vld [vmem:[%s5868_s0 + $0x2a0] sm:$0xf] }
 0x244   :  { %2695 = vmatmul.bf16.gmra.mxu3 %v3195_v37  ;;  %2627 = vmatmul.bf16.gmra.mxu2 %v3243_v22  ;;  %v4015_v22 = vld [vmem:[%s5868_s0 + $0x2d0] sm:$0xf0] }
 0x245   :  { %v5556_v2 = vadd.f32 %v2497_v46, %v2425_v49 }
 0x246   :  { %v2280_v35 = vpop.f32.mrf.mxu1  ;;  %v2499_v53 = vpop.f32.mrf.mxu0 }
 0x247   :  { %v2429_v44 = vpop.f32.mrf.mxu3  ;;  %v2281_v21 = vadd.f32 %v2280_v35, %v5160_v18  ;;  %v2361_v6 = vpop.f32.mrf.mxu2  ;;  %v4008_v18 = vld [vmem:[%s5868_s0 + $0x29c] sm:$0xf] }
 0x249   :  { %v2354_v17 = vadd.f32 %v2353_v0, %v2281_v21  ;;  %v3244_v0 = vld [vmem:[%s5868_s0 + $0x2cc] sm:$0xf0] }
 0x24a   :  { %v3247_v39 = vor.u32 %v4008_v18, %v3244_v0 }
 0x24b   :  { %v2427_v38 = vadd.f32 %v2426_v8, %v2354_v17 }
 0x24d   :  { %v5577_v58 = vadd.f32 %v2499_v53, %v2427_v38  ;;  %v3251_v53 = vor.u32 %v4015_v22, %v3250_v25  ;;  %v3398_v25 = vld [vmem:[%s5868_s0 + $0x3d0] sm:$0xf]  ;;  %v4053_v22 = vld [vmem:[%s5868_s0 + $0x400] sm:$0xf0] }
 0x24e   :  { %v2283_v9 = vpop.f32.mrf.mxu1  ;;  %v2502_v62 = vpop.f32.mrf.mxu0 }
 0x24f   :  { %v2431_v16 = vpop.f32.mrf.mxu3  ;;  %v2284_v59 = vadd.f32 %v2283_v9, %v5175_v31  ;;  %v2363_v29 = vpop.f32.mrf.mxu2  ;;  %v4007_v31 = vld [vmem:[%s5868_s0 + $0x294] sm:$0xf] }
 0x251   :  { %v2357_v10 = vadd.f32 %v2356_v27, %v2284_v59  ;;  %2549 = vmatmul.bf16.gmra.mxu1 %v3187_v54  ;;  %3917 = vmatmul.msk.bf16.gmra.mxu0 %vm1819_vm0, %v3199_v13  ;;  %v3236_v27 = vld [vmem:[%s5868_s0 + $0x2c4] sm:$0xf0]  ;;  %v3347_v54 = vor.u32 %v4040_v42, %v3346_v24  ;;  %v4033_v42 = vld [vmem:[%s5868_s0 + $0x364] sm:$0xf] }
 0x252   :  { %v3239_v35 = vor.u32 %v4007_v31, %v3236_v27 }
 0x253   :  { %v2430_v28 = vadd.f32 %v2429_v44, %v2357_v10  ;;  %v3302_v10 = vld [vmem:[%s5868_s0 + $0x308] sm:$0xf] }
 0x254   :  { %2700 = vmatmul.bf16.gmra.mxu3 %v3247_v39  ;;  %2632 = vmatmul.bf16.gmra.mxu2 %v3295_v4  ;;  %v4028_v4 = vld [vmem:[%s5868_s0 + $0x338] sm:$0xf0] }
 0x255   :  { %v5587_v8 = vadd.f32 %v2502_v62, %v2430_v28 }
 0x256   :  { %v2285_v46 = vpop.f32.mrf.mxu1  ;;  %v2504_v37 = vpop.f32.mrf.mxu0 }
 0x257   :  { %v2434_v63 = vpop.f32.mrf.mxu3  ;;  %v2286_v5 = vadd.f32 %v2285_v46, %v5199_v3  ;;  %v2366_v1 = vpop.f32.mrf.mxu2  ;;  %v4021_v3 = vld [vmem:[%s5868_s0 + $0x304] sm:$0xf] }
 0x259   :  { %v2359_v43 = vadd.f32 %v2358_v7, %v2286_v5  ;;  %v3296_v7 = vld [vmem:[%s5868_s0 + $0x334] sm:$0xf0] }
 0x25a   :  { %v3299_v41 = vor.u32 %v4021_v3, %v3296_v7 }
 0x25b   :  { %v2432_v49 = vadd.f32 %v2431_v16, %v2359_v43 }
 0x25d   :  { %v5608_v44 = vadd.f32 %v2504_v37, %v2432_v49  ;;  %v3303_v37 = vor.u32 %v4028_v4, %v3302_v10 }
 0x25e   :  { %v2288_v17 = vpop.f32.mrf.mxu1  ;;  %v2507_v57 = vpop.f32.mrf.mxu0 }
 0x25f   :  { %v2436_v21 = vpop.f32.mrf.mxu3  ;;  %v2289_v38 = vadd.f32 %v2288_v17, %v5208_v14  ;;  %v2368_v18 = vpop.f32.mrf.mxu2  ;;  %v4020_v14 = vld [vmem:[%s5868_s0 + $0x2fc] sm:$0xf] }
 0x260   :  { %v4047_v18 = vld [vmem:[%s5868_s0 + $0x3d4] sm:$0xf] }
 0x261   :  { %v2362_v0 = vadd.f32 %v2361_v6, %v2289_v38  ;;  %2554 = vmatmul.bf16.gmra.mxu1 %v3239_v35  ;;  %3918 = vmatmul.msk.bf16.gmra.mxu0 %vm1819_vm0, %v3251_v53  ;;  %v3288_v6 = vld [vmem:[%s5868_s0 + $0x32c] sm:$0xf0]  ;;  %v3399_v35 = vor.u32 %v4053_v22, %v3398_v25  ;;  %v4041_v38 = vld [vmem:[%s5868_s0 + $0x3a0] sm:$0xf0]  ;;  %v3392_v22 = vld [vmem:[%s5868_s0 + $0x3fc] sm:$0xf0] }
 0x262   :  { %v3291_v46 = vor.u32 %v4020_v14, %v3288_v6  ;;  %v4066_v14 = vld [vmem:[%s5868_s0 + $0x468] sm:$0xf0] }
 0x263   :  { %v2435_v13 = vadd.f32 %v2434_v63, %v2362_v0  ;;  %v3400_v0 = vld [vmem:[%s5868_s0 + $0x404] sm:$0xf0] }
 0x264   :  { %2705 = vmatmul.bf16.gmra.mxu3 %v3299_v41  ;;  %2637 = vmatmul.bf16.gmra.mxu2 %v3347_v54 }
 0x265   :  { %v5618_v16 = vadd.f32 %v2507_v57, %v2435_v13 }
 0x266   :  { %v2290_v62 = vpop.f32.mrf.mxu1  ;;  %v2509_v39 = vpop.f32.mrf.mxu0 }
 0x267   :  { %v2439_v9 = vpop.f32.mrf.mxu3  ;;  %v2291_v40 = vadd.f32 %v2290_v62, %v5238_v45  ;;  %v2598_v51 = vpop.f32.mrf.mxu2  ;;  %v4034_v45 = vld [vmem:[%s5868_s0 + $0x36c] sm:$0xf] }
 0x269   :  { %v2364_v59 = vadd.f32 %v2363_v29, %v2291_v40  ;;  %v3348_v29 = vld [vmem:[%s5868_s0 + $0x39c] sm:$0xf0]  ;;  %v3403_v40 = vor.u32 %v4047_v18, %v3400_v0  ;;  %v4079_v18 = vld [vmem:[%s5868_s0 + $0x4d0] sm:$0xf0] }
 0x26a   :  { %v3351_v27 = vor.u32 %v4034_v45, %v3348_v29 }
 0x26b   :  { %v2437_v28 = vadd.f32 %v2436_v21, %v2364_v59  ;;  %v3450_v59 = vld [vmem:[%s5868_s0 + $0x438] sm:$0xf] }
 0x26d   :  { %v5639_v63 = vadd.f32 %v2509_v39, %v2437_v28  ;;  %v3451_v28 = vor.u32 %v4066_v14, %v3450_v59 }
 0x26e   :  { %v2293_v43 = vpop.f32.mrf.mxu1  ;;  %v2512_v31 = vpop.f32.mrf.mxu0 }
 0x26f   :  { %v2441_v5 = vpop.f32.mrf.mxu3  ;;  %v2294_v49 = vadd.f32 %v2293_v43, %v5247_v33  ;;  %v2600_v3 = vpop.f32.mrf.mxu2  ;;  %v3340_v33 = vld [vmem:[%s5868_s0 + $0x394] sm:$0xf0] }
 0x270   :  { %v3343_v54 = vor.u32 %v4033_v42, %v3340_v33 }
 0x271   :  { %v2367_v7 = vadd.f32 %v2366_v1, %v2294_v49  ;;  %2559 = vmatmul.bf16.gmra.mxu1 %v3291_v46  ;;  %3919 = vmatmul.msk.bf16.gmra.mxu0 %vm1819_vm0, %v3303_v37  ;;  %v3354_v1 = vld [vmem:[%s5868_s0 + $0x370] sm:$0xf]  ;;  %v3406_v49 = vld [vmem:[%s5868_s0 + $0x3d8] sm:$0xf] }
 0x272   :  { %v3355_v13 = vor.u32 %v4041_v38, %v3354_v1  ;;  %v3502_v38 = vld [vmem:[%s5868_s0 + $0x4a0] sm:$0xf] }
 0x273   :  { %v2440_v53 = vadd.f32 %v2439_v9, %v2367_v7  ;;  %v4060_v7 = vld [vmem:[%s5868_s0 + $0x43c] sm:$0xf] }
 0x274   :  { %2710 = vmatmul.bf16.gmra.mxu3 %v3351_v27  ;;  %2642 = vmatmul.bf16.gmra.mxu2 %v3399_v35  ;;  %v3452_v35 = vld [vmem:[%s5868_s0 + $0x46c] sm:$0xf0] }
 0x275   :  { %v5649_v21 = vadd.f32 %v2512_v31, %v2440_v53  ;;  %v3455_v1 = vor.u32 %v4060_v7, %v3452_v35 }
 0x276   :  { %v2295_v57 = vpop.f32.mrf.mxu1  ;;  %v2514_v41 = vpop.f32.mrf.mxu0 }
 0x277   :  { %v2671_v17 = vpop.f32.mrf.mxu3  ;;  %v2603_v24 = vpop.f32.mrf.mxu2 }
 0x27e   :  { %v2525_v62 = vpop.f32.mrf.mxu1  ;;  %v2744_v39 = vpop.f32.mrf.mxu0 }
 0x27f   :  { %v2673_v9 = vpop.f32.mrf.mxu3  ;;  %v2526_v6 = vadd.f32 %v2525_v62, %v5283_v47  ;;  %v2605_v10 = vpop.f32.mrf.mxu2 }
 0x281   :  { %v2599_v4 = vadd.f32 %v2598_v51, %v2526_v6  ;;  %2564 = vmatmul.bf16.gmra.mxu1 %v3343_v54  ;;  %3920 = vmatmul.msk.bf16.gmra.mxu0 %vm1819_vm0, %v3355_v13  ;;  %v4046_v51 = vld [vmem:[%s5868_s0 + $0x3cc] sm:$0xf] }
 0x283   :  { %v2672_v45 = vadd.f32 %v2671_v17, %v2599_v4  ;;  %v3395_v17 = vor.u32 %v4046_v51, %v3392_v22 }
 0x284   :  { %2715 = vmatmul.bf16.gmra.mxu3 %v3403_v40  ;;  %2647 = vmatmul.bf16.gmra.mxu2 %v3451_v28 }
 0x285   :  { %v2745_v29 = vadd.f32 %v2744_v39, %v2672_v45  ;;  %v3503_v39 = vor.u32 %v4079_v18, %v3502_v38 }
 0x286   :  { %v2527_v37 = vpop.f32.mrf.mxu1  ;;  %v2746_v5 = vpop.f32.mrf.mxu0 }
 0x287   :  { %v2676_v46 = vpop.f32.mrf.mxu3  ;;  %v2808_v43 = vmax.f32 %v2745_v29, 0.0  ;;  %v2528_v31 = vadd.f32 %v2527_v37, %v5307_v60  ;;  %v2608_v27 = vpop.f32.mrf.mxu2  ;;  %v4054_v60 = vld [vmem:[%s5868_s0 + $0x408] sm:$0xf0]  ;;  %v4059_v37 = vld [vmem:[%s5868_s0 + $0x434] sm:$0xf] }
 0x288   :  { %v3407_v57 = vor.u32 %v4054_v60, %v3406_v49 }
 0x289   :  { %v2833_v25 = vpack.c.bf16 %v2808_v43, %v2808_v43  ;;  %v2601_v47 = vadd.f32 %v2600_v3, %v2528_v31  ;;  %v4067_v43 = vld [vmem:[%s5868_s0 + $0x470] sm:$0xf0]  ;;  %v4073_v31 = vld [vmem:[%s5868_s0 + $0x4a4] sm:$0xf] }
 0x28b   :  { %2859 = vst.msk [vmem:[%s5869_s3] sm:$0xf] %vm2858_vm1, %v2833_v25  ;;  %v2674_v3 = vadd.f32 %v2673_v9, %v2601_v47  ;;  %v3504_v25 = vld [vmem:[%s5868_s0 + $0x4d4] sm:$0xf0] }
 0x28c   :  { %v3507_v35 = vor.u32 %v4073_v31, %v3504_v25 }
 0x28d   :  { %v2747_v53 = vadd.f32 %v2746_v5, %v2674_v3  ;;  %v3444_v5 = vld [vmem:[%s5868_s0 + $0x464] sm:$0xf0] }
 0x28e   :  { %v2530_v42 = vpop.f32.mrf.mxu1  ;;  %v2749_v33 = vpop.f32.mrf.mxu0  ;;  %v3447_v51 = vor.u32 %v4059_v37, %v3444_v5 }
 0x28f   :  { %v2678_v41 = vpop.f32.mrf.mxu3  ;;  %v2809_v0 = vmax.f32 %v2747_v53, 0.0  ;;  %v2531_v54 = vadd.f32 %v2530_v42, %v5316_v61  ;;  %v2610_v13 = vpop.f32.mrf.mxu2 }
 0x291   :  { %v2834_v9 = vpack.c.bf16 %v2809_v0, %v2809_v0  ;;  %v2604_v62 = vadd.f32 %v2603_v24, %v2531_v54  ;;  %2569 = vmatmul.bf16.gmra.mxu1 %v3395_v17  ;;  %3921 = vmatmul.msk.bf16.gmra.mxu0 %vm1819_vm0, %v3407_v57 }
 0x293   :  { %2860 = vst.msk [vmem:[%s5869_s3 + $0x4] sm:$0xf] %vm2858_vm1, %v2834_v9  ;;  %v2677_v40 = vadd.f32 %v2676_v46, %v2604_v62  ;;  %v3458_v46 = vld [vmem:[%s5868_s0 + $0x440] sm:$0xf] }
 0x294   :  { %2720 = vmatmul.bf16.gmra.mxu3 %v3455_v1  ;;  %2652 = vmatmul.bf16.gmra.mxu2 %v3503_v39  ;;  %v3459_v22 = vor.u32 %v4067_v43, %v3458_v46 }
 0x295   :  { %v2750_v59 = vadd.f32 %v2749_v33, %v2677_v40  ;;  %v4072_v40 = vld [vmem:[%s5868_s0 + $0x49c] sm:$0xf] }
 0x296   :  { %v2532_v6 = vpop.f32.mrf.mxu1  ;;  %v2751_v4 = vpop.f32.mrf.mxu0 }
 0x297   :  { %v2681_v14 = vpop.f32.mrf.mxu3  ;;  %v2810_v61 = vmax.f32 %v2750_v59, 0.0  ;;  %v2533_v28 = vadd.f32 %v2532_v6, %v5346_v48  ;;  %v2613_v24 = vpop.f32.mrf.mxu2  ;;  %v188_v48 = vld [vmem:[%s5868_s0 + $0x508] sm:$0xff]  ;;  %v3496_v59 = vld [vmem:[%s5868_s0 + $0x4cc] sm:$0xf0]  ;;  %v4080_v6 = vld [vmem:[%s5868_s0 + $0x4d8] sm:$0xf0] }
 0x298   :  { %v891_v60 = vunpack.c.l.b16 %v188_v48 }
 0x299   :  { %v2835_v45 = vpack.c.bf16 %v2810_v61, %v2810_v61  ;;  %v2606_v29 = vadd.f32 %v2605_v10, %v2533_v28  ;;  %v3499_v61 = vor.u32 %v4072_v40, %v3496_v59 }
 0x29a   :  { %v1060_v33 = vpack.c.b16 %v891_v60, %v891_v60 }
 0x29b   :  { %2861 = vst.msk [vmem:[%s5869_s3 + $0x8] sm:$0xf] %vm2858_vm1, %v2835_v45  ;;  %v2679_v10 = vadd.f32 %v2678_v41, %v2606_v29 }
 0x29d   :  { %v2752_v47 = vadd.f32 %v2751_v4, %v2679_v10 }
 0x29e   :  { %v2535_v3 = vpop.f32.mrf.mxu1  ;;  %v2754_v7 = vpop.f32.mrf.mxu0 }
 0x29f   :  { %v2683_v49 = vpop.f32.mrf.mxu3  ;;  %v2811_v53 = vmax.f32 %v2752_v47, 0.0  ;;  %v2536_v17 = vadd.f32 %v2535_v3, %v5352_v23  ;;  %v2615_v57 = vpop.f32.mrf.mxu2 }
 0x2a1   :  { %v2836_v41 = vpack.c.bf16 %v2811_v53, %v2811_v53  ;;  %v2609_v42 = vadd.f32 %v2608_v27, %v2536_v17  ;;  %2574 = vmatmul.bf16.gmra.mxu1 %v3447_v51  ;;  %3922 = vmatmul.msk.bf16.gmra.mxu0 %vm1819_vm0, %v3459_v22  ;;  %v890_v53 = vunpack.c.h.b16 %v5381_v20 }
 0x2a3   :  { %2862 = vst.msk [vmem:[%s5869_s3 + $0xc] sm:$0xf] %vm2858_vm1, %v2836_v41  ;;  %v2682_v1 = vadd.f32 %v2681_v14, %v2609_v42  ;;  %v3510_v14 = vld [vmem:[%s5868_s0 + $0x4a8] sm:$0xf] }
 0x2a4   :  { %2725 = vmatmul.bf16.gmra.mxu3 %v3507_v35  ;;  %2657 = vmatmul.bf16.gmra.mxu2 %v1060_v33  ;;  %v3511_v28 = vor.u32 %v4080_v6, %v3510_v14  ;;  %v1059_v33 = vpack.c.b16 %v890_v53, %v890_v53 }
 0x2a5   :  { %v2755_v38 = vadd.f32 %v2754_v7, %v2682_v1 }
 0x2a6   :  { %v2537_v0 = vpop.f32.mrf.mxu1  ;;  %v2756_v54 = vpop.f32.mrf.mxu0 }
 0x2a7   :  { %v2686_v18 = vpop.f32.mrf.mxu3  ;;  %v2812_v23 = vmax.f32 %v2755_v38, 0.0  ;;  %v2538_v9 = vadd.f32 %v2537_v0, %v5367_v34  ;;  %v2618_v27 = vpop.f32.mrf.mxu2  ;;  %v892_v34 = vunpack.c.h.b16 %v188_v48 }
 0x2a9   :  { %v2837_v62 = vpack.c.bf16 %v2812_v23, %v2812_v23  ;;  %v2611_v39 = vadd.f32 %v2610_v13, %v2538_v9  ;;  %v1061_v5 = vpack.c.b16 %v892_v34, %v892_v34 }
 0x2ab   :  { %2863 = vst.msk [vmem:[%s5869_s3 + $0x10] sm:$0xf] %vm2858_vm1, %v2837_v62  ;;  %v2684_v13 = vadd.f32 %v2683_v49, %v2611_v39 }
 0x2ad   :  { %v2757_v4 = vadd.f32 %v2756_v54, %v2684_v13 }
 0x2ae   :  { %v2540_v29 = vpop.f32.mrf.mxu1  ;;  %v2759_v37 = vpop.f32.mrf.mxu0 }
 0x2af   :  { %v2688_v45 = vpop.f32.mrf.mxu3  ;;  %v2813_v46 = vmax.f32 %v2757_v4, 0.0  ;;  %v2541_v43 = vadd.f32 %v2540_v29, %v5376_v32  ;;  %v2620_v10 = vpop.f32.mrf.mxu2  ;;  %v189_v32 = vld [vmem:[%s5868_s0 + $0x510] sm:$0xf] }
 0x2b0   :  { %v893_v17 = vunpack.c.l.b16 %v189_v32 }
 0x2b1   :  { %v2838_v31 = vpack.c.bf16 %v2813_v46, %v2813_v46  ;;  %v2614_v25 = vadd.f32 %v2613_v24, %v2541_v43  ;;  %2579 = vmatmul.bf16.gmra.mxu1 %v3499_v61  ;;  %3923 = vmatmul.msk.bf16.gmra.mxu0 %vm1819_vm0, %v3511_v28 }
 0x2b2   :  { %v1062_v1 = vpack.c.b16 %v893_v17, %v893_v17 }
 0x2b3   :  { %2864 = vst.msk [vmem:[%s5869_s3 + $0x14] sm:$0xf] %vm2858_vm1, %v2838_v31  ;;  %v2687_v48 = vadd.f32 %v2686_v18, %v2614_v25 }
 0x2b4   :  { %2730 = vmatmul.bf16.gmra.mxu3 %v1061_v5 }
 0x2b5   :  { %v2760_v47 = vadd.f32 %v2759_v37, %v2687_v48 }
 0x2b6   :  { %v2542_v22 = vpop.f32.mrf.mxu1  ;;  %v2761_v49 = vpop.f32.mrf.mxu0 }
 0x2b7   :  { %v2691_v51 = vpop.f32.mrf.mxu3  ;;  %v2814_v60 = vmax.f32 %v2760_v47, 0.0  ;;  %v2543_v24 = vadd.f32 %v2542_v22, %v5392_v55  ;;  %v2623_v3 = vpop.f32.mrf.mxu2 }
 0x2b9   :  { %v2839_v7 = vpack.c.bf16 %v2814_v60, %v2814_v60  ;;  %v2616_v35 = vadd.f32 %v2615_v57, %v2543_v24 }
 0x2bb   :  { %2865 = vst.msk [vmem:[%s5869_s3 + $0x18] sm:$0xf] %vm2858_vm1, %v2839_v7  ;;  %v2689_v41 = vadd.f32 %v2688_v45, %v2616_v35 }
 0x2bd   :  { %v2762_v42 = vadd.f32 %v2761_v49, %v2689_v41 }
 0x2be   :  { %v2545_v18 = vpop.f32.mrf.mxu1  ;;  %v2764_v0 = vpop.f32.mrf.mxu0 }
 0x2bf   :  { %v2693_v38 = vpop.f32.mrf.mxu3  ;;  %v2815_v54 = vmax.f32 %v2762_v42, 0.0  ;;  %v2546_v55 = vadd.f32 %v2545_v18, %v5401_v11  ;;  %v2625_v23 = vpop.f32.mrf.mxu2 }
 0x2c1   :  { %v2840_v57 = vpack.c.bf16 %v2815_v54, %v2815_v54  ;;  %v2619_v9 = vadd.f32 %v2618_v27, %v2546_v55  ;;  %2584 = vmatmul.bf16.gmra.mxu1 %v1059_v33  ;;  %3924 = vmatmul.msk.bf16.gmra.mxu0 %vm1819_vm0, %v1062_v1 }
 0x2c3   :  { %2866 = vst.msk [vmem:[%s5869_s3 + $0x1c] sm:$0xf] %vm2858_vm1, %v2840_v57  ;;  %v2692_v20 = vadd.f32 %v2691_v51, %v2619_v9 }
 0x2c5   :  { %v2765_v62 = vadd.f32 %v2764_v0, %v2692_v20 }
 0x2c6   :  { %v2547_v40 = vpop.f32.mrf.mxu1  ;;  %v2766_v59 = vpop.f32.mrf.mxu0 }
 0x2c7   :  { %v2696_v39 = vpop.f32.mrf.mxu3  ;;  %v2816_v14 = vmax.f32 %v2765_v62, 0.0  ;;  %v2548_v6 = vadd.f32 %v2547_v40, %v5422_v56  ;;  %v2628_v11 = vpop.f32.mrf.mxu2 }
 0x2c9   :  { %v2841_v34 = vpack.c.bf16 %v2816_v14, %v2816_v14  ;;  %v2621_v13 = vadd.f32 %v2620_v10, %v2548_v6 }
 0x2cb   :  { %2867 = vst.msk [vmem:[%s5869_s3 + $0x20] sm:$0xf] %vm2858_vm1, %v2841_v34  ;;  %v2694_v27 = vadd.f32 %v2693_v38, %v2621_v13 }
 0x2cd   :  { %v2767_v4 = vadd.f32 %v2766_v59, %v2694_v27 }
 0x2ce   :  { %v2550_v28 = vpop.f32.mrf.mxu1  ;;  %v2769_v45 = vpop.f32.mrf.mxu0 }
 0x2cf   :  { %v2698_v61 = vpop.f32.mrf.mxu3  ;;  %v2817_v29 = vmax.f32 %v2767_v4, 0.0  ;;  %v2551_v37 = vadd.f32 %v2550_v28, %v5432_v52  ;;  %v2630_v5 = vpop.f32.mrf.mxu2 }
 0x2d1   :  { %v2842_v46 = vpack.c.bf16 %v2817_v29, %v2817_v29  ;;  %v2624_v43 = vadd.f32 %v2623_v3, %v2551_v37 }
 0x2d3   :  { %2868 = vst.msk [vmem:[%s5869_s3 + $0x24] sm:$0xf] %vm2858_vm1, %v2842_v46  ;;  %v2697_v56 = vadd.f32 %v2696_v39, %v2624_v43 }
 0x2d5   :  { %v2770_v10 = vadd.f32 %v2769_v45, %v2697_v56 }
 0x2d6   :  { %v2552_v25 = vpop.f32.mrf.mxu1  ;;  %v2771_v48 = vpop.f32.mrf.mxu0 }
 0x2d7   :  { %v2701_v31 = vpop.f32.mrf.mxu3  ;;  %v2818_v47 = vmax.f32 %v2770_v10, 0.0  ;;  %v2553_v51 = vadd.f32 %v2552_v25, %v5453_v26  ;;  %v2633_v22 = vpop.f32.mrf.mxu2 }
 0x2d9   :  { %v2843_v49 = vpack.c.bf16 %v2818_v47, %v2818_v47  ;;  %v2626_v32 = vadd.f32 %v2625_v23, %v2553_v51 }
 0x2db   :  { %2869 = vst.msk [vmem:[%s5869_s3 + $0x28] sm:$0xf] %vm2858_vm1, %v2843_v49  ;;  %v2699_v52 = vadd.f32 %v2698_v61, %v2626_v32 }
 0x2dd   :  { %v2772_v60 = vadd.f32 %v2771_v48, %v2699_v52 }
 0x2de   :  { %v2555_v3 = vpop.f32.mrf.mxu1  ;;  %v2774_v7 = vpop.f32.mrf.mxu0 }
 0x2df   :  { %v2703_v24 = vpop.f32.mrf.mxu3  ;;  %v2819_v35 = vmax.f32 %v2772_v60, 0.0  ;;  %v2556_v53 = vadd.f32 %v2555_v3, %v5463_v50  ;;  %v2635_v17 = vpop.f32.mrf.mxu2 }
 0x2e1   :  { %v2844_v41 = vpack.c.bf16 %v2819_v35, %v2819_v35  ;;  %v2629_v42 = vadd.f32 %v2628_v11, %v2556_v53 }
 0x2e3   :  { %2870 = vst.msk [vmem:[%s5869_s3 + $0x2c] sm:$0xf] %vm2858_vm1, %v2844_v41  ;;  %v2702_v26 = vadd.f32 %v2701_v31, %v2629_v42 }
 0x2e5   :  { %v2775_v33 = vadd.f32 %v2774_v7, %v2702_v26 }
 0x2e6   :  { %v2557_v38 = vpop.f32.mrf.mxu1  ;;  %v2776_v18 = vpop.f32.mrf.mxu0 }
 0x2e7   :  { %v2706_v1 = vpop.f32.mrf.mxu3  ;;  %v2820_v0 = vmax.f32 %v2775_v33, 0.0  ;;  %v2558_v54 = vadd.f32 %v2557_v38, %v5484_v15  ;;  %v2638_v55 = vpop.f32.mrf.mxu2 }
 0x2e9   :  { %v2845_v23 = vpack.c.bf16 %v2820_v0, %v2820_v0  ;;  %v2631_v57 = vadd.f32 %v2630_v5, %v2558_v54 }
 0x2eb   :  { %2871 = vst.msk [vmem:[%s5869_s3 + $0x30] sm:$0xf] %vm2858_vm1, %v2845_v23  ;;  %v2704_v50 = vadd.f32 %v2703_v24, %v2631_v57 }
 0x2ed   :  { %v2777_v9 = vadd.f32 %v2776_v18, %v2704_v50 }
 0x2ee   :  { %v2560_v62 = vpop.f32.mrf.mxu1  ;;  %v2779_v39 = vpop.f32.mrf.mxu0 }
 0x2ef   :  { %v2708_v20 = vpop.f32.mrf.mxu3  ;;  %v2821_v40 = vmax.f32 %v2777_v9, 0.0  ;;  %v2561_v59 = vadd.f32 %v2560_v62, %v5494_v19  ;;  %v2640_v14 = vpop.f32.mrf.mxu2 }
 0x2f1   :  { %v2846_v6 = vpack.c.bf16 %v2821_v40, %v2821_v40  ;;  %v2634_v11 = vadd.f32 %v2633_v22, %v2561_v59 }
 0x2f3   :  { %2872 = vst.msk [vmem:[%s5869_s3 + $0x34] sm:$0xf] %vm2858_vm1, %v2846_v6  ;;  %v2707_v15 = vadd.f32 %v2706_v1, %v2634_v11 }
 0x2f5   :  { %v2780_v34 = vadd.f32 %v2779_v39, %v2707_v15 }
 0x2f6   :  { %v2562_v27 = vpop.f32.mrf.mxu1  ;;  %v2781_v4 = vpop.f32.mrf.mxu0 }
 0x2f7   :  { %v2711_v13 = vpop.f32.mrf.mxu3  ;;  %v2822_v61 = vmax.f32 %v2780_v34, 0.0  ;;  %v2563_v28 = vadd.f32 %v2562_v27, %v5515_v12  ;;  %v2643_v45 = vpop.f32.mrf.mxu2 }
 0x2f9   :  { %v2847_v29 = vpack.c.bf16 %v2822_v61, %v2822_v61  ;;  %v2636_v37 = vadd.f32 %v2635_v17, %v2563_v28 }
 0x2fb   :  { %2873 = vst.msk [vmem:[%s5869_s3 + $0x38] sm:$0xf] %vm2858_vm1, %v2847_v29  ;;  %v2709_v19 = vadd.f32 %v2708_v20, %v2636_v37 }
 0x2fd   :  { %v2782_v5 = vadd.f32 %v2781_v4, %v2709_v19 }
 0x2fe   :  { %v2565_v43 = vpop.f32.mrf.mxu1  ;;  %v2784_v56 = vpop.f32.mrf.mxu0 }
 0x2ff   :  { %v2713_v46 = vpop.f32.mrf.mxu3  ;;  %v2823_v10 = vmax.f32 %v2782_v5, 0.0  ;;  %v2566_v31 = vadd.f32 %v2565_v43, %v5525_v30  ;;  %v2645_v25 = vpop.f32.mrf.mxu2 }
 0x301   :  { %v2848_v48 = vpack.c.bf16 %v2823_v10, %v2823_v10  ;;  %v2639_v47 = vadd.f32 %v2638_v55, %v2566_v31 }
 0x303   :  { %2874 = vst.msk [vmem:[%s5869_s3 + $0x3c] sm:$0xf] %vm2858_vm1, %v2848_v48  ;;  %v2712_v12 = vadd.f32 %v2711_v13, %v2639_v47 }
 0x305   :  { %v2785_v51 = vadd.f32 %v2784_v56, %v2712_v12 }
 0x306   :  { %v2567_v49 = vpop.f32.mrf.mxu1  ;;  %v2786_v32 = vpop.f32.mrf.mxu0 }
 0x307   :  { %v2716_v22 = vpop.f32.mrf.mxu3  ;;  %v2824_v52 = vmax.f32 %v2785_v51, 0.0  ;;  %v2568_v60 = vadd.f32 %v2567_v49, %v5546_v36  ;;  %v2648_v24 = vpop.f32.mrf.mxu2 }
 0x309   :  { %v2849_v3 = vpack.c.bf16 %v2824_v52, %v2824_v52  ;;  %v2641_v7 = vadd.f32 %v2640_v14, %v2568_v60 }
 0x30b   :  { %2875 = vst.msk [vmem:[%s5869_s3 + $0x40] sm:$0xf] %vm2858_vm1, %v2849_v3  ;;  %v2714_v30 = vadd.f32 %v2713_v46, %v2641_v7 }
 0x30d   :  { %v2787_v35 = vadd.f32 %v2786_v32, %v2714_v30 }
 0x30e   :  { %v2570_v17 = vpop.f32.mrf.mxu1  ;;  %v2789_v41 = vpop.f32.mrf.mxu0 }
 0x30f   :  { %v2718_v53 = vpop.f32.mrf.mxu3  ;;  %v2825_v42 = vmax.f32 %v2787_v35, 0.0  ;;  %v2571_v26 = vadd.f32 %v2570_v17, %v5556_v2  ;;  %v2650_v33 = vpop.f32.mrf.mxu2 }
 0x311   :  { %v2850_v1 = vpack.c.bf16 %v2825_v42, %v2825_v42  ;;  %v2644_v38 = vadd.f32 %v2643_v45, %v2571_v26 }
 0x313   :  { %2876 = vst.msk [vmem:[%s5869_s3 + $0x44] sm:$0xf] %vm2858_vm1, %v2850_v1  ;;  %v2717_v36 = vadd.f32 %v2716_v22, %v2644_v38 }
 0x315   :  { %v2790_v18 = vadd.f32 %v2789_v41, %v2717_v36 }
 0x316   :  { %v2572_v54 = vpop.f32.mrf.mxu1  ;;  %v2791_v55 = vpop.f32.mrf.mxu0 }
 0x317   :  { %v2721_v0 = vpop.f32.mrf.mxu3  ;;  %v2826_v23 = vmax.f32 %v2790_v18, 0.0  ;;  %v2573_v57 = vadd.f32 %v2572_v54, %v5577_v58  ;;  %v2653_v50 = vpop.f32.mrf.mxu2 }
 0x319   :  { %v2851_v9 = vpack.c.bf16 %v2826_v23, %v2826_v23  ;;  %v2646_v20 = vadd.f32 %v2645_v25, %v2573_v57 }
 0x31b   :  { %2877 = vst.msk [vmem:[%s5869_s3 + $0x48] sm:$0xf] %vm2858_vm1, %v2851_v9  ;;  %v2719_v2 = vadd.f32 %v2718_v53, %v2646_v20 }
 0x31d   :  { %v2792_v62 = vadd.f32 %v2791_v55, %v2719_v2 }
 0x31e   :  { %v2575_v40 = vpop.f32.mrf.mxu1  ;;  %v2794_v59 = vpop.f32.mrf.mxu0 }
 0x31f   :  { %v2723_v39 = vpop.f32.mrf.mxu3  ;;  %v2827_v14 = vmax.f32 %v2792_v62, 0.0  ;;  %v2576_v6 = vadd.f32 %v2575_v40, %v5587_v8  ;;  %v2655_v11 = vpop.f32.mrf.mxu2 }
 0x321   :  { %v2852_v15 = vpack.c.bf16 %v2827_v14, %v2827_v14  ;;  %v2649_v34 = vadd.f32 %v2648_v24, %v2576_v6 }
 0x323   :  { %2878 = vst.msk [vmem:[%s5869_s3 + $0x4c] sm:$0xf] %vm2858_vm1, %v2852_v15  ;;  %v2722_v58 = vadd.f32 %v2721_v0, %v2649_v34 }
 0x325   :  { %v2795_v13 = vadd.f32 %v2794_v59, %v2722_v58 }
 0x326   :  { %v2577_v4 = vpop.f32.mrf.mxu1  ;;  %v2796_v61 = vpop.f32.mrf.mxu0 }
 0x327   :  { %v2726_v27 = vpop.f32.mrf.mxu3  ;;  %v2828_v28 = vmax.f32 %v2795_v13, 0.0  ;;  %v2578_v45 = vadd.f32 %v2577_v4, %v5608_v44  ;;  %v2658_v29 = vpop.f32.mrf.mxu2 }
 0x329   :  { %v2853_v37 = vpack.c.bf16 %v2828_v28, %v2828_v28  ;;  %v2651_v19 = vadd.f32 %v2650_v33, %v2578_v45 }
 0x32b   :  { %2879 = vst.msk [vmem:[%s5869_s3 + $0x50] sm:$0xf] %vm2858_vm1, %v2853_v37  ;;  %v2724_v8 = vadd.f32 %v2723_v39, %v2651_v19 }
 0x32d   :  { %v2797_v5 = vadd.f32 %v2796_v61, %v2724_v8 }
 0x32e   :  { %v2580_v43 = vpop.f32.mrf.mxu1  ;;  %v2799_v56 = vpop.f32.mrf.mxu0 }
 0x32f   :  { %v2728_v46 = vpop.f32.mrf.mxu3  ;;  %v2829_v10 = vmax.f32 %v2797_v5, 0.0  ;;  %v2581_v31 = vadd.f32 %v2580_v43, %v5618_v16  ;;  %v2660_v25 = vpop.f32.mrf.mxu2 }
 0x331   :  { %v2854_v48 = vpack.c.bf16 %v2829_v10, %v2829_v10  ;;  %v2654_v47 = vadd.f32 %v2653_v50, %v2581_v31 }
 0x333   :  { %2880 = vst.msk [vmem:[%s5869_s3 + $0x54] sm:$0xf] %vm2858_vm1, %v2854_v48  ;;  %v2727_v44 = vadd.f32 %v2726_v27, %v2654_v47 }
 0x335   :  { %v2800_v12 = vadd.f32 %v2799_v56, %v2727_v44 }
 0x336   :  { %v2582_v22 = vpop.f32.mrf.mxu1  ;;  %v2801_v49 = vpop.f32.mrf.mxu0 }
 0x337   :  { %v2731_v51 = vpop.f32.mrf.mxu3  ;;  %v2830_v32 = vmax.f32 %v2800_v12, 0.0  ;;  %v2583_v52 = vadd.f32 %v2582_v22, %v5639_v63 }
 0x339   :  { %v2855_v60 = vpack.c.bf16 %v2830_v32, %v2830_v32  ;;  %v2656_v24 = vadd.f32 %v2655_v11, %v2583_v52 }
 0x33b   :  { %2881 = vst.msk [vmem:[%s5869_s3 + $0x58] sm:$0xf] %vm2858_vm1, %v2855_v60  ;;  %v2729_v16 = vadd.f32 %v2728_v46, %v2656_v24 }
 0x33d   :  { %v2802_v3 = vadd.f32 %v2801_v49, %v2729_v16 }
 0x33e   :  { %v2585_v30 = vpop.f32.mrf.mxu1  ;;  %v2804_v35 = vpop.f32.mrf.mxu0 }
 0x33f   :  { %v2733_v7 = vpop.f32.mrf.mxu3  ;;  %v2831_v53 = vmax.f32 %v2802_v3, 0.0  ;;  %v2586_v17 = vadd.f32 %v2585_v30, %v5649_v21 }
 0x341   :  { %v2856_v41 = vpack.c.bf16 %v2831_v53, %v2831_v53  ;;  %v2659_v42 = vadd.f32 %v2658_v29, %v2586_v17 }
 0x343   :  { %2882 = vst.msk [vmem:[%s5869_s3 + $0x5c] sm:$0xf] %vm2858_vm1, %v2856_v41  ;;  %v2732_v63 = vadd.f32 %v2731_v51, %v2659_v42 }
 0x345   :  { %v2805_v26 = vadd.f32 %v2804_v35, %v2732_v63 }
 0x346   :  { %v2587_v33 = vpop.f32.mrf.mxu1  ;;  %v2806_v1 = vpop.f32.mrf.mxu0 }
 0x347   :  { %v2832_v38 = vmax.f32 %v2805_v26, 0.0 }
 0x349   :  { %v2857_v36 = vpack.c.bf16 %v2832_v38, %v2832_v38 }
 0x34b   :  { %2883 = vst.msk [vmem:[%s5869_s3 + $0x60] sm:$0xf] %vm2858_vm1, %v2857_v36 }

// kernel: forward.9
= control target key start
LH: loop header
LB: loop body
LE: loop exit
PB: predicated region body
PF: predicated region fallthrough
CT: control target
= control target key end

     0   :  { %s7236_s0 = inlined_call_operand.vmem [shape: bf16[2,1600], index: 0, kind: input, shape index: {}]   ;;  %s7237_s1 = inlined_call_operand.vmem [shape: bf16[1600,384], index: 1, kind: input, shape index: {}]   ;;  %s7238_s2 = inlined_call_operand.vmem [shape: f32[1,384], index: 2, kind: input, shape index: {}]   ;;  %s7239_s3 = inlined_call_operand.vmem [shape: bf16[384,192], index: 3, kind: input, shape index: {}]   ;;  %s7240_s4 = inlined_call_operand.vmem [shape: f32[1,192], index: 4, kind: input, shape index: {}]   ;;  %s7241_s5 = inlined_call_operand.vmem [shape: bf16[192,128], index: 5, kind: input, shape index: {}]   ;;  %s7242_s6 = inlined_call_operand.vmem [shape: f32[1,128], index: 6, kind: input, shape index: {}]   ;;  %s7243_s7 = inlined_call_operand.hbm [shape: f32[2,128], index: 7, kind: output, shape index: {}]  }
   0x1   :  { %v3191_v0 = vld [vmem:[%s7237_s1 + $0xa8] sm:$0xf]  ;;  %v4571_v1 = vld [vmem:[%s7237_s1 + $0xb0] sm:$0xf0]  ;;  %v3179_v11 = vld [vmem:[%s7237_s1 + $0x90] sm:$0xf] }
   0x2   :  { %v3287_v2 = vld [vmem:[%s7237_s1 + $0x168] sm:$0xf]  ;;  %v3192_v3 = vor.u32 %v4571_v1, %v3191_v0  ;;  %v4595_v4 = vld [vmem:[%s7237_s1 + $0x170] sm:$0xf0]  ;;  %v4568_v13 = vld [vmem:[%s7237_s1 + $0x98] sm:$0xf0] }
   0x3   :  { %v3383_v5 = vld [vmem:[%s7237_s1 + $0x228] sm:$0xf]  ;;  %v4619_v6 = vld [vmem:[%s7237_s1 + $0x230] sm:$0xf0]  ;;  %v3288_v7 = vor.u32 %v4595_v4, %v3287_v2  ;;  %v3275_v14 = vld [vmem:[%s7237_s1 + $0x150] sm:$0xf]  ;;  %v3180_v16 = vor.u32 %v4568_v13, %v3179_v11 }
   0x4   :  { %v3384_v8 = vor.u32 %v4619_v6, %v3383_v5  ;;  %v3479_v9 = vld [vmem:[%s7237_s1 + $0x2e8] sm:$0xf]  ;;  %v4643_v10 = vld [vmem:[%s7237_s1 + $0x2f0] sm:$0xf0]  ;;  %2070 = vmatpush.bf16.msra.mxu0 %v3192_v3  ;;  %v4592_v15 = vld [vmem:[%s7237_s1 + $0x158] sm:$0xf0] }
   0x5   :  { %v3480_v12 = vor.u32 %v4643_v10, %v3479_v9  ;;  %2083 = vmatpush.bf16.msra.mxu1 %v3288_v7  ;;  %v3276_v17 = vor.u32 %v4592_v15, %v3275_v14  ;;  %v3371_v18 = vld [vmem:[%s7237_s1 + $0x210] sm:$0xf]  ;;  %v4616_v19 = vld [vmem:[%s7237_s1 + $0x218] sm:$0xf0]  ;;  %v3167_v23 = vld [vmem:[%s7237_s1 + $0x78] sm:$0xf] }
   0x6   :  { %2096 = vmatpush.bf16.msra.mxu2 %v3384_v8  ;;  %v3467_v20 = vld [vmem:[%s7237_s1 + $0x2d0] sm:$0xf]  ;;  %v3372_v21 = vor.u32 %v4616_v19, %v3371_v18  ;;  %v4640_v22 = vld [vmem:[%s7237_s1 + $0x2d8] sm:$0xf0]  ;;  %v4565_v24 = vld [vmem:[%s7237_s1 + $0x80] sm:$0xf0] }
   0x7   :  { %2109 = vmatpush.bf16.msra.mxu3 %v3480_v12  ;;  %v3468_v25 = vor.u32 %v4640_v22, %v3467_v20  ;;  %v3263_v26 = vld [vmem:[%s7237_s1 + $0x138] sm:$0xf]  ;;  %v4589_v27 = vld [vmem:[%s7237_s1 + $0x140] sm:$0xf0]  ;;  %v3168_v29 = vor.u32 %v4565_v24, %v3167_v23  ;;  %v3155_v35 = vld [vmem:[%s7237_s1 + $0x60] sm:$0xf] }
   0x8   :  { %v3359_v28 = vld [vmem:[%s7237_s1 + $0x1f8] sm:$0xf]  ;;  %2071 = vmatpush.bf16.msra.mxu0 %v3180_v16  ;;  %v4613_v30 = vld [vmem:[%s7237_s1 + $0x200] sm:$0xf0]  ;;  %v3264_v33 = vor.u32 %v4589_v27, %v3263_v26  ;;  %v4562_v36 = vld [vmem:[%s7237_s1 + $0x68] sm:$0xf0] }
   0x9   :  { %v3455_v31 = vld [vmem:[%s7237_s1 + $0x2b8] sm:$0xf]  ;;  %v4637_v32 = vld [vmem:[%s7237_s1 + $0x2c0] sm:$0xf0]  ;;  %2084 = vmatpush.bf16.msra.mxu1 %v3276_v17  ;;  %v3360_v34 = vor.u32 %v4613_v30, %v3359_v28  ;;  %v3251_v37 = vld [vmem:[%s7237_s1 + $0x120] sm:$0xf]  ;;  %v3156_v44 = vor.u32 %v4562_v36, %v3155_v35 }
   0xa   :  { %2097 = vmatpush.bf16.msra.mxu2 %v3372_v21  ;;  %v3456_v38 = vor.u32 %v4637_v32, %v3455_v31  ;;  %v4586_v39 = vld [vmem:[%s7237_s1 + $0x128] sm:$0xf0]  ;;  %v3347_v40 = vld [vmem:[%s7237_s1 + $0x1e0] sm:$0xf]  ;;  %v3143_v47 = vld [vmem:[%s7237_s1 + $0x48] sm:$0xf] }
   0xb   :  { %2110 = vmatpush.bf16.msra.mxu3 %v3468_v25  ;;  %v4610_v41 = vld [vmem:[%s7237_s1 + $0x1e8] sm:$0xf0]  ;;  %v3443_v42 = vld [vmem:[%s7237_s1 + $0x2a0] sm:$0xf]  ;;  %v3252_v45 = vor.u32 %v4586_v39, %v3251_v37  ;;  %v4559_v48 = vld [vmem:[%s7237_s1 + $0x50] sm:$0xf0] }
   0xc   :  { %v4634_v43 = vld [vmem:[%s7237_s1 + $0x2a8] sm:$0xf0]  ;;  %2072 = vmatpush.bf16.msra.mxu0 %v3168_v29  ;;  %v3348_v46 = vor.u32 %v4610_v41, %v3347_v40  ;;  %v3239_v49 = vld [vmem:[%s7237_s1 + $0x108] sm:$0xf]  ;;  %v4583_v51 = vld [vmem:[%s7237_s1 + $0x110] sm:$0xf0]  ;;  %v3144_v56 = vor.u32 %v4559_v48, %v3143_v47 }
   0xd   :  { %2085 = vmatpush.bf16.msra.mxu1 %v3264_v33  ;;  %v3444_v50 = vor.u32 %v4634_v43, %v3443_v42  ;;  %v3335_v52 = vld [vmem:[%s7237_s1 + $0x1c8] sm:$0xf]  ;;  %v4607_v53 = vld [vmem:[%s7237_s1 + $0x1d0] sm:$0xf0]  ;;  %v3240_v57 = vor.u32 %v4583_v51, %v3239_v49  ;;  %v3131_v59 = vld [vmem:[%s7237_s1 + $0x30] sm:$0xf] }
   0xe   :  { %2098 = vmatpush.bf16.msra.mxu2 %v3360_v34  ;;  %v3431_v54 = vld [vmem:[%s7237_s1 + $0x288] sm:$0xf]  ;;  %v4631_v55 = vld [vmem:[%s7237_s1 + $0x290] sm:$0xf0]  ;;  %v3336_v58 = vor.u32 %v4607_v53, %v3335_v52  ;;  %v4556_v60 = vld [vmem:[%s7237_s1 + $0x38] sm:$0xf0] }
   0xf   :  { %2111 = vmatpush.bf16.msra.mxu3 %v3456_v38  ;;  %v3227_v61 = vld [vmem:[%s7237_s1 + $0xf0] sm:$0xf]  ;;  %v3432_v62 = vor.u32 %v4631_v55, %v3431_v54  ;;  %v4580_v63 = vld [vmem:[%s7237_s1 + $0xf8] sm:$0xf0]  ;;  %v3132_v4 = vor.u32 %v4556_v60, %v3131_v59  ;;  %v3119_v7 = vld [vmem:[%s7237_s1 + $0x18] sm:$0xf] }
  0x10   :  { %2073 = vmatpush.bf16.msra.mxu0 %v3156_v44  ;;  %v3323_v0 = vld [vmem:[%s7237_s1 + $0x1b0] sm:$0xf]  ;;  %v4604_v1 = vld [vmem:[%s7237_s1 + $0x1b8] sm:$0xf0]  ;;  %v3228_v5 = vor.u32 %v4580_v63, %v3227_v61  ;;  %v4553_v8 = vld [vmem:[%s7237_s1 + $0x20] sm:$0xf0] }
  0x11   :  { %2086 = vmatpush.bf16.msra.mxu1 %v3252_v45  ;;  %v3419_v2 = vld [vmem:[%s7237_s1 + $0x270] sm:$0xf]  ;;  %v4628_v3 = vld [vmem:[%s7237_s1 + $0x278] sm:$0xf0]  ;;  %v3324_v6 = vor.u32 %v4604_v1, %v3323_v0  ;;  %v3215_v9 = vld [vmem:[%s7237_s1 + $0xd8] sm:$0xf]  ;;  %v3120_v16 = vor.u32 %v4553_v8, %v3119_v7 }
  0x12   :  { %2099 = vmatpush.bf16.msra.mxu2 %v3348_v46  ;;  %v3420_v10 = vor.u32 %v4628_v3, %v3419_v2  ;;  %v4577_v11 = vld [vmem:[%s7237_s1 + $0xe0] sm:$0xf0]  ;;  %v3311_v12 = vld [vmem:[%s7237_s1 + $0x198] sm:$0xf]  ;;  %v3107_v17 = vld [vmem:[%s7237_s1] sm:$0xf] }
  0x13   :  { %2112 = vmatpush.bf16.msra.mxu3 %v3444_v50  ;;  %v4601_v13 = vld [vmem:[%s7237_s1 + $0x1a0] sm:$0xf0]  ;;  %v3407_v14 = vld [vmem:[%s7237_s1 + $0x258] sm:$0xf]  ;;  %v4550_v18 = vld [vmem:[%s7237_s1 + $0x8] sm:$0xf0]  ;;  %v3216_v19 = vor.u32 %v4577_v11, %v3215_v9 }
  0x14   :  { %2074 = vmatpush.bf16.msra.mxu0 %v3144_v56  ;;  %v4625_v15 = vld [vmem:[%s7237_s1 + $0x260] sm:$0xf0]  ;;  %v3312_v20 = vor.u32 %v4601_v13, %v3311_v12  ;;  %v3203_v21 = vld [vmem:[%s7237_s1 + $0xc0] sm:$0xf]  ;;  %v4574_v22 = vld [vmem:[%s7237_s1 + $0xc8] sm:$0xf0]  ;;  %v3108_v31 = vor.u32 %v4550_v18, %v3107_v17 }
  0x15   :  { %2087 = vmatpush.bf16.msra.mxu1 %v3240_v57  ;;  %v3299_v23 = vld [vmem:[%s7237_s1 + $0x180] sm:$0xf]  ;;  %v3408_v24 = vor.u32 %v4625_v15, %v3407_v14  ;;  %v4598_v25 = vld [vmem:[%s7237_s1 + $0x188] sm:$0xf0]  ;;  %v3575_v28 = vld [vmem:[%s7237_s1 + $0x3a8] sm:$0xf]  ;;  %v3204_v35 = vor.u32 %v4574_v22, %v3203_v21 }
  0x16   :  { %2100 = vmatpush.bf16.msra.mxu2 %v3336_v58  ;;  %v3395_v26 = vld [vmem:[%s7237_s1 + $0x240] sm:$0xf]  ;;  %v4622_v27 = vld [vmem:[%s7237_s1 + $0x248] sm:$0xf0]  ;;  %v4667_v29 = vld [vmem:[%s7237_s1 + $0x3b0] sm:$0xf0]  ;;  %v3300_v36 = vor.u32 %v4598_v25, %v3299_v23 }
  0x17   :  { %2113 = vmatpush.bf16.msra.mxu3 %v3432_v62  ;;  %v3671_v30 = vld [vmem:[%s7237_s1 + $0x468] sm:$0xf]  ;;  %v4691_v32 = vld [vmem:[%s7237_s1 + $0x470] sm:$0xf0]  ;;  %v3396_v39 = vor.u32 %v4622_v27, %v3395_v26  ;;  %v3576_v40 = vor.u32 %v4667_v29, %v3575_v28  ;;  %v3563_v43 = vld [vmem:[%s7237_s1 + $0x390] sm:$0xf] }
  0x18   :  { %2075 = vmatpush.bf16.msra.mxu0 %v3132_v4  ;;  %v3767_v33 = vld [vmem:[%s7237_s1 + $0x528] sm:$0xf]  ;;  %v4715_v34 = vld [vmem:[%s7237_s1 + $0x530] sm:$0xf0]  ;;  %v3672_v41 = vor.u32 %v4691_v32, %v3671_v30  ;;  %v4664_v44 = vld [vmem:[%s7237_s1 + $0x398] sm:$0xf0] }
  0x19   :  { %2088 = vmatpush.bf16.msra.mxu1 %v3228_v5  ;;  %v3863_v37 = vld [vmem:[%s7237_s1 + $0x5e8] sm:$0xf]  ;;  %v4739_v38 = vld [vmem:[%s7237_s1 + $0x5f0] sm:$0xf0]  ;;  %v3768_v42 = vor.u32 %v4715_v34, %v3767_v33  ;;  %v3659_v45 = vld [vmem:[%s7237_s1 + $0x450] sm:$0xf]  ;;  %v3564_v52 = vor.u32 %v4664_v44, %v3563_v43 }
  0x1a   :  { %2101 = vmatpush.bf16.msra.mxu2 %v3324_v6  ;;  %v3864_v46 = vor.u32 %v4739_v38, %v3863_v37  ;;  %v4688_v47 = vld [vmem:[%s7237_s1 + $0x458] sm:$0xf0]  ;;  %v3755_v48 = vld [vmem:[%s7237_s1 + $0x510] sm:$0xf]  ;;  %v3551_v55 = vld [vmem:[%s7237_s1 + $0x378] sm:$0xf] }
  0x1b   :  { %2114 = vmatpush.bf16.msra.mxu3 %v3420_v10  ;;  %v4712_v49 = vld [vmem:[%s7237_s1 + $0x518] sm:$0xf0]  ;;  %v3851_v50 = vld [vmem:[%s7237_s1 + $0x5d0] sm:$0xf]  ;;  %v3660_v53 = vor.u32 %v4688_v47, %v3659_v45  ;;  %v4661_v56 = vld [vmem:[%s7237_s1 + $0x380] sm:$0xf0] }
  0x1c   :  { %2076 = vmatpush.bf16.msra.mxu0 %v3120_v16  ;;  %v4736_v51 = vld [vmem:[%s7237_s1 + $0x5d8] sm:$0xf0]  ;;  %v3756_v54 = vor.u32 %v4712_v49, %v3755_v48  ;;  %v3647_v57 = vld [vmem:[%s7237_s1 + $0x438] sm:$0xf]  ;;  %v4685_v59 = vld [vmem:[%s7237_s1 + $0x440] sm:$0xf0]  ;;  %v3552_v0 = vor.u32 %v4661_v56, %v3551_v55 }
  0x1d   :  { %2089 = vmatpush.bf16.msra.mxu1 %v3216_v19  ;;  %v3852_v58 = vor.u32 %v4736_v51, %v3851_v50  ;;  %v3743_v60 = vld [vmem:[%s7237_s1 + $0x4f8] sm:$0xf]  ;;  %v4709_v61 = vld [vmem:[%s7237_s1 + $0x500] sm:$0xf0]  ;;  %v3539_v1 = vld [vmem:[%s7237_s1 + $0x360] sm:$0xf]  ;;  %v3648_v3 = vor.u32 %v4685_v59, %v3647_v57 }
  0x1e   :  { %2102 = vmatpush.bf16.msra.mxu2 %v3312_v20  ;;  %v3839_v62 = vld [vmem:[%s7237_s1 + $0x5b8] sm:$0xf]  ;;  %v4733_v63 = vld [vmem:[%s7237_s1 + $0x5c0] sm:$0xf0]  ;;  %v3744_v4 = vor.u32 %v4709_v61, %v3743_v60  ;;  %v4658_v5 = vld [vmem:[%s7237_s1 + $0x368] sm:$0xf0] }
  0x1f   :  { %2115 = vmatpush.bf16.msra.mxu3 %v3408_v24  ;;  %v28_v2 = vld [vmem:[%s7236_s0] sm:$0xff]  ;;  %v3840_v7 = vor.u32 %v4733_v63, %v3839_v62  ;;  %v4682_v8 = vld [vmem:[%s7237_s1 + $0x428] sm:$0xf0]  ;;  %v3540_v13 = vor.u32 %v4658_v5, %v3539_v1  ;;  %v3527_v16 = vld [vmem:[%s7237_s1 + $0x348] sm:$0xf] }
  0x20   :  { %2077 = vmatpush.bf16.msra.mxu0 %v3108_v31  ;;  %v3635_v6 = vld [vmem:[%s7237_s1 + $0x420] sm:$0xf]  ;;  %439 = vst [vmem:[#allocation1] ss:$9 sm:$0xff] %v28_v2  ;;  %v4706_v10 = vld [vmem:[%s7237_s1 + $0x4e8] sm:$0xf0] }
  0x21   :  { %2090 = vmatpush.bf16.msra.mxu1 %v3204_v35  ;;  %v3731_v9 = vld [vmem:[%s7237_s1 + $0x4e0] sm:$0xf]  ;;  %v4730_v12 = vld [vmem:[%s7237_s1 + $0x5a8] sm:$0xf0]  ;;  %v3636_v14 = vor.u32 %v4682_v8, %v3635_v6  ;;  %v4655_v17 = vld [vmem:[%s7237_s1 + $0x350] sm:$0xf0] }
  0x22   :  { %2103 = vmatpush.bf16.msra.mxu2 %v3300_v36  ;;  %v3827_v11 = vld [vmem:[%s7237_s1 + $0x5a0] sm:$0xf]  ;;  %v3732_v15 = vor.u32 %v4706_v10, %v3731_v9  ;;  %v3623_v18 = vld [vmem:[%s7237_s1 + $0x408] sm:$0xf]  ;;  %v4679_v20 = vld [vmem:[%s7237_s1 + $0x410] sm:$0xf0]  ;;  %v3528_v26 = vor.u32 %v4655_v17, %v3527_v16 }
  0x23   :  { %2116 = vmatpush.bf16.msra.mxu3 %v3396_v39  ;;  %v3828_v19 = vor.u32 %v4730_v12, %v3827_v11  ;;  %v3719_v21 = vld [vmem:[%s7237_s1 + $0x4c8] sm:$0xf]  ;;  %v4703_v22 = vld [vmem:[%s7237_s1 + $0x4d0] sm:$0xf0]  ;;  %v3515_v25 = vld [vmem:[%s7237_s1 + $0x330] sm:$0xf]  ;;  %v3624_v30 = vor.u32 %v4679_v20, %v3623_v18 }
  0x24   :  { %2122 = vmatpush.bf16.msrb.mxu0 %v3576_v40  ;;  %v3815_v23 = vld [vmem:[%s7237_s1 + $0x588] sm:$0xf]  ;;  %v4727_v24 = vld [vmem:[%s7237_s1 + $0x590] sm:$0xf0]  ;;  %v3720_v31 = vor.u32 %v4703_v22, %v3719_v21  ;;  %v4652_v32 = vld [vmem:[%s7237_s1 + $0x338] sm:$0xf0] }
  0x25   :  { %2135 = vmatpush.bf16.msrb.mxu1 %v3672_v41  ;;  %v3611_v33 = vld [vmem:[%s7237_s1 + $0x3f0] sm:$0xf]  ;;  %v3816_v35 = vor.u32 %v4727_v24, %v3815_v23  ;;  %v4676_v36 = vld [vmem:[%s7237_s1 + $0x3f8] sm:$0xf0]  ;;  %v3516_v41 = vor.u32 %v4652_v32, %v3515_v25  ;;  %v4649_v45 = vld [vmem:[%s7237_s1 + $0x320] sm:$0xf0] }
  0x26   :  { %2148 = vmatpush.bf16.msrb.mxu2 %v3768_v42  ;;  %v3707_v37 = vld [vmem:[%s7237_s1 + $0x4b0] sm:$0xf]  ;;  %v4700_v38 = vld [vmem:[%s7237_s1 + $0x4b8] sm:$0xf0]  ;;  %v3503_v42 = vld [vmem:[%s7237_s1 + $0x318] sm:$0xf]  ;;  %v3612_v43 = vor.u32 %v4676_v36, %v3611_v33 }
  0x27   :  { %2161 = vmatpush.bf16.msrb.mxu3 %v3864_v46  ;;  %v5302_v27 = vld [vmem:[#allocation1 + $0x12] sm:$0xff]  ;;  %v5304_v28 = vld [vmem:[#allocation1] sm:$0xff]  ;;  %v5314_v34 = vld [vmem:[#allocation1 + $0x9] sm:$0xff]  ;;  %v3708_v44 = vor.u32 %v4700_v38, %v3707_v37  ;;  %v3504_v55 = vor.u32 %v4649_v45, %v3503_v42 }
  0x28   :  { %2123 = vmatpush.bf16.msrb.mxu0 %v3564_v52  ;;  %v5306_v29 = vld [vmem:[#allocation1 + $0x1b] sm:$0xff]  ;;  %2104 = vmatmul.bf16.vlgmr.msra.gmra.mxu2 %v5302_v27  ;;  %v3803_v39 = vld [vmem:[%s7237_s1 + $0x570] sm:$0xf]  ;;  %v4673_v47 = vld [vmem:[%s7237_s1 + $0x3e0] sm:$0xf0] }
  0x29   :  { %2136 = vmatpush.bf16.msrb.mxu1 %v3660_v53  ;;  %v4724_v40 = vld [vmem:[%s7237_s1 + $0x578] sm:$0xf0]  ;;  %2078 = vmatmul.bf16.vlgmr.msra.gmra.mxu0 %v5304_v28  ;;  %v3599_v46 = vld [vmem:[%s7237_s1 + $0x3d8] sm:$0xf]  ;;  %v4697_v50 = vld [vmem:[%s7237_s1 + $0x4a0] sm:$0xf0] }
  0x2a   :  { %2149 = vmatpush.bf16.msrb.mxu2 %v3756_v54  ;;  %2117 = vmatmul.bf16.vlgmr.msra.gmra.mxu3 %v5306_v29  ;;  %v3804_v48 = vor.u32 %v4724_v40, %v3803_v39  ;;  %v3695_v49 = vld [vmem:[%s7237_s1 + $0x498] sm:$0xf]  ;;  %v4721_v52 = vld [vmem:[%s7237_s1 + $0x560] sm:$0xf0]  ;;  %v3491_v53 = vld [vmem:[%s7237_s1 + $0x300] sm:$0xf]  ;;  %v3600_v62 = vor.u32 %v4673_v47, %v3599_v46 }
  0x2b   :  { %2162 = vmatpush.bf16.msrb.mxu3 %v3852_v58  ;;  %2091 = vmatmul.bf16.vlgmr.msra.gmra.mxu1 %v5314_v34  ;;  %v3791_v51 = vld [vmem:[%s7237_s1 + $0x558] sm:$0xf]  ;;  %v4646_v54 = vld [vmem:[%s7237_s1 + $0x308] sm:$0xf0]  ;;  %v3587_v56 = vld [vmem:[%s7237_s1 + $0x3c0] sm:$0xf]  ;;  %v3696_v63 = vor.u32 %v4697_v50, %v3695_v49 }
  0x2c   :  { %2124 = vmatpush.bf16.msrb.mxu0 %v3552_v0  ;;  %v4670_v57 = vld [vmem:[%s7237_s1 + $0x3c8] sm:$0xf0]  ;;  %v3683_v58 = vld [vmem:[%s7237_s1 + $0x480] sm:$0xf]  ;;  %v5377_v60 = vld [vmem:[#allocation1 + $0x36] sm:$0xff]  ;;  %v3492_v9 = vor.u32 %v4646_v54, %v3491_v53 }
  0x2d   :  { %2137 = vmatpush.bf16.msrb.mxu1 %v3648_v3  ;;  %v4694_v59 = vld [vmem:[%s7237_s1 + $0x488] sm:$0xf0]  ;;  %v5382_v0 = vld [vmem:[#allocation1 + $0x24] sm:$0xff]  ;;  %v3792_v3 = vor.u32 %v4721_v52, %v3791_v51  ;;  %v4787_v10 = vld [vmem:[%s7237_s1 + $0x770] sm:$0xf0] }
  0x2e   :  { %2150 = vmatpush.bf16.msrb.mxu2 %v3744_v4  ;;  %v29_v61 = vld [vmem:[%s7236_s0 + $0x8] sm:$0x1f]  ;;  %v5384_v1 = vld [vmem:[#allocation1 + $0x3f] sm:$0xff]  ;;  %v5386_v2 = vld [vmem:[#allocation1 + $0x2d] sm:$0xff] }
  0x2f   :  { %2163 = vmatpush.bf16.msrb.mxu3 %v3840_v7  ;;  %v3779_v4 = vld [vmem:[%s7237_s1 + $0x540] sm:$0xf]  ;;  %v4718_v5 = vld [vmem:[%s7237_s1 + $0x548] sm:$0xf0]  ;;  %449 = vst [vmem:[#allocation1] ss:$9 sm:$0xff] %v29_v61 }
  0x30   :  { %2125 = vmatpush.bf16.msrb.mxu0 %v3540_v13  ;;  %v3959_v6 = vld [vmem:[%s7237_s1 + $0x6a8] sm:$0xf]  ;;  %v4763_v7 = vld [vmem:[%s7237_s1 + $0x6b0] sm:$0xf0]  ;;  %v3588_v13 = vor.u32 %v4670_v57, %v3587_v56  ;;  %v3780_v17 = vor.u32 %v4718_v5, %v3779_v4  ;;  %v3947_v21 = vld [vmem:[%s7237_s1 + $0x690] sm:$0xf] }
  0x31   :  { %2138 = vmatpush.bf16.msrb.mxu1 %v3636_v14  ;;  %v4055_v8 = vld [vmem:[%s7237_s1 + $0x768] sm:$0xf]  ;;  %v4811_v12 = vld [vmem:[%s7237_s1 + $0x830] sm:$0xf0]  ;;  %v3684_v14 = vor.u32 %v4694_v59, %v3683_v58  ;;  %v3960_v18 = vor.u32 %v4763_v7, %v3959_v6  ;;  %v4760_v22 = vld [vmem:[%s7237_s1 + $0x698] sm:$0xf0] }
  0x32   :  { %2151 = vmatpush.bf16.msrb.mxu2 %v3732_v15  ;;  %v4151_v11 = vld [vmem:[%s7237_s1 + $0x828] sm:$0xf]  ;;  %v4835_v16 = vld [vmem:[%s7237_s1 + $0x8f0] sm:$0xf0]  ;;  %v4043_v23 = vld [vmem:[%s7237_s1 + $0x750] sm:$0xf]  ;;  %v3948_v33 = vor.u32 %v4760_v22, %v3947_v21 }
  0x33   :  { %2164 = vmatpush.bf16.msrb.mxu3 %v3828_v19  ;;  %v4247_v15 = vld [vmem:[%s7237_s1 + $0x8e8] sm:$0xf]  ;;  %v4056_v19 = vor.u32 %v4787_v10, %v4055_v8  ;;  %v4152_v20 = vor.u32 %v4811_v12, %v4151_v11  ;;  %v4784_v25 = vld [vmem:[%s7237_s1 + $0x758] sm:$0xf0]  ;;  %v3935_v37 = vld [vmem:[%s7237_s1 + $0x678] sm:$0xf] }
  0x34   :  { %2126 = vmatpush.bf16.msrb.mxu0 %v3528_v26  ;;  %v4248_v24 = vor.u32 %v4835_v16, %v4247_v15  ;;  %v4139_v26 = vld [vmem:[%s7237_s1 + $0x810] sm:$0xf]  ;;  %v4832_v32 = vld [vmem:[%s7237_s1 + $0x8d8] sm:$0xf0]  ;;  %v4757_v38 = vld [vmem:[%s7237_s1 + $0x680] sm:$0xf0] }
  0x35   :  { %2139 = vmatpush.bf16.msrb.mxu1 %v3624_v30  ;;  %v4808_v30 = vld [vmem:[%s7237_s1 + $0x818] sm:$0xf0]  ;;  %v4031_v39 = vld [vmem:[%s7237_s1 + $0x738] sm:$0xf]  ;;  %v4829_v45 = vld [vmem:[%s7237_s1 + $0x8c0] sm:$0xf0]  ;;  %v3936_v46 = vor.u32 %v4757_v38, %v3935_v37 }
  0x36   :  { %2152 = vmatpush.bf16.msrb.mxu2 %v3720_v31  ;;  %v4235_v31 = vld [vmem:[%s7237_s1 + $0x8d0] sm:$0xf]  ;;  %v4140_v36 = vor.u32 %v4808_v30, %v4139_v26  ;;  %v4127_v42 = vld [vmem:[%s7237_s1 + $0x7f8] sm:$0xf]  ;;  %v3923_v49 = vld [vmem:[%s7237_s1 + $0x660] sm:$0xf] }
  0x37   :  { %2165 = vmatpush.bf16.msrb.mxu3 %v3816_v35  ;;  %v4044_v35 = vor.u32 %v4784_v25, %v4043_v23  ;;  %v4236_v40 = vor.u32 %v4832_v32, %v4235_v31  ;;  %v4754_v50 = vld [vmem:[%s7237_s1 + $0x668] sm:$0xf0]  ;;  %v4019_v51 = vld [vmem:[%s7237_s1 + $0x720] sm:$0xf]  ;;  %v4775_v5 = vld [vmem:[%s7237_s1 + $0x710] sm:$0xf0] }
  0x38   :  { %2127 = vmatpush.bf16.msrb.mxu0 %v3516_v41  ;;  %v4781_v41 = vld [vmem:[%s7237_s1 + $0x740] sm:$0xf0]  ;;  %v4778_v53 = vld [vmem:[%s7237_s1 + $0x728] sm:$0xf0]  ;;  %v4115_v54 = vld [vmem:[%s7237_s1 + $0x7e0] sm:$0xf]  ;;  %v3924_v58 = vor.u32 %v4754_v50, %v3923_v49 }
  0x39   :  { %2140 = vmatpush.bf16.msrb.mxu1 %v3612_v43  ;;  %v4805_v43 = vld [vmem:[%s7237_s1 + $0x800] sm:$0xf0]  ;;  %v4032_v47 = vor.u32 %v4781_v41, %v4031_v39  ;;  %v4211_v56 = vld [vmem:[%s7237_s1 + $0x8a0] sm:$0xf]  ;;  %v4826_v57 = vld [vmem:[%s7237_s1 + $0x8a8] sm:$0xf0]  ;;  %v4020_v59 = vor.u32 %v4778_v53, %v4019_v51 }
  0x3a   :  { %2153 = vmatpush.bf16.msrb.mxu2 %v3708_v44  ;;  %v4223_v44 = vld [vmem:[%s7237_s1 + $0x8b8] sm:$0xf]  ;;  %v4212_v4 = vor.u32 %v4826_v57, %v4211_v56  ;;  %v4103_v6 = vld [vmem:[%s7237_s1 + $0x7c8] sm:$0xf]  ;;  %v4799_v7 = vld [vmem:[%s7237_s1 + $0x7d0] sm:$0xf0] }
  0x3b   :  { %2166 = vmatpush.bf16.msrb.mxu3 %v3804_v48  ;;  %v4128_v48 = vor.u32 %v4805_v43, %v4127_v42  ;;  %v4224_v52 = vor.u32 %v4829_v45, %v4223_v44  ;;  %v4199_v8 = vld [vmem:[%s7237_s1 + $0x888] sm:$0xf]  ;;  %v4104_v12 = vor.u32 %v4799_v7, %v4103_v6  ;;  %v3995_v15 = vld [vmem:[%s7237_s1 + $0x6f0] sm:$0xf]  ;;  %v4820_v21 = vld [vmem:[%s7237_s1 + $0x878] sm:$0xf0] }
  0x3c   :  { %2128 = vmatpush.bf16.msrb.mxu0 %v3504_v55  ;;  %v4802_v55 = vld [vmem:[%s7237_s1 + $0x7e8] sm:$0xf0]  ;;  %v3887_v25 = vld [vmem:[%s7237_s1 + $0x618] sm:$0xf]  ;;  %v4745_v26 = vld [vmem:[%s7237_s1 + $0x620] sm:$0xf0] }
  0x3d   :  { %2141 = vmatpush.bf16.msrb.mxu1 %v3600_v62  ;;  %v4116_v61 = vor.u32 %v4802_v55, %v4115_v54  ;;  %v3911_v62 = vld [vmem:[%s7237_s1 + $0x648] sm:$0xf]  ;;  %v3983_v30 = vld [vmem:[%s7237_s1 + $0x6d8] sm:$0xf]  ;;  %v4769_v32 = vld [vmem:[%s7237_s1 + $0x6e0] sm:$0xf0]  ;;  %v3888_v38 = vor.u32 %v4745_v26, %v3887_v25 }
  0x3e   :  { %2154 = vmatpush.bf16.msrb.mxu2 %v3696_v63  ;;  %v4751_v63 = vld [vmem:[%s7237_s1 + $0x650] sm:$0xf0]  ;;  %v4817_v37 = vld [vmem:[%s7237_s1 + $0x860] sm:$0xf0]  ;;  %v3875_v39 = vld [vmem:[%s7237_s1 + $0x600] sm:$0xf]  ;;  %v3984_v41 = vor.u32 %v4769_v32, %v3983_v30 }
  0x3f   :  { %2167 = vmatpush.bf16.msrb.mxu3 %v3792_v3  ;;  %v4007_v3 = vld [vmem:[%s7237_s1 + $0x708] sm:$0xf]  ;;  %v3912_v10 = vor.u32 %v4751_v63, %v3911_v62  ;;  %v3971_v43 = vld [vmem:[%s7237_s1 + $0x6c0] sm:$0xf]  ;;  %v4766_v44 = vld [vmem:[%s7237_s1 + $0x6c8] sm:$0xf0] }
  0x40   :  { %2129 = vmatpush.bf16.msrb.mxu0 %v3492_v9  ;;  %v4823_v9 = vld [vmem:[%s7237_s1 + $0x890] sm:$0xf0]  ;;  %v4008_v11 = vor.u32 %v4775_v5, %v4007_v3  ;;  %v4067_v45 = vld [vmem:[%s7237_s1 + $0x780] sm:$0xf]  ;;  %v4814_v49 = vld [vmem:[%s7237_s1 + $0x848] sm:$0xf0]  ;;  %v3972_v57 = vor.u32 %v4766_v44, %v3971_v43 }
  0x41   :  { %2142 = vmatpush.bf16.msrb.mxu1 %v3588_v13  ;;  %v3899_v13 = vld [vmem:[%s7237_s1 + $0x630] sm:$0xf]  ;;  %v4200_v16 = vor.u32 %v4823_v9, %v4199_v8  ;;  %v4295_v50 = vld [vmem:[%s7237_s1 + $0x948] sm:$0xf]  ;;  %v4847_v51 = vld [vmem:[%s7237_s1 + $0x950] sm:$0xf0] }
  0x42   :  { %2155 = vmatpush.bf16.msrb.mxu2 %v3684_v14  ;;  %v4748_v14 = vld [vmem:[%s7237_s1 + $0x638] sm:$0xf0]  ;;  %v3193_v54 = vld [vmem:[%s7237_s1 + $0xb4] sm:$0xf0]  ;;  %v4594_v55 = vld [vmem:[%s7237_s1 + $0x16c] sm:$0xf]  ;;  %v4296_v63 = vor.u32 %v4847_v51, %v4295_v50 }
  0x43   :  { %2168 = vmatpush.bf16.msrb.mxu3 %v3780_v17  ;;  %2130 = vmatmul.bf16.vlgmr.msrb.gmra.mxu0 %v5382_v0  ;;  %v4772_v17 = vld [vmem:[%s7237_s1 + $0x6f8] sm:$0xf0]  ;;  %v3900_v22 = vor.u32 %v4748_v14, %v3899_v13  ;;  %v3289_v56 = vld [vmem:[%s7237_s1 + $0x174] sm:$0xf0]  ;;  %v5614_v5 = vld [vmem:[#allocation1] sm:$0xff] }
  0x44   :  { %2174 = vmatpush.bf16.msra.mxu0 %v3960_v18  ;;  %2143 = vmatmul.bf16.vlgmr.msrb.gmra.mxu1 %v5386_v2  ;;  %v4091_v18 = vld [vmem:[%s7237_s1 + $0x7b0] sm:$0xf]  ;;  %v3996_v23 = vor.u32 %v4772_v17, %v3995_v15  ;;  %v4844_v7 = vld [vmem:[%s7237_s1 + $0x938] sm:$0xf0]  ;;  %v4567_v8 = vld [vmem:[%s7237_s1 + $0x94] sm:$0xf] }
  0x45   :  { %2187 = vmatpush.bf16.msra.mxu1 %v4056_v19  ;;  %2156 = vmatmul.bf16.vlgmr.msrb.gmra.mxu2 %v5377_v60  ;;  %v4796_v19 = vld [vmem:[%s7237_s1 + $0x7b8] sm:$0xf0]  ;;  %v4283_v6 = vld [vmem:[%s7237_s1 + $0x930] sm:$0xf]  ;;  %v4615_v14 = vld [vmem:[%s7237_s1 + $0x214] sm:$0xf] }
  0x46   :  { %2200 = vmatpush.bf16.msra.mxu2 %v4152_v20  ;;  %2169 = vmatmul.bf16.vlgmr.msrb.gmra.mxu3 %v5384_v1  ;;  %v4187_v20 = vld [vmem:[%s7237_s1 + $0x870] sm:$0xf]  ;;  %v3373_v15 = vld [vmem:[%s7237_s1 + $0x21c] sm:$0xf0]  ;;  %v4588_v26 = vld [vmem:[%s7237_s1 + $0x13c] sm:$0xf] }
  0x47   :  { %2213 = vmatpush.bf16.msra.mxu3 %v4248_v24  ;;  %v4092_v24 = vor.u32 %v4796_v19, %v4091_v18  ;;  %v4188_v31 = vor.u32 %v4820_v21, %v4187_v20  ;;  %v5634_v13 = vld [vmem:[#allocation1 + $0x12] sm:$0xff]  ;;  %v5644_v17 = vld [vmem:[#allocation1 + $0x1b] sm:$0xff]  ;;  %v4284_v18 = vor.u32 %v4844_v7, %v4283_v6  ;;  %v3376_v25 = vor.u32 %v4615_v14, %v3373_v15  ;;  %v3265_v30 = vld [vmem:[%s7237_s1 + $0x144] sm:$0xf0] }
  0x48   :  { %2175 = vmatpush.bf16.msra.mxu0 %v3948_v33  ;;  %v4079_v33 = vld [vmem:[%s7237_s1 + $0x798] sm:$0xf]  ;;  %v3361_v32 = vld [vmem:[%s7237_s1 + $0x204] sm:$0xf0] }
  0x49   :  { %2188 = vmatpush.bf16.msra.mxu1 %v4044_v35  ;;  %v4793_v35 = vld [vmem:[%s7237_s1 + $0x7a0] sm:$0xf0]  ;;  %v4271_v19 = vld [vmem:[%s7237_s1 + $0x918] sm:$0xf] }
  0x4a   :  { %2201 = vmatpush.bf16.msra.mxu2 %v4140_v36  ;;  %v4175_v36 = vld [vmem:[%s7237_s1 + $0x858] sm:$0xf]  ;;  %v4080_v42 = vor.u32 %v4793_v35, %v4079_v33 }
  0x4b   :  { %2214 = vmatpush.bf16.msra.mxu3 %v4236_v40  ;;  %v4742_v40 = vld [vmem:[%s7237_s1 + $0x608] sm:$0xf0] }
  0x4c   :  { %2176 = vmatpush.bf16.msra.mxu0 %v3936_v46  ;;  %v4176_v46 = vor.u32 %v4817_v37, %v4175_v36  ;;  %v3876_v53 = vor.u32 %v4742_v40, %v3875_v39 }
  0x4d   :  { %2189 = vmatpush.bf16.msra.mxu1 %v4032_v47  ;;  %v4790_v47 = vld [vmem:[%s7237_s1 + $0x788] sm:$0xf0] }
  0x4e   :  { %2202 = vmatpush.bf16.msra.mxu2 %v4128_v48  ;;  %v4163_v48 = vld [vmem:[%s7237_s1 + $0x840] sm:$0xf] }
  0x4f   :  { %2215 = vmatpush.bf16.msra.mxu3 %v4224_v52  ;;  %v4570_v52 = vld [vmem:[%s7237_s1 + $0xac] sm:$0xf]  ;;  %v4164_v62 = vor.u32 %v4814_v49, %v4163_v48 }
  0x50   :  { %2177 = vmatpush.bf16.msra.mxu0 %v3924_v58  ;;  %v4068_v58 = vor.u32 %v4790_v47, %v4067_v45  ;;  %v3196_v3 = vor.u32 %v4570_v52, %v3193_v54 }
  0x51   :  { %2190 = vmatpush.bf16.msra.mxu1 %v4020_v59  ;;  %v4618_v59 = vld [vmem:[%s7237_s1 + $0x22c] sm:$0xf] }
  0x52   :  { %2203 = vmatpush.bf16.msra.mxu2 %v4116_v61  ;;  %v3385_v61 = vld [vmem:[%s7237_s1 + $0x234] sm:$0xf0] }
  0x53   :  { %2216 = vmatpush.bf16.msra.mxu3 %v4212_v4  ;;  %v3292_v4 = vor.u32 %v4594_v55, %v3289_v56  ;;  %v3388_v9 = vor.u32 %v4618_v59, %v3385_v61 }
  0x54   :  { %2178 = vmatpush.bf16.msra.mxu0 %v3912_v10  ;;  %v3181_v10 = vld [vmem:[%s7237_s1 + $0x9c] sm:$0xf0] }
  0x55   :  { %2191 = vmatpush.bf16.msra.mxu1 %v4008_v11  ;;  %v4591_v11 = vld [vmem:[%s7237_s1 + $0x154] sm:$0xf]  ;;  %v3184_v20 = vor.u32 %v4567_v8, %v3181_v10 }
  0x56   :  { %2204 = vmatpush.bf16.msra.mxu2 %v4104_v12  ;;  %v3277_v12 = vld [vmem:[%s7237_s1 + $0x15c] sm:$0xf0] }
  0x57   :  { %2217 = vmatpush.bf16.msra.mxu3 %v4200_v16  ;;  %v5642_v16 = vld [vmem:[#allocation1 + $0x9] sm:$0xff]  ;;  %v3280_v21 = vor.u32 %v4591_v11, %v3277_v12 }
  0x58   :  { %2179 = vmatpush.bf16.msra.mxu0 %v3900_v22  ;;  %v4841_v22 = vld [vmem:[%s7237_s1 + $0x920] sm:$0xf0] }
  0x59   :  { %2192 = vmatpush.bf16.msra.mxu1 %v3996_v23  ;;  %v4564_v23 = vld [vmem:[%s7237_s1 + $0x7c] sm:$0xf] }
  0x5a   :  { %2205 = vmatpush.bf16.msra.mxu2 %v4092_v24  ;;  %v3169_v24 = vld [vmem:[%s7237_s1 + $0x84] sm:$0xf0] }
  0x5b   :  { %2218 = vmatpush.bf16.msra.mxu3 %v4188_v31  ;;  %v4612_v31 = vld [vmem:[%s7237_s1 + $0x1fc] sm:$0xf] }
  0x5c   :  { %2180 = vmatpush.bf16.msra.mxu0 %v3888_v38 }
  0x5d   :  { %2193 = vmatpush.bf16.msra.mxu1 %v3984_v41 }
  0x5e   :  { %2206 = vmatpush.bf16.msra.mxu2 %v4080_v42 }
  0x5f   :  { %2219 = vmatpush.bf16.msra.mxu3 %v4176_v46 }
  0x60   :  { %2181 = vmatpush.bf16.msra.mxu0 %v3876_v53 }
  0x61   :  { %2194 = vmatpush.bf16.msra.mxu1 %v3972_v57 }
  0x62   :  { %2207 = vmatpush.bf16.msra.mxu2 %v4068_v58 }
  0x63   :  { %2220 = vmatpush.bf16.msra.mxu3 %v4164_v62  ;;  %2182 = vmatmul.bf16.vlgmr.msra.gmra.mxu0 %v5614_v5 }
  0x64   :  { %2230 = vmatpush.bf16.msrb.mxu0 %v4296_v63  ;;  %2195 = vmatmul.bf16.vlgmr.msra.gmra.mxu1 %v5642_v16 }
  0x65   :  { %2239 = vmatpush.bf16.msrb.mxu1 %v3196_v3  ;;  %2208 = vmatmul.bf16.vlgmr.msra.gmra.mxu2 %v5634_v13 }
  0x66   :  { %2252 = vmatpush.bf16.msrb.mxu2 %v3292_v4 }
  0x67   :  { %2265 = vmatpush.bf16.msrb.mxu3 %v3388_v9 }
  0x68   :  { %12 = vsyncpa [#allocation3], 0  ;;  %2221 = vmatmul.bf16.vlgmr.msra.gmra.mxu3 %v5644_v17  ;;  %2231 = vmatpush.bf16.msrb.mxu0 %v4284_v18  ;;  %v4272_v33 = vor.u32 %v4841_v22, %v4271_v19  ;;  %v4259_v35 = vld [vmem:[%s7237_s1 + $0x900] sm:$0xf]  ;;  %v3172_v36 = vor.u32 %v4564_v23, %v3169_v24  ;;  %v3268_v37 = vor.u32 %v4588_v26, %v3265_v30  ;;  %v4838_v38 = vld [vmem:[%s7237_s1 + $0x908] sm:$0xf0] }
  0x69   :  { %2240 = vmatpush.bf16.msrb.mxu1 %v3184_v20  ;;  %v4561_v39 = vld [vmem:[%s7237_s1 + $0x64] sm:$0xf]  ;;  %v3157_v40 = vld [vmem:[%s7237_s1 + $0x6c] sm:$0xf0]  ;;  %v3364_v41 = vor.u32 %v4612_v31, %v3361_v32  ;;  %v4642_v46 = vld [vmem:[%s7237_s1 + $0x2ec] sm:$0xf]  ;;  %v4260_v48 = vor.u32 %v4838_v38, %v4259_v35 }
  0x6a   :  { %2253 = vmatpush.bf16.msrb.mxu2 %v3280_v21  ;;  %v4585_v42 = vld [vmem:[%s7237_s1 + $0x124] sm:$0xf]  ;;  %v3253_v43 = vld [vmem:[%s7237_s1 + $0x12c] sm:$0xf0]  ;;  %v3481_v47 = vld [vmem:[%s7237_s1 + $0x2f4] sm:$0xf0]  ;;  %v3160_v49 = vor.u32 %v4561_v39, %v3157_v40 }
  0x6b   :  { %2266 = vmatpush.bf16.msrb.mxu3 %v3376_v25  ;;  %v4609_v44 = vld [vmem:[%s7237_s1 + $0x1e4] sm:$0xf]  ;;  %v3349_v45 = vld [vmem:[%s7237_s1 + $0x1ec] sm:$0xf0]  ;;  %v3256_v50 = vor.u32 %v4585_v42, %v3253_v43  ;;  %v4558_v51 = vld [vmem:[%s7237_s1 + $0x4c] sm:$0xf]  ;;  %v3484_v54 = vor.u32 %v4642_v46, %v3481_v47 }
  0x6c   :  { %2232 = vmatpush.bf16.msrb.mxu0 %v4272_v33  ;;  %v3145_v52 = vld [vmem:[%s7237_s1 + $0x54] sm:$0xf0]  ;;  %v3352_v53 = vor.u32 %v4609_v44, %v3349_v45  ;;  %v4582_v55 = vld [vmem:[%s7237_s1 + $0x10c] sm:$0xf]  ;;  %v4639_v59 = vld [vmem:[%s7237_s1 + $0x2d4] sm:$0xf] }
  0x6d   :  { %2241 = vmatpush.bf16.msrb.mxu1 %v3172_v36  ;;  %v3241_v56 = vld [vmem:[%s7237_s1 + $0x114] sm:$0xf0]  ;;  %v4606_v57 = vld [vmem:[%s7237_s1 + $0x1cc] sm:$0xf]  ;;  %v3469_v61 = vld [vmem:[%s7237_s1 + $0x2dc] sm:$0xf0]  ;;  %v3148_v62 = vor.u32 %v4558_v51, %v3145_v52 }
  0x6e   :  { %2254 = vmatpush.bf16.msrb.mxu2 %v3268_v37  ;;  %v3337_v58 = vld [vmem:[%s7237_s1 + $0x1d4] sm:$0xf0]  ;;  %v3244_v63 = vor.u32 %v4582_v55, %v3241_v56  ;;  %v4555_v3 = vld [vmem:[%s7237_s1 + $0x34] sm:$0xf]  ;;  %v3133_v4 = vld [vmem:[%s7237_s1 + $0x3c] sm:$0xf0]  ;;  %v3472_v7 = vor.u32 %v4639_v59, %v3469_v61 }
  0x6f   :  { %2267 = vmatpush.bf16.msrb.mxu3 %v3364_v41  ;;  %v3340_v6 = vor.u32 %v4606_v57, %v3337_v58  ;;  %v4579_v8 = vld [vmem:[%s7237_s1 + $0xf4] sm:$0xf]  ;;  %v3229_v9 = vld [vmem:[%s7237_s1 + $0xfc] sm:$0xf0]  ;;  %v4636_v12 = vld [vmem:[%s7237_s1 + $0x2bc] sm:$0xf]  ;;  %v3136_v18 = vor.u32 %v4555_v3, %v3133_v4 }
  0x70   :  { %2233 = vmatpush.bf16.msrb.mxu0 %v4260_v48  ;;  %v4603_v10 = vld [vmem:[%s7237_s1 + $0x1b4] sm:$0xf]  ;;  %v3325_v11 = vld [vmem:[%s7237_s1 + $0x1bc] sm:$0xf0]  ;;  %v3457_v14 = vld [vmem:[%s7237_s1 + $0x2c4] sm:$0xf0]  ;;  %v3232_v19 = vor.u32 %v4579_v8, %v3229_v9 }
  0x71   :  { %2242 = vmatpush.bf16.msrb.mxu1 %v3160_v49  ;;  %v5752_v15 = vld [vmem:[#allocation1 + $0x24] sm:$0xff]  ;;  %vm2067_vm0 = vcmask 523264   ;;  %v4552_v20 = vld [vmem:[%s7237_s1 + $0x1c] sm:$0xf]  ;;  %v3328_v22 = vor.u32 %v4603_v10, %v3325_v11  ;;  %v3460_v23 = vor.u32 %v4636_v12, %v3457_v14  ;;  %v3445_v32 = vld [vmem:[%s7237_s1 + $0x2ac] sm:$0xf0] }
  0x72   :  { %2255 = vmatpush.bf16.msrb.mxu2 %v3256_v50  ;;  %v3121_v21 = vld [vmem:[%s7237_s1 + $0x24] sm:$0xf0]  ;;  %v4576_v24 = vld [vmem:[%s7237_s1 + $0xdc] sm:$0xf]  ;;  %v4633_v31 = vld [vmem:[%s7237_s1 + $0x2a4] sm:$0xf] }
  0x73   :  { %2268 = vmatpush.bf16.msrb.mxu3 %v3352_v53  ;;  %v3217_v25 = vld [vmem:[%s7237_s1 + $0xe4] sm:$0xf0]  ;;  %v4600_v26 = vld [vmem:[%s7237_s1 + $0x19c] sm:$0xf]  ;;  %4305 = vmatmul.msk.bf16.vlgmr.msrb.gmra.mxu0 %vm2067_vm0, %v5752_v15  ;;  %v3124_v33 = vor.u32 %v4552_v20, %v3121_v21  ;;  %v4549_v36 = vld [vmem:[%s7237_s1 + $0x4] sm:$0xf]  ;;  %v3448_v40 = vor.u32 %v4633_v31, %v3445_v32 }
  0x74   :  { %2278 = vmatpush.bf16.msra.mxu0 %v3484_v54  ;;  %v3313_v30 = vld [vmem:[%s7237_s1 + $0x1a4] sm:$0xf0]  ;;  %v3220_v35 = vor.u32 %v4576_v24, %v3217_v25  ;;  %v3109_v37 = vld [vmem:[%s7237_s1 + $0xc] sm:$0xf0]  ;;  %v4573_v38 = vld [vmem:[%s7237_s1 + $0xc4] sm:$0xf] }
  0x75   :  { %2243 = vmatpush.bf16.msrb.mxu1 %v3148_v62  ;;  %v3316_v39 = vor.u32 %v4600_v26, %v3313_v30  ;;  %v3205_v41 = vld [vmem:[%s7237_s1 + $0xcc] sm:$0xf0]  ;;  %v4597_v42 = vld [vmem:[%s7237_s1 + $0x184] sm:$0xf]  ;;  %v4630_v44 = vld [vmem:[%s7237_s1 + $0x28c] sm:$0xf]  ;;  %v3112_v50 = vor.u32 %v4549_v36, %v3109_v37 }
  0x76   :  { %2256 = vmatpush.bf16.msrb.mxu2 %v3244_v63  ;;  %v3301_v43 = vld [vmem:[%s7237_s1 + $0x18c] sm:$0xf0]  ;;  %v3433_v45 = vld [vmem:[%s7237_s1 + $0x294] sm:$0xf0]  ;;  %v4666_v46 = vld [vmem:[%s7237_s1 + $0x3ac] sm:$0xf]  ;;  %v3208_v51 = vor.u32 %v4573_v38, %v3205_v41 }
  0x77   :  { %2269 = vmatpush.bf16.msrb.mxu3 %v3340_v6  ;;  %v3577_v47 = vld [vmem:[%s7237_s1 + $0x3b4] sm:$0xf0]  ;;  %v4690_v48 = vld [vmem:[%s7237_s1 + $0x46c] sm:$0xf]  ;;  %v3304_v54 = vor.u32 %v4597_v42, %v3301_v43  ;;  %v3436_v55 = vor.u32 %v4630_v44, %v3433_v45  ;;  %v4627_v58 = vld [vmem:[%s7237_s1 + $0x274] sm:$0xf] }
  0x78   :  { %2279 = vmatpush.bf16.msra.mxu0 %v3472_v7  ;;  %v3673_v49 = vld [vmem:[%s7237_s1 + $0x474] sm:$0xf0]  ;;  %v4714_v52 = vld [vmem:[%s7237_s1 + $0x52c] sm:$0xf]  ;;  %v3580_v56 = vor.u32 %v4666_v46, %v3577_v47  ;;  %v3421_v59 = vld [vmem:[%s7237_s1 + $0x27c] sm:$0xf0] }
  0x79   :  { %2244 = vmatpush.bf16.msrb.mxu1 %v3136_v18  ;;  %v3769_v53 = vld [vmem:[%s7237_s1 + $0x534] sm:$0xf0]  ;;  %v3676_v57 = vor.u32 %v4690_v48, %v3673_v49  ;;  %v4663_v61 = vld [vmem:[%s7237_s1 + $0x394] sm:$0xf]  ;;  %v3565_v63 = vld [vmem:[%s7237_s1 + $0x39c] sm:$0xf0]  ;;  %v3424_v8 = vor.u32 %v4627_v58, %v3421_v59 }
  0x7a   :  { %2257 = vmatpush.bf16.msrb.mxu2 %v3232_v19  ;;  %v3772_v62 = vor.u32 %v4714_v52, %v3769_v53  ;;  %v4687_v3 = vld [vmem:[%s7237_s1 + $0x454] sm:$0xf]  ;;  %v3661_v4 = vld [vmem:[%s7237_s1 + $0x45c] sm:$0xf0]  ;;  %v3568_v9 = vor.u32 %v4663_v61, %v3565_v63  ;;  %v4624_v11 = vld [vmem:[%s7237_s1 + $0x25c] sm:$0xf] }
  0x7b   :  { %2270 = vmatpush.bf16.msrb.mxu3 %v3328_v22  ;;  %v4711_v6 = vld [vmem:[%s7237_s1 + $0x514] sm:$0xf]  ;;  %v3757_v7 = vld [vmem:[%s7237_s1 + $0x51c] sm:$0xf0]  ;;  %v3664_v10 = vor.u32 %v4687_v3, %v3661_v4  ;;  %v3409_v12 = vld [vmem:[%s7237_s1 + $0x264] sm:$0xf0] }
  0x7c   :  { %2280 = vmatpush.bf16.msra.mxu0 %v3460_v23  ;;  %v4660_v14 = vld [vmem:[%s7237_s1 + $0x37c] sm:$0xf]  ;;  %v3760_v18 = vor.u32 %v4711_v6, %v3757_v7  ;;  %v3553_v19 = vld [vmem:[%s7237_s1 + $0x384] sm:$0xf0]  ;;  %v3412_v24 = vor.u32 %v4624_v11, %v3409_v12  ;;  %v4621_v25 = vld [vmem:[%s7237_s1 + $0x244] sm:$0xf] }
  0x7d   :  { %2245 = vmatpush.bf16.msrb.mxu1 %v3124_v33  ;;  %v4684_v20 = vld [vmem:[%s7237_s1 + $0x43c] sm:$0xf]  ;;  %v3649_v21 = vld [vmem:[%s7237_s1 + $0x444] sm:$0xf0]  ;;  %v3556_v26 = vor.u32 %v4660_v14, %v3553_v19  ;;  %v3397_v31 = vld [vmem:[%s7237_s1 + $0x24c] sm:$0xf0] }
  0x7e   :  { %2258 = vmatpush.bf16.msrb.mxu2 %v3220_v35  ;;  %v4708_v22 = vld [vmem:[%s7237_s1 + $0x4fc] sm:$0xf]  ;;  %v3745_v23 = vld [vmem:[%s7237_s1 + $0x504] sm:$0xf0]  ;;  %v3652_v30 = vor.u32 %v4684_v20, %v3649_v21  ;;  %v4657_v32 = vld [vmem:[%s7237_s1 + $0x364] sm:$0xf]  ;;  %v3400_v42 = vor.u32 %v4621_v25, %v3397_v31 }
  0x7f   :  { %2271 = vmatpush.bf16.msrb.mxu3 %v3316_v39  ;;  %v3541_v33 = vld [vmem:[%s7237_s1 + $0x36c] sm:$0xf0]  ;;  %v3748_v35 = vor.u32 %v4708_v22, %v3745_v23  ;;  %v4681_v36 = vld [vmem:[%s7237_s1 + $0x424] sm:$0xf]  ;;  %v3865_v41 = vld [vmem:[%s7237_s1 + $0x5f4] sm:$0xf0] }
  0x80   :  { %2281 = vmatpush.bf16.msra.mxu0 %v3448_v40  ;;  %v3637_v37 = vld [vmem:[%s7237_s1 + $0x42c] sm:$0xf0]  ;;  %v4705_v38 = vld [vmem:[%s7237_s1 + $0x4e4] sm:$0xf]  ;;  %v4738_v40 = vld [vmem:[%s7237_s1 + $0x5ec] sm:$0xf]  ;;  %v3544_v43 = vor.u32 %v4657_v32, %v3541_v33 }
  0x81   :  { %2246 = vmatpush.bf16.msrb.mxu1 %v3112_v50  ;;  %v3733_v39 = vld [vmem:[%s7237_s1 + $0x4ec] sm:$0xf0]  ;;  %v3640_v44 = vor.u32 %v4681_v36, %v3637_v37  ;;  %v4654_v45 = vld [vmem:[%s7237_s1 + $0x34c] sm:$0xf]  ;;  %v3529_v46 = vld [vmem:[%s7237_s1 + $0x354] sm:$0xf0]  ;;  %v3868_v48 = vor.u32 %v4738_v40, %v3865_v41 }
  0x82   :  { %2259 = vmatpush.bf16.msrb.mxu2 %v3208_v51  ;;  %v3736_v47 = vor.u32 %v4705_v38, %v3733_v39  ;;  %v4678_v49 = vld [vmem:[%s7237_s1 + $0x40c] sm:$0xf]  ;;  %v3625_v50 = vld [vmem:[%s7237_s1 + $0x414] sm:$0xf0]  ;;  %v4735_v53 = vld [vmem:[%s7237_s1 + $0x5d4] sm:$0xf] }
  0x83   :  { %2272 = vmatpush.bf16.msrb.mxu3 %v3304_v54  ;;  %v4702_v51 = vld [vmem:[%s7237_s1 + $0x4cc] sm:$0xf]  ;;  %v3721_v52 = vld [vmem:[%s7237_s1 + $0x4d4] sm:$0xf0]  ;;  %v3853_v54 = vld [vmem:[%s7237_s1 + $0x5dc] sm:$0xf0] }
  0x84   :  { %2282 = vmatpush.bf16.msra.mxu0 %v3436_v55  ;;  %2247 = vmatmul.bf16.vlgmr.msrb.gmra.mxu1 %v5304_v28  ;;  %v3532_v55 = vor.u32 %v4654_v45, %v3529_v46  ;;  %v3517_v58 = vld [vmem:[%s7237_s1 + $0x33c] sm:$0xf0]  ;;  %v3724_v59 = vor.u32 %v4702_v51, %v3721_v52  ;;  %v3856_v61 = vor.u32 %v4735_v53, %v3853_v54  ;;  %v4699_v3 = vld [vmem:[%s7237_s1 + $0x4b4] sm:$0xf]  ;;  %v4732_v6 = vld [vmem:[%s7237_s1 + $0x5bc] sm:$0xf] }
  0x85   :  { %2291 = vmatpush.bf16.msra.mxu1 %v3580_v56  ;;  %2260 = vmatmul.bf16.vlgmr.msrb.gmra.mxu2 %v5314_v34  ;;  %v3628_v56 = vor.u32 %v4678_v49, %v3625_v50  ;;  %v3613_v63 = vld [vmem:[%s7237_s1 + $0x3fc] sm:$0xf0]  ;;  %v3841_v7 = vld [vmem:[%s7237_s1 + $0x5c4] sm:$0xf0]  ;;  %v4696_v20 = vld [vmem:[%s7237_s1 + $0x49c] sm:$0xf] }
  0x86   :  { %2304 = vmatpush.bf16.msra.mxu2 %v3676_v57  ;;  %2273 = vmatmul.bf16.vlgmr.msrb.gmra.mxu3 %v5302_v27  ;;  %v4651_v57 = vld [vmem:[%s7237_s1 + $0x334] sm:$0xf]  ;;  %v3709_v4 = vld [vmem:[%s7237_s1 + $0x4bc] sm:$0xf0]  ;;  %v3505_v11 = vld [vmem:[%s7237_s1 + $0x324] sm:$0xf0]  ;;  %v3844_v14 = vor.u32 %v4732_v6, %v3841_v7 }
  0x87   :  { %2317 = vmatpush.bf16.msra.mxu3 %v3772_v62  ;;  %v4675_v62 = vld [vmem:[%s7237_s1 + $0x3f4] sm:$0xf]  ;;  %v3712_v12 = vor.u32 %v4699_v3, %v3709_v4  ;;  %v3601_v19 = vld [vmem:[%s7237_s1 + $0x3e4] sm:$0xf0]  ;;  %v4729_v22 = vld [vmem:[%s7237_s1 + $0x5a4] sm:$0xf] }
  0x88   :  { %2283 = vmatpush.bf16.msra.mxu0 %v3424_v8  ;;  %v3520_v8 = vor.u32 %v4651_v57, %v3517_v58  ;;  %v3697_v21 = vld [vmem:[%s7237_s1 + $0x4a4] sm:$0xf0]  ;;  %v3829_v23 = vld [vmem:[%s7237_s1 + $0x5ac] sm:$0xf0]  ;;  %v4669_v31 = vld [vmem:[%s7237_s1 + $0x3c4] sm:$0xf] }
  0x89   :  { %2292 = vmatpush.bf16.msra.mxu1 %v3568_v9  ;;  %v3616_v9 = vor.u32 %v4675_v62, %v3613_v63  ;;  %v3700_v32 = vor.u32 %v4696_v20, %v3697_v21  ;;  %v3832_v33 = vor.u32 %v4729_v22, %v3829_v23  ;;  %v4693_v36 = vld [vmem:[%s7237_s1 + $0x484] sm:$0xf]  ;;  %v3685_v37 = vld [vmem:[%s7237_s1 + $0x48c] sm:$0xf0]  ;;  %v4726_v38 = vld [vmem:[%s7237_s1 + $0x58c] sm:$0xf] }
  0x8a   :  { %2305 = vmatpush.bf16.msra.mxu2 %v3664_v10  ;;  %v4648_v10 = vld [vmem:[%s7237_s1 + $0x31c] sm:$0xf]  ;;  %v3817_v39 = vld [vmem:[%s7237_s1 + $0x594] sm:$0xf0]  ;;  %v4762_v40 = vld [vmem:[%s7237_s1 + $0x6ac] sm:$0xf] }
  0x8b   :  { %2318 = vmatpush.bf16.msra.mxu3 %v3760_v18  ;;  %v4672_v18 = vld [vmem:[%s7237_s1 + $0x3dc] sm:$0xf]  ;;  %v3961_v41 = vld [vmem:[%s7237_s1 + $0x6b4] sm:$0xf0]  ;;  %v4810_v46 = vld [vmem:[%s7237_s1 + $0x82c] sm:$0xf]  ;;  %v3820_v49 = vor.u32 %v4726_v38, %v3817_v39 }
  0x8c   :  { %2284 = vmatpush.bf16.msra.mxu0 %v3412_v24  ;;  %v3508_v24 = vor.u32 %v4648_v10, %v3505_v11  ;;  %v3604_v25 = vor.u32 %v4672_v18, %v3601_v19  ;;  %v3964_v50 = vor.u32 %v4762_v40, %v3961_v41  ;;  %v4723_v52 = vld [vmem:[%s7237_s1 + $0x574] sm:$0xf]  ;;  %v3805_v53 = vld [vmem:[%s7237_s1 + $0x57c] sm:$0xf0]  ;;  %v4720_v4 = vld [vmem:[%s7237_s1 + $0x55c] sm:$0xf] }
  0x8d   :  { %2293 = vmatpush.bf16.msra.mxu1 %v3556_v26  ;;  %v4645_v26 = vld [vmem:[%s7237_s1 + $0x304] sm:$0xf]  ;;  %v4759_v54 = vld [vmem:[%s7237_s1 + $0x694] sm:$0xf]  ;;  %v4045_v58 = vld [vmem:[%s7237_s1 + $0x75c] sm:$0xf0]  ;;  %v3808_v62 = vor.u32 %v4723_v52, %v3805_v53 }
  0x8e   :  { %2306 = vmatpush.bf16.msra.mxu2 %v3652_v30  ;;  %v3493_v30 = vld [vmem:[%s7237_s1 + $0x30c] sm:$0xf0]  ;;  %v4783_v57 = vld [vmem:[%s7237_s1 + $0x754] sm:$0xf]  ;;  %v3793_v6 = vld [vmem:[%s7237_s1 + $0x564] sm:$0xf0] }
  0x8f   :  { %2319 = vmatpush.bf16.msra.mxu3 %v3748_v35  ;;  %v3589_v35 = vld [vmem:[%s7237_s1 + $0x3cc] sm:$0xf0]  ;;  %v4048_v3 = vor.u32 %v4783_v57, %v4045_v58  ;;  %v4756_v7 = vld [vmem:[%s7237_s1 + $0x67c] sm:$0xf]  ;;  %v4033_v11 = vld [vmem:[%s7237_s1 + $0x744] sm:$0xf0]  ;;  %v3796_v18 = vor.u32 %v4720_v4, %v3793_v6 }
  0x90   :  { %2285 = vmatpush.bf16.msra.mxu0 %v3400_v42  ;;  %v4786_v42 = vld [vmem:[%s7237_s1 + $0x76c] sm:$0xf]  ;;  %v3592_v45 = vor.u32 %v4669_v31, %v3589_v35  ;;  %v4780_v10 = vld [vmem:[%s7237_s1 + $0x73c] sm:$0xf]  ;;  %v4717_v19 = vld [vmem:[%s7237_s1 + $0x544] sm:$0xf] }
  0x91   :  { %2294 = vmatpush.bf16.msra.mxu1 %v3544_v43  ;;  %v4057_v43 = vld [vmem:[%s7237_s1 + $0x774] sm:$0xf0]  ;;  %v4036_v21 = vor.u32 %v4780_v10, %v4033_v11  ;;  %v3781_v22 = vld [vmem:[%s7237_s1 + $0x54c] sm:$0xf0]  ;;  %v4753_v23 = vld [vmem:[%s7237_s1 + $0x664] sm:$0xf] }
  0x92   :  { %2307 = vmatpush.bf16.msra.mxu2 %v3640_v44  ;;  %v3496_v44 = vor.u32 %v4645_v26, %v3493_v30  ;;  %v4060_v51 = vor.u32 %v4786_v42, %v4057_v43  ;;  %v4777_v26 = vld [vmem:[%s7237_s1 + $0x724] sm:$0xf]  ;;  %v4021_v30 = vld [vmem:[%s7237_s1 + $0x72c] sm:$0xf0]  ;;  %v4249_v35 = vld [vmem:[%s7237_s1 + $0x8f4] sm:$0xf0] }
  0x93   :  { %2320 = vmatpush.bf16.msra.mxu3 %v3736_v47  ;;  %2286 = vmatmul.bf16.vlgmr.msra.gmra.mxu0 %v5306_v29  ;;  %v4153_v47 = vld [vmem:[%s7237_s1 + $0x834] sm:$0xf0]  ;;  %v4801_v31 = vld [vmem:[%s7237_s1 + $0x7e4] sm:$0xf]  ;;  %v4024_v38 = vor.u32 %v4777_v26, %v4021_v30  ;;  %v4750_v39 = vld [vmem:[%s7237_s1 + $0x64c] sm:$0xf] }
  0x94   :  { %2330 = vmatpush.bf16.msrb.mxu0 %v3868_v48  ;;  %v3688_v48 = vor.u32 %v4693_v36, %v3685_v37  ;;  %v3784_v36 = vor.u32 %v4717_v19, %v3781_v22  ;;  %v3913_v40 = vld [vmem:[%s7237_s1 + $0x654] sm:$0xf0]  ;;  %v4774_v43 = vld [vmem:[%s7237_s1 + $0x70c] sm:$0xf]  ;;  %v3901_v52 = vld [vmem:[%s7237_s1 + $0x63c] sm:$0xf0] }
  0x95   :  { %2295 = vmatpush.bf16.msra.mxu1 %v3532_v55  ;;  %v4156_v55 = vor.u32 %v4810_v46, %v4153_v47  ;;  %v4105_v46 = vld [vmem:[%s7237_s1 + $0x7d4] sm:$0xf0]  ;;  %v4831_v47 = vld [vmem:[%s7237_s1 + $0x8d4] sm:$0xf]  ;;  %v430_v58 = vld [vmem:[%s7238_s2] sm:$0x7] }
  0x96   :  { %2308 = vmatpush.bf16.msra.mxu2 %v3628_v56  ;;  %v3949_v56 = vld [vmem:[%s7237_s1 + $0x69c] sm:$0xf0]  ;;  %v4771_v53 = vld [vmem:[%s7237_s1 + $0x6f4] sm:$0xf]  ;;  %v4744_v4 = vld [vmem:[%s7237_s1 + $0x61c] sm:$0xf] }
  0x97   :  { %2321 = vmatpush.bf16.msra.mxu3 %v3724_v59  ;;  %v4807_v59 = vld [vmem:[%s7237_s1 + $0x814] sm:$0xf]  ;;  %v3952_v63 = vor.u32 %v4759_v54, %v3949_v56  ;;  %v3997_v56 = vld [vmem:[%s7237_s1 + $0x6fc] sm:$0xf0]  ;;  %v3889_v6 = vld [vmem:[%s7237_s1 + $0x624] sm:$0xf0] }
  0x98   :  { %2331 = vmatpush.bf16.msrb.mxu0 %v3856_v61  ;;  %v4141_v61 = vld [vmem:[%s7237_s1 + $0x81c] sm:$0xf0]  ;;  %v4795_v57 = vld [vmem:[%s7237_s1 + $0x7b4] sm:$0xf]  ;;  %v4768_v10 = vld [vmem:[%s7237_s1 + $0x6dc] sm:$0xf] }
  0x99   :  { %2296 = vmatpush.bf16.msra.mxu1 %v3520_v8  ;;  %v4144_v8 = vor.u32 %v4807_v59, %v4141_v61  ;;  %v4093_v59 = vld [vmem:[%s7237_s1 + $0x7bc] sm:$0xf0]  ;;  %v4828_v61 = vld [vmem:[%s7237_s1 + $0x8bc] sm:$0xf]  ;;  %v3985_v11 = vld [vmem:[%s7237_s1 + $0x6e4] sm:$0xf0] }
  0x9a   :  { %2309 = vmatpush.bf16.msra.mxu2 %v3616_v9  ;;  %v3937_v9 = vld [vmem:[%s7237_s1 + $0x684] sm:$0xf0]  ;;  %v4213_v19 = vld [vmem:[%s7237_s1 + $0x8ac] sm:$0xf0]  ;;  %v3988_v22 = vor.u32 %v4768_v10, %v3985_v11  ;;  %v4816_v11 = vld [vmem:[%s7237_s1 + $0x85c] sm:$0xf] }
  0x9b   :  { %2322 = vmatpush.bf16.msra.mxu3 %v3712_v12  ;;  %v4804_v12 = vld [vmem:[%s7237_s1 + $0x7fc] sm:$0xf]  ;;  %v3940_v20 = vor.u32 %v4756_v7, %v3937_v9  ;;  %v432_v7 = vperm.slane %v430_v58, 0  ;;  %s3096_s0 = sshll.u32 %s7243_s7, 4  ;;  %s3097_s0 = int_to_ptr.hbm [resolvable:$true] %s3096_s0 }
  0x9c   :  { %2332 = vmatpush.bf16.msrb.mxu0 %v3844_v14  ;;  %v4129_v14 = vld [vmem:[%s7237_s1 + $0x804] sm:$0xf0] }
  0x9d   :  { %2297 = vmatpush.bf16.msra.mxu1 %v3508_v24  ;;  %v3925_v24 = vld [vmem:[%s7237_s1 + $0x66c] sm:$0xf0] }
  0x9e   :  { %2310 = vmatpush.bf16.msra.mxu2 %v3604_v25  ;;  %v4132_v25 = vor.u32 %v4804_v12, %v4129_v14  ;;  %v3928_v37 = vor.u32 %v4753_v23, %v3925_v24  ;;  %v4792_v12 = vld [vmem:[%s7237_s1 + $0x79c] sm:$0xf]  ;;  %v4081_v14 = vld [vmem:[%s7237_s1 + $0x7a4] sm:$0xf0]  ;;  %v4741_v23 = vld [vmem:[%s7237_s1 + $0x604] sm:$0xf] }
  0x9f   :  { %2323 = vmatpush.bf16.msra.mxu3 %v3700_v32  ;;  %v4117_v32 = vld [vmem:[%s7237_s1 + $0x7ec] sm:$0xf0] }
  0xa0   :  { %2333 = vmatpush.bf16.msrb.mxu0 %v3832_v33  ;;  %v4834_v33 = vld [vmem:[%s7237_s1 + $0x8ec] sm:$0xf]  ;;  %v4120_v41 = vor.u32 %v4801_v31, %v4117_v32  ;;  %v3877_v24 = vld [vmem:[%s7237_s1 + $0x60c] sm:$0xf0]  ;;  %v4084_v31 = vor.u32 %v4792_v12, %v4081_v14  ;;  %v4177_v12 = vld [vmem:[%s7237_s1 + $0x864] sm:$0xf0] }
  0xa1   :  { %2298 = vmatpush.bf16.msra.mxu1 %v3496_v44  ;;  %v4252_v42 = vor.u32 %v4834_v33, %v4249_v35  ;;  %v4009_v44 = vld [vmem:[%s7237_s1 + $0x714] sm:$0xf0]  ;;  %v3973_v33 = vld [vmem:[%s7237_s1 + $0x6cc] sm:$0xf0]  ;;  %v4789_v35 = vld [vmem:[%s7237_s1 + $0x784] sm:$0xf] }
  0xa2   :  { %2311 = vmatpush.bf16.msra.mxu2 %v3592_v45  ;;  %v4798_v45 = vld [vmem:[%s7237_s1 + $0x7cc] sm:$0xf]  ;;  %v4840_v14 = vld [vmem:[%s7237_s1 + $0x91c] sm:$0xf] }
  0xa3   :  { %2324 = vmatpush.bf16.msra.mxu3 %v3688_v48  ;;  %v4237_v48 = vld [vmem:[%s7237_s1 + $0x8dc] sm:$0xf0]  ;;  %v4108_v54 = vor.u32 %v4798_v45, %v4105_v46  ;;  %v3295_v46 = vld [vmem:[%s7237_s1 + $0x170] sm:$0xf] }
  0xa4   :  { %2334 = vmatpush.bf16.msrb.mxu0 %v3820_v49  ;;  %2299 = vmatmul.bf16.vlgmr.msra.gmra.mxu1 %v5382_v0  ;;  %v3916_v49 = vor.u32 %v4750_v39, %v3913_v40  ;;  %v4846_v39 = vld [vmem:[%s7237_s1 + $0x94c] sm:$0xf] }
  0xa5   :  { %2343 = vmatpush.bf16.msrb.mxu1 %v3964_v50  ;;  %2312 = vmatmul.bf16.vlgmr.msra.gmra.mxu2 %v5386_v2  ;;  %v4012_v50 = vor.u32 %v4774_v43, %v4009_v44  ;;  %v4572_v43 = vld [vmem:[%s7237_s1 + $0xb8] sm:$0xf0]  ;;  %v3880_v44 = vor.u32 %v4741_v23, %v3877_v24  ;;  %v4180_v24 = vor.u32 %v4816_v11, %v4177_v12  ;;  %v4581_v12 = vld [vmem:[%s7237_s1 + $0x100] sm:$0xf0] }
  0xa6   :  { %2356 = vmatpush.bf16.msrb.mxu2 %v4060_v51  ;;  %2325 = vmatmul.bf16.vlgmr.msra.gmra.mxu3 %v5377_v60  ;;  %v4747_v51 = vld [vmem:[%s7237_s1 + $0x634] sm:$0xf] }
  0xa7   :  { %2369 = vmatpush.bf16.msrb.mxu3 %v4156_v55  ;;  %v4240_v55 = vor.u32 %v4831_v47, %v4237_v48  ;;  %v4596_v47 = vld [vmem:[%s7237_s1 + $0x178] sm:$0xf0] }
  0xa8   :  { %2335 = vmatpush.bf16.msrb.mxu0 %v3808_v62  ;;  %v4225_v62 = vld [vmem:[%s7237_s1 + $0x8c4] sm:$0xf0]  ;;  %v2092_v30 = vpop.f32.mrf.mxu1  ;;  %v3296_v58 = vor.u32 %v4596_v47, %v3295_v46 }
  0xa9   :  { %2344 = vmatpush.bf16.msrb.mxu1 %v3952_v63  ;;  %v3904_v63 = vor.u32 %v4747_v51, %v3901_v52  ;;  %v4228_v9 = vor.u32 %v4828_v61, %v4225_v62  ;;  %v3187_v61 = vld [vmem:[%s7237_s1 + $0x98] sm:$0xf]  ;;  %v4569_v62 = vld [vmem:[%s7237_s1 + $0xa0] sm:$0xf0] }
  0xaa   :  { %2357 = vmatpush.bf16.msrb.mxu2 %v4048_v3  ;;  %v4000_v3 = vor.u32 %v4771_v53, %v3997_v56  ;;  %v4189_v56 = vld [vmem:[%s7237_s1 + $0x87c] sm:$0xf0]  ;;  %v3188_v10 = vor.u32 %v4569_v62, %v3187_v61  ;;  %v4641_v61 = vld [vmem:[%s7237_s1 + $0x2e0] sm:$0xf0] }
  0xab   :  { %2370 = vmatpush.bf16.msrb.mxu3 %v4144_v8  ;;  %v4096_v8 = vor.u32 %v4795_v57, %v4093_v59  ;;  %v2105_v48 = vpop.f32.mrf.mxu2  ;;  %v4843_v57 = vld [vmem:[%s7237_s1 + $0x934] sm:$0xf]  ;;  %v4285_v59 = vld [vmem:[%s7237_s1 + $0x93c] sm:$0xf0] }
  0xac   :  { %2336 = vmatpush.bf16.msrb.mxu0 %v3796_v18  ;;  %v4825_v18 = vld [vmem:[%s7237_s1 + $0x8a4] sm:$0xf] }
  0xad   :  { %2345 = vmatpush.bf16.msrb.mxu1 %v3940_v20  ;;  %v2079_v20 = vpop.f32.mrf.mxu0  ;;  %v4216_v32 = vor.u32 %v4825_v18, %v4213_v19  ;;  %v2118_v52 = vpop.f32.mrf.mxu3  ;;  %v4273_v19 = vld [vmem:[%s7237_s1 + $0x924] sm:$0xf0] }
  0xae   :  { %2358 = vmatpush.bf16.msrb.mxu2 %v4036_v21  ;;  %v3892_v21 = vor.u32 %v4744_v4, %v3889_v6  ;;  %v2080_v26 = vadd.f32 %v2079_v20, %v432_v7  ;;  %v3283_v4 = vld [vmem:[%s7237_s1 + $0x158] sm:$0xf]  ;;  %v4593_v6 = vld [vmem:[%s7237_s1 + $0x160] sm:$0xf0]  ;;  %v3175_v20 = vld [vmem:[%s7237_s1 + $0x80] sm:$0xf] }
  0xaf   :  { %2371 = vmatpush.bf16.msrb.mxu3 %v4132_v25  ;;  %v4765_v25 = vld [vmem:[%s7237_s1 + $0x6c4] sm:$0xf]  ;;  %v3284_v18 = vor.u32 %v4593_v6, %v3283_v4  ;;  %v3139_v6 = vld [vmem:[%s7237_s1 + $0x38] sm:$0xf] }
  0xb0   :  { %2337 = vmatpush.bf16.msrb.mxu0 %v3784_v36  ;;  %v4069_v36 = vld [vmem:[%s7237_s1 + $0x78c] sm:$0xf0]  ;;  %v2093_v40 = vadd.f32 %v2092_v30, %v2080_v26  ;;  %v3976_v45 = vor.u32 %v4765_v25, %v3973_v33  ;;  %v2094_v7 = vpop.f32.mrf.mxu1  ;;  %v4813_v25 = vld [vmem:[%s7237_s1 + $0x844] sm:$0xf] }
  0xb1   :  { %2346 = vmatpush.bf16.msrb.mxu1 %v3928_v37  ;;  %v4822_v37 = vld [vmem:[%s7237_s1 + $0x88c] sm:$0xf]  ;;  %v4165_v30 = vld [vmem:[%s7237_s1 + $0x84c] sm:$0xf0]  ;;  %v4557_v7 = vld [vmem:[%s7237_s1 + $0x40] sm:$0xf0] }
  0xb2   :  { %2359 = vmatpush.bf16.msrb.mxu2 %v4024_v38  ;;  %v4201_v38 = vld [vmem:[%s7237_s1 + $0x894] sm:$0xf0]  ;;  %v2106_v51 = vadd.f32 %v2105_v48, %v2093_v40  ;;  %v4620_v40 = vld [vmem:[%s7237_s1 + $0x238] sm:$0xf0] }
  0xb3   :  { %2372 = vmatpush.bf16.msrb.mxu3 %v4120_v41  ;;  %2338 = vmatmul.bf16.vlgmr.msrb.gmra.mxu0 %v5384_v1  ;;  %v4297_v41 = vld [vmem:[%s7237_s1 + $0x954] sm:$0xf0]  ;;  %v2107_v23 = vpop.f32.mrf.mxu2 }
  0xb4   :  { %2382 = vmatpush.bf16.msra.mxu0 %v4252_v42  ;;  %v3199_v42 = vld [vmem:[%s7237_s1 + $0xb0] sm:$0xf]  ;;  %v4300_v53 = vor.u32 %v4846_v39, %v4297_v41  ;;  %v4168_v41 = vor.u32 %v4813_v25, %v4165_v30  ;;  %v3127_v25 = vld [vmem:[%s7237_s1 + $0x20] sm:$0xf]  ;;  %v4578_v30 = vld [vmem:[%s7237_s1 + $0xe8] sm:$0xf0] }
  0xb5   :  { %2347 = vmatpush.bf16.msrb.mxu1 %v3916_v49  ;;  %v4072_v49 = vor.u32 %v4789_v35, %v4069_v36  ;;  %v2120_v26 = vpop.f32.mrf.mxu3  ;;  %v3163_v35 = vld [vmem:[%s7237_s1 + $0x68] sm:$0xf]  ;;  %v4563_v36 = vld [vmem:[%s7237_s1 + $0x70] sm:$0xf0]  ;;  %v3391_v39 = vld [vmem:[%s7237_s1 + $0x230] sm:$0xf] }
  0xb6   :  { %2360 = vmatpush.bf16.msrb.mxu2 %v4012_v50  ;;  %v4204_v50 = vor.u32 %v4822_v37, %v4201_v38  ;;  %v3259_v37 = vld [vmem:[%s7237_s1 + $0x128] sm:$0xf]  ;;  %v4587_v38 = vld [vmem:[%s7237_s1 + $0x130] sm:$0xf0]  ;;  %v3164_v46 = vor.u32 %v4563_v36, %v3163_v35  ;;  %v4554_v26 = vld [vmem:[%s7237_s1 + $0x28] sm:$0xf0] }
  0xb7   :  { %2373 = vmatpush.bf16.msrb.mxu3 %v4108_v54  ;;  %v3200_v54 = vor.u32 %v4572_v43, %v3199_v42  ;;  %v3487_v42 = vld [vmem:[%s7237_s1 + $0x2f0] sm:$0xf]  ;;  %v4644_v43 = vld [vmem:[%s7237_s1 + $0x2f8] sm:$0xf0]  ;;  %v4635_v35 = vld [vmem:[%s7237_s1 + $0x2b0] sm:$0xf0]  ;;  %v3128_v36 = vor.u32 %v4554_v26, %v3127_v25 }
  0xb8   :  { %2383 = vmatpush.bf16.msra.mxu0 %v4240_v55  ;;  %v4819_v55 = vld [vmem:[%s7237_s1 + $0x874] sm:$0xf] }
  0xb9   :  { %2348 = vmatpush.bf16.msrb.mxu1 %v3904_v63  ;;  %v2119_v63 = vadd.f32 %v2118_v52, %v2106_v51  ;;  %v3151_v51 = vld [vmem:[%s7237_s1 + $0x50] sm:$0xf]  ;;  %v4560_v52 = vld [vmem:[%s7237_s1 + $0x58] sm:$0xf0]  ;;  %v4599_v26 = vld [vmem:[%s7237_s1 + $0x190] sm:$0xf0] }
  0xba   :  { %2361 = vmatpush.bf16.msrb.mxu2 %v4000_v3  ;;  %v2081_v3 = vpop.f32.mrf.mxu0  ;;  %v3152_v62 = vor.u32 %v4560_v52, %v3151_v51  ;;  %v3679_v52 = vld [vmem:[%s7237_s1 + $0x470] sm:$0xf] }
  0xbb   :  { %2374 = vmatpush.bf16.msrb.mxu3 %v4096_v8  ;;  %v4192_v8 = vor.u32 %v4819_v55, %v4189_v56  ;;  %v4584_v55 = vld [vmem:[%s7237_s1 + $0x118] sm:$0xf0]  ;;  %v3379_v56 = vld [vmem:[%s7237_s1 + $0x218] sm:$0xf] }
  0xbc   :  { %2384 = vmatpush.bf16.msra.mxu0 %v4228_v9  ;;  %v4288_v9 = vor.u32 %v4843_v57, %v4285_v59  ;;  %v4617_v57 = vld [vmem:[%s7237_s1 + $0x220] sm:$0xf0]  ;;  %v3475_v59 = vld [vmem:[%s7237_s1 + $0x2d8] sm:$0xf] }
  0xbd   :  { %2349 = vmatpush.bf16.msrb.mxu1 %v3892_v21  ;;  %v4566_v21 = vld [vmem:[%s7237_s1 + $0x88] sm:$0xf0]  ;;  %v3380_v4 = vor.u32 %v4617_v57, %v3379_v56  ;;  %v3476_v11 = vor.u32 %v4641_v61, %v3475_v59  ;;  %v4605_v59 = vld [vmem:[%s7237_s1 + $0x1c0] sm:$0xf0]  ;;  %v3427_v61 = vld [vmem:[%s7237_s1 + $0x278] sm:$0xf] }
  0xbe   :  { %2362 = vmatpush.bf16.msrb.mxu2 %v3988_v22  ;;  %v4590_v22 = vld [vmem:[%s7237_s1 + $0x148] sm:$0xf0] }
  0xbf   :  { %2375 = vmatpush.bf16.msrb.mxu3 %v4084_v31  ;;  %v4837_v31 = vld [vmem:[%s7237_s1 + $0x904] sm:$0xf] }
  0xc0   :  { %2385 = vmatpush.bf16.msra.mxu0 %v4216_v32  ;;  %v4261_v32 = vld [vmem:[%s7237_s1 + $0x90c] sm:$0xf0] }
  0xc1   :  { %2350 = vmatpush.bf16.msrb.mxu1 %v3880_v44  ;;  %v2144_v48 = vpop.f32.mrf.mxu1 }
  0xc2   :  { %2363 = vmatpush.bf16.msrb.mxu2 %v3976_v45  ;;  %v2131_v44 = vpop.f32.mrf.mxu0  ;;  %v4264_v45 = vor.u32 %v4837_v31, %v4261_v32  ;;  %v3355_v31 = vld [vmem:[%s7237_s1 + $0x1e8] sm:$0xf]  ;;  %v4611_v32 = vld [vmem:[%s7237_s1 + $0x1f0] sm:$0xf0] }
  0xc3   :  { %2376 = vmatpush.bf16.msrb.mxu3 %v4072_v49  ;;  %v2132_v47 = vadd.f32 %v2131_v44, %v2119_v63  ;;  %v3260_v49 = vor.u32 %v4587_v38, %v3259_v37  ;;  %v3115_v37 = vld [vmem:[%s7237_s1 + $0x8] sm:$0xf] }
  0xc4   :  { %2386 = vmatpush.bf16.msra.mxu0 %v4204_v50  ;;  %2351 = vmatmul.bf16.vlgmr.msrb.gmra.mxu1 %v5614_v5  ;;  %v3271_v5 = vld [vmem:[%s7237_s1 + $0x140] sm:$0xf]  ;;  %v3392_v50 = vor.u32 %v4620_v40, %v3391_v39  ;;  %v3356_v40 = vor.u32 %v4611_v32, %v3355_v31  ;;  %v4659_v31 = vld [vmem:[%s7237_s1 + $0x370] sm:$0xf0]  ;;  %v3643_v32 = vld [vmem:[%s7237_s1 + $0x428] sm:$0xf] }
  0xc5   :  { %2399 = vmatpush.bf16.msra.mxu1 %v4300_v53  ;;  %2364 = vmatmul.bf16.vlgmr.msrb.gmra.mxu2 %v5642_v16  ;;  %v4276_v16 = vor.u32 %v4840_v14, %v4273_v19  ;;  %v3272_v33 = vor.u32 %v4590_v22, %v3271_v5  ;;  %v3247_v53 = vld [vmem:[%s7237_s1 + $0x110] sm:$0xf]  ;;  %v3367_v14 = vld [vmem:[%s7237_s1 + $0x200] sm:$0xf]  ;;  %v3140_v5 = vor.u32 %v4557_v7, %v3139_v6  ;;  %v3667_v6 = vld [vmem:[%s7237_s1 + $0x458] sm:$0xf] }
  0xc6   :  { %2408 = vmatpush.bf16.msra.mxu2 %v3200_v54  ;;  %2377 = vmatmul.bf16.vlgmr.msrb.gmra.mxu3 %v5634_v13  ;;  %v3176_v13 = vor.u32 %v4566_v21, %v3175_v20  ;;  %v3488_v54 = vor.u32 %v4644_v43, %v3487_v42  ;;  %v3248_v3 = vor.u32 %v4584_v55, %v3247_v53  ;;  %v3463_v19 = vld [vmem:[%s7237_s1 + $0x2c0] sm:$0xf]  ;;  %v4575_v42 = vld [vmem:[%s7237_s1 + $0xd0] sm:$0xf0]  ;;  %v4692_v53 = vld [vmem:[%s7237_s1 + $0x478] sm:$0xf0] }
  0xc7   :  { %2421 = vmatpush.bf16.msra.mxu3 %v3296_v58  ;;  %v2145_v58 = vadd.f32 %v2144_v48, %v2132_v47  ;;  %v3439_v47 = vld [vmem:[%s7237_s1 + $0x290] sm:$0xf]  ;;  %v4632_v48 = vld [vmem:[%s7237_s1 + $0x298] sm:$0xf0]  ;;  %v4689_v7 = vld [vmem:[%s7237_s1 + $0x460] sm:$0xf0] }
  0xc8   :  { %2387 = vmatpush.bf16.msra.mxu0 %v4192_v8  ;;  %v2157_v63 = vpop.f32.mrf.mxu2  ;;  %v3235_v8 = vld [vmem:[%s7237_s1 + $0xf8] sm:$0xf]  ;;  %v3440_v56 = vor.u32 %v4632_v48, %v3439_v47  ;;  %v4656_v47 = vld [vmem:[%s7237_s1 + $0x358] sm:$0xf0]  ;;  %v3631_v48 = vld [vmem:[%s7237_s1 + $0x410] sm:$0xf] }
  0xc9   :  { %2400 = vmatpush.bf16.msra.mxu1 %v4288_v9  ;;  %v2158_v9 = vadd.f32 %v2157_v63, %v2145_v58  ;;  %v2146_v22 = vpop.f32.mrf.mxu1  ;;  %v3236_v23 = vor.u32 %v4581_v12, %v3235_v8  ;;  %v3331_v58 = vld [vmem:[%s7237_s1 + $0x1b8] sm:$0xf]  ;;  %v4629_v63 = vld [vmem:[%s7237_s1 + $0x280] sm:$0xf0]  ;;  %v4602_v12 = vld [vmem:[%s7237_s1 + $0x1a8] sm:$0xf0] }
  0xca   :  { %2409 = vmatpush.bf16.msra.mxu2 %v3188_v10  ;;  %v2170_v10 = vpop.f32.mrf.mxu3  ;;  %v2133_v21 = vpop.f32.mrf.mxu0  ;;  %v3332_v8 = vor.u32 %v4605_v59, %v3331_v58  ;;  %v4686_v22 = vld [vmem:[%s7237_s1 + $0x448] sm:$0xf0]  ;;  %v3523_v59 = vld [vmem:[%s7237_s1 + $0x338] sm:$0xf] }
  0xcb   :  { %2422 = vmatpush.bf16.msra.mxu3 %v3284_v18  ;;  %v4614_v18 = vld [vmem:[%s7237_s1 + $0x208] sm:$0xf0]  ;;  %v6353_v20 = vadd.f32 %v2170_v10, %v2158_v9  ;;  %v3428_v9 = vor.u32 %v4629_v63, %v3427_v61  ;;  %v4653_v61 = vld [vmem:[%s7237_s1 + $0x340] sm:$0xf0] }
  0xcc   :  { %2388 = vmatpush.bf16.msra.mxu0 %v4180_v24  ;;  %v3368_v24 = vor.u32 %v4614_v18, %v3367_v14  ;;  %v3415_v14 = vld [vmem:[%s7237_s1 + $0x260] sm:$0xf]  ;;  %v3668_v18 = vor.u32 %v4689_v7, %v3667_v6  ;;  %v4662_v21 = vld [vmem:[%s7237_s1 + $0x388] sm:$0xf0]  ;;  %v4677_v7 = vld [vmem:[%s7237_s1 + $0x400] sm:$0xf0] }
  0xcd   :  { %2401 = vmatpush.bf16.msra.mxu1 %v4276_v16  ;;  %v3223_v16 = vld [vmem:[%s7237_s1 + $0xe0] sm:$0xf] }
  0xce   :  { %2410 = vmatpush.bf16.msra.mxu2 %v3176_v13  ;;  %v3224_v39 = vor.u32 %v4578_v30, %v3223_v16  ;;  %v3403_v16 = vld [vmem:[%s7237_s1 + $0x248] sm:$0xf] }
  0xcf   :  { %2423 = vmatpush.bf16.msra.mxu3 %v3272_v33  ;;  %v3451_v33 = vld [vmem:[%s7237_s1 + $0x2a8] sm:$0xf] }
  0xd0   :  { %2389 = vmatpush.bf16.msra.mxu0 %v4168_v41  ;;  %v2159_v38 = vpop.f32.mrf.mxu2  ;;  %v3211_v41 = vld [vmem:[%s7237_s1 + $0xc8] sm:$0xf]  ;;  %v3452_v44 = vor.u32 %v4635_v35, %v3451_v33  ;;  %v4683_v35 = vld [vmem:[%s7237_s1 + $0x430] sm:$0xf0] }
  0xd1   :  { %2402 = vmatpush.bf16.msra.mxu1 %v4264_v45  ;;  %v3343_v45 = vld [vmem:[%s7237_s1 + $0x1d0] sm:$0xf]  ;;  %v3547_v30 = vld [vmem:[%s7237_s1 + $0x368] sm:$0xf] }
  0xd2   :  { %2411 = vmatpush.bf16.msra.mxu2 %v3164_v46  ;;  %v2172_v43 = vpop.f32.mrf.mxu3  ;;  %v4608_v46 = vld [vmem:[%s7237_s1 + $0x1d8] sm:$0xf0] }
  0xd3   :  { %2424 = vmatpush.bf16.msra.mxu3 %v3260_v49  ;;  %2390 = vmatmul.bf16.vlgmr.msra.gmra.mxu0 %v5644_v17  ;;  %v4638_v17 = vld [vmem:[%s7237_s1 + $0x2c8] sm:$0xf0]  ;;  %v3583_v49 = vld [vmem:[%s7237_s1 + $0x3b0] sm:$0xf]  ;;  %v3344_v55 = vor.u32 %v4608_v46, %v3343_v45  ;;  %v3548_v43 = vor.u32 %v4659_v31, %v3547_v30  ;;  %v4647_v30 = vld [vmem:[%s7237_s1 + $0x310] sm:$0xf0] }
  0xd4   :  { %2434 = vmatpush.bf16.msrb.mxu0 %v3392_v50  ;;  %v3464_v13 = vor.u32 %v4638_v17, %v3463_v19  ;;  %4306 = vmatmul.msk.bf16.vlgmr.msra.gmra.mxu1 %vm2067_vm0, %v5752_v15  ;;  %v4551_v15 = vld [vmem:[%s7237_s1 + $0x10] sm:$0xf0]  ;;  %v4668_v50 = vld [vmem:[%s7237_s1 + $0x3b8] sm:$0xf0]  ;;  %v4626_v19 = vld [vmem:[%s7237_s1 + $0x268] sm:$0xf0] }
  0xd5   :  { %2447 = vmatpush.bf16.msrb.mxu1 %v3488_v54  ;;  %v3116_v51 = vor.u32 %v4551_v15, %v3115_v37  ;;  %v3212_v54 = vor.u32 %v4575_v42, %v3211_v41  ;;  %v3584_v57 = vor.u32 %v4668_v50, %v3583_v49  ;;  %v3559_v17 = vld [vmem:[%s7237_s1 + $0x380] sm:$0xf]  ;;  %v3416_v25 = vor.u32 %v4626_v19, %v3415_v14  ;;  %v4716_v37 = vld [vmem:[%s7237_s1 + $0x538] sm:$0xf0]  ;;  %v3871_v15 = vld [vmem:[%s7237_s1 + $0x5f0] sm:$0xf] }
  0xd6   :  { %2412 = vmatpush.bf16.msra.mxu2 %v3152_v62  ;;  %v3680_v62 = vor.u32 %v4692_v53, %v3679_v52  ;;  %v4740_v41 = vld [vmem:[%s7237_s1 + $0x5f8] sm:$0xf0]  ;;  %v4713_v52 = vld [vmem:[%s7237_s1 + $0x520] sm:$0xf0]  ;;  %v3859_v53 = vld [vmem:[%s7237_s1 + $0x5d8] sm:$0xf] }
  0xd7   :  { %2425 = vmatpush.bf16.msra.mxu3 %v3248_v3  ;;  %v3571_v3 = vld [vmem:[%s7237_s1 + $0x398] sm:$0xf]  ;;  %v3872_v49 = vor.u32 %v4740_v41, %v3871_v15  ;;  %v4680_v50 = vld [vmem:[%s7237_s1 + $0x418] sm:$0xf0]  ;;  %v3595_v31 = vld [vmem:[%s7237_s1 + $0x3c8] sm:$0xf] }
  0xd8   :  { %2435 = vmatpush.bf16.msrb.mxu0 %v3380_v4  ;;  %v4665_v4 = vld [vmem:[%s7237_s1 + $0x3a0] sm:$0xf0]  ;;  %v4728_v15 = vld [vmem:[%s7237_s1 + $0x598] sm:$0xf0]  ;;  %v3967_v41 = vld [vmem:[%s7237_s1 + $0x6b0] sm:$0xf] }
  0xd9   :  { %2448 = vmatpush.bf16.msrb.mxu1 %v3476_v11  ;;  %v3572_v10 = vor.u32 %v4665_v4, %v3571_v3  ;;  %v3319_v11 = vld [vmem:[%s7237_s1 + $0x1a0] sm:$0xf] }
  0xda   :  { %2413 = vmatpush.bf16.msra.mxu2 %v3140_v5  ;;  %v3655_v5 = vld [vmem:[%s7237_s1 + $0x440] sm:$0xf] }
  0xdb   :  { %2426 = vmatpush.bf16.msra.mxu3 %v3236_v23  ;;  %v3320_v23 = vor.u32 %v4602_v12, %v3319_v11  ;;  %v4734_v11 = vld [vmem:[%s7237_s1 + $0x5c8] sm:$0xf0] }
  0xdc   :  { %2436 = vmatpush.bf16.msrb.mxu0 %v3368_v24  ;;  %v3307_v24 = vld [vmem:[%s7237_s1 + $0x188] sm:$0xf] }
  0xdd   :  { %2449 = vmatpush.bf16.msrb.mxu1 %v3464_v13  ;;  %v3656_v13 = vor.u32 %v4686_v22, %v3655_v5  ;;  %v4674_v22 = vld [vmem:[%s7237_s1 + $0x3e8] sm:$0xf0] }
  0xde   :  { %2414 = vmatpush.bf16.msra.mxu2 %v3128_v36  ;;  %v3775_v36 = vld [vmem:[%s7237_s1 + $0x530] sm:$0xf] }
  0xdf   :  { %2427 = vmatpush.bf16.msra.mxu3 %v3224_v39  ;;  %v3308_v39 = vor.u32 %v4599_v26, %v3307_v24  ;;  %v3776_v46 = vor.u32 %v4716_v37, %v3775_v36  ;;  %v4707_v24 = vld [vmem:[%s7237_s1 + $0x4f0] sm:$0xf0]  ;;  %v3727_v36 = vld [vmem:[%s7237_s1 + $0x4d0] sm:$0xf]  ;;  %v4704_v37 = vld [vmem:[%s7237_s1 + $0x4d8] sm:$0xf0] }
  0xe0   :  { %2437 = vmatpush.bf16.msrb.mxu0 %v3356_v40  ;;  %v2183_v33 = vpop.f32.mrf.mxu0 }
  0xe1   :  { %2450 = vmatpush.bf16.msrb.mxu1 %v3452_v44  ;;  %v2184_v38 = vadd.f32 %v2183_v33, %v6353_v20  ;;  %v2196_v40 = vpop.f32.mrf.mxu1  ;;  %v3644_v44 = vor.u32 %v4683_v35, %v3643_v32  ;;  %v3535_v20 = vld [vmem:[%s7237_s1 + $0x350] sm:$0xf]  ;;  %v4671_v32 = vld [vmem:[%s7237_s1 + $0x3d0] sm:$0xf0] }
  0xe2   :  { %2415 = vmatpush.bf16.msra.mxu2 %v3116_v51  ;;  %v3763_v51 = vld [vmem:[%s7237_s1 + $0x518] sm:$0xf] }
  0xe3   :  { %2428 = vmatpush.bf16.msra.mxu3 %v3212_v54  ;;  %v2197_v45 = vadd.f32 %v2196_v40, %v2184_v38  ;;  %v4737_v54 = vld [vmem:[%s7237_s1 + $0x5e0] sm:$0xf0]  ;;  %v3764_v58 = vor.u32 %v4713_v52, %v3763_v51  ;;  %v3823_v38 = vld [vmem:[%s7237_s1 + $0x590] sm:$0xf]  ;;  %v3811_v51 = vld [vmem:[%s7237_s1 + $0x578] sm:$0xf] }
  0xe4   :  { %2438 = vmatpush.bf16.msrb.mxu0 %v3344_v55  ;;  %v3536_v55 = vor.u32 %v4656_v47, %v3535_v20  ;;  %v3860_v3 = vor.u32 %v4737_v54, %v3859_v53  ;;  %v3728_v20 = vor.u32 %v4704_v37, %v3727_v36  ;;  %v3824_v47 = vor.u32 %v4728_v15, %v3823_v38  ;;  %v4725_v53 = vld [vmem:[%s7237_s1 + $0x580] sm:$0xf0]  ;;  %v3955_v54 = vld [vmem:[%s7237_s1 + $0x698] sm:$0xf]  ;;  %v4015_v36 = vld [vmem:[%s7237_s1 + $0x710] sm:$0xf] }
  0xe5   :  { %2451 = vmatpush.bf16.msrb.mxu1 %v3440_v56  ;;  %2416 = vmatmul.bf16.vlgmr.msra.gmra.mxu2 %v5304_v28  ;;  %v3560_v28 = vor.u32 %v4662_v21, %v3559_v17  ;;  %v3632_v56 = vor.u32 %v4680_v50, %v3631_v48  ;;  %v4650_v21 = vld [vmem:[%s7237_s1 + $0x328] sm:$0xf0]  ;;  %v4701_v50 = vld [vmem:[%s7237_s1 + $0x4c0] sm:$0xf0]  ;;  %v4776_v38 = vld [vmem:[%s7237_s1 + $0x718] sm:$0xf0] }
  0xe6   :  { %2460 = vmatpush.bf16.msrb.mxu2 %v3584_v57  ;;  %2429 = vmatmul.bf16.vlgmr.msra.gmra.mxu3 %v5314_v34  ;;  %v4623_v34 = vld [vmem:[%s7237_s1 + $0x250] sm:$0xf0]  ;;  %v4809_v15 = vld [vmem:[%s7237_s1 + $0x820] sm:$0xf0] }
  0xe7   :  { %2473 = vmatpush.bf16.msrb.mxu3 %v3680_v62  ;;  %v3404_v42 = vor.u32 %v4623_v34, %v3403_v16  ;;  %v3619_v62 = vld [vmem:[%s7237_s1 + $0x3f8] sm:$0xf]  ;;  %v3499_v16 = vld [vmem:[%s7237_s1 + $0x308] sm:$0xf] }
  0xe8   :  { %2439 = vmatpush.bf16.msrb.mxu0 %v3332_v8  ;;  %v2209_v57 = vpop.f32.mrf.mxu2  ;;  %v2185_v4 = vpop.f32.mrf.mxu0  ;;  %v3751_v8 = vld [vmem:[%s7237_s1 + $0x500] sm:$0xf]  ;;  %v3620_v19 = vor.u32 %v4677_v7, %v3619_v62 }
  0xe9   :  { %2452 = vmatpush.bf16.msrb.mxu1 %v3428_v9  ;;  %v2210_v63 = vadd.f32 %v2209_v57, %v2197_v45  ;;  %v4710_v9 = vld [vmem:[%s7237_s1 + $0x508] sm:$0xf0]  ;;  %v2198_v12 = vpop.f32.mrf.mxu1  ;;  %v4788_v45 = vld [vmem:[%s7237_s1 + $0x778] sm:$0xf0]  ;;  %v4785_v57 = vld [vmem:[%s7237_s1 + $0x760] sm:$0xf0] }
  0xea   :  { %2461 = vmatpush.bf16.msrb.mxu2 %v3572_v10  ;;  %v3847_v10 = vld [vmem:[%s7237_s1 + $0x5c0] sm:$0xf]  ;;  %v3752_v17 = vor.u32 %v4710_v9, %v3751_v8  ;;  %v4758_v8 = vld [vmem:[%s7237_s1 + $0x688] sm:$0xf0]  ;;  %v3691_v12 = vld [vmem:[%s7237_s1 + $0x488] sm:$0xf] }
  0xeb   :  { %2474 = vmatpush.bf16.msrb.mxu3 %v3668_v18  ;;  %v2222_v6 = vpop.f32.mrf.mxu3  ;;  %v3524_v18 = vor.u32 %v4653_v61, %v3523_v59  ;;  %v3848_v5 = vor.u32 %v4734_v11, %v3847_v10  ;;  %v3812_v59 = vor.u32 %v4725_v53, %v3811_v51  ;;  %v3703_v62 = vld [vmem:[%s7237_s1 + $0x4a0] sm:$0xf]  ;;  %v4773_v51 = vld [vmem:[%s7237_s1 + $0x700] sm:$0xf0]  ;;  %v4806_v53 = vld [vmem:[%s7237_s1 + $0x808] sm:$0xf0] }
  0xec   :  { %2440 = vmatpush.bf16.msrb.mxu0 %v3320_v23  ;;  %v6554_v14 = vadd.f32 %v2222_v6, %v2210_v63  ;;  %v3739_v23 = vld [vmem:[%s7237_s1 + $0x4e8] sm:$0xf]  ;;  %v4698_v63 = vld [vmem:[%s7237_s1 + $0x4a8] sm:$0xf0]  ;;  %v3943_v7 = vld [vmem:[%s7237_s1 + $0x680] sm:$0xf] }
  0xed   :  { %2453 = vmatpush.bf16.msrb.mxu1 %v3416_v25  ;;  %v3835_v25 = vld [vmem:[%s7237_s1 + $0x5a8] sm:$0xf]  ;;  %v4722_v6 = vld [vmem:[%s7237_s1 + $0x568] sm:$0xf0]  ;;  %v4039_v10 = vld [vmem:[%s7237_s1 + $0x740] sm:$0xf]  ;;  %v3704_v11 = vor.u32 %v4698_v63, %v3703_v62 }
  0xee   :  { %2462 = vmatpush.bf16.msrb.mxu2 %v3560_v28  ;;  %v4731_v28 = vld [vmem:[%s7237_s1 + $0x5b0] sm:$0xf0]  ;;  %v4770_v63 = vld [vmem:[%s7237_s1 + $0x6e8] sm:$0xf0] }
  0xef   :  { %2475 = vmatpush.bf16.msrb.mxu3 %v3656_v13  ;;  %v3740_v13 = vor.u32 %v4707_v24, %v3739_v23  ;;  %v3836_v35 = vor.u32 %v4731_v28, %v3835_v25  ;;  %v4779_v23 = vld [vmem:[%s7237_s1 + $0x730] sm:$0xf0]  ;;  %v4159_v24 = vld [vmem:[%s7237_s1 + $0x830] sm:$0xf]  ;;  %v4812_v25 = vld [vmem:[%s7237_s1 + $0x838] sm:$0xf0] }
  0xf0   :  { %2441 = vmatpush.bf16.msrb.mxu0 %v3308_v39  ;;  %v2211_v33 = vpop.f32.mrf.mxu2  ;;  %v6601_v40 = vpop.f32.mrf.mxu0 }
  0xf1   :  { %2454 = vmatpush.bf16.msrb.mxu1 %v3404_v42  ;;  %v4764_v42 = vld [vmem:[%s7237_s1 + $0x6b8] sm:$0xf0]  ;;  %v3919_v33 = vld [vmem:[%s7237_s1 + $0x650] sm:$0xf] }
  0xf2   :  { %2463 = vmatpush.bf16.msrb.mxu2 %v3548_v43  ;;  %v3500_v43 = vor.u32 %v4647_v30, %v3499_v16  ;;  %v3968_v48 = vor.u32 %v4764_v42, %v3967_v41  ;;  %v4836_v16 = vld [vmem:[%s7237_s1 + $0x8f8] sm:$0xf0]  ;;  %v4243_v41 = vld [vmem:[%s7237_s1 + $0x8d8] sm:$0xf]  ;;  %v4833_v42 = vld [vmem:[%s7237_s1 + $0x8e0] sm:$0xf0] }
  0xf3   :  { %2476 = vmatpush.bf16.msrb.mxu3 %v3644_v44  ;;  %2442 = vmatmul.bf16.vlgmr.msrb.gmra.mxu0 %v5302_v27  ;;  %v3511_v27 = vld [vmem:[%s7237_s1 + $0x320] sm:$0xf]  ;;  %v2224_v39 = vpop.f32.mrf.mxu3  ;;  %v4063_v44 = vld [vmem:[%s7237_s1 + $0x770] sm:$0xf] }
  0xf4   :  { %2486 = vmatpush.bf16.msra.mxu0 %v3776_v46  ;;  %2455 = vmatmul.bf16.vlgmr.msrb.gmra.mxu1 %v5306_v29  ;;  %v3607_v29 = vld [vmem:[%s7237_s1 + $0x3e0] sm:$0xf]  ;;  %v3512_v26 = vor.u32 %v4650_v21, %v3511_v27  ;;  %v3596_v46 = vor.u32 %v4671_v32, %v3595_v31  ;;  %v4064_v52 = vor.u32 %v4788_v45, %v4063_v44  ;;  %v3787_v27 = vld [vmem:[%s7237_s1 + $0x548] sm:$0xf]  ;;  %v4147_v39 = vld [vmem:[%s7237_s1 + $0x818] sm:$0xf] }
  0xf5   :  { %2499 = vmatpush.bf16.msra.mxu1 %v3872_v49  ;;  %v3608_v34 = vor.u32 %v4674_v22, %v3607_v29  ;;  %v3715_v49 = vld [vmem:[%s7237_s1 + $0x4b8] sm:$0xf]  ;;  %v3931_v29 = vld [vmem:[%s7237_s1 + $0x668] sm:$0xf]  ;;  %v4160_v32 = vor.u32 %v4812_v25, %v4159_v24  ;;  %v4016_v45 = vor.u32 %v4776_v38, %v4015_v36  ;;  %v4848_v24 = vld [vmem:[%s7237_s1 + $0x958] sm:$0xf0] }
  0xf6   :  { %2464 = vmatpush.bf16.msrb.mxu2 %v3536_v55  ;;  %v4761_v55 = vld [vmem:[%s7237_s1 + $0x6a0] sm:$0xf0]  ;;  %v4027_v22 = vld [vmem:[%s7237_s1 + $0x728] sm:$0xf]  ;;  %v4291_v38 = vld [vmem:[%s7237_s1 + $0x938] sm:$0xf] }
  0xf7   :  { %2477 = vmatpush.bf16.msrb.mxu3 %v3632_v56  ;;  %v4051_v56 = vld [vmem:[%s7237_s1 + $0x758] sm:$0xf]  ;;  %v3956_v61 = vor.u32 %v4761_v55, %v3955_v54  ;;  %v4028_v31 = vor.u32 %v4779_v23, %v4027_v22  ;;  %v4231_v54 = vld [vmem:[%s7237_s1 + $0x8c0] sm:$0xf]  ;;  %v4824_v22 = vld [vmem:[%s7237_s1 + $0x898] sm:$0xf0] }
  0xf8   :  { %2487 = vmatpush.bf16.msra.mxu0 %v3764_v58  ;;  %v3716_v58 = vor.u32 %v4701_v50, %v3715_v49  ;;  %v4052_v4 = vor.u32 %v4785_v57, %v4051_v56  ;;  %v2237_v9 = vpop.f32.mrf.mxu0  ;;  %v4244_v50 = vor.u32 %v4833_v42, %v4243_v41  ;;  %v4303_v23 = vld [vmem:[%s7237_s1 + $0x950] sm:$0xf]  ;;  %v4358_v41 = vld [vmem:[%s7239_s3 + $0x60] sm:$0xf]  ;;  %v4862_v42 = vld [vmem:[%s7239_s3 + $0x64] sm:$0xf0] }
  0xf9   :  { %2500 = vmatpush.bf16.msra.mxu1 %v3860_v3  ;;  %v3799_v3 = vld [vmem:[%s7237_s1 + $0x560] sm:$0xf] }
  0xfa   :  { %2465 = vmatpush.bf16.msrb.mxu2 %v3524_v18  ;;  %v3800_v18 = vor.u32 %v4722_v6, %v3799_v3  ;;  %v4123_v3 = vld [vmem:[%s7237_s1 + $0x7e8] sm:$0xf] }
  0xfb   :  { %2478 = vmatpush.bf16.msrb.mxu3 %v3620_v19  ;;  %v3944_v19 = vor.u32 %v4758_v8, %v3943_v7  ;;  %v4219_v6 = vld [vmem:[%s7237_s1 + $0x8a8] sm:$0xf]  ;;  %v4827_v7 = vld [vmem:[%s7237_s1 + $0x8b0] sm:$0xf0] }
  0xfc   :  { %2488 = vmatpush.bf16.msra.mxu0 %v3752_v17  ;;  %v4695_v17 = vld [vmem:[%s7237_s1 + $0x490] sm:$0xf0] }
  0xfd   :  { %2501 = vmatpush.bf16.msra.mxu1 %v3848_v5  ;;  %v4755_v5 = vld [vmem:[%s7237_s1 + $0x670] sm:$0xf0]  ;;  %v3692_v28 = vor.u32 %v4695_v17, %v3691_v12 }
  0xfe   :  { %2466 = vmatpush.bf16.msrb.mxu2 %v3512_v26  ;;  %v4255_v26 = vld [vmem:[%s7237_s1 + $0x8f0] sm:$0xf]  ;;  %v3932_v30 = vor.u32 %v4755_v5, %v3931_v29  ;;  %v4767_v17 = vld [vmem:[%s7237_s1 + $0x6d0] sm:$0xf0]  ;;  %v4800_v29 = vld [vmem:[%s7237_s1 + $0x7d8] sm:$0xf0] }
  0xff   :  { %2479 = vmatpush.bf16.msrb.mxu3 %v3608_v34  ;;  %v4256_v37 = vor.u32 %v4836_v16, %v4255_v26  ;;  %v4207_v5 = vld [vmem:[%s7237_s1 + $0x890] sm:$0xf]  ;;  %v4864_v26 = vld [vmem:[%s7239_s3 + $0x74] sm:$0xf0] }
 0x100   :  { %2489 = vmatpush.bf16.msra.mxu0 %v3740_v13 }
 0x101   :  { %2502 = vmatpush.bf16.msra.mxu1 %v3836_v35  ;;  %v6704_v34 = vpop.f32.mrf.mxu1  ;;  %v4752_v35 = vld [vmem:[%s7237_s1 + $0x658] sm:$0xf0] }
 0x102   :  { %2467 = vmatpush.bf16.msrb.mxu2 %v3500_v43  ;;  %v3920_v43 = vor.u32 %v4752_v35, %v3919_v33  ;;  %v4797_v33 = vld [vmem:[%s7237_s1 + $0x7c0] sm:$0xf0]  ;;  %v4195_v35 = vld [vmem:[%s7237_s1 + $0x878] sm:$0xf] }
 0x103   :  { %2480 = vmatpush.bf16.msrb.mxu3 %v3596_v46  ;;  %v4148_v46 = vor.u32 %v4809_v15, %v4147_v39  ;;  %v4845_v39 = vld [vmem:[%s7237_s1 + $0x940] sm:$0xf0] }
 0x104   :  { %2490 = vmatpush.bf16.msra.mxu0 %v3728_v20  ;;  %v3907_v20 = vld [vmem:[%s7237_s1 + $0x638] sm:$0xf] }
 0x105   :  { %2503 = vmatpush.bf16.msra.mxu1 %v3824_v47  ;;  %2468 = vmatmul.bf16.vlgmr.msrb.gmra.mxu2 %v5382_v0  ;;  %v4782_v0 = vld [vmem:[%s7237_s1 + $0x748] sm:$0xf0]  ;;  %v4749_v47 = vld [vmem:[%s7237_s1 + $0x640] sm:$0xf0] }
 0x106   :  { %2512 = vmatpush.bf16.msra.mxu2 %v3968_v48  ;;  %2481 = vmatmul.bf16.vlgmr.msrb.gmra.mxu3 %v5386_v2  ;;  %v4719_v2 = vld [vmem:[%s7237_s1 + $0x550] sm:$0xf0]  ;;  %v4040_v21 = vor.u32 %v4782_v0, %v4039_v10  ;;  %v4003_v48 = vld [vmem:[%s7237_s1 + $0x6f8] sm:$0xf]  ;;  %v3908_v56 = vor.u32 %v4749_v47, %v3907_v20  ;;  %v3883_v10 = vld [vmem:[%s7237_s1 + $0x608] sm:$0xf] }
 0x107   :  { %2525 = vmatpush.bf16.msra.mxu3 %v4064_v52  ;;  %v3788_v13 = vor.u32 %v4719_v2, %v3787_v27  ;;  %v4135_v52 = vld [vmem:[%s7237_s1 + $0x800] sm:$0xf]  ;;  %v4004_v57 = vor.u32 %v4773_v51, %v4003_v48  ;;  %v4220_v2 = vor.u32 %v4827_v7, %v4219_v6  ;;  %v4794_v47 = vld [vmem:[%s7237_s1 + $0x7a8] sm:$0xf0]  ;;  %v4359_v51 = vor.u32 %v4862_v42, %v4358_v41  ;;  %v4839_v6 = vld [vmem:[%s7237_s1 + $0x910] sm:$0xf0] }
 0x108   :  { %2491 = vmatpush.bf16.msra.mxu0 %v3716_v58  ;;  %v6730_v44 = vpop.f32.mrf.mxu2  ;;  %v4136_v58 = vor.u32 %v4806_v53, %v4135_v52  ;;  %v4087_v20 = vld [vmem:[%s7237_s1 + $0x7a0] sm:$0xf]  ;;  %v4818_v52 = vld [vmem:[%s7237_s1 + $0x868] sm:$0xf0]  ;;  %v4414_v42 = vld [vmem:[%s7239_s3 + $0xd0] sm:$0xf] }
 0x109   :  { %2504 = vmatpush.bf16.msra.mxu1 %v3812_v59  ;;  %v6741_v49 = vpop.f32.mrf.mxu3  ;;  %v2250_v55 = vpop.f32.mrf.mxu1  ;;  %v3895_v59 = vld [vmem:[%s7237_s1 + $0x620] sm:$0xf] }
 0x10a   :  { %2513 = vmatpush.bf16.msra.mxu2 %v3956_v61  ;;  %v3991_v61 = vld [vmem:[%s7237_s1 + $0x6e0] sm:$0xf]  ;;  %v4350_v55 = vld [vmem:[%s7239_s3 + $0x50] sm:$0xf] }
 0x10b   :  { %2526 = vmatpush.bf16.msra.mxu3 %v4052_v4  ;;  %v4803_v4 = vld [vmem:[%s7237_s1 + $0x7f0] sm:$0xf0]  ;;  %v4183_v48 = vld [vmem:[%s7237_s1 + $0x860] sm:$0xf] }
 0x10c   :  { %2492 = vmatpush.bf16.msra.mxu0 %v3704_v11  ;;  %v3992_v11 = vor.u32 %v4770_v63, %v3991_v61  ;;  %v4124_v12 = vor.u32 %v4803_v4, %v4123_v3  ;;  %v4279_v53 = vld [vmem:[%s7237_s1 + $0x920] sm:$0xf]  ;;  %v4791_v61 = vld [vmem:[%s7237_s1 + $0x790] sm:$0xf0]  ;;  %v4267_v4 = vld [vmem:[%s7237_s1 + $0x908] sm:$0xf] }
 0x10d   :  { %2505 = vmatpush.bf16.msra.mxu1 %v3800_v18  ;;  %v4743_v18 = vld [vmem:[%s7237_s1 + $0x610] sm:$0xf0]  ;;  %v4342_v7 = vld [vmem:[%s7239_s3 + $0x40] sm:$0xf] }
 0x10e   :  { %2514 = vmatpush.bf16.msra.mxu2 %v3944_v19  ;;  %v3979_v19 = vld [vmem:[%s7237_s1 + $0x6c8] sm:$0xf]  ;;  %v3884_v25 = vor.u32 %v4743_v18, %v3883_v10  ;;  %v4815_v63 = vld [vmem:[%s7237_s1 + $0x850] sm:$0xf0] }
 0x10f   :  { %2527 = vmatpush.bf16.msra.mxu3 %v4040_v21  ;;  %v4111_v21 = vld [vmem:[%s7237_s1 + $0x7d0] sm:$0xf]  ;;  %v3980_v16 = vor.u32 %v4767_v17, %v3979_v19  ;;  %v4863_v10 = vld [vmem:[%s7239_s3 + $0x74] sm:$0xf]  ;;  %v4268_v19 = vor.u32 %v4839_v6, %v4267_v4  ;;  %v4872_v6 = vld [vmem:[%s7239_s3 + $0xb4] sm:$0xf0] }
 0x110   :  { %2493 = vmatpush.bf16.msra.mxu0 %v3692_v28  ;;  %v6784_v8 = vpop.f32.mrf.mxu0  ;;  %v2263_v0 = vpop.f32.mrf.mxu2  ;;  %v4366_v28 = vld [vmem:[%s7239_s3 + $0x70] sm:$0xf] }
 0x111   :  { %2506 = vmatpush.bf16.msra.mxu1 %v3788_v13  ;;  %v2276_v27 = vpop.f32.mrf.mxu3  ;;  %v4112_v13 = vor.u32 %v4800_v29, %v4111_v21  ;;  %v4367_v36 = vor.u32 %v4864_v26, %v4366_v28  ;;  %v4368_v0 = vld [vmem:[%s7239_s3 + $0x78] sm:$0xf0]  ;;  %v4430_v17 = vld [vmem:[%s7239_s3 + $0xf0] sm:$0xf] }
 0x112   :  { %2515 = vmatpush.bf16.msra.mxu2 %v3932_v30  ;;  %v4208_v30 = vor.u32 %v4824_v22, %v4207_v5  ;;  %v4880_v27 = vld [vmem:[%s7239_s3 + $0xf4] sm:$0xf0]  ;;  %v4371_v5 = vor.u32 %v4863_v10, %v4368_v0  ;;  %v4334_v22 = vld [vmem:[%s7239_s3 + $0x30] sm:$0xf] }
 0x113   :  { %2528 = vmatpush.bf16.msra.mxu3 %v4028_v31  ;;  %2494 = vmatmul.bf16.vlgmr.msra.gmra.mxu0 %v5377_v60  ;;  %v4830_v60 = vld [vmem:[%s7237_s1 + $0x8c8] sm:$0xf0]  ;;  %v4304_v31 = vor.u32 %v4848_v24, %v4303_v23  ;;  %v4856_v23 = vld [vmem:[%s7239_s3 + $0x34] sm:$0xf0]  ;;  %v4861_v24 = vld [vmem:[%s7239_s3 + $0x64] sm:$0xf]  ;;  %v4431_v28 = vor.u32 %v4880_v27, %v4430_v17 }
 0x114   :  { %2538 = vmatpush.bf16.msrb.mxu0 %v4160_v32  ;;  %2507 = vmatmul.bf16.vlgmr.msra.gmra.mxu1 %v5384_v1  ;;  %v4746_v1 = vld [vmem:[%s7237_s1 + $0x628] sm:$0xf0]  ;;  %v4232_v62 = vor.u32 %v4830_v60, %v4231_v54  ;;  %v4099_v32 = vld [vmem:[%s7237_s1 + $0x7b8] sm:$0xf]  ;;  %v4398_v4 = vld [vmem:[%s7239_s3 + $0xb0] sm:$0xf] }
 0x115   :  { %2551 = vmatpush.bf16.msrb.mxu1 %v4256_v37  ;;  %v3896_v9 = vor.u32 %v4746_v1, %v3895_v59  ;;  %v4821_v37 = vld [vmem:[%s7237_s1 + $0x880] sm:$0xf0]  ;;  %v4842_v54 = vld [vmem:[%s7237_s1 + $0x928] sm:$0xf0]  ;;  %v4184_v59 = vor.u32 %v4818_v52, %v4183_v48 }
 0x116   :  { %2516 = vmatpush.bf16.msra.mxu2 %v3920_v43  ;;  %v4100_v43 = vor.u32 %v4797_v33, %v4099_v32  ;;  %v4912_v60 = vld [vmem:[#allocation1 + $0x9] sm:$0xff]  ;;  %v4280_v1 = vor.u32 %v4842_v54, %v4279_v53  ;;  %v4326_v33 = vld [vmem:[%s7239_s3 + $0x20] sm:$0xf]  ;;  %v4877_v17 = vld [vmem:[%s7239_s3 + $0xe4] sm:$0xf] }
 0x117   :  { %2529 = vmatpush.bf16.msra.mxu3 %v4016_v45  ;;  %v4196_v45 = vor.u32 %v4821_v37, %v4195_v35  ;;  %v4854_v37 = vld [vmem:[%s7239_s3 + $0x24] sm:$0xf0] }
 0x118   :  { %2539 = vmatpush.bf16.msrb.mxu0 %v4148_v46  ;;  %v2289_v15 = vpop.f32.mrf.mxu0  ;;  %v4292_v46 = vor.u32 %v4845_v39, %v4291_v38  ;;  %v4352_v38 = vld [vmem:[%s7239_s3 + $0x58] sm:$0xf0]  ;;  %v4916_v48 = vld [vmem:[#allocation1 + $0x24] sm:$0xff] }
 0x119   :  { %2552 = vmatpush.bf16.msrb.mxu1 %v4244_v50  ;;  %v4911_v50 = vld [vmem:[#allocation1] sm:$0xff] }
 0x11a   :  { %2517 = vmatpush.bf16.msra.mxu2 %v3908_v56  ;;  %v4860_v56 = vld [vmem:[%s7239_s3 + $0x54] sm:$0xf0] }
 0x11b   :  { %2530 = vmatpush.bf16.msra.mxu3 %v4004_v57  ;;  %v4088_v57 = vor.u32 %v4794_v47, %v4087_v20  ;;  %v4351_v3 = vor.u32 %v4860_v56, %v4350_v55  ;;  %v4915_v39 = vld [vmem:[#allocation1 + $0x1b] sm:$0xff]  ;;  %v4318_v47 = vld [vmem:[%s7239_s3 + $0x10] sm:$0xf]  ;;  %v4874_v55 = vld [vmem:[%s7239_s3 + $0xc4] sm:$0xf0] }
 0x11c   :  { %2540 = vmatpush.bf16.msrb.mxu0 %v4136_v58  ;;  %v4075_v58 = vld [vmem:[%s7237_s1 + $0x788] sm:$0xf] }
 0x11d   :  { %2553 = vmatpush.bf16.msrb.mxu1 %v4232_v62  ;;  %v4171_v62 = vld [vmem:[%s7237_s1 + $0x848] sm:$0xf] }
 0x11e   :  { %2518 = vmatpush.bf16.msra.mxu2 %v3896_v9  ;;  %v4858_v9 = vld [vmem:[%s7239_s3 + $0x44] sm:$0xf0]  ;;  %v4172_v18 = vor.u32 %v4815_v63, %v4171_v62  ;;  %v4336_v63 = vld [vmem:[%s7239_s3 + $0x38] sm:$0xf0] }
 0x11f   :  { %2531 = vmatpush.bf16.msra.mxu3 %v3992_v11  ;;  %v4076_v11 = vor.u32 %v4791_v61, %v4075_v58  ;;  %v4343_v29 = vor.u32 %v4858_v9, %v4342_v7  ;;  %v2236_v61 = vadd.f32 %v6601_v40, %v6554_v14  ;;  %v4850_v62 = vld [vmem:[%s7239_s3 + $0x4] sm:$0xf0]  ;;  %v4432_v14 = vld [vmem:[%s7239_s3 + $0xf8] sm:$0xf0] }
 0x120   :  { %2541 = vmatpush.bf16.msrb.mxu0 %v4124_v12 }
 0x121   :  { %2554 = vmatpush.bf16.msrb.mxu1 %v4220_v2  ;;  %v6900_v12 = vpop.f32.mrf.mxu1  ;;  %v6911_v2 = vld [vmem:[%s7238_s2] sm:$0x7]  ;;  %v2577_v0 = vmax.f32 %v2236_v61, 0.0 }
 0x122   :  { %2519 = vmatpush.bf16.msra.mxu2 %v3884_v25  ;;  %v433_v21 = vperm.slane %v6911_v2, 1  ;;  %v4360_v25 = vld [vmem:[%s7239_s3 + $0x68] sm:$0xf0] }
 0x123   :  { %2532 = vmatpush.bf16.msra.mxu3 %v3980_v16  ;;  %v4422_v16 = vld [vmem:[%s7239_s3 + $0xe0] sm:$0xf]  ;;  %v4363_v32 = vor.u32 %v4861_v24, %v4360_v25  ;;  %v2580_v24 = vpack.c.bf16 %v2577_v0, %v2577_v0 }
 0x124   :  { %2542 = vmatpush.bf16.msrb.mxu0 %v4112_v13  ;;  %v4878_v13 = vld [vmem:[%s7239_s3 + $0xe4] sm:$0xf0] }
 0x125   :  { %2555 = vmatpush.bf16.msrb.mxu1 %v4208_v30  ;;  %2520 = vmatmul.bf16.vlgmr.msra.gmra.mxu2 %v4911_v50  ;;  %v2249_v30 = vadd.f32 %v6704_v34, %v433_v21  ;;  %v4859_v34 = vld [vmem:[%s7239_s3 + $0x54] sm:$0xf]  ;;  %v4423_v41 = vor.u32 %v4878_v13, %v4422_v16  ;;  %v4852_v50 = vld [vmem:[%s7239_s3 + $0x14] sm:$0xf0]  ;;  %v4399_v21 = vor.u32 %v4872_v6, %v4398_v4  ;;  %v4320_v16 = vld [vmem:[%s7239_s3 + $0x18] sm:$0xf0] }
 0x126   :  { %2568 = vmatpush.bf16.msrb.mxu2 %v4304_v31  ;;  %2533 = vmatmul.bf16.vlgmr.msra.gmra.mxu3 %v4912_v60  ;;  %v4335_v31 = vor.u32 %v4856_v23, %v4334_v22  ;;  %v4355_v20 = vor.u32 %v4859_v34, %v4352_v38  ;;  %v4406_v60 = vld [vmem:[%s7239_s3 + $0xc0] sm:$0xf]  ;;  %v4875_v13 = vld [vmem:[%s7239_s3 + $0xd4] sm:$0xf]  ;;  %v4849_v34 = vld [vmem:[%s7239_s3 + $0x4] sm:$0xf] }
 0x127   :  { %2877 = vmatpush.bf16.msrb.mxu3 %v4367_v36  ;;  %v4914_v36 = vld [vmem:[#allocation1 + $0x12] sm:$0xff]  ;;  %v4407_v40 = vor.u32 %v4874_v55, %v4406_v60  ;;  %v4312_v38 = vld [vmem:[%s7239_s3 + $0x8] sm:$0xf0]  ;;  %v4869_v60 = vld [vmem:[%s7239_s3 + $0xa4] sm:$0xf] }
 0x128   :  { %2543 = vmatpush.bf16.msrb.mxu0 %v4100_v43  ;;  %v6926_v26 = vpop.f32.mrf.mxu2  ;;  %v4876_v43 = vld [vmem:[%s7239_s3 + $0xd4] sm:$0xf0]  ;;  %v4392_v55 = vld [vmem:[%s7239_s3 + $0xa8] sm:$0xf0] }
 0x129   :  { %2556 = vmatpush.bf16.msrb.mxu1 %v4196_v45  ;;  %v6938_v35 = vpop.f32.mrf.mxu3  ;;  %v2302_v15 = vpop.f32.mrf.mxu1  ;;  %v2262_v45 = vadd.f32 %v6730_v44, %v2249_v30  ;;  %v4344_v44 = vld [vmem:[%s7239_s3 + $0x48] sm:$0xf0]  ;;  %v4415_v53 = vor.u32 %v4876_v43, %v4414_v42  ;;  %v4374_v42 = vld [vmem:[%s7239_s3 + $0x80] sm:$0xf]  ;;  %v4866_v43 = vld [vmem:[%s7239_s3 + $0x84] sm:$0xf0] }
 0x12a   :  { %2569 = vmatpush.bf16.msrb.mxu2 %v4292_v46  ;;  %v4327_v46 = vor.u32 %v4854_v37, %v4326_v33 }
 0x12b   :  { %2878 = vmatpush.bf16.msrb.mxu3 %v4359_v51  ;;  %v4857_v51 = vld [vmem:[%s7239_s3 + $0x44] sm:$0xf]  ;;  %v2275_v56 = vadd.f32 %v6741_v49, %v2262_v45  ;;  %v4855_v49 = vld [vmem:[%s7239_s3 + $0x34] sm:$0xf] }
 0x12c   :  { %2544 = vmatpush.bf16.msrb.mxu0 %v4088_v57  ;;  %v4319_v57 = vor.u32 %v4852_v50, %v4318_v47  ;;  %v4347_v58 = vor.u32 %v4857_v51, %v4344_v44  ;;  %v4339_v10 = vor.u32 %v4855_v49, %v4336_v63  ;;  %v4871_v47 = vld [vmem:[%s7239_s3 + $0xb4] sm:$0xf]  ;;  %v4375_v50 = vor.u32 %v4866_v43, %v4374_v42  ;;  %v4865_v63 = vld [vmem:[%s7239_s3 + $0x84] sm:$0xf]  ;;  %v4470_v42 = vld [vmem:[%s7239_s3 + $0x140] sm:$0xf] }
 0x12d   :  { %2557 = vmatpush.bf16.msrb.mxu1 %v4184_v59  ;;  %v4310_v59 = vld [vmem:[%s7239_s3] sm:$0xf]  ;;  %v2288_v7 = vadd.f32 %v6784_v8, %v2275_v56  ;;  %v4424_v8 = vld [vmem:[%s7239_s3 + $0xe8] sm:$0xf0]  ;;  %v4890_v43 = vld [vmem:[%s7239_s3 + $0x144] sm:$0xf0] }
 0x12e   :  { %2570 = vmatpush.bf16.msrb.mxu2 %v4280_v1  ;;  %v4311_v9 = vor.u32 %v4850_v62, %v4310_v59  ;;  %v4427_v25 = vor.u32 %v4877_v17, %v4424_v8  ;;  %v4384_v59 = vld [vmem:[%s7239_s3 + $0x98] sm:$0xf0] }
 0x12f   :  { %2879 = vmatpush.bf16.msrb.mxu3 %v4351_v3  ;;  %v4879_v3 = vld [vmem:[%s7239_s3 + $0xf4] sm:$0xf]  ;;  %v2301_v22 = vadd.f32 %v6900_v12, %v2288_v7  ;;  %v4416_v12 = vld [vmem:[%s7239_s3 + $0xd8] sm:$0xf0] }
 0x130   :  { %2545 = vmatpush.bf16.msrb.mxu0 %v4076_v11  ;;  %v6969_v52 = vpop.f32.mrf.mxu0  ;;  %v2315_v54 = vpop.f32.mrf.mxu2  ;;  %v4435_v11 = vor.u32 %v4879_v3, %v4432_v14  ;;  %v4419_v37 = vor.u32 %v4875_v13, %v4416_v12  ;;  %v4376_v3 = vld [vmem:[%s7239_s3 + $0x88] sm:$0xf0]  ;;  %v4893_v13 = vld [vmem:[%s7239_s3 + $0x164] sm:$0xf] }
 0x131   :  { %2558 = vmatpush.bf16.msrb.mxu1 %v4172_v18  ;;  %v2328_v1 = vpop.f32.mrf.mxu3  ;;  %v4853_v18 = vld [vmem:[%s7239_s3 + $0x24] sm:$0xf]  ;;  %v2314_v33 = vadd.f32 %v6926_v26, %v2301_v22  ;;  %v4408_v26 = vld [vmem:[%s7239_s3 + $0xc8] sm:$0xf0]  ;;  %v4379_v6 = vor.u32 %v4865_v63, %v4376_v3  ;;  %v4446_v63 = vld [vmem:[%s7239_s3 + $0x110] sm:$0xf] }
 0x132   :  { %2571 = vmatpush.bf16.msrb.mxu2 %v4268_v19  ;;  %v4328_v19 = vld [vmem:[%s7239_s3 + $0x28] sm:$0xf0]  ;;  %v4884_v3 = vld [vmem:[%s7239_s3 + $0x114] sm:$0xf0] }
 0x133   :  { %2880 = vmatpush.bf16.msrb.mxu3 %v4343_v29  ;;  %2546 = vmatmul.bf16.vlgmr.msrb.gmra.mxu0 %v4914_v36  ;;  %v4390_v29 = vld [vmem:[%s7239_s3 + $0xa0] sm:$0xf]  ;;  %v4331_v23 = vor.u32 %v4853_v18, %v4328_v19  ;;  %v2327_v45 = vadd.f32 %v6938_v35, %v2314_v33 }
 0x134   :  { %2559 = vmatmul.bf16.vlgmr.msrb.gmra.mxu1 %v4915_v39  ;;  %2890 = vmatpush.bf16.msra.mxu0 %v4431_v28  ;;  %v4851_v28 = vld [vmem:[%s7239_s3 + $0x14] sm:$0xf]  ;;  %v4873_v39 = vld [vmem:[%s7239_s3 + $0xc4] sm:$0xf] }
 0x135   :  { %4307 = vmatmul.msk.bf16.vlgmr.msrb.gmra.mxu2 %vm2067_vm0, %v4916_v48  ;;  %v4323_v36 = vor.u32 %v4851_v28, %v4320_v16  ;;  %v4400_v48 = vld [vmem:[%s7239_s3 + $0xb8] sm:$0xf0]  ;;  %v2340_v51 = vadd.f32 %v6969_v52, %v2327_v45  ;;  %v4395_v52 = vor.u32 %v4869_v60, %v4392_v55  ;;  %v4486_v28 = vld [vmem:[%s7239_s3 + $0x160] sm:$0xf]  ;;  %v4894_v16 = vld [vmem:[%s7239_s3 + $0x164] sm:$0xf0] }
 0x136   :  { %2916 = vmatpush.bf16.msra.mxu2 %v4371_v5  ;;  %v4870_v5 = vld [vmem:[%s7239_s3 + $0xa4] sm:$0xf0]  ;;  %v4403_v44 = vor.u32 %v4871_v47, %v4400_v48  ;;  %v4487_v12 = vor.u32 %v4894_v16, %v4486_v28  ;;  %v4889_v45 = vld [vmem:[%s7239_s3 + $0x144] sm:$0xf]  ;;  %v4472_v47 = vld [vmem:[%s7239_s3 + $0x148] sm:$0xf0] }
 0x137   :  { %2881 = vmatpush.bf16.msrb.mxu3 %v4335_v31  ;;  %v4391_v30 = vor.u32 %v4870_v5, %v4390_v29  ;;  %v4382_v31 = vld [vmem:[%s7239_s3 + $0x90] sm:$0xf]  ;;  %v4896_v29 = vld [vmem:[%s7239_s3 + $0x174] sm:$0xf0]  ;;  %v4895_v5 = vld [vmem:[%s7239_s3 + $0x174] sm:$0xf]  ;;  %v4475_v48 = vor.u32 %v4889_v45, %v4472_v47 }
 0x138   :  { %2891 = vmatpush.bf16.msra.mxu0 %v4423_v41  ;;  %v2341_v27 = vpop.f32.mrf.mxu0 }
 0x13a   :  { %2917 = vmatpush.bf16.msra.mxu2 %v4363_v32  ;;  %v4868_v32 = vld [vmem:[%s7239_s3 + $0x94] sm:$0xf0] }
 0x13b   :  { %2882 = vmatpush.bf16.msrb.mxu3 %v4327_v46  ;;  %v4383_v15 = vor.u32 %v4868_v32, %v4382_v31  ;;  %v4315_v46 = vor.u32 %v4849_v34, %v4312_v38  ;;  %v4891_v34 = vld [vmem:[%s7239_s3 + $0x154] sm:$0xf] }
 0x13c   :  { %2892 = vmatpush.bf16.msra.mxu0 %v4415_v53 }
 0x13e   :  { %2918 = vmatpush.bf16.msra.mxu2 %v4355_v20  ;;  %v4411_v20 = vor.u32 %v4873_v39, %v4408_v26  ;;  %v4480_v39 = vld [vmem:[%s7239_s3 + $0x158] sm:$0xf0] }
 0x13f   :  { %2883 = vmatpush.bf16.msrb.mxu3 %v4319_v57  ;;  %v4483_v26 = vor.u32 %v4891_v34, %v4480_v39 }
 0x140   :  { %2893 = vmatpush.bf16.msra.mxu0 %v4407_v40 }
 0x141   :  { %v2352_v41 = vpop.f32.mrf.mxu1 }
 0x142   :  { %2919 = vmatpush.bf16.msra.mxu2 %v4347_v58  ;;  %v2353_v35 = vadd.f32 %v2352_v41, %v2340_v51  ;;  %v4867_v58 = vld [vmem:[%s7239_s3 + $0x94] sm:$0xf]  ;;  %v4888_v51 = vld [vmem:[%s7239_s3 + $0x134] sm:$0xf0] }
 0x143   :  { %2884 = vmatpush.bf16.msrb.mxu3 %v4311_v9  ;;  %v4387_v62 = vor.u32 %v4867_v58, %v4384_v59  ;;  %v4885_v58 = vld [vmem:[%s7239_s3 + $0x124] sm:$0xf] }
 0x144   :  { %2894 = vmatpush.bf16.msra.mxu0 %v4399_v21  ;;  %v4494_v21 = vld [vmem:[%s7239_s3 + $0x170] sm:$0xf] }
 0x146   :  { %2920 = vmatpush.bf16.msra.mxu2 %v4339_v10  ;;  %2885 = vmatmul.bf16.vlgmr.msrb.gmra.mxu3 %v2580_v24 }
 0x147   :  { %2929 = vmatpush.bf16.msra.mxu3 %v4435_v11 }
 0x148   :  { %2895 = vmatpush.bf16.msra.mxu0 %v4391_v30  ;;  %v2365_v53 = vpop.f32.mrf.mxu2  ;;  %v4488_v30 = vld [vmem:[%s7239_s3 + $0x168] sm:$0xf0] }
 0x149   :  { %v2378_v54 = vpop.f32.mrf.mxu3  ;;  %v2354_v56 = vpop.f32.mrf.mxu1  ;;  %v2366_v57 = vadd.f32 %v2365_v53, %v2353_v35  ;;  %v4491_v32 = vor.u32 %v4893_v13, %v4488_v30  ;;  %v4464_v53 = vld [vmem:[%s7239_s3 + $0x138] sm:$0xf0] }
 0x14a   :  { %2921 = vmatpush.bf16.msra.mxu2 %v4331_v23  ;;  %v4495_v23 = vor.u32 %v4896_v29, %v4494_v21 }
 0x14b   :  { %2930 = vmatpush.bf16.msra.mxu3 %v4427_v25  ;;  %v2379_v1 = vadd.f32 %v2378_v54, %v2366_v57  ;;  %v4454_v57 = vld [vmem:[%s7239_s3 + $0x120] sm:$0xf] }
 0x14c   :  { %2896 = vmatpush.bf16.msra.mxu0 %v4383_v15  ;;  %2903 = vmatpush.bf16.msra.mxu1 %v4495_v23 }
 0x14e   :  { %2922 = vmatpush.bf16.msra.mxu2 %v4323_v36  ;;  %v4478_v36 = vld [vmem:[%s7239_s3 + $0x150] sm:$0xf] }
 0x14f   :  { %2931 = vmatpush.bf16.msra.mxu3 %v4419_v37  ;;  %v4892_v37 = vld [vmem:[%s7239_s3 + $0x154] sm:$0xf0] }
 0x150   :  { %2897 = vmatpush.bf16.msra.mxu0 %v4375_v50  ;;  %v2391_v61 = vpop.f32.mrf.mxu0  ;;  %v2367_v14 = vpop.f32.mrf.mxu2  ;;  %2904 = vmatpush.bf16.msra.mxu1 %v4487_v12  ;;  %v4479_v38 = vor.u32 %v4892_v37, %v4478_v36  ;;  %v4462_v50 = vld [vmem:[%s7239_s3 + $0x130] sm:$0xf] }
 0x151   :  { %v2392_v49 = vadd.f32 %v2391_v61, %v2379_v1  ;;  %v2380_v40 = vpop.f32.mrf.mxu3  ;;  %v2404_v4 = vpop.f32.mrf.mxu1  ;;  %v4463_v35 = vor.u32 %v4888_v51, %v4462_v50  ;;  %v4456_v61 = vld [vmem:[%s7239_s3 + $0x128] sm:$0xf0]  ;;  %v4883_v14 = vld [vmem:[%s7239_s3 + $0x114] sm:$0xf]  ;;  %v2631_v50 = vld [vmem:[%s7240_s4] sm:$0x3] }
 0x152   :  { %2923 = vmatpush.bf16.msra.mxu2 %v4315_v46  ;;  %v434_v46 = vperm.slane %v6911_v2, 2  ;;  %v4887_v2 = vld [vmem:[%s7239_s3 + $0x134] sm:$0xf]  ;;  %v4901_v51 = vld [vmem:[%s7241_s5 + $0x20] sm:$0xff] }
 0x153   :  { %2932 = vmatpush.bf16.msra.mxu3 %v4411_v20  ;;  %v2405_v7 = vadd.f32 %v2404_v4, %v2392_v49  ;;  %v4471_v20 = vor.u32 %v4890_v43, %v4470_v42  ;;  %v4467_v60 = vor.u32 %v4887_v2, %v4464_v53  ;;  %v4459_v49 = vor.u32 %v4885_v58, %v4456_v61  ;;  %v4908_v42 = vld [vmem:[%s7241_s5 + $0x58] sm:$0xff]  ;;  %v4903_v43 = vld [vmem:[%s7241_s5 + $0x30] sm:$0xff]  ;;  %v4898_v61 = vld [vmem:[%s7241_s5 + $0x8] sm:$0xff] }
 0x154   :  { %2905 = vmatpush.bf16.msra.mxu1 %v4479_v38  ;;  %v4447_v4 = vor.u32 %v4884_v3, %v4446_v63  ;;  %v2633_v2 = vperm.slane %v2631_v50, 0 }
 0x155   :  { %2924 = vmatmul.bf16.vlgmr.msra.gmra.mxu2 %v2580_v24  ;;  %v2578_v9 = vmax.f32 %v2405_v7, 0.0  ;;  %v4496_v24 = vld [vmem:[%s7239_s3 + $0x178] sm:$0xf0] }
 0x156   :  { %v4499_v25 = vor.u32 %v4895_v5, %v4496_v24  ;;  %3079 = vmatpush.bf16.msrb.mxu2 %v4908_v42 }
 0x157   :  { %2933 = vmatpush.bf16.msra.mxu3 %v4403_v44  ;;  %v2581_v0 = vpack.c.bf16 %v2578_v9, %v2578_v9 }
 0x158   :  { %v2393_v10 = vpop.f32.mrf.mxu0  ;;  %2942 = vmatpush.bf16.msrb.mxu0 %v4499_v25  ;;  %2906 = vmatpush.bf16.msra.mxu1 %v4471_v20  ;;  %v4902_v20 = vld [vmem:[%s7241_s5 + $0x28] sm:$0xff] }
 0x159   :  { %2898 = vmatmul.bf16.vlgmr.msra.gmra.mxu0 %v2581_v0  ;;  %v2406_v11 = vpop.f32.mrf.mxu1 }
 0x15a   :  { %v4882_v11 = vld [vmem:[%s7239_s3 + $0x104] sm:$0xf0] }
 0x15b   :  { %2934 = vmatpush.bf16.msra.mxu3 %v4395_v52  ;;  %v4886_v52 = vld [vmem:[%s7239_s3 + $0x124] sm:$0xf0] }
 0x15c   :  { %2943 = vmatpush.bf16.msrb.mxu0 %v4491_v32  ;;  %2907 = vmatpush.bf16.msra.mxu1 %v4463_v35  ;;  %v4455_v1 = vor.u32 %v4886_v52, %v4454_v57 }
 0x15f   :  { %2935 = vmatpush.bf16.msra.mxu3 %v4387_v62 }
 0x160   :  { %2944 = vmatpush.bf16.msrb.mxu0 %v4483_v26  ;;  %2908 = vmatpush.bf16.msra.mxu1 %v4455_v1 }
 0x163   :  { %2936 = vmatpush.bf16.msra.mxu3 %v4379_v6  ;;  %v4448_v6 = vld [vmem:[%s7239_s3 + $0x118] sm:$0xf0] }
 0x164   :  { %2945 = vmatpush.bf16.msrb.mxu0 %v4475_v48  ;;  %v4451_v9 = vor.u32 %v4883_v14, %v4448_v6  ;;  %2909 = vmatpush.bf16.msra.mxu1 %v4447_v4  ;;  %v4906_v48 = vld [vmem:[%s7241_s5 + $0x48] sm:$0xff] }
 0x166   :  { %2937 = vmatmul.bf16.vlgmr.msra.gmra.mxu3 %v2581_v0  ;;  %v4438_v0 = vld [vmem:[%s7239_s3 + $0x100] sm:$0xf] }
 0x168   :  { %v2417_v18 = vpop.f32.mrf.mxu2  ;;  %2946 = vmatpush.bf16.msrb.mxu0 %v4467_v60  ;;  %v4899_v60 = vld [vmem:[%s7241_s5 + $0x10] sm:$0xff] }
 0x169   :  { %v2430_v19 = vpop.f32.mrf.mxu3  ;;  %v2418_v44 = vadd.f32 %v2417_v18, %v434_v46  ;;  %v4881_v18 = vld [vmem:[%s7239_s3 + $0x104] sm:$0xf]  ;;  %v4907_v46 = vld [vmem:[%s7241_s5 + $0x50] sm:$0xff] }
 0x16a   :  { %3080 = vmatpush.bf16.msrb.mxu2 %v4907_v46 }
 0x16b   :  { %v2431_v62 = vadd.f32 %v2430_v19, %v2418_v44  ;;  %v4900_v44 = vld [vmem:[%s7241_s5 + $0x18] sm:$0xff] }
 0x16c   :  { %2947 = vmatpush.bf16.msrb.mxu0 %v4459_v49  ;;  %v4897_v49 = vld [vmem:[%s7241_s5] sm:$0xff] }
 0x16e   :  { %3081 = vmatpush.bf16.msrb.mxu2 %v4906_v48 }
 0x170   :  { %v7087_v17 = vpop.f32.mrf.mxu0  ;;  %v2419_v27 = vpop.f32.mrf.mxu2  ;;  %2948 = vmatpush.bf16.msrb.mxu0 %v4451_v9 }
 0x171   :  { %v7089_v8 = vpop.f32.mrf.mxu1  ;;  %v2432_v22 = vpop.f32.mrf.mxu3  ;;  %v2444_v40 = vadd.f32 %v7087_v17, %v2431_v62  ;;  %v4439_v17 = vor.u32 %v4882_v11, %v4438_v0  ;;  %v4440_v27 = vld [vmem:[%s7239_s3 + $0x108] sm:$0xf0]  ;;  %v4905_v62 = vld [vmem:[%s7241_s5 + $0x40] sm:$0xff] }
 0x172   :  { %v4443_v21 = vor.u32 %v4881_v18, %v4440_v27  ;;  %3082 = vmatpush.bf16.msrb.mxu2 %v4905_v62  ;;  %v4910_v18 = vld [vmem:[%s7242_s6] ss:$0 sm:$0xff] }
 0x173   :  { %v2457_v19 = vadd.f32 %v7089_v8, %v2444_v40  ;;  %2910 = vmatpush.bf16.msra.mxu1 %v4439_v17 }
 0x174   :  { %2949 = vmatpush.bf16.msrb.mxu0 %v4443_v21 }
 0x178   :  { %v2445_v31 = vpop.f32.mrf.mxu0 }
 0x179   :  { %v2458_v33 = vpop.f32.mrf.mxu1 }
 0x188   :  { %v2469_v15 = vpop.f32.mrf.mxu2 }
 0x189   :  { %v2482_v41 = vpop.f32.mrf.mxu3  ;;  %v2470_v29 = vadd.f32 %v2469_v15, %v2457_v19 }
 0x18b   :  { %v2483_v5 = vadd.f32 %v2482_v41, %v2470_v29  ;;  %v4904_v41 = vld [vmem:[%s7241_s5 + $0x38] sm:$0xff]  ;;  %s4943_s5 = smov [#allocation2]  }
 0x18c   :  { %3062 = vmatpush.bf16.msrb.mxu1 %v4904_v41  ;;  %s3094_s3 = sshll.u32 %s4943_s5, 4  ;;  %s3095_s3 = int_to_ptr.vmem [resolvable:$true] %s3094_s3 }
 0x190   :  { %v2495_v54 = vpop.f32.mrf.mxu0  ;;  %v2471_v56 = vpop.f32.mrf.mxu2  ;;  %3063 = vmatpush.bf16.msrb.mxu1 %v4903_v43 }
 0x191   :  { %v2508_v55 = vpop.f32.mrf.mxu1  ;;  %v2484_v59 = vpop.f32.mrf.mxu3  ;;  %v2496_v22 = vadd.f32 %v2495_v54, %v2483_v5 }
 0x193   :  { %v2509_v25 = vadd.f32 %v2508_v55, %v2496_v22  ;;  %v2634_v55 = vperm.slane %v2631_v50, 1 }
 0x194   :  { %3064 = vmatpush.bf16.msrb.mxu1 %v4902_v20 }
 0x198   :  { %v2497_v7 = vpop.f32.mrf.mxu0  ;;  %3065 = vmatpush.bf16.msrb.mxu1 %v4901_v51 }
 0x199   :  { %v2510_v10 = vpop.f32.mrf.mxu1 }
 0x19c   :  { %3066 = vmatpush.bf16.msrb.mxu1 %v4900_v44 }
 0x1a0   :  { %3067 = vmatpush.bf16.msrb.mxu1 %v4899_v60 }
 0x1a4   :  { %3068 = vmatpush.bf16.msrb.mxu1 %v4898_v61 }
 0x1a8   :  { %v2521_v23 = vpop.f32.mrf.mxu2  ;;  %3069 = vmatpush.bf16.msrb.mxu1 %v4897_v49 }
 0x1a9   :  { %v2534_v24 = vpop.f32.mrf.mxu3  ;;  %v2522_v28 = vadd.f32 %v2521_v23, %v2509_v25 }
 0x1ab   :  { %v2535_v8 = vadd.f32 %v2534_v24, %v2522_v28 }
 0x1b0   :  { %v2547_v16 = vpop.f32.mrf.mxu0  ;;  %v2523_v12 = vpop.f32.mrf.mxu2 }
 0x1b1   :  { %v2560_v13 = vpop.f32.mrf.mxu1  ;;  %v2536_v30 = vpop.f32.mrf.mxu3  ;;  %v2548_v31 = vadd.f32 %v2547_v16, %v2535_v8 }
 0x1b3   :  { %v2561_v33 = vadd.f32 %v2560_v13, %v2548_v31 }
 0x1b8   :  { %v2549_v32 = vpop.f32.mrf.mxu0  ;;  %v2573_v37 = vpop.f32.mrf.mxu2 }
 0x1b9   :  { %v2562_v36 = vpop.f32.mrf.mxu1  ;;  %v2574_v34 = vadd.f32 %v2573_v37, %v2561_v33 }
 0x1bb   :  { %v2579_v38 = vmax.f32 %v2574_v34, 0.0 }
 0x1bd   :  { %v2582_v39 = vpack.c.bf16 %v2579_v38, %v2579_v38 }
 0x1bf   :  { %2911 = vmatmul.bf16.vlgmr.msra.gmra.mxu1 %v2582_v39  ;;  %2950 = vmatmul.bf16.vlgmr.msrb.gmra.mxu0 %v2582_v39 }
 0x1c0   :  { %v2575_v26 = vpop.f32.mrf.mxu2 }
 0x1c9   :  { %v2886_v15 = vpop.f32.mrf.mxu3 }
 0x1ca   :  { %v2887_v53 = vadd.f32 %v2886_v15, %v2633_v2 }
 0x1d1   :  { %v2888_v45 = vpop.f32.mrf.mxu3 }
 0x1d6   :  { %v2899_v54 = vpop.f32.mrf.mxu0 }
 0x1d7   :  { %v2900_v56 = vadd.f32 %v2899_v54, %v2887_v53 }
 0x1d8   :  { %v2925_v47 = vpop.f32.mrf.mxu2 }
 0x1d9   :  { %v2926_v57 = vadd.f32 %v2925_v47, %v2634_v55 }
 0x1de   :  { %v2901_v59 = vpop.f32.mrf.mxu0 }
 0x1e0   :  { %v2927_v35 = vpop.f32.mrf.mxu2 }
 0x1e9   :  { %v2938_v52 = vpop.f32.mrf.mxu3 }
 0x1ea   :  { %v2939_v58 = vadd.f32 %v2938_v52, %v2926_v57 }
 0x1f1   :  { %v2940_v1 = vpop.f32.mrf.mxu3 }
 0x23c   :  { %v2912_v63 = vpop.f32.mrf.mxu1  ;;  %v2951_v3 = vpop.f32.mrf.mxu0 }
 0x23d   :  { %v2913_v14 = vadd.f32 %v2912_v63, %v2900_v56  ;;  %v2952_v40 = vadd.f32 %v2951_v3, %v2939_v58 }
 0x23f   :  { %v2955_v4 = vmax.f32 %v2913_v14, 0.0  ;;  %v2956_v6 = vmax.f32 %v2952_v40, 0.0 }
 0x241   :  { %v2957_v7 = vpack.c.bf16 %v2955_v4, %v2955_v4  ;;  %v2958_v9 = vpack.c.bf16 %v2956_v6, %v2956_v6 }
 0x243   :  { %3070 = vmatmul.bf16.vlgmr.msrb.gmra.mxu1 %v2957_v7  ;;  %4548 = vmatmul.msk.bf16.vlgmr.msrb.gmra.mxu2 %vm2067_vm0, %v2958_v9 }
 0x244   :  { %v2914_v10 = vpop.f32.mrf.mxu1  ;;  %v2953_v0 = vpop.f32.mrf.mxu0 }
 0x2c0   :  { %v3071_v11 = vpop.f32.mrf.mxu1 }
 0x2c1   :  { %v3072_v19 = vadd.f32 %v4910_v18, %v3071_v11 }
 0x2c6   :  { %v3084_v17 = vpop.f32.mrf.mxu2 }
 0x2c7   :  { %v3085_v27 = vadd.f32 %v3084_v17, %v3072_v19 }
 0x2c8   :  { %v3073_v21 = vpop.f32.mrf.mxu1 }
 0x2c9   :  { %3088 = vst [vmem:[#allocation2] sm:$0x3] %v3085_v27 }
 0x2ca   :  { %3099 = dma.vmem_to_hbm [thread:$0]  %s3095_s3, 32, %s3097_s0, [#allocation3]  }
 0x2ce   :  { %v3086_v29 = vpop.f32.mrf.mxu2 }
 0x2cf   :  { %4941 = dma.done.wait [#allocation3], 32  }
 0x2d0   :  { %4942 = vsyncadd [#allocation3], 4294967264 }
 0x2d1   :  { %3104 = vsyncpa [#allocation3], 1 }

</bundles_post_ra>
